<compile_context>
chip_gen: v7x
topology: tpu7x:2x2x1
jax: 0.10.0
libtpu: 0.0.40
codegen_flags: <defaults>
</compile_context>

<pallas_src>
import functools

import jax
import jax.numpy as jnp
from jax import lax
from jax.experimental import pallas as pl
from jax.experimental.pallas import tpu as pltpu


# ----------------------------------------------------------------------------
# Fused kernel: (pre-ReLU'd bf16) grouped 3x3/s2 conv + training-mode BatchNorm
# ----------------------------------------------------------------------------
def _fused_kernel(x_ref, w_ref, gamma_ref, beta_ref, o_ref,
                  *, cblk, n, oh, owp, ow, eps):
    # x_ref    : (N, Hh, 2, Wh, 2, Cblk) bf16  ReLU'd, padded, 2x2 phase-decomposed
    # w_ref    : (1, 9, Cblk, Cblk)      bf16  block-diagonal per-tap weights (ci, co)
    # gamma_ref: (1, 1, Cblk)            f32
    # beta_ref : (1, 1, Cblk)            f32
    # o_ref    : (N, OH, OWp, Cblk)      f32
    m = n * oh * owp
    inv_cnt = 1.0 / float(n * oh * ow)          # BN count = N*OH*OW valid positions
    n_pad = float(n * oh * (owp - ow))          # number of zeroed (padded-column) rows

    acc = jnp.zeros((m, cblk), jnp.float32)
    for kh in range(3):                         # static 9-tap unrolled loop
        for kw in range(3):
            ph, pw = kh % 2, kw % 2
            # Thanks to the 2x2 phase decomposition every stride-2 tap is a
            # contiguous, lane-dense window: offset (kh//2, kw//2) in the phase
            # image, parity (ph, pw) selected by static int indices.
            tap = x_ref[:, kh // 2:kh // 2 + oh, ph,
                        kw // 2:kw // 2 + owp, pw, :]          # (N, OH, OWp, Cblk) bf16
            acc += jnp.dot(tap.reshape(m, cblk), w_ref[0, kh * 3 + kw],
                           preferred_element_type=jnp.float32)

    # Zero the padded output column once (in-kernel iota, no mask DMA).
    col = lax.broadcasted_iota(jnp.int32, (m, 1), 0) % owp      # owp is a mult. of 8
    acc = jnp.where(col < ow, acc, 0.0)

    # ---- fused BatchNorm2d (batch statistics over the N*OH*OW valid rows) ----
    mean = jnp.sum(acc, axis=0, keepdims=True) * inv_cnt        # (1, Cblk)
    d = acc - mean
    # Each zeroed (padded) row contributes exactly mean^2 to sum(d*d); subtract it
    # analytically instead of running a second masked pass over acc.
    var = (jnp.sum(d * d, axis=0, keepdims=True) - n_pad * mean * mean) * inv_cnt
    scale = lax.rsqrt(var + eps) * gamma_ref[0]                  # (1, Cblk)
    out = d * scale + beta_ref[0]                                # (M, Cblk)
    o_ref[...] = out.reshape(n, oh, owp, cblk)


# ----------------------------------------------------------------------------
# One-time weight repacking: grouped OIHW -> block-diagonal per-tap bf16
# (hoisted out of the hot path)
# ----------------------------------------------------------------------------
def prepare_weights(w_oihw, groups, groups_per_block):
    C = w_oihw.shape[0]
    G, GB = groups, groups_per_block
    Cg = C // G
    NB = G // GB
    w = (w_oihw.reshape(G, Cg, Cg, 3, 3)        # (g, co, ci, kh, kw)
               .transpose(0, 3, 4, 2, 1)        # (g, kh, kw, ci, co)
               .reshape(NB, GB, 9, Cg, Cg))     # (block, g_local, tap, ci, co)
    eye = jnp.eye(GB, dtype=w.dtype)
    # block-diagonal embed: row = (g, ci), col = (h, co), nonzero only when g == h
    wbd = jnp.einsum('ngtio,gh->ntgiho', w, eye)                 # (NB, 9, GB, Cg, GB, Cg)
    return wbd.reshape(NB, 9, GB * Cg, GB * Cg).astype(jnp.bfloat16)


# ----------------------------------------------------------------------------
# Wrapper: fused ingress transform + pallas_call plumbing
# ----------------------------------------------------------------------------
@functools.partial(jax.jit, static_argnames=("groups", "groups_per_block", "eps"))
def relu_groupconv_bn(x_nchw, w_packed, gamma, beta, *, groups, groups_per_block,
                      eps=1e-5):
    N, C, H, W = x_nchw.shape
    G, GB = groups, groups_per_block
    assert G % GB == 0 and C % G == 0
    Cg = C // G
    Cblk = GB * Cg
    NB = G // GB

    # conv geometry (kernel 3, stride 2, pad 1)
    OH = (H + 2 - 3) // 2 + 1
    OW = (W + 2 - 3) // 2 + 1
    OWp = ((OW + 7) // 8) * 8       # sublane-pad output width; extra cols are garbage
    Hh, Wh = OH + 1, OWp + 1        # half-resolution (phase) spatial extents
    Hp, Wp = 2 * Hh, 2 * Wh         # padded input extents
    assert Hp >= H + 2 and Wp >= W + 2

    # Ingress fusion: ReLU in f32 (v5e-safe) -> bf16 -> channels-last -> zero-pad ->
    # 2x2 phase decomposition ((Hp, Wp, C) -> (Hh, 2, Wh, 2, C) is a free contiguous
    # reshape).  One fused XLA pass; the kernel reads bf16 (half the HBM bytes) and
    # never sees an im2col tensor.
    xr = jnp.maximum(x_nchw, 0.0).astype(jnp.bfloat16)                 # (N, C, H, W)
    x = xr.transpose(0, 2, 3, 1)                                       # (N, H, W, C)
    xp = jnp.pad(x, ((0, 0), (1, Hp - H - 1), (1, Wp - W - 1), (0, 0)))
    xph = xp.reshape(N, Hh, 2, Wh, 2, C)

    gamma3 = gamma.reshape(NB, 1, Cblk).astype(jnp.float32)
    beta3 = beta.reshape(NB, 1, Cblk).astype(jnp.float32)

    kernel = functools.partial(_fused_kernel, cblk=Cblk, n=N,
                               oh=OH, owp=OWp, ow=OW, eps=eps)

    out = pl.pallas_call(
        kernel,
        out_shape=jax.ShapeDtypeStruct((N, OH, OWp, C), jnp.float32),
        grid=(NB,),
        in_specs=[
            pl.BlockSpec((N, Hh, 2, Wh, 2, Cblk), lambda i: (0, 0, 0, 0, 0, i)),
            pl.BlockSpec((1, 9, Cblk, Cblk), lambda i: (i, 0, 0, 0)),
            pl.BlockSpec((1, 1, Cblk), lambda i: (i, 0, 0)),
            pl.BlockSpec((1, 1, Cblk), lambda i: (i, 0, 0)),
        ],
        out_specs=pl.BlockSpec((N, OH, OWp, Cblk), lambda i: (0, 0, 0, i)),
        compiler_params=pltpu.CompilerParams(
            dimension_semantics=("parallel",)),
    )(xph, w_packed, gamma3, beta3)

    # Drop the garbage output columns and convert back to NCHW (skip this transpose
    # if the surrounding model can consume channels-last directly).
    return jnp.transpose(out[:, :, :OW, :], (0, 3, 1, 2))
    # TODO(synk): BatchNorm running_mean/running_var buffer updates (training-time
    # side effect) are not modeled; only the returned tensor semantics match.


# ----------------------------------------------------------------------------
# Pure-JAX reference for verification
# ----------------------------------------------------------------------------
def _reference(x_nchw, w_oihw, gamma, beta, *, groups, eps=1e-5):
    xr = jnp.maximum(x_nchw, 0.0)
    y = lax.conv_general_dilated(
        xr, w_oihw, window_strides=(2, 2), padding=((1, 1), (1, 1)),
        dimension_numbers=("NCHW", "OIHW", "NCHW"),
        feature_group_count=groups)
    mean = jnp.mean(y, axis=(0, 2, 3), keepdims=True)
    var = jnp.mean((y - mean) ** 2, axis=(0, 2, 3), keepdims=True)
    return ((y - mean) * lax.rsqrt(var + eps)
            * gamma.reshape(1, -1, 1, 1) + beta.reshape(1, -1, 1, 1))


if __name__ == "__main__":
    # Small config consistent with the module structure (real: N=1, G=27, Cg=112, 14x14):
    # N=2, G=8 groups, Cg=32 (C=256), 14x14 -> 7x7, 4 groups per grid step
    # -> 128-wide lane-dense blocks and a 2-step "parallel" grid (balanced on v7x;
    # on v5e/v6e a single big block would also be fine).
    N, G, Cg, H, W = 2, 8, 32, 14, 14
    GB = 4
    C = G * Cg

    key = jax.random.PRNGKey(0)
    k_x, k_w, k_g, k_b = jax.random.split(key, 4)
    x = jax.random.normal(k_x, (N, C, H, W), dtype=jnp.float32)
    w = 0.05 * jax.random.normal(k_w, (C, Cg, 3, 3), dtype=jnp.float32)   # OIHW, grouped
    gamma = 1.0 + 0.1 * jax.random.normal(k_g, (C,), dtype=jnp.float32)
    beta = 0.1 * jax.random.normal(k_b, (C,), dtype=jnp.float32)

    w_packed = prepare_weights(w, G, GB)   # one-time block-diag repack + bf16 cast

    out = relu_groupconv_bn(x, w_packed, gamma, beta, groups=G, groups_per_block=GB)
    out = jax.block_until_ready(out)

    ref = _reference(x, w, gamma, beta, groups=G)
    assert out.shape == (N, C, 7, 7), out.shape
    # bf16 MXU operands (f32 accumulation) -> loosened tolerance vs the f32 reference.
    assert jnp.allclose(out, ref, atol=5e-2, rtol=5e-2), \
        float(jnp.max(jnp.abs(out - ref)))

    print("KERNEL_OK")
</pallas_src>

<mosaic_0001>
module attributes {stable_mosaic.version = 11 : i64} {
  func.func @_fused_kernel(%arg0: i32, %arg1: memref<2x8x2x9x2x128xbf16, #tpu.memory_space<vmem>>, %arg2: memref<1x9x128x128xbf16, #tpu.memory_space<vmem>>, %arg3: memref<1x1x128xf32, #tpu.memory_space<vmem>>, %arg4: memref<1x1x128xf32, #tpu.memory_space<vmem>>, %arg5: memref<2x7x8x128xf32, #tpu.memory_space<vmem>>) attributes {dimension_semantics = [#tpu.dimension_semantics<parallel>], iteration_bounds = array<i64: 2>, scalar_prefetch = 0 : i64, scratch_operands = 0 : i64, tpu.core_type = #tpu.core_type<tc>, window_params = [{transform_indices = @transform_0, window_bounds = array<i64: 2, 8, 2, 9, 2, 128>}, {transform_indices = @transform_1, window_bounds = array<i64: 1, 9, 128, 128>}, {transform_indices = @transform_2, window_bounds = array<i64: 1, 1, 128>}, {transform_indices = @transform_3, window_bounds = array<i64: 1, 1, 128>}, {transform_indices = @transform_4, window_bounds = array<i64: 2, 7, 8, 128>}]} {
    %cst = arith.constant 0.000000e+00 : f32
    %0 = vector.broadcast %cst : f32 to vector<112x128xf32>
    %c0 = arith.constant 0 : index
    %c0_0 = arith.constant 0 : index
    %c0_1 = arith.constant 0 : index
    %c0_2 = arith.constant 0 : index
    %c0_3 = arith.constant 0 : index
    %c0_4 = arith.constant 0 : index
    %1 = vector.load %arg1[%c0, %c0_0, %c0_1, %c0_2, %c0_3, %c0_4] : memref<2x8x2x9x2x128xbf16, #tpu.memory_space<vmem>>, vector<2x7x1x8x1x128xbf16>
    %2 = vector.shape_cast %1 : vector<2x7x1x8x1x128xbf16> to vector<2x7x8x128xbf16>
    %3 = vector.shape_cast %2 : vector<2x7x8x128xbf16> to vector<112x128xbf16>
    %c0_5 = arith.constant 0 : index
    %c0_6 = arith.constant 0 : index
    %c0_7 = arith.constant 0 : index
    %c0_8 = arith.constant 0 : index
    %4 = vector.load %arg2[%c0_5, %c0_6, %c0_7, %c0_8] : memref<1x9x128x128xbf16, #tpu.memory_space<vmem>>, vector<1x1x128x128xbf16>
    %5 = vector.shape_cast %4 : vector<1x1x128x128xbf16> to vector<128x128xbf16>
    %cst_9 = arith.constant dense<0.000000e+00> : vector<112x128xf32>
    %6 = tpu.matmul %3, %5, %cst_9 {dimension_numbers = #tpu.dot_dimension_numbers<[1], [0], [0], [1], [0, 0, 1, 1], [], []>} : vector<112x128xbf16>, vector<128x128xbf16>, vector<112x128xf32> -> vector<112x128xf32>
    %7 = arith.addf %0, %6 : vector<112x128xf32>
    %c0_10 = arith.constant 0 : index
    %c0_11 = arith.constant 0 : index
    %c0_12 = arith.constant 0 : index
    %c0_13 = arith.constant 0 : index
    %c1 = arith.constant 1 : index
    %c0_14 = arith.constant 0 : index
    %8 = vector.load %arg1[%c0_10, %c0_11, %c0_12, %c0_13, %c1, %c0_14] : memref<2x8x2x9x2x128xbf16, #tpu.memory_space<vmem>>, vector<2x7x1x8x1x128xbf16>
    %9 = vector.shape_cast %8 : vector<2x7x1x8x1x128xbf16> to vector<2x7x8x128xbf16>
    %10 = vector.shape_cast %9 : vector<2x7x8x128xbf16> to vector<112x128xbf16>
    %c0_15 = arith.constant 0 : index
    %c1_16 = arith.constant 1 : index
    %c0_17 = arith.constant 0 : index
    %c0_18 = arith.constant 0 : index
    %11 = vector.load %arg2[%c0_15, %c1_16, %c0_17, %c0_18] : memref<1x9x128x128xbf16, #tpu.memory_space<vmem>>, vector<1x1x128x128xbf16>
    %12 = vector.shape_cast %11 : vector<1x1x128x128xbf16> to vector<128x128xbf16>
    %cst_19 = arith.constant dense<0.000000e+00> : vector<112x128xf32>
    %13 = tpu.matmul %10, %12, %cst_19 {dimension_numbers = #tpu.dot_dimension_numbers<[1], [0], [0], [1], [0, 0, 1, 1], [], []>} : vector<112x128xbf16>, vector<128x128xbf16>, vector<112x128xf32> -> vector<112x128xf32>
    %14 = arith.addf %7, %13 : vector<112x128xf32>
    %c0_20 = arith.constant 0 : index
    %c0_21 = arith.constant 0 : index
    %c0_22 = arith.constant 0 : index
    %c1_23 = arith.constant 1 : index
    %c0_24 = arith.constant 0 : index
    %c0_25 = arith.constant 0 : index
    %15 = vector.load %arg1[%c0_20, %c0_21, %c0_22, %c1_23, %c0_24, %c0_25] : memref<2x8x2x9x2x128xbf16, #tpu.memory_space<vmem>>, vector<2x7x1x8x1x128xbf16>
    %16 = vector.shape_cast %15 : vector<2x7x1x8x1x128xbf16> to vector<2x7x8x128xbf16>
    %17 = vector.shape_cast %16 : vector<2x7x8x128xbf16> to vector<112x128xbf16>
    %c0_26 = arith.constant 0 : index
    %c2 = arith.constant 2 : index
    %c0_27 = arith.constant 0 : index
    %c0_28 = arith.constant 0 : index
    %18 = vector.load %arg2[%c0_26, %c2, %c0_27, %c0_28] : memref<1x9x128x128xbf16, #tpu.memory_space<vmem>>, vector<1x1x128x128xbf16>
    %19 = vector.shape_cast %18 : vector<1x1x128x128xbf16> to vector<128x128xbf16>
    %cst_29 = arith.constant dense<0.000000e+00> : vector<112x128xf32>
    %20 = tpu.matmul %17, %19, %cst_29 {dimension_numbers = #tpu.dot_dimension_numbers<[1], [0], [0], [1], [0, 0, 1, 1], [], []>} : vector<112x128xbf16>, vector<128x128xbf16>, vector<112x128xf32> -> vector<112x128xf32>
    %21 = arith.addf %14, %20 : vector<112x128xf32>
    %c0_30 = arith.constant 0 : index
    %c0_31 = arith.constant 0 : index
    %c1_32 = arith.constant 1 : index
    %c0_33 = arith.constant 0 : index
    %c0_34 = arith.constant 0 : index
    %c0_35 = arith.constant 0 : index
    %22 = vector.load %arg1[%c0_30, %c0_31, %c1_32, %c0_33, %c0_34, %c0_35] : memref<2x8x2x9x2x128xbf16, #tpu.memory_space<vmem>>, vector<2x7x1x8x1x128xbf16>
    %23 = vector.shape_cast %22 : vector<2x7x1x8x1x128xbf16> to vector<2x7x8x128xbf16>
    %24 = vector.shape_cast %23 : vector<2x7x8x128xbf16> to vector<112x128xbf16>
    %c0_36 = arith.constant 0 : index
    %c3 = arith.constant 3 : index
    %c0_37 = arith.constant 0 : index
    %c0_38 = arith.constant 0 : index
    %25 = vector.load %arg2[%c0_36, %c3, %c0_37, %c0_38] : memref<1x9x128x128xbf16, #tpu.memory_space<vmem>>, vector<1x1x128x128xbf16>
    %26 = vector.shape_cast %25 : vector<1x1x128x128xbf16> to vector<128x128xbf16>
    %cst_39 = arith.constant dense<0.000000e+00> : vector<112x128xf32>
    %27 = tpu.matmul %24, %26, %cst_39 {dimension_numbers = #tpu.dot_dimension_numbers<[1], [0], [0], [1], [0, 0, 1, 1], [], []>} : vector<112x128xbf16>, vector<128x128xbf16>, vector<112x128xf32> -> vector<112x128xf32>
    %28 = arith.addf %21, %27 : vector<112x128xf32>
    %c0_40 = arith.constant 0 : index
    %c0_41 = arith.constant 0 : index
    %c1_42 = arith.constant 1 : index
    %c0_43 = arith.constant 0 : index
    %c1_44 = arith.constant 1 : index
    %c0_45 = arith.constant 0 : index
    %29 = vector.load %arg1[%c0_40, %c0_41, %c1_42, %c0_43, %c1_44, %c0_45] : memref<2x8x2x9x2x128xbf16, #tpu.memory_space<vmem>>, vector<2x7x1x8x1x128xbf16>
    %30 = vector.shape_cast %29 : vector<2x7x1x8x1x128xbf16> to vector<2x7x8x128xbf16>
    %31 = vector.shape_cast %30 : vector<2x7x8x128xbf16> to vector<112x128xbf16>
    %c0_46 = arith.constant 0 : index
    %c4 = arith.constant 4 : index
    %c0_47 = arith.constant 0 : index
    %c0_48 = arith.constant 0 : index
    %32 = vector.load %arg2[%c0_46, %c4, %c0_47, %c0_48] : memref<1x9x128x128xbf16, #tpu.memory_space<vmem>>, vector<1x1x128x128xbf16>
    %33 = vector.shape_cast %32 : vector<1x1x128x128xbf16> to vector<128x128xbf16>
    %cst_49 = arith.constant dense<0.000000e+00> : vector<112x128xf32>
    %34 = tpu.matmul %31, %33, %cst_49 {dimension_numbers = #tpu.dot_dimension_numbers<[1], [0], [0], [1], [0, 0, 1, 1], [], []>} : vector<112x128xbf16>, vector<128x128xbf16>, vector<112x128xf32> -> vector<112x128xf32>
    %35 = arith.addf %28, %34 : vector<112x128xf32>
    %c0_50 = arith.constant 0 : index
    %c0_51 = arith.constant 0 : index
    %c1_52 = arith.constant 1 : index
    %c1_53 = arith.constant 1 : index
    %c0_54 = arith.constant 0 : index
    %c0_55 = arith.constant 0 : index
    %36 = vector.load %arg1[%c0_50, %c0_51, %c1_52, %c1_53, %c0_54, %c0_55] : memref<2x8x2x9x2x128xbf16, #tpu.memory_space<vmem>>, vector<2x7x1x8x1x128xbf16>
    %37 = vector.shape_cast %36 : vector<2x7x1x8x1x128xbf16> to vector<2x7x8x128xbf16>
    %38 = vector.shape_cast %37 : vector<2x7x8x128xbf16> to vector<112x128xbf16>
    %c0_56 = arith.constant 0 : index
    %c5 = arith.constant 5 : index
    %c0_57 = arith.constant 0 : index
    %c0_58 = arith.constant 0 : index
    %39 = vector.load %arg2[%c0_56, %c5, %c0_57, %c0_58] : memref<1x9x128x128xbf16, #tpu.memory_space<vmem>>, vector<1x1x128x128xbf16>
    %40 = vector.shape_cast %39 : vector<1x1x128x128xbf16> to vector<128x128xbf16>
    %cst_59 = arith.constant dense<0.000000e+00> : vector<112x128xf32>
    %41 = tpu.matmul %38, %40, %cst_59 {dimension_numbers = #tpu.dot_dimension_numbers<[1], [0], [0], [1], [0, 0, 1, 1], [], []>} : vector<112x128xbf16>, vector<128x128xbf16>, vector<112x128xf32> -> vector<112x128xf32>
    %42 = arith.addf %35, %41 : vector<112x128xf32>
    %c0_60 = arith.constant 0 : index
    %c1_61 = arith.constant 1 : index
    %c0_62 = arith.constant 0 : index
    %c0_63 = arith.constant 0 : index
    %c0_64 = arith.constant 0 : index
    %c0_65 = arith.constant 0 : index
    %43 = vector.load %arg1[%c0_60, %c1_61, %c0_62, %c0_63, %c0_64, %c0_65] : memref<2x8x2x9x2x128xbf16, #tpu.memory_space<vmem>>, vector<2x7x1x8x1x128xbf16>
    %44 = vector.shape_cast %43 : vector<2x7x1x8x1x128xbf16> to vector<2x7x8x128xbf16>
    %45 = vector.shape_cast %44 : vector<2x7x8x128xbf16> to vector<112x128xbf16>
    %c0_66 = arith.constant 0 : index
    %c6 = arith.constant 6 : index
    %c0_67 = arith.constant 0 : index
    %c0_68 = arith.constant 0 : index
    %46 = vector.load %arg2[%c0_66, %c6, %c0_67, %c0_68] : memref<1x9x128x128xbf16, #tpu.memory_space<vmem>>, vector<1x1x128x128xbf16>
    %47 = vector.shape_cast %46 : vector<1x1x128x128xbf16> to vector<128x128xbf16>
    %cst_69 = arith.constant dense<0.000000e+00> : vector<112x128xf32>
    %48 = tpu.matmul %45, %47, %cst_69 {dimension_numbers = #tpu.dot_dimension_numbers<[1], [0], [0], [1], [0, 0, 1, 1], [], []>} : vector<112x128xbf16>, vector<128x128xbf16>, vector<112x128xf32> -> vector<112x128xf32>
    %49 = arith.addf %42, %48 : vector<112x128xf32>
    %c0_70 = arith.constant 0 : index
    %c1_71 = arith.constant 1 : index
    %c0_72 = arith.constant 0 : index
    %c0_73 = arith.constant 0 : index
    %c1_74 = arith.constant 1 : index
    %c0_75 = arith.constant 0 : index
    %50 = vector.load %arg1[%c0_70, %c1_71, %c0_72, %c0_73, %c1_74, %c0_75] : memref<2x8x2x9x2x128xbf16, #tpu.memory_space<vmem>>, vector<2x7x1x8x1x128xbf16>
    %51 = vector.shape_cast %50 : vector<2x7x1x8x1x128xbf16> to vector<2x7x8x128xbf16>
    %52 = vector.shape_cast %51 : vector<2x7x8x128xbf16> to vector<112x128xbf16>
    %c0_76 = arith.constant 0 : index
    %c7 = arith.constant 7 : index
    %c0_77 = arith.constant 0 : index
    %c0_78 = arith.constant 0 : index
    %53 = vector.load %arg2[%c0_76, %c7, %c0_77, %c0_78] : memref<1x9x128x128xbf16, #tpu.memory_space<vmem>>, vector<1x1x128x128xbf16>
    %54 = vector.shape_cast %53 : vector<1x1x128x128xbf16> to vector<128x128xbf16>
    %cst_79 = arith.constant dense<0.000000e+00> : vector<112x128xf32>
    %55 = tpu.matmul %52, %54, %cst_79 {dimension_numbers = #tpu.dot_dimension_numbers<[1], [0], [0], [1], [0, 0, 1, 1], [], []>} : vector<112x128xbf16>, vector<128x128xbf16>, vector<112x128xf32> -> vector<112x128xf32>
    %56 = arith.addf %49, %55 : vector<112x128xf32>
    %c0_80 = arith.constant 0 : index
    %c1_81 = arith.constant 1 : index
    %c0_82 = arith.constant 0 : index
    %c1_83 = arith.constant 1 : index
    %c0_84 = arith.constant 0 : index
    %c0_85 = arith.constant 0 : index
    %57 = vector.load %arg1[%c0_80, %c1_81, %c0_82, %c1_83, %c0_84, %c0_85] : memref<2x8x2x9x2x128xbf16, #tpu.memory_space<vmem>>, vector<2x7x1x8x1x128xbf16>
    %58 = vector.shape_cast %57 : vector<2x7x1x8x1x128xbf16> to vector<2x7x8x128xbf16>
    %59 = vector.shape_cast %58 : vector<2x7x8x128xbf16> to vector<112x128xbf16>
    %c0_86 = arith.constant 0 : index
    %c8 = arith.constant 8 : index
    %c0_87 = arith.constant 0 : index
    %c0_88 = arith.constant 0 : index
    %60 = vector.load %arg2[%c0_86, %c8, %c0_87, %c0_88] : memref<1x9x128x128xbf16, #tpu.memory_space<vmem>>, vector<1x1x128x128xbf16>
    %61 = vector.shape_cast %60 : vector<1x1x128x128xbf16> to vector<128x128xbf16>
    %cst_89 = arith.constant dense<0.000000e+00> : vector<112x128xf32>
    %62 = tpu.matmul %59, %61, %cst_89 {dimension_numbers = #tpu.dot_dimension_numbers<[1], [0], [0], [1], [0, 0, 1, 1], [], []>} : vector<112x128xbf16>, vector<128x128xbf16>, vector<112x128xf32> -> vector<112x128xf32>
    %63 = arith.addf %56, %62 : vector<112x128xf32>
    %64 = tpu.iota {dimensions = array<i32: 0>} : vector<112x1xi32>
    %c8_i32 = arith.constant 8 : i32
    %c0_i32 = arith.constant 0 : i32
    %65 = arith.cmpi eq, %c8_i32, %c0_i32 : i32
    %c1_i32 = arith.constant 1 : i32
    %66 = arith.select %65, %c1_i32, %c8_i32 : i32
    %67 = vector.broadcast %66 : i32 to vector<112x1xi32>
    %68 = arith.remsi %64, %67 : vector<112x1xi32>
    %c0_i32_90 = arith.constant 0 : i32
    %69 = vector.broadcast %c0_i32_90 : i32 to vector<112x1xi32>
    %70 = arith.cmpi ne, %68, %69 : vector<112x1xi32>
    %c0_i32_91 = arith.constant 0 : i32
    %71 = vector.broadcast %c0_i32_91 : i32 to vector<112x1xi32>
    %72 = arith.cmpi slt, %68, %71 : vector<112x1xi32>
    %c0_i32_92 = arith.constant 0 : i32
    %73 = arith.cmpi slt, %66, %c0_i32_92 : i32
    %74 = vector.broadcast %73 : i1 to vector<112x1xi1>
    %75 = vector.broadcast %74 : vector<112x1xi1> to vector<112x1xi1>
    %76 = arith.xori %72, %75 : vector<112x1xi1>
    %77 = arith.andi %76, %70 : vector<112x1xi1>
    %78 = vector.broadcast %66 : i32 to vector<112x1xi32>
    %79 = arith.addi %68, %78 : vector<112x1xi32>
    %80 = arith.select %77, %79, %68 : vector<112x1xi1>, vector<112x1xi32>
    %c7_i32 = arith.constant 7 : i32
    %81 = vector.broadcast %c7_i32 : i32 to vector<112x1xi32>
    %82 = arith.cmpi slt, %80, %81 : vector<112x1xi32>
    %cst_93 = arith.constant 0.000000e+00 : f32
    %83 = vector.shape_cast %82 : vector<112x1xi1> to vector<112x1xi1>
    %84 = vector.broadcast %83 : vector<112x1xi1> to vector<112x128xi1>
    %85 = vector.broadcast %cst_93 : f32 to vector<112x128xf32>
    %86 = arith.select %84, %63, %85 : vector<112x128xi1>, vector<112x128xf32>
    %cst_94 = arith.constant dense<0.000000e+00> : vector<128xf32>
    %87 = vector.multi_reduction <add>, %86, %cst_94 [0] : vector<112x128xf32> to vector<128xf32>
    %88 = vector.shape_cast %87 : vector<128xf32> to vector<1x128xf32>
    %cst_95 = arith.constant 0.0102040814 : f32
    %89 = vector.broadcast %cst_95 : f32 to vector<1x128xf32>
    %90 = arith.mulf %88, %89 : vector<1x128xf32>
    %91 = vector.broadcast %90 : vector<1x128xf32> to vector<112x128xf32>
    %92 = arith.subf %86, %91 : vector<112x128xf32>
    %93 = arith.mulf %92, %92 : vector<112x128xf32>
    %cst_96 = arith.constant dense<0.000000e+00> : vector<128xf32>
    %94 = vector.multi_reduction <add>, %93, %cst_96 [0] : vector<112x128xf32> to vector<128xf32>
    %95 = vector.shape_cast %94 : vector<128xf32> to vector<1x128xf32>
    %cst_97 = arith.constant 1.400000e+01 : f32
    %96 = vector.broadcast %cst_97 : f32 to vector<1x128xf32>
    %97 = arith.mulf %96, %90 : vector<1x128xf32>
    %98 = arith.mulf %97, %90 : vector<1x128xf32>
    %99 = arith.subf %95, %98 : vector<1x128xf32>
    %cst_98 = arith.constant 0.0102040814 : f32
    %100 = vector.broadcast %cst_98 : f32 to vector<1x128xf32>
    %101 = arith.mulf %99, %100 : vector<1x128xf32>
    %cst_99 = arith.constant 9.99999974E-6 : f32
    %102 = vector.broadcast %cst_99 : f32 to vector<1x128xf32>
    %103 = arith.addf %101, %102 : vector<1x128xf32>
    %104 = math.rsqrt %103 : vector<1x128xf32>
    %c0_100 = arith.constant 0 : index
    %c0_101 = arith.constant 0 : index
    %c0_102 = arith.constant 0 : index
    %105 = vector.load %arg3[%c0_100, %c0_101, %c0_102] : memref<1x1x128xf32, #tpu.memory_space<vmem>>, vector<1x1x128xf32>
    %106 = vector.shape_cast %105 : vector<1x1x128xf32> to vector<1x128xf32>
    %107 = arith.mulf %104, %106 : vector<1x128xf32>
    %108 = vector.broadcast %107 : vector<1x128xf32> to vector<112x128xf32>
    %109 = arith.mulf %92, %108 : vector<112x128xf32>
    %c0_103 = arith.constant 0 : index
    %c0_104 = arith.constant 0 : index
    %c0_105 = arith.constant 0 : index
    %110 = vector.load %arg4[%c0_103, %c0_104, %c0_105] : memref<1x1x128xf32, #tpu.memory_space<vmem>>, vector<1x1x128xf32>
    %111 = vector.shape_cast %110 : vector<1x1x128xf32> to vector<1x128xf32>
    %112 = vector.broadcast %111 : vector<1x128xf32> to vector<112x128xf32>
    %113 = arith.addf %109, %112 : vector<112x128xf32>
    %114 = vector.shape_cast %113 : vector<112x128xf32> to vector<2x7x8x128xf32>
    %c0_106 = arith.constant 0 : index
    %c0_107 = arith.constant 0 : index
    %c0_108 = arith.constant 0 : index
    %c0_109 = arith.constant 0 : index
    %115 = vector.load %arg5[%c0_106, %c0_107, %c0_108, %c0_109] : memref<2x7x8x128xf32, #tpu.memory_space<vmem>>, vector<2x7x8x128xf32>
    tpu.vector_store %arg5[%c0_106, %c0_107, %c0_108, %c0_109], %114 {strides = array<i32>} : memref<2x7x8x128xf32, #tpu.memory_space<vmem>>, vector<2x7x8x128xf32>,
    return
  }
  func.func @transform_0(%arg0: i32) -> (i32, i32, i32, i32, i32, i32) {
    %c0_i32 = arith.constant 0 : i32
    %c0_i32_0 = arith.constant 0 : i32
    %c0_i32_1 = arith.constant 0 : i32
    %c0_i32_2 = arith.constant 0 : i32
    %c0_i32_3 = arith.constant 0 : i32
    %c0_i32_4 = arith.constant 0 : i32
    return %c0_i32, %c0_i32_0, %c0_i32_1, %c0_i32_2, %c0_i32_3, %arg0 : i32, i32, i32, i32, i32, i32
  }
  func.func @transform_1(%arg0: i32) -> (i32, i32, i32, i32) {
    %c0_i32 = arith.constant 0 : i32
    %c0_i32_0 = arith.constant 0 : i32
    %c0_i32_1 = arith.constant 0 : i32
    %c0_i32_2 = arith.constant 0 : i32
    return %arg0, %c0_i32, %c0_i32_0, %c0_i32_1 : i32, i32, i32, i32
  }
  func.func @transform_2(%arg0: i32) -> (i32, i32, i32) {
    %c0_i32 = arith.constant 0 : i32
    %c0_i32_0 = arith.constant 0 : i32
    %c0_i32_1 = arith.constant 0 : i32
    return %arg0, %c0_i32, %c0_i32_0 : i32, i32, i32
  }
  func.func @transform_3(%arg0: i32) -> (i32, i32, i32) {
    %c0_i32 = arith.constant 0 : i32
    %c0_i32_0 = arith.constant 0 : i32
    %c0_i32_1 = arith.constant 0 : i32
    return %arg0, %c0_i32, %c0_i32_0 : i32, i32, i32
  }
  func.func @transform_4(%arg0: i32) -> (i32, i32, i32, i32) {
    %c0_i32 = arith.constant 0 : i32
    %c0_i32_0 = arith.constant 0 : i32
    %c0_i32_1 = arith.constant 0 : i32
    %c0_i32_2 = arith.constant 0 : i32
    return %c0_i32, %c0_i32_0, %c0_i32_1, %arg0 : i32, i32, i32, i32
  }
}

</mosaic_0001>

<bundles_post_ra>
// kernel: relu_groupconv_bn.1
= control target key start
LH: loop header
LB: loop body
LE: loop exit
PB: predicated region body
PF: predicated region fallthrough
CT: control target
= control target key end

     0   :  { %s23403_s15 = smov 0   ;;  %s23405_s16 = smov 0   ;;  %s27842_s0 = inlined_call_operand.vmem [shape: bf16[2,8,2,9,2,256], index: 0, kind: input, shape index: {}]   ;;  %s27843_s1 = inlined_call_operand.vmem [shape: bf16[2,9,128,128], index: 1, kind: input, shape index: {}]   ;;  %s27844_s2 = inlined_call_operand.vmem [shape: f32[2,1,128], index: 2, kind: input, shape index: {}]   ;;  %s27845_s3 = inlined_call_operand.vmem [shape: f32[2,1,128], index: 3, kind: input, shape index: {}]   ;;  %s27846_s4 = inlined_call_operand.vmem [shape: f32[2,7,8,256], index: 4, kind: output, shape index: {}]  }
   0x1   :  { %s23407_s17 = smov 0  }
   0x2 LB: > { %s23419_s18 = sadd.s32 4294967295, %s23373_s17   ;;  %s23422_s19 = sadd.s32 1, %s23373_s17   ;;  %s23373_s17 = sphi %s23407_s17, %s28049_s17   ;;  %s23369_s16 = sphi %s23405_s16, %s28048_s16   ;;  %s23365_s15 = sphi %s23403_s15, %s28047_s15  }
   0x3   : > { %s18_s20 = ssub.s32 %s23373_s17, %s23422_s19  ;;  %s21_s21 = sadd.s32 1, %s23369_s16 }
   0x4   : > { %p19_p0 = scmp.eq.s32.totalorder %s18_s20, 0  ;;  %p28_p1 = scmp.ne.s32.totalorder %s23369_s16, %s23365_s15 }
   0x5   : > { %p29_p2 = scmp.eq.s32.totalorder %s23373_s17, 0  ;;  %p136_p3 = scmp.eq.s32.totalorder %s23419_s18, 1 }
   0x6   : > { %s23432_s22 = scalar_select %p19_p0, %s23369_s16, %s21_s21  }
   0x7   : > { %p30_p4 = por %p29_p2, %p28_p1  ;;  %p23434_p5 = por %p136_p3, %p28_p1 }
   0x8   : > { %p20594_p6 = scmp.ge.s32.totalorder %s23373_s17, 2 }
   0xa   : > { %158 = sbr.rel (%p20594_p6) target bundleno = 212 (0xd4), region = 16 }
  0x11   : > { %161 = sbr.rel (!%p30_p4) target bundleno = 212 (0xd4), region = 20  ;;  %s163_s24 = sand.u32 (%p30_p4), 1, %s23369_s16  }
  0x12   : > { %s23444_s27 = scalar_lea.vmem (%p30_p4), %s27842_s0, %s23373_s17  ;;  %s23238_s28 = smul.u32 (%p30_p4), 288, %s163_s24 }
  0x13   : > { %v182_v0 = vld [vmem:[%s23444_s27] sm:$0x1] (%p30_p4)  ;;  %v184_v1 = vld [vmem:[%s23444_s27 + $0x2] sm:$0x1] (%p30_p4)  ;;  %v186_v2 = vld [vmem:[%s23444_s27 + $0x4] sm:$0x1] (%p30_p4) }
  0x14   : > { %v188_v3 = vld [vmem:[%s23444_s27 + $0x6] sm:$0x1] (%p30_p4)  ;;  %v190_v4 = vld [vmem:[%s23444_s27 + $0x8] sm:$0x1] (%p30_p4)  ;;  %v192_v5 = vld [vmem:[%s23444_s27 + $0xa] sm:$0x1] (%p30_p4) }
  0x15   : > { %v194_v6 = vld [vmem:[%s23444_s27 + $0xc] sm:$0x1] (%p30_p4)  ;;  %s23453_s29 = scalar_lea.vmem (%p30_p4), [#allocation2], %s23238_s28  ;;  %v196_v7 = vld [vmem:[%s23444_s27 + $0xe] sm:$0x1] (%p30_p4) }
  0x16   : > { %183 = vst [vmem:[%s23453_s29] sm:$0x1] (%p30_p4), %v182_v0  ;;  %185 = vst [vmem:[%s23453_s29 + $0x1] sm:$0x1] (%p30_p4), %v184_v1  ;;  %v198_v8 = vld [vmem:[%s23444_s27 + $0x10] sm:$0x1] (%p30_p4) }
  0x17   : > { %187 = vst [vmem:[%s23453_s29 + $0x2] sm:$0x1] (%p30_p4), %v186_v2  ;;  %189 = vst [vmem:[%s23453_s29 + $0x3] sm:$0x1] (%p30_p4), %v188_v3  ;;  %v200_v9 = vld [vmem:[%s23444_s27 + $0x12] sm:$0x1] (%p30_p4) }
  0x18   : > { %191 = vst [vmem:[%s23453_s29 + $0x4] sm:$0x1] %v190_v4  ;;  %193 = vst [vmem:[%s23453_s29 + $0x5] sm:$0x1] %v192_v5  ;;  %v202_v10 = vld [vmem:[%s23444_s27 + $0x14] sm:$0x1] }
  0x19   : > { %195 = vst [vmem:[%s23453_s29 + $0x6] sm:$0x1] %v194_v6  ;;  %197 = vst [vmem:[%s23453_s29 + $0x7] sm:$0x1] %v196_v7  ;;  %v204_v11 = vld [vmem:[%s23444_s27 + $0x16] sm:$0x1] }
  0x1a   : > { %199 = vst [vmem:[%s23453_s29 + $0x8] sm:$0x1] %v198_v8  ;;  %201 = vst [vmem:[%s23453_s29 + $0x9] sm:$0x1] %v200_v9  ;;  %v206_v12 = vld [vmem:[%s23444_s27 + $0x18] sm:$0x1] }
  0x1b   : > { %203 = vst [vmem:[%s23453_s29 + $0xa] sm:$0x1] %v202_v10  ;;  %205 = vst [vmem:[%s23453_s29 + $0xb] sm:$0x1] %v204_v11  ;;  %v208_v13 = vld [vmem:[%s23444_s27 + $0x1a] sm:$0x1] }
  0x1c   : > { %207 = vst [vmem:[%s23453_s29 + $0xc] sm:$0x1] %v206_v12  ;;  %v210_v14 = vld [vmem:[%s23444_s27 + $0x1c] sm:$0x1]  ;;  %v212_v15 = vld [vmem:[%s23444_s27 + $0x1e] sm:$0x1] }
  0x1d   : > { %209 = vst [vmem:[%s23453_s29 + $0xd] sm:$0x1] %v208_v13  ;;  %211 = vst [vmem:[%s23453_s29 + $0xe] sm:$0x1] %v210_v14  ;;  %v214_v16 = vld [vmem:[%s23444_s27 + $0x20] sm:$0x1] }
  0x1e   : > { %213 = vst [vmem:[%s23453_s29 + $0xf] sm:$0x1] %v212_v15  ;;  %v216_v17 = vld [vmem:[%s23444_s27 + $0x22] sm:$0x1]  ;;  %v218_v18 = vld [vmem:[%s23444_s27 + $0x24] sm:$0x1] }
  0x1f   : > { %215 = vst [vmem:[%s23453_s29 + $0x10] sm:$0x1] %v214_v16  ;;  %217 = vst [vmem:[%s23453_s29 + $0x11] sm:$0x1] %v216_v17  ;;  %v220_v19 = vld [vmem:[%s23444_s27 + $0x26] sm:$0x1] }
  0x20   : > { %219 = vst [vmem:[%s23453_s29 + $0x12] sm:$0x1] %v218_v18  ;;  %v222_v20 = vld [vmem:[%s23444_s27 + $0x28] sm:$0x1]  ;;  %v224_v21 = vld [vmem:[%s23444_s27 + $0x2a] sm:$0x1] }
  0x21   : > { %221 = vst [vmem:[%s23453_s29 + $0x13] sm:$0x1] %v220_v19  ;;  %223 = vst [vmem:[%s23453_s29 + $0x14] sm:$0x1] %v222_v20  ;;  %v226_v22 = vld [vmem:[%s23444_s27 + $0x2c] sm:$0x1] }
  0x22   : > { %225 = vst [vmem:[%s23453_s29 + $0x15] sm:$0x1] %v224_v21  ;;  %v228_v23 = vld [vmem:[%s23444_s27 + $0x2e] sm:$0x1]  ;;  %v230_v24 = vld [vmem:[%s23444_s27 + $0x30] sm:$0x1] }
  0x23   : > { %227 = vst [vmem:[%s23453_s29 + $0x16] sm:$0x1] %v226_v22  ;;  %229 = vst [vmem:[%s23453_s29 + $0x17] sm:$0x1] %v228_v23  ;;  %v232_v25 = vld [vmem:[%s23444_s27 + $0x32] sm:$0x1] }
  0x24   : > { %231 = vst [vmem:[%s23453_s29 + $0x18] sm:$0x1] %v230_v24  ;;  %v234_v26 = vld [vmem:[%s23444_s27 + $0x34] sm:$0x1]  ;;  %v236_v27 = vld [vmem:[%s23444_s27 + $0x36] sm:$0x1] }
  0x25   : > { %233 = vst [vmem:[%s23453_s29 + $0x19] sm:$0x1] %v232_v25  ;;  %235 = vst [vmem:[%s23453_s29 + $0x1a] sm:$0x1] %v234_v26  ;;  %v238_v28 = vld [vmem:[%s23444_s27 + $0x38] sm:$0x1] }
  0x26   : > { %237 = vst [vmem:[%s23453_s29 + $0x1b] sm:$0x1] %v236_v27  ;;  %v240_v29 = vld [vmem:[%s23444_s27 + $0x3a] sm:$0x1]  ;;  %v242_v30 = vld [vmem:[%s23444_s27 + $0x3c] sm:$0x1] }
  0x27   : > { %239 = vst [vmem:[%s23453_s29 + $0x1c] sm:$0x1] %v238_v28  ;;  %241 = vst [vmem:[%s23453_s29 + $0x1d] sm:$0x1] %v240_v29  ;;  %v244_v31 = vld [vmem:[%s23444_s27 + $0x3e] sm:$0x1] }
  0x28   : > { %243 = vst [vmem:[%s23453_s29 + $0x1e] sm:$0x1] %v242_v30  ;;  %v246_v32 = vld [vmem:[%s23444_s27 + $0x40] sm:$0x1]  ;;  %v248_v33 = vld [vmem:[%s23444_s27 + $0x42] sm:$0x1] }
  0x29   : > { %245 = vst [vmem:[%s23453_s29 + $0x1f] sm:$0x1] %v244_v31  ;;  %247 = vst [vmem:[%s23453_s29 + $0x20] sm:$0x1] %v246_v32  ;;  %v250_v34 = vld [vmem:[%s23444_s27 + $0x44] sm:$0x1] }
  0x2a   : > { %249 = vst [vmem:[%s23453_s29 + $0x21] sm:$0x1] %v248_v33  ;;  %v252_v35 = vld [vmem:[%s23444_s27 + $0x46] sm:$0x1]  ;;  %v254_v36 = vld [vmem:[%s23444_s27 + $0x48] sm:$0x1] }
  0x2b   : > { %251 = vst [vmem:[%s23453_s29 + $0x22] sm:$0x1] %v250_v34  ;;  %253 = vst [vmem:[%s23453_s29 + $0x23] sm:$0x1] %v252_v35  ;;  %v256_v37 = vld [vmem:[%s23444_s27 + $0x4a] sm:$0x1] }
  0x2c   : > { %255 = vst [vmem:[%s23453_s29 + $0x24] sm:$0x1] %v254_v36  ;;  %v258_v38 = vld [vmem:[%s23444_s27 + $0x4c] sm:$0x1]  ;;  %v260_v39 = vld [vmem:[%s23444_s27 + $0x4e] sm:$0x1] }
  0x2d   : > { %257 = vst [vmem:[%s23453_s29 + $0x25] sm:$0x1] %v256_v37  ;;  %259 = vst [vmem:[%s23453_s29 + $0x26] sm:$0x1] %v258_v38  ;;  %v262_v40 = vld [vmem:[%s23444_s27 + $0x50] sm:$0x1] }
  0x2e   : > { %261 = vst [vmem:[%s23453_s29 + $0x27] sm:$0x1] %v260_v39  ;;  %v264_v41 = vld [vmem:[%s23444_s27 + $0x52] sm:$0x1]  ;;  %v266_v42 = vld [vmem:[%s23444_s27 + $0x54] sm:$0x1] }
  0x2f   : > { %263 = vst [vmem:[%s23453_s29 + $0x28] sm:$0x1] %v262_v40  ;;  %265 = vst [vmem:[%s23453_s29 + $0x29] sm:$0x1] %v264_v41  ;;  %v268_v43 = vld [vmem:[%s23444_s27 + $0x56] sm:$0x1] }
  0x30   : > { %267 = vst [vmem:[%s23453_s29 + $0x2a] sm:$0x1] %v266_v42  ;;  %v270_v44 = vld [vmem:[%s23444_s27 + $0x58] sm:$0x1]  ;;  %v272_v45 = vld [vmem:[%s23444_s27 + $0x5a] sm:$0x1] }
  0x31   : > { %269 = vst [vmem:[%s23453_s29 + $0x2b] sm:$0x1] %v268_v43  ;;  %271 = vst [vmem:[%s23453_s29 + $0x2c] sm:$0x1] %v270_v44  ;;  %v274_v46 = vld [vmem:[%s23444_s27 + $0x5c] sm:$0x1] }
  0x32   : > { %273 = vst [vmem:[%s23453_s29 + $0x2d] sm:$0x1] %v272_v45  ;;  %v276_v47 = vld [vmem:[%s23444_s27 + $0x5e] sm:$0x1]  ;;  %v278_v48 = vld [vmem:[%s23444_s27 + $0x60] sm:$0x1] }
  0x33   : > { %275 = vst [vmem:[%s23453_s29 + $0x2e] sm:$0x1] %v274_v46  ;;  %277 = vst [vmem:[%s23453_s29 + $0x2f] sm:$0x1] %v276_v47  ;;  %v280_v49 = vld [vmem:[%s23444_s27 + $0x62] sm:$0x1] }
  0x34   : > { %279 = vst [vmem:[%s23453_s29 + $0x30] sm:$0x1] %v278_v48  ;;  %v282_v50 = vld [vmem:[%s23444_s27 + $0x64] sm:$0x1]  ;;  %v284_v51 = vld [vmem:[%s23444_s27 + $0x66] sm:$0x1] }
  0x35   : > { %281 = vst [vmem:[%s23453_s29 + $0x31] sm:$0x1] %v280_v49  ;;  %283 = vst [vmem:[%s23453_s29 + $0x32] sm:$0x1] %v282_v50  ;;  %v286_v52 = vld [vmem:[%s23444_s27 + $0x68] sm:$0x1] }
  0x36   : > { %285 = vst [vmem:[%s23453_s29 + $0x33] sm:$0x1] %v284_v51  ;;  %v288_v53 = vld [vmem:[%s23444_s27 + $0x6a] sm:$0x1]  ;;  %v290_v54 = vld [vmem:[%s23444_s27 + $0x6c] sm:$0x1] }
  0x37   : > { %287 = vst [vmem:[%s23453_s29 + $0x34] sm:$0x1] %v286_v52  ;;  %289 = vst [vmem:[%s23453_s29 + $0x35] sm:$0x1] %v288_v53  ;;  %v292_v55 = vld [vmem:[%s23444_s27 + $0x6e] sm:$0x1] }
  0x38   : > { %291 = vst [vmem:[%s23453_s29 + $0x36] sm:$0x1] %v290_v54  ;;  %v294_v56 = vld [vmem:[%s23444_s27 + $0x70] sm:$0x1]  ;;  %v296_v57 = vld [vmem:[%s23444_s27 + $0x72] sm:$0x1] }
  0x39   : > { %293 = vst [vmem:[%s23453_s29 + $0x37] sm:$0x1] %v292_v55  ;;  %295 = vst [vmem:[%s23453_s29 + $0x38] sm:$0x1] %v294_v56  ;;  %v298_v58 = vld [vmem:[%s23444_s27 + $0x74] sm:$0x1] }
  0x3a   : > { %297 = vst [vmem:[%s23453_s29 + $0x39] sm:$0x1] %v296_v57  ;;  %v300_v59 = vld [vmem:[%s23444_s27 + $0x76] sm:$0x1]  ;;  %v302_v60 = vld [vmem:[%s23444_s27 + $0x78] sm:$0x1] }
  0x3b   : > { %299 = vst [vmem:[%s23453_s29 + $0x3a] sm:$0x1] %v298_v58  ;;  %301 = vst [vmem:[%s23453_s29 + $0x3b] sm:$0x1] %v300_v59  ;;  %v304_v61 = vld [vmem:[%s23444_s27 + $0x7a] sm:$0x1] }
  0x3c   : > { %303 = vst [vmem:[%s23453_s29 + $0x3c] sm:$0x1] %v302_v60  ;;  %v306_v62 = vld [vmem:[%s23444_s27 + $0x7c] sm:$0x1]  ;;  %v308_v63 = vld [vmem:[%s23444_s27 + $0x7e] sm:$0x1] }
  0x3d   : > { %305 = vst [vmem:[%s23453_s29 + $0x3d] sm:$0x1] %v304_v61  ;;  %307 = vst [vmem:[%s23453_s29 + $0x3e] sm:$0x1] %v306_v62  ;;  %v310_v0 = vld [vmem:[%s23444_s27 + $0x80] sm:$0x1] }
  0x3e   : > { %309 = vst [vmem:[%s23453_s29 + $0x3f] sm:$0x1] %v308_v63  ;;  %v312_v1 = vld [vmem:[%s23444_s27 + $0x82] sm:$0x1]  ;;  %v314_v2 = vld [vmem:[%s23444_s27 + $0x84] sm:$0x1] }
  0x3f   : > { %311 = vst [vmem:[%s23453_s29 + $0x40] sm:$0x1] %v310_v0  ;;  %313 = vst [vmem:[%s23453_s29 + $0x41] sm:$0x1] %v312_v1  ;;  %v316_v3 = vld [vmem:[%s23444_s27 + $0x86] sm:$0x1] }
  0x40   : > { %315 = vst [vmem:[%s23453_s29 + $0x42] sm:$0x1] %v314_v2  ;;  %v318_v4 = vld [vmem:[%s23444_s27 + $0x88] sm:$0x1]  ;;  %v320_v5 = vld [vmem:[%s23444_s27 + $0x8a] sm:$0x1] }
  0x41   : > { %317 = vst [vmem:[%s23453_s29 + $0x43] sm:$0x1] %v316_v3  ;;  %319 = vst [vmem:[%s23453_s29 + $0x44] sm:$0x1] %v318_v4  ;;  %v322_v6 = vld [vmem:[%s23444_s27 + $0x8c] sm:$0x1] }
  0x42   : > { %321 = vst [vmem:[%s23453_s29 + $0x45] sm:$0x1] %v320_v5  ;;  %v324_v7 = vld [vmem:[%s23444_s27 + $0x8e] sm:$0x1]  ;;  %v326_v8 = vld [vmem:[%s23444_s27 + $0x90] sm:$0x1] }
  0x43   : > { %323 = vst [vmem:[%s23453_s29 + $0x46] sm:$0x1] %v322_v6  ;;  %325 = vst [vmem:[%s23453_s29 + $0x47] sm:$0x1] %v324_v7  ;;  %v328_v9 = vld [vmem:[%s23444_s27 + $0x92] sm:$0x1] }
  0x44   : > { %327 = vst [vmem:[%s23453_s29 + $0x48] sm:$0x1] %v326_v8  ;;  %v330_v10 = vld [vmem:[%s23444_s27 + $0x94] sm:$0x1]  ;;  %v332_v11 = vld [vmem:[%s23444_s27 + $0x96] sm:$0x1] }
  0x45   : > { %329 = vst [vmem:[%s23453_s29 + $0x49] sm:$0x1] %v328_v9  ;;  %331 = vst [vmem:[%s23453_s29 + $0x4a] sm:$0x1] %v330_v10  ;;  %v334_v12 = vld [vmem:[%s23444_s27 + $0x98] sm:$0x1] }
  0x46   : > { %333 = vst [vmem:[%s23453_s29 + $0x4b] sm:$0x1] %v332_v11  ;;  %v336_v13 = vld [vmem:[%s23444_s27 + $0x9a] sm:$0x1]  ;;  %v338_v14 = vld [vmem:[%s23444_s27 + $0x9c] sm:$0x1] }
  0x47   : > { %335 = vst [vmem:[%s23453_s29 + $0x4c] sm:$0x1] %v334_v12  ;;  %337 = vst [vmem:[%s23453_s29 + $0x4d] sm:$0x1] %v336_v13  ;;  %v340_v15 = vld [vmem:[%s23444_s27 + $0x9e] sm:$0x1] }
  0x48   : > { %339 = vst [vmem:[%s23453_s29 + $0x4e] sm:$0x1] %v338_v14  ;;  %v342_v16 = vld [vmem:[%s23444_s27 + $0xa0] sm:$0x1]  ;;  %v344_v17 = vld [vmem:[%s23444_s27 + $0xa2] sm:$0x1] }
  0x49   : > { %341 = vst [vmem:[%s23453_s29 + $0x4f] sm:$0x1] %v340_v15  ;;  %343 = vst [vmem:[%s23453_s29 + $0x50] sm:$0x1] %v342_v16  ;;  %v346_v18 = vld [vmem:[%s23444_s27 + $0xa4] sm:$0x1] }
  0x4a   : > { %345 = vst [vmem:[%s23453_s29 + $0x51] sm:$0x1] %v344_v17  ;;  %v348_v19 = vld [vmem:[%s23444_s27 + $0xa6] sm:$0x1]  ;;  %v350_v20 = vld [vmem:[%s23444_s27 + $0xa8] sm:$0x1] }
  0x4b   : > { %347 = vst [vmem:[%s23453_s29 + $0x52] sm:$0x1] %v346_v18  ;;  %349 = vst [vmem:[%s23453_s29 + $0x53] sm:$0x1] %v348_v19  ;;  %v352_v21 = vld [vmem:[%s23444_s27 + $0xaa] sm:$0x1] }
  0x4c   : > { %351 = vst [vmem:[%s23453_s29 + $0x54] sm:$0x1] %v350_v20  ;;  %v354_v22 = vld [vmem:[%s23444_s27 + $0xac] sm:$0x1]  ;;  %v356_v23 = vld [vmem:[%s23444_s27 + $0xae] sm:$0x1] }
  0x4d   : > { %353 = vst [vmem:[%s23453_s29 + $0x55] sm:$0x1] %v352_v21  ;;  %355 = vst [vmem:[%s23453_s29 + $0x56] sm:$0x1] %v354_v22  ;;  %v358_v24 = vld [vmem:[%s23444_s27 + $0xb0] sm:$0x1] }
  0x4e   : > { %357 = vst [vmem:[%s23453_s29 + $0x57] sm:$0x1] %v356_v23  ;;  %v360_v25 = vld [vmem:[%s23444_s27 + $0xb2] sm:$0x1]  ;;  %v362_v26 = vld [vmem:[%s23444_s27 + $0xb4] sm:$0x1] }
  0x4f   : > { %359 = vst [vmem:[%s23453_s29 + $0x58] sm:$0x1] %v358_v24  ;;  %361 = vst [vmem:[%s23453_s29 + $0x59] sm:$0x1] %v360_v25  ;;  %v364_v27 = vld [vmem:[%s23444_s27 + $0xb6] sm:$0x1] }
  0x50   : > { %363 = vst [vmem:[%s23453_s29 + $0x5a] sm:$0x1] %v362_v26  ;;  %v366_v28 = vld [vmem:[%s23444_s27 + $0xb8] sm:$0x1]  ;;  %v368_v29 = vld [vmem:[%s23444_s27 + $0xba] sm:$0x1] }
  0x51   : > { %365 = vst [vmem:[%s23453_s29 + $0x5b] sm:$0x1] %v364_v27  ;;  %367 = vst [vmem:[%s23453_s29 + $0x5c] sm:$0x1] %v366_v28  ;;  %v370_v30 = vld [vmem:[%s23444_s27 + $0xbc] sm:$0x1] }
  0x52   : > { %369 = vst [vmem:[%s23453_s29 + $0x5d] sm:$0x1] %v368_v29  ;;  %v372_v31 = vld [vmem:[%s23444_s27 + $0xbe] sm:$0x1]  ;;  %v374_v32 = vld [vmem:[%s23444_s27 + $0xc0] sm:$0x1] }
  0x53   : > { %371 = vst [vmem:[%s23453_s29 + $0x5e] sm:$0x1] %v370_v30  ;;  %373 = vst [vmem:[%s23453_s29 + $0x5f] sm:$0x1] %v372_v31  ;;  %v376_v33 = vld [vmem:[%s23444_s27 + $0xc2] sm:$0x1] }
  0x54   : > { %375 = vst [vmem:[%s23453_s29 + $0x60] sm:$0x1] %v374_v32  ;;  %v378_v34 = vld [vmem:[%s23444_s27 + $0xc4] sm:$0x1]  ;;  %v380_v35 = vld [vmem:[%s23444_s27 + $0xc6] sm:$0x1] }
  0x55   : > { %377 = vst [vmem:[%s23453_s29 + $0x61] sm:$0x1] %v376_v33  ;;  %379 = vst [vmem:[%s23453_s29 + $0x62] sm:$0x1] %v378_v34  ;;  %v382_v36 = vld [vmem:[%s23444_s27 + $0xc8] sm:$0x1] }
  0x56   : > { %381 = vst [vmem:[%s23453_s29 + $0x63] sm:$0x1] %v380_v35  ;;  %v384_v37 = vld [vmem:[%s23444_s27 + $0xca] sm:$0x1]  ;;  %v386_v38 = vld [vmem:[%s23444_s27 + $0xcc] sm:$0x1] }
  0x57   : > { %383 = vst [vmem:[%s23453_s29 + $0x64] sm:$0x1] %v382_v36  ;;  %385 = vst [vmem:[%s23453_s29 + $0x65] sm:$0x1] %v384_v37  ;;  %v388_v39 = vld [vmem:[%s23444_s27 + $0xce] sm:$0x1] }
  0x58   : > { %387 = vst [vmem:[%s23453_s29 + $0x66] sm:$0x1] %v386_v38  ;;  %v390_v40 = vld [vmem:[%s23444_s27 + $0xd0] sm:$0x1]  ;;  %v392_v41 = vld [vmem:[%s23444_s27 + $0xd2] sm:$0x1] }
  0x59   : > { %389 = vst [vmem:[%s23453_s29 + $0x67] sm:$0x1] %v388_v39  ;;  %391 = vst [vmem:[%s23453_s29 + $0x68] sm:$0x1] %v390_v40  ;;  %v394_v42 = vld [vmem:[%s23444_s27 + $0xd4] sm:$0x1] }
  0x5a   : > { %393 = vst [vmem:[%s23453_s29 + $0x69] sm:$0x1] %v392_v41  ;;  %v396_v43 = vld [vmem:[%s23444_s27 + $0xd6] sm:$0x1]  ;;  %v398_v44 = vld [vmem:[%s23444_s27 + $0xd8] sm:$0x1] }
  0x5b   : > { %395 = vst [vmem:[%s23453_s29 + $0x6a] sm:$0x1] %v394_v42  ;;  %397 = vst [vmem:[%s23453_s29 + $0x6b] sm:$0x1] %v396_v43  ;;  %v400_v45 = vld [vmem:[%s23444_s27 + $0xda] sm:$0x1] }
  0x5c   : > { %399 = vst [vmem:[%s23453_s29 + $0x6c] sm:$0x1] %v398_v44  ;;  %v402_v46 = vld [vmem:[%s23444_s27 + $0xdc] sm:$0x1]  ;;  %v404_v47 = vld [vmem:[%s23444_s27 + $0xde] sm:$0x1] }
  0x5d   : > { %401 = vst [vmem:[%s23453_s29 + $0x6d] sm:$0x1] %v400_v45  ;;  %403 = vst [vmem:[%s23453_s29 + $0x6e] sm:$0x1] %v402_v46  ;;  %v406_v48 = vld [vmem:[%s23444_s27 + $0xe0] sm:$0x1] }
  0x5e   : > { %405 = vst [vmem:[%s23453_s29 + $0x6f] sm:$0x1] %v404_v47  ;;  %v408_v49 = vld [vmem:[%s23444_s27 + $0xe2] sm:$0x1]  ;;  %v410_v50 = vld [vmem:[%s23444_s27 + $0xe4] sm:$0x1] }
  0x5f   : > { %407 = vst [vmem:[%s23453_s29 + $0x70] sm:$0x1] %v406_v48  ;;  %409 = vst [vmem:[%s23453_s29 + $0x71] sm:$0x1] %v408_v49  ;;  %v412_v51 = vld [vmem:[%s23444_s27 + $0xe6] sm:$0x1] }
  0x60   : > { %411 = vst [vmem:[%s23453_s29 + $0x72] sm:$0x1] %v410_v50  ;;  %v414_v52 = vld [vmem:[%s23444_s27 + $0xe8] sm:$0x1]  ;;  %v416_v53 = vld [vmem:[%s23444_s27 + $0xea] sm:$0x1] }
  0x61   : > { %413 = vst [vmem:[%s23453_s29 + $0x73] sm:$0x1] %v412_v51  ;;  %415 = vst [vmem:[%s23453_s29 + $0x74] sm:$0x1] %v414_v52  ;;  %v418_v54 = vld [vmem:[%s23444_s27 + $0xec] sm:$0x1] }
  0x62   : > { %417 = vst [vmem:[%s23453_s29 + $0x75] sm:$0x1] %v416_v53  ;;  %v420_v55 = vld [vmem:[%s23444_s27 + $0xee] sm:$0x1]  ;;  %v422_v56 = vld [vmem:[%s23444_s27 + $0xf0] sm:$0x1] }
  0x63   : > { %419 = vst [vmem:[%s23453_s29 + $0x76] sm:$0x1] %v418_v54  ;;  %421 = vst [vmem:[%s23453_s29 + $0x77] sm:$0x1] %v420_v55  ;;  %v424_v57 = vld [vmem:[%s23444_s27 + $0xf2] sm:$0x1] }
  0x64   : > { %423 = vst [vmem:[%s23453_s29 + $0x78] sm:$0x1] %v422_v56  ;;  %v426_v58 = vld [vmem:[%s23444_s27 + $0xf4] sm:$0x1]  ;;  %v428_v59 = vld [vmem:[%s23444_s27 + $0xf6] sm:$0x1] }
  0x65   : > { %425 = vst [vmem:[%s23453_s29 + $0x79] sm:$0x1] %v424_v57  ;;  %427 = vst [vmem:[%s23453_s29 + $0x7a] sm:$0x1] %v426_v58  ;;  %v430_v60 = vld [vmem:[%s23444_s27 + $0xf8] sm:$0x1] }
  0x66   : > { %429 = vst [vmem:[%s23453_s29 + $0x7b] sm:$0x1] %v428_v59  ;;  %v432_v61 = vld [vmem:[%s23444_s27 + $0xfa] sm:$0x1]  ;;  %v434_v62 = vld [vmem:[%s23444_s27 + $0xfc] sm:$0x1] }
  0x67   : > { %431 = vst [vmem:[%s23453_s29 + $0x7c] sm:$0x1] %v430_v60  ;;  %433 = vst [vmem:[%s23453_s29 + $0x7d] sm:$0x1] %v432_v61  ;;  %v436_v63 = vld [vmem:[%s23444_s27 + $0xfe] sm:$0x1] }
  0x68   : > { %435 = vst [vmem:[%s23453_s29 + $0x7e] sm:$0x1] %v434_v62  ;;  %v438_v0 = vld [vmem:[%s23444_s27 + $0x100] sm:$0x1]  ;;  %v440_v1 = vld [vmem:[%s23444_s27 + $0x102] sm:$0x1] }
  0x69   : > { %437 = vst [vmem:[%s23453_s29 + $0x7f] sm:$0x1] %v436_v63  ;;  %439 = vst [vmem:[%s23453_s29 + $0x80] sm:$0x1] %v438_v0  ;;  %v442_v2 = vld [vmem:[%s23444_s27 + $0x104] sm:$0x1] }
  0x6a   : > { %441 = vst [vmem:[%s23453_s29 + $0x81] sm:$0x1] %v440_v1  ;;  %v444_v3 = vld [vmem:[%s23444_s27 + $0x106] sm:$0x1]  ;;  %v446_v4 = vld [vmem:[%s23444_s27 + $0x108] sm:$0x1] }
  0x6b   : > { %443 = vst [vmem:[%s23453_s29 + $0x82] sm:$0x1] %v442_v2  ;;  %445 = vst [vmem:[%s23453_s29 + $0x83] sm:$0x1] %v444_v3  ;;  %v448_v5 = vld [vmem:[%s23444_s27 + $0x10a] sm:$0x1] }
  0x6c   : > { %447 = vst [vmem:[%s23453_s29 + $0x84] sm:$0x1] %v446_v4  ;;  %v450_v6 = vld [vmem:[%s23444_s27 + $0x10c] sm:$0x1]  ;;  %v452_v7 = vld [vmem:[%s23444_s27 + $0x10e] sm:$0x1] }
  0x6d   : > { %449 = vst [vmem:[%s23453_s29 + $0x85] sm:$0x1] %v448_v5  ;;  %451 = vst [vmem:[%s23453_s29 + $0x86] sm:$0x1] %v450_v6  ;;  %v454_v8 = vld [vmem:[%s23444_s27 + $0x110] sm:$0x1] }
  0x6e   : > { %453 = vst [vmem:[%s23453_s29 + $0x87] sm:$0x1] %v452_v7  ;;  %v456_v9 = vld [vmem:[%s23444_s27 + $0x112] sm:$0x1]  ;;  %v458_v10 = vld [vmem:[%s23444_s27 + $0x114] sm:$0x1] }
  0x6f   : > { %455 = vst [vmem:[%s23453_s29 + $0x88] sm:$0x1] %v454_v8  ;;  %457 = vst [vmem:[%s23453_s29 + $0x89] sm:$0x1] %v456_v9  ;;  %v460_v11 = vld [vmem:[%s23444_s27 + $0x116] sm:$0x1] }
  0x70   : > { %459 = vst [vmem:[%s23453_s29 + $0x8a] sm:$0x1] %v458_v10  ;;  %v462_v12 = vld [vmem:[%s23444_s27 + $0x118] sm:$0x1]  ;;  %v464_v13 = vld [vmem:[%s23444_s27 + $0x11a] sm:$0x1] }
  0x71   : > { %461 = vst [vmem:[%s23453_s29 + $0x8b] sm:$0x1] %v460_v11  ;;  %463 = vst [vmem:[%s23453_s29 + $0x8c] sm:$0x1] %v462_v12  ;;  %v466_v14 = vld [vmem:[%s23444_s27 + $0x11c] sm:$0x1] }
  0x72   : > { %465 = vst [vmem:[%s23453_s29 + $0x8d] sm:$0x1] %v464_v13  ;;  %v468_v15 = vld [vmem:[%s23444_s27 + $0x11e] sm:$0x1]  ;;  %v470_v16 = vld [vmem:[%s23444_s27 + $0x120] sm:$0x1] }
  0x73   : > { %467 = vst [vmem:[%s23453_s29 + $0x8e] sm:$0x1] %v466_v14  ;;  %469 = vst [vmem:[%s23453_s29 + $0x8f] sm:$0x1] %v468_v15  ;;  %v472_v17 = vld [vmem:[%s23444_s27 + $0x122] sm:$0x1] }
  0x74   : > { %471 = vst [vmem:[%s23453_s29 + $0x90] sm:$0x1] %v470_v16  ;;  %v474_v18 = vld [vmem:[%s23444_s27 + $0x124] sm:$0x1]  ;;  %v476_v19 = vld [vmem:[%s23444_s27 + $0x126] sm:$0x1] }
  0x75   : > { %473 = vst [vmem:[%s23453_s29 + $0x91] sm:$0x1] %v472_v17  ;;  %475 = vst [vmem:[%s23453_s29 + $0x92] sm:$0x1] %v474_v18  ;;  %v478_v20 = vld [vmem:[%s23444_s27 + $0x128] sm:$0x1] }
  0x76   : > { %477 = vst [vmem:[%s23453_s29 + $0x93] sm:$0x1] %v476_v19  ;;  %v480_v21 = vld [vmem:[%s23444_s27 + $0x12a] sm:$0x1]  ;;  %v482_v22 = vld [vmem:[%s23444_s27 + $0x12c] sm:$0x1] }
  0x77   : > { %479 = vst [vmem:[%s23453_s29 + $0x94] sm:$0x1] %v478_v20  ;;  %481 = vst [vmem:[%s23453_s29 + $0x95] sm:$0x1] %v480_v21  ;;  %v484_v23 = vld [vmem:[%s23444_s27 + $0x12e] sm:$0x1] }
  0x78   : > { %483 = vst [vmem:[%s23453_s29 + $0x96] sm:$0x1] %v482_v22  ;;  %v486_v24 = vld [vmem:[%s23444_s27 + $0x130] sm:$0x1]  ;;  %v488_v25 = vld [vmem:[%s23444_s27 + $0x132] sm:$0x1] }
  0x79   : > { %485 = vst [vmem:[%s23453_s29 + $0x97] sm:$0x1] %v484_v23  ;;  %487 = vst [vmem:[%s23453_s29 + $0x98] sm:$0x1] %v486_v24  ;;  %v490_v26 = vld [vmem:[%s23444_s27 + $0x134] sm:$0x1] }
  0x7a   : > { %489 = vst [vmem:[%s23453_s29 + $0x99] sm:$0x1] %v488_v25  ;;  %v492_v27 = vld [vmem:[%s23444_s27 + $0x136] sm:$0x1]  ;;  %v494_v28 = vld [vmem:[%s23444_s27 + $0x138] sm:$0x1] }
  0x7b   : > { %491 = vst [vmem:[%s23453_s29 + $0x9a] sm:$0x1] %v490_v26  ;;  %493 = vst [vmem:[%s23453_s29 + $0x9b] sm:$0x1] %v492_v27  ;;  %v496_v29 = vld [vmem:[%s23444_s27 + $0x13a] sm:$0x1] }
  0x7c   : > { %495 = vst [vmem:[%s23453_s29 + $0x9c] sm:$0x1] %v494_v28  ;;  %v498_v30 = vld [vmem:[%s23444_s27 + $0x13c] sm:$0x1]  ;;  %v500_v31 = vld [vmem:[%s23444_s27 + $0x13e] sm:$0x1] }
  0x7d   : > { %497 = vst [vmem:[%s23453_s29 + $0x9d] sm:$0x1] %v496_v29  ;;  %499 = vst [vmem:[%s23453_s29 + $0x9e] sm:$0x1] %v498_v30  ;;  %v502_v32 = vld [vmem:[%s23444_s27 + $0x140] sm:$0x1] }
  0x7e   : > { %501 = vst [vmem:[%s23453_s29 + $0x9f] sm:$0x1] %v500_v31  ;;  %v504_v33 = vld [vmem:[%s23444_s27 + $0x142] sm:$0x1]  ;;  %v506_v34 = vld [vmem:[%s23444_s27 + $0x144] sm:$0x1] }
  0x7f   : > { %503 = vst [vmem:[%s23453_s29 + $0xa0] sm:$0x1] %v502_v32  ;;  %505 = vst [vmem:[%s23453_s29 + $0xa1] sm:$0x1] %v504_v33  ;;  %v508_v35 = vld [vmem:[%s23444_s27 + $0x146] sm:$0x1] }
  0x80   : > { %507 = vst [vmem:[%s23453_s29 + $0xa2] sm:$0x1] %v506_v34  ;;  %v510_v36 = vld [vmem:[%s23444_s27 + $0x148] sm:$0x1]  ;;  %v512_v37 = vld [vmem:[%s23444_s27 + $0x14a] sm:$0x1] }
  0x81   : > { %509 = vst [vmem:[%s23453_s29 + $0xa3] sm:$0x1] %v508_v35  ;;  %511 = vst [vmem:[%s23453_s29 + $0xa4] sm:$0x1] %v510_v36  ;;  %v514_v38 = vld [vmem:[%s23444_s27 + $0x14c] sm:$0x1] }
  0x82   : > { %513 = vst [vmem:[%s23453_s29 + $0xa5] sm:$0x1] %v512_v37  ;;  %v516_v39 = vld [vmem:[%s23444_s27 + $0x14e] sm:$0x1]  ;;  %v518_v40 = vld [vmem:[%s23444_s27 + $0x150] sm:$0x1] }
  0x83   : > { %515 = vst [vmem:[%s23453_s29 + $0xa6] sm:$0x1] %v514_v38  ;;  %517 = vst [vmem:[%s23453_s29 + $0xa7] sm:$0x1] %v516_v39  ;;  %v520_v41 = vld [vmem:[%s23444_s27 + $0x152] sm:$0x1] }
  0x84   : > { %519 = vst [vmem:[%s23453_s29 + $0xa8] sm:$0x1] %v518_v40  ;;  %v522_v42 = vld [vmem:[%s23444_s27 + $0x154] sm:$0x1]  ;;  %v524_v43 = vld [vmem:[%s23444_s27 + $0x156] sm:$0x1] }
  0x85   : > { %521 = vst [vmem:[%s23453_s29 + $0xa9] sm:$0x1] %v520_v41  ;;  %523 = vst [vmem:[%s23453_s29 + $0xaa] sm:$0x1] %v522_v42  ;;  %v526_v44 = vld [vmem:[%s23444_s27 + $0x158] sm:$0x1] }
  0x86   : > { %525 = vst [vmem:[%s23453_s29 + $0xab] sm:$0x1] %v524_v43  ;;  %v528_v45 = vld [vmem:[%s23444_s27 + $0x15a] sm:$0x1]  ;;  %v530_v46 = vld [vmem:[%s23444_s27 + $0x15c] sm:$0x1] }
  0x87   : > { %527 = vst [vmem:[%s23453_s29 + $0xac] sm:$0x1] %v526_v44  ;;  %529 = vst [vmem:[%s23453_s29 + $0xad] sm:$0x1] %v528_v45  ;;  %v532_v47 = vld [vmem:[%s23444_s27 + $0x15e] sm:$0x1] }
  0x88   : > { %531 = vst [vmem:[%s23453_s29 + $0xae] sm:$0x1] %v530_v46  ;;  %v534_v48 = vld [vmem:[%s23444_s27 + $0x160] sm:$0x1]  ;;  %v536_v49 = vld [vmem:[%s23444_s27 + $0x162] sm:$0x1] }
  0x89   : > { %533 = vst [vmem:[%s23453_s29 + $0xaf] sm:$0x1] %v532_v47  ;;  %535 = vst [vmem:[%s23453_s29 + $0xb0] sm:$0x1] %v534_v48  ;;  %v538_v50 = vld [vmem:[%s23444_s27 + $0x164] sm:$0x1] }
  0x8a   : > { %537 = vst [vmem:[%s23453_s29 + $0xb1] sm:$0x1] %v536_v49  ;;  %v540_v51 = vld [vmem:[%s23444_s27 + $0x166] sm:$0x1]  ;;  %v542_v52 = vld [vmem:[%s23444_s27 + $0x168] sm:$0x1] }
  0x8b   : > { %539 = vst [vmem:[%s23453_s29 + $0xb2] sm:$0x1] %v538_v50  ;;  %541 = vst [vmem:[%s23453_s29 + $0xb3] sm:$0x1] %v540_v51  ;;  %v544_v53 = vld [vmem:[%s23444_s27 + $0x16a] sm:$0x1] }
  0x8c   : > { %543 = vst [vmem:[%s23453_s29 + $0xb4] sm:$0x1] %v542_v52  ;;  %v546_v54 = vld [vmem:[%s23444_s27 + $0x16c] sm:$0x1]  ;;  %v548_v55 = vld [vmem:[%s23444_s27 + $0x16e] sm:$0x1] }
  0x8d   : > { %545 = vst [vmem:[%s23453_s29 + $0xb5] sm:$0x1] %v544_v53  ;;  %547 = vst [vmem:[%s23453_s29 + $0xb6] sm:$0x1] %v546_v54  ;;  %v550_v56 = vld [vmem:[%s23444_s27 + $0x170] sm:$0x1] }
  0x8e   : > { %549 = vst [vmem:[%s23453_s29 + $0xb7] sm:$0x1] %v548_v55  ;;  %v552_v57 = vld [vmem:[%s23444_s27 + $0x172] sm:$0x1]  ;;  %v554_v58 = vld [vmem:[%s23444_s27 + $0x174] sm:$0x1] }
  0x8f   : > { %551 = vst [vmem:[%s23453_s29 + $0xb8] sm:$0x1] %v550_v56  ;;  %553 = vst [vmem:[%s23453_s29 + $0xb9] sm:$0x1] %v552_v57  ;;  %v556_v59 = vld [vmem:[%s23444_s27 + $0x176] sm:$0x1] }
  0x90   : > { %555 = vst [vmem:[%s23453_s29 + $0xba] sm:$0x1] %v554_v58  ;;  %v558_v60 = vld [vmem:[%s23444_s27 + $0x178] sm:$0x1]  ;;  %v560_v61 = vld [vmem:[%s23444_s27 + $0x17a] sm:$0x1] }
  0x91   : > { %557 = vst [vmem:[%s23453_s29 + $0xbb] sm:$0x1] %v556_v59  ;;  %559 = vst [vmem:[%s23453_s29 + $0xbc] sm:$0x1] %v558_v60  ;;  %v562_v62 = vld [vmem:[%s23444_s27 + $0x17c] sm:$0x1] }
  0x92   : > { %561 = vst [vmem:[%s23453_s29 + $0xbd] sm:$0x1] %v560_v61  ;;  %v564_v63 = vld [vmem:[%s23444_s27 + $0x17e] sm:$0x1]  ;;  %v566_v0 = vld [vmem:[%s23444_s27 + $0x180] sm:$0x1] }
  0x93   : > { %563 = vst [vmem:[%s23453_s29 + $0xbe] sm:$0x1] %v562_v62  ;;  %565 = vst [vmem:[%s23453_s29 + $0xbf] sm:$0x1] %v564_v63  ;;  %v568_v1 = vld [vmem:[%s23444_s27 + $0x182] sm:$0x1] }
  0x94   : > { %567 = vst [vmem:[%s23453_s29 + $0xc0] sm:$0x1] %v566_v0  ;;  %v570_v2 = vld [vmem:[%s23444_s27 + $0x184] sm:$0x1]  ;;  %v572_v3 = vld [vmem:[%s23444_s27 + $0x186] sm:$0x1] }
  0x95   : > { %569 = vst [vmem:[%s23453_s29 + $0xc1] sm:$0x1] %v568_v1  ;;  %571 = vst [vmem:[%s23453_s29 + $0xc2] sm:$0x1] %v570_v2  ;;  %v574_v4 = vld [vmem:[%s23444_s27 + $0x188] sm:$0x1] }
  0x96   : > { %573 = vst [vmem:[%s23453_s29 + $0xc3] sm:$0x1] %v572_v3  ;;  %v576_v5 = vld [vmem:[%s23444_s27 + $0x18a] sm:$0x1]  ;;  %v578_v6 = vld [vmem:[%s23444_s27 + $0x18c] sm:$0x1] }
  0x97   : > { %575 = vst [vmem:[%s23453_s29 + $0xc4] sm:$0x1] %v574_v4  ;;  %577 = vst [vmem:[%s23453_s29 + $0xc5] sm:$0x1] %v576_v5  ;;  %v580_v7 = vld [vmem:[%s23444_s27 + $0x18e] sm:$0x1] }
  0x98   : > { %579 = vst [vmem:[%s23453_s29 + $0xc6] sm:$0x1] %v578_v6  ;;  %v582_v8 = vld [vmem:[%s23444_s27 + $0x190] sm:$0x1]  ;;  %v584_v9 = vld [vmem:[%s23444_s27 + $0x192] sm:$0x1] }
  0x99   : > { %581 = vst [vmem:[%s23453_s29 + $0xc7] sm:$0x1] %v580_v7  ;;  %583 = vst [vmem:[%s23453_s29 + $0xc8] sm:$0x1] %v582_v8  ;;  %v586_v10 = vld [vmem:[%s23444_s27 + $0x194] sm:$0x1] }
  0x9a   : > { %585 = vst [vmem:[%s23453_s29 + $0xc9] sm:$0x1] %v584_v9  ;;  %v588_v11 = vld [vmem:[%s23444_s27 + $0x196] sm:$0x1]  ;;  %v590_v12 = vld [vmem:[%s23444_s27 + $0x198] sm:$0x1] }
  0x9b   : > { %587 = vst [vmem:[%s23453_s29 + $0xca] sm:$0x1] %v586_v10  ;;  %589 = vst [vmem:[%s23453_s29 + $0xcb] sm:$0x1] %v588_v11  ;;  %v592_v13 = vld [vmem:[%s23444_s27 + $0x19a] sm:$0x1] }
  0x9c   : > { %591 = vst [vmem:[%s23453_s29 + $0xcc] sm:$0x1] %v590_v12  ;;  %v594_v14 = vld [vmem:[%s23444_s27 + $0x19c] sm:$0x1]  ;;  %v596_v15 = vld [vmem:[%s23444_s27 + $0x19e] sm:$0x1] }
  0x9d   : > { %593 = vst [vmem:[%s23453_s29 + $0xcd] sm:$0x1] %v592_v13  ;;  %595 = vst [vmem:[%s23453_s29 + $0xce] sm:$0x1] %v594_v14  ;;  %v598_v16 = vld [vmem:[%s23444_s27 + $0x1a0] sm:$0x1] }
  0x9e   : > { %597 = vst [vmem:[%s23453_s29 + $0xcf] sm:$0x1] %v596_v15  ;;  %v600_v17 = vld [vmem:[%s23444_s27 + $0x1a2] sm:$0x1]  ;;  %v602_v18 = vld [vmem:[%s23444_s27 + $0x1a4] sm:$0x1] }
  0x9f   : > { %599 = vst [vmem:[%s23453_s29 + $0xd0] sm:$0x1] %v598_v16  ;;  %601 = vst [vmem:[%s23453_s29 + $0xd1] sm:$0x1] %v600_v17  ;;  %v604_v19 = vld [vmem:[%s23444_s27 + $0x1a6] sm:$0x1] }
  0xa0   : > { %603 = vst [vmem:[%s23453_s29 + $0xd2] sm:$0x1] %v602_v18  ;;  %v606_v20 = vld [vmem:[%s23444_s27 + $0x1a8] sm:$0x1]  ;;  %v608_v21 = vld [vmem:[%s23444_s27 + $0x1aa] sm:$0x1] }
  0xa1   : > { %605 = vst [vmem:[%s23453_s29 + $0xd3] sm:$0x1] %v604_v19  ;;  %607 = vst [vmem:[%s23453_s29 + $0xd4] sm:$0x1] %v606_v20  ;;  %v610_v22 = vld [vmem:[%s23444_s27 + $0x1ac] sm:$0x1] }
  0xa2   : > { %609 = vst [vmem:[%s23453_s29 + $0xd5] sm:$0x1] %v608_v21  ;;  %v612_v23 = vld [vmem:[%s23444_s27 + $0x1ae] sm:$0x1]  ;;  %v614_v24 = vld [vmem:[%s23444_s27 + $0x1b0] sm:$0x1] }
  0xa3   : > { %611 = vst [vmem:[%s23453_s29 + $0xd6] sm:$0x1] %v610_v22  ;;  %613 = vst [vmem:[%s23453_s29 + $0xd7] sm:$0x1] %v612_v23  ;;  %v616_v25 = vld [vmem:[%s23444_s27 + $0x1b2] sm:$0x1] }
  0xa4   : > { %615 = vst [vmem:[%s23453_s29 + $0xd8] sm:$0x1] %v614_v24  ;;  %v618_v26 = vld [vmem:[%s23444_s27 + $0x1b4] sm:$0x1]  ;;  %v620_v27 = vld [vmem:[%s23444_s27 + $0x1b6] sm:$0x1] }
  0xa5   : > { %617 = vst [vmem:[%s23453_s29 + $0xd9] sm:$0x1] %v616_v25  ;;  %619 = vst [vmem:[%s23453_s29 + $0xda] sm:$0x1] %v618_v26  ;;  %v622_v28 = vld [vmem:[%s23444_s27 + $0x1b8] sm:$0x1] }
  0xa6   : > { %621 = vst [vmem:[%s23453_s29 + $0xdb] sm:$0x1] %v620_v27  ;;  %v624_v29 = vld [vmem:[%s23444_s27 + $0x1ba] sm:$0x1]  ;;  %v626_v30 = vld [vmem:[%s23444_s27 + $0x1bc] sm:$0x1] }
  0xa7   : > { %623 = vst [vmem:[%s23453_s29 + $0xdc] sm:$0x1] %v622_v28  ;;  %625 = vst [vmem:[%s23453_s29 + $0xdd] sm:$0x1] %v624_v29  ;;  %v628_v31 = vld [vmem:[%s23444_s27 + $0x1be] sm:$0x1] }
  0xa8   : > { %627 = vst [vmem:[%s23453_s29 + $0xde] sm:$0x1] %v626_v30  ;;  %v630_v32 = vld [vmem:[%s23444_s27 + $0x1c0] sm:$0x1]  ;;  %v632_v33 = vld [vmem:[%s23444_s27 + $0x1c2] sm:$0x1] }
  0xa9   : > { %629 = vst [vmem:[%s23453_s29 + $0xdf] sm:$0x1] %v628_v31  ;;  %631 = vst [vmem:[%s23453_s29 + $0xe0] sm:$0x1] %v630_v32  ;;  %v634_v34 = vld [vmem:[%s23444_s27 + $0x1c4] sm:$0x1] }
  0xaa   : > { %633 = vst [vmem:[%s23453_s29 + $0xe1] sm:$0x1] %v632_v33  ;;  %v636_v35 = vld [vmem:[%s23444_s27 + $0x1c6] sm:$0x1]  ;;  %v638_v36 = vld [vmem:[%s23444_s27 + $0x1c8] sm:$0x1] }
  0xab   : > { %635 = vst [vmem:[%s23453_s29 + $0xe2] sm:$0x1] %v634_v34  ;;  %637 = vst [vmem:[%s23453_s29 + $0xe3] sm:$0x1] %v636_v35  ;;  %v640_v37 = vld [vmem:[%s23444_s27 + $0x1ca] sm:$0x1] }
  0xac   : > { %639 = vst [vmem:[%s23453_s29 + $0xe4] sm:$0x1] %v638_v36  ;;  %v642_v38 = vld [vmem:[%s23444_s27 + $0x1cc] sm:$0x1]  ;;  %v644_v39 = vld [vmem:[%s23444_s27 + $0x1ce] sm:$0x1] }
  0xad   : > { %641 = vst [vmem:[%s23453_s29 + $0xe5] sm:$0x1] %v640_v37  ;;  %643 = vst [vmem:[%s23453_s29 + $0xe6] sm:$0x1] %v642_v38  ;;  %v646_v40 = vld [vmem:[%s23444_s27 + $0x1d0] sm:$0x1] }
  0xae   : > { %645 = vst [vmem:[%s23453_s29 + $0xe7] sm:$0x1] %v644_v39  ;;  %v648_v41 = vld [vmem:[%s23444_s27 + $0x1d2] sm:$0x1]  ;;  %v650_v42 = vld [vmem:[%s23444_s27 + $0x1d4] sm:$0x1] }
  0xaf   : > { %647 = vst [vmem:[%s23453_s29 + $0xe8] sm:$0x1] %v646_v40  ;;  %649 = vst [vmem:[%s23453_s29 + $0xe9] sm:$0x1] %v648_v41  ;;  %v652_v43 = vld [vmem:[%s23444_s27 + $0x1d6] sm:$0x1] }
  0xb0   : > { %651 = vst [vmem:[%s23453_s29 + $0xea] sm:$0x1] %v650_v42  ;;  %v654_v44 = vld [vmem:[%s23444_s27 + $0x1d8] sm:$0x1]  ;;  %v656_v45 = vld [vmem:[%s23444_s27 + $0x1da] sm:$0x1] }
  0xb1   : > { %653 = vst [vmem:[%s23453_s29 + $0xeb] sm:$0x1] %v652_v43  ;;  %655 = vst [vmem:[%s23453_s29 + $0xec] sm:$0x1] %v654_v44  ;;  %v658_v46 = vld [vmem:[%s23444_s27 + $0x1dc] sm:$0x1] }
  0xb2   : > { %657 = vst [vmem:[%s23453_s29 + $0xed] sm:$0x1] %v656_v45  ;;  %v660_v47 = vld [vmem:[%s23444_s27 + $0x1de] sm:$0x1]  ;;  %v662_v48 = vld [vmem:[%s23444_s27 + $0x1e0] sm:$0x1] }
  0xb3   : > { %659 = vst [vmem:[%s23453_s29 + $0xee] sm:$0x1] %v658_v46  ;;  %661 = vst [vmem:[%s23453_s29 + $0xef] sm:$0x1] %v660_v47  ;;  %v664_v49 = vld [vmem:[%s23444_s27 + $0x1e2] sm:$0x1] }
  0xb4   : > { %663 = vst [vmem:[%s23453_s29 + $0xf0] sm:$0x1] %v662_v48  ;;  %v666_v50 = vld [vmem:[%s23444_s27 + $0x1e4] sm:$0x1]  ;;  %v668_v51 = vld [vmem:[%s23444_s27 + $0x1e6] sm:$0x1] }
  0xb5   : > { %665 = vst [vmem:[%s23453_s29 + $0xf1] sm:$0x1] %v664_v49  ;;  %667 = vst [vmem:[%s23453_s29 + $0xf2] sm:$0x1] %v666_v50  ;;  %v670_v52 = vld [vmem:[%s23444_s27 + $0x1e8] sm:$0x1] }
  0xb6   : > { %669 = vst [vmem:[%s23453_s29 + $0xf3] sm:$0x1] %v668_v51  ;;  %v672_v53 = vld [vmem:[%s23444_s27 + $0x1ea] sm:$0x1]  ;;  %v674_v54 = vld [vmem:[%s23444_s27 + $0x1ec] sm:$0x1] }
  0xb7   : > { %671 = vst [vmem:[%s23453_s29 + $0xf4] sm:$0x1] %v670_v52  ;;  %673 = vst [vmem:[%s23453_s29 + $0xf5] sm:$0x1] %v672_v53  ;;  %v676_v55 = vld [vmem:[%s23444_s27 + $0x1ee] sm:$0x1] }
  0xb8   : > { %675 = vst [vmem:[%s23453_s29 + $0xf6] sm:$0x1] %v674_v54  ;;  %v678_v56 = vld [vmem:[%s23444_s27 + $0x1f0] sm:$0x1]  ;;  %v680_v57 = vld [vmem:[%s23444_s27 + $0x1f2] sm:$0x1] }
  0xb9   : > { %677 = vst [vmem:[%s23453_s29 + $0xf7] sm:$0x1] %v676_v55  ;;  %679 = vst [vmem:[%s23453_s29 + $0xf8] sm:$0x1] %v678_v56  ;;  %v682_v58 = vld [vmem:[%s23444_s27 + $0x1f4] sm:$0x1] }
  0xba   : > { %681 = vst [vmem:[%s23453_s29 + $0xf9] sm:$0x1] %v680_v57  ;;  %v684_v59 = vld [vmem:[%s23444_s27 + $0x1f6] sm:$0x1]  ;;  %v686_v60 = vld [vmem:[%s23444_s27 + $0x1f8] sm:$0x1] }
  0xbb   : > { %683 = vst [vmem:[%s23453_s29 + $0xfa] sm:$0x1] %v682_v58  ;;  %685 = vst [vmem:[%s23453_s29 + $0xfb] sm:$0x1] %v684_v59  ;;  %v688_v61 = vld [vmem:[%s23444_s27 + $0x1fa] sm:$0x1] }
  0xbc   : > { %687 = vst [vmem:[%s23453_s29 + $0xfc] sm:$0x1] %v686_v60  ;;  %v690_v62 = vld [vmem:[%s23444_s27 + $0x1fc] sm:$0x1]  ;;  %v692_v63 = vld [vmem:[%s23444_s27 + $0x1fe] sm:$0x1] }
  0xbd   : > { %689 = vst [vmem:[%s23453_s29 + $0xfd] sm:$0x1] %v688_v61  ;;  %691 = vst [vmem:[%s23453_s29 + $0xfe] sm:$0x1] %v690_v62  ;;  %v694_v0 = vld [vmem:[%s23444_s27 + $0x200] sm:$0x1] }
  0xbe   : > { %693 = vst [vmem:[%s23453_s29 + $0xff] sm:$0x1] %v692_v63  ;;  %v696_v1 = vld [vmem:[%s23444_s27 + $0x202] sm:$0x1]  ;;  %v698_v2 = vld [vmem:[%s23444_s27 + $0x204] sm:$0x1] }
  0xbf   : > { %695 = vst [vmem:[%s23453_s29 + $0x100] sm:$0x1] %v694_v0  ;;  %697 = vst [vmem:[%s23453_s29 + $0x101] sm:$0x1] %v696_v1  ;;  %v700_v3 = vld [vmem:[%s23444_s27 + $0x206] sm:$0x1] }
  0xc0   : > { %699 = vst [vmem:[%s23453_s29 + $0x102] sm:$0x1] %v698_v2  ;;  %v702_v4 = vld [vmem:[%s23444_s27 + $0x208] sm:$0x1]  ;;  %v704_v5 = vld [vmem:[%s23444_s27 + $0x20a] sm:$0x1] }
  0xc1   : > { %701 = vst [vmem:[%s23453_s29 + $0x103] sm:$0x1] %v700_v3  ;;  %703 = vst [vmem:[%s23453_s29 + $0x104] sm:$0x1] %v702_v4  ;;  %v706_v6 = vld [vmem:[%s23444_s27 + $0x20c] sm:$0x1] }
  0xc2   : > { %705 = vst [vmem:[%s23453_s29 + $0x105] sm:$0x1] %v704_v5  ;;  %v708_v7 = vld [vmem:[%s23444_s27 + $0x20e] sm:$0x1]  ;;  %v710_v8 = vld [vmem:[%s23444_s27 + $0x210] sm:$0x1] }
  0xc3   : > { %707 = vst [vmem:[%s23453_s29 + $0x106] sm:$0x1] %v706_v6  ;;  %709 = vst [vmem:[%s23453_s29 + $0x107] sm:$0x1] %v708_v7  ;;  %v712_v9 = vld [vmem:[%s23444_s27 + $0x212] sm:$0x1] }
  0xc4   : > { %711 = vst [vmem:[%s23453_s29 + $0x108] sm:$0x1] %v710_v8  ;;  %v714_v10 = vld [vmem:[%s23444_s27 + $0x214] sm:$0x1]  ;;  %v716_v11 = vld [vmem:[%s23444_s27 + $0x216] sm:$0x1] }
  0xc5   : > { %713 = vst [vmem:[%s23453_s29 + $0x109] sm:$0x1] %v712_v9  ;;  %715 = vst [vmem:[%s23453_s29 + $0x10a] sm:$0x1] %v714_v10  ;;  %v718_v12 = vld [vmem:[%s23444_s27 + $0x218] sm:$0x1] }
  0xc6   : > { %717 = vst [vmem:[%s23453_s29 + $0x10b] sm:$0x1] %v716_v11  ;;  %v720_v13 = vld [vmem:[%s23444_s27 + $0x21a] sm:$0x1]  ;;  %v722_v14 = vld [vmem:[%s23444_s27 + $0x21c] sm:$0x1] }
  0xc7   : > { %719 = vst [vmem:[%s23453_s29 + $0x10c] sm:$0x1] %v718_v12  ;;  %721 = vst [vmem:[%s23453_s29 + $0x10d] sm:$0x1] %v720_v13  ;;  %v724_v15 = vld [vmem:[%s23444_s27 + $0x21e] sm:$0x1] }
  0xc8   : > { %723 = vst [vmem:[%s23453_s29 + $0x10e] sm:$0x1] %v722_v14  ;;  %v726_v16 = vld [vmem:[%s23444_s27 + $0x220] sm:$0x1]  ;;  %v728_v17 = vld [vmem:[%s23444_s27 + $0x222] sm:$0x1] }
  0xc9   : > { %725 = vst [vmem:[%s23453_s29 + $0x10f] sm:$0x1] %v724_v15  ;;  %727 = vst [vmem:[%s23453_s29 + $0x110] sm:$0x1] %v726_v16  ;;  %v730_v18 = vld [vmem:[%s23444_s27 + $0x224] sm:$0x1] }
  0xca   : > { %729 = vst [vmem:[%s23453_s29 + $0x111] sm:$0x1] %v728_v17  ;;  %v732_v19 = vld [vmem:[%s23444_s27 + $0x226] sm:$0x1]  ;;  %v734_v20 = vld [vmem:[%s23444_s27 + $0x228] sm:$0x1] }
  0xcb   : > { %731 = vst [vmem:[%s23453_s29 + $0x112] sm:$0x1] %v730_v18  ;;  %733 = vst [vmem:[%s23453_s29 + $0x113] sm:$0x1] %v732_v19  ;;  %v736_v21 = vld [vmem:[%s23444_s27 + $0x22a] sm:$0x1] }
  0xcc   : > { %735 = vst [vmem:[%s23453_s29 + $0x114] sm:$0x1] %v734_v20  ;;  %v738_v22 = vld [vmem:[%s23444_s27 + $0x22c] sm:$0x1]  ;;  %v740_v23 = vld [vmem:[%s23444_s27 + $0x22e] sm:$0x1] }
  0xcd   : > { %737 = vst [vmem:[%s23453_s29 + $0x115] sm:$0x1] %v736_v21  ;;  %739 = vst [vmem:[%s23453_s29 + $0x116] sm:$0x1] %v738_v22  ;;  %v742_v24 = vld [vmem:[%s23444_s27 + $0x230] sm:$0x1] }
  0xce   : > { %741 = vst [vmem:[%s23453_s29 + $0x117] sm:$0x1] %v740_v23  ;;  %v744_v25 = vld [vmem:[%s23444_s27 + $0x232] sm:$0x1]  ;;  %v746_v26 = vld [vmem:[%s23444_s27 + $0x234] sm:$0x1] }
  0xcf   : > { %743 = vst [vmem:[%s23453_s29 + $0x118] sm:$0x1] %v742_v24  ;;  %745 = vst [vmem:[%s23453_s29 + $0x119] sm:$0x1] %v744_v25  ;;  %v748_v27 = vld [vmem:[%s23444_s27 + $0x236] sm:$0x1] }
  0xd0   : > { %747 = vst [vmem:[%s23453_s29 + $0x11a] sm:$0x1] %v746_v26  ;;  %v750_v28 = vld [vmem:[%s23444_s27 + $0x238] sm:$0x1]  ;;  %v752_v29 = vld [vmem:[%s23444_s27 + $0x23a] sm:$0x1] }
  0xd1   : > { %749 = vst [vmem:[%s23453_s29 + $0x11b] sm:$0x1] %v748_v27  ;;  %751 = vst [vmem:[%s23453_s29 + $0x11c] sm:$0x1] %v750_v28  ;;  %v754_v30 = vld [vmem:[%s23444_s27 + $0x23c] sm:$0x1] }
  0xd2   : > { %753 = vst [vmem:[%s23453_s29 + $0x11d] sm:$0x1] %v752_v29  ;;  %v756_v31 = vld [vmem:[%s23444_s27 + $0x23e] sm:$0x1]  ;;  %755 = vst [vmem:[%s23453_s29 + $0x11e] sm:$0x1] %v754_v30 }
  0xd3   : > { %757 = vst [vmem:[%s23453_s29 + $0x11f] sm:$0x1] %v756_v31 }
  0xd4 PF: > { %p20595_p7 = scmp.ge.s32.totalorder %s23373_s17, 1  ;;  %p1375_p8 = scmp.lt.s32.totalorder %s23373_s17, 3 }
  0xd6   : > { %p1376_p9 = pnand %p20595_p7, %p1375_p8 }
  0xd8   : > { %1379 = sbr.rel (%p1376_p9) target bundleno = 1432 (0x598), region = 73 }
  0xdf   : > { %p1417_p10 = scmp.lt.s32.totalorder %s23419_s18, 1  ;;  %s1382_s30 = sand.u32 1, %s23365_s15   ;;  %v1696_v32 = vlaneseq  ;;  %v27847_v33 = vmov 0.0   ;;  %v23376_v34 = vmov 1966171168   ;;  %vm23377_vm0 = vmmov 0  }
  0xe0   : > { %22616 = vmatprep.subr.bf16.mxu1 %v27847_v33  ;;  %22792 = vmatprep.subr.bf16.mxu0 %v27847_v33  ;;  %s23239_s5 = smul.u32 288, %s1382_s30  ;;  %v1694_v35 = vunpack.c.l.s4 %v23376_v34  ;;  %vm3367_vm1 = vcmask 1041409   ;;  %vm3370_vm2 = vcmask 1042434   ;;  %vm3373_vm3 = vcmask 1043459   ;;  %s22478_s25 = sshll.u32 (%p23434_p5), %s23419_s18, 3 }
  0xe1   : > { %s24033_s6 = scalar_select %p1417_p10, %s23419_s18, 1  ;;  %22632 = vmatprep.mubr.msk.bf16.mxu1 %vm23377_vm0, %v27847_v33  ;;  %22808 = vmatprep.mubr.msk.bf16.mxu0 %vm23377_vm0, %v27847_v33  ;;  %v24040_v37 = vshrl.u32 %v1696_v32, 7  ;;  %vm3376_vm4 = vcmask 1044484   ;;  %vm3379_vm5 = vcmask 1045509   ;;  %vm3382_vm6 = vcmask 1046534  }
  0xe2   : > { %v1695_v36 = vunpack.c.0.s8 %v1694_v35  ;;  %s24048_s11 = scalar_lea.vmem [#allocation2], %s23239_s5  ;;  %vm3385_vm7 = vcmask 1047559   ;;  %s23240_s24 = smul.u32 112, %s1382_s30 }
  0xe3   : > { %s23241_s7 = smul.u32 576, %s24033_s6  ;;  %27911 = vst [vmem:[#allocation4_spill] sm:$0xff] %v24040_v37  ;;  %v20613_v39 = vld.sshfl [vmem:[%s24048_s11] sm:$0x1 pattern:$0x75316420]  ;;  %s1424_s14 = scalar_lea.vmem %s27844_s2, %s24033_s6 }
  0xe4   : > { %v20615_v40 = vld.sshfl [vmem:[%s24048_s11 + $0x2] sm:$0x1 pattern:$0x75316420]  ;;  %v24054_v42 = vsub.s32 %v1695_v36, %v24040_v37  ;;  %s1427_s21 = scalar_lea.vmem %s27845_s3, %s24033_s6  ;;  %s27796_s15 = scalar_lea.vmem [#allocation3], %s23240_s24 }
  0xe5   : > { %s24045_s10 = scalar_lea.vmem %s27843_s1, %s23241_s7  ;;  %v20614_v45 = vld.sshfl [vmem:[%s24048_s11 + $0x1] sm:$0x1 pattern:$0x75316420]  ;;  %s20421_s28 = scalar_lea.vmem (%p23434_p5), %s27846_s4, %s22478_s25 }
  0xe6   : > { %v23269_v38 = vld [vmem:[%s24045_s10 + $0x40] sm:$0xff]   ;;  %v23271_v43 = vld [vmem:[%s24045_s10 + $0x48] sm:$0xff]   ;;  %v1699_v46 = vrot.slane %v20613_v39, %v24054_v42  ;;  %v1727_v47 = vrot.slane %v20615_v40, %v24054_v42  ;;  %v23273_v48 = vld [vmem:[%s24045_s10 + $0x50] sm:$0xff]   ;;  %v1713_v50 = vrot.slane %v20614_v45, %v24054_v42 }
  0xe7   : > { %v23270_v41 = vld [vmem:[%s24045_s10 + $0x100] sm:$0xff]   ;;  %22617 = vmatpush3.bf16.msra.mxu1 %v23269_v38  ;;  %v23272_v44 = vld [vmem:[%s24045_s10 + $0x108] sm:$0xff]   ;;  %v23274_v49 = vld [vmem:[%s24045_s10 + $0x110] sm:$0xff]  }
  0xe8   : > { %22793 = vmatpush3.bf16.msra.mxu0 %v23270_v41  ;;  %22618 = vmatprep.subr.bf16.mxu1 %v27847_v33  ;;  %v24068_v51 = vunpack.c.l.b16 %v1699_v46  ;;  %v24070_v52 = vunpack.c.l.b16 %v1727_v47  ;;  %v23275_v53 = vld [vmem:[%s24045_s10 + $0x58] sm:$0xff]   ;;  %v24076_v55 = vunpack.c.l.b16 %v1713_v50  ;;  %v23277_v58 = vld [vmem:[%s24045_s10 + $0x60] sm:$0xff]   ;;  %v23279_v2 = vld [vmem:[%s24045_s10 + $0x68] sm:$0xff]  }
  0xe9   : > { %22794 = vmatprep.subr.bf16.mxu0 %v27847_v33  ;;  %v23276_v54 = vld [vmem:[%s24045_s10 + $0x118] sm:$0xff]   ;;  %v23278_v60 = vld [vmem:[%s24045_s10 + $0x120] sm:$0xff]   ;;  %v23280_v3 = vld [vmem:[%s24045_s10 + $0x128] sm:$0xff]  }
  0xea   : > { %v3366_v56 = vrot.slane %v24068_v51, 1  ;;  %v3369_v57 = vrot.slane %v24070_v52, 7  ;;  %v20616_v62 = vld.sshfl [vmem:[%s24048_s11 + $0x3] sm:$0x1 pattern:$0x75316420] }
  0xeb   : > { %22619 = vmatpush3.bf16.msra.mxu1 %v23271_v43  ;;  %v20617_v63 = vld.sshfl [vmem:[%s24048_s11 + $0x4] sm:$0x1 pattern:$0x75316420]  ;;  %v1741_v0 = vrot.slane %v20616_v62, %v24054_v42  ;;  %v23281_v13 = vld [vmem:[%s24045_s10 + $0x70] sm:$0xff]   ;;  %v23283_v41 = vld [vmem:[%s24045_s10 + $0x78] sm:$0xff]  }
  0xec   : > { %22795 = vmatpush3.bf16.msra.mxu0 %v23272_v44  ;;  %22620 = vmatprep.subr.bf16.mxu1 %v27847_v33  ;;  %v3368_v1 = vsel %vm3367_vm1, %v24076_v55, %v3366_v56  ;;  %v20618_v4 = vld.sshfl [vmem:[%s24048_s11 + $0x5] sm:$0x1 pattern:$0x75316420]  ;;  %v1755_v5 = vrot.slane %v20617_v63, %v24054_v42  ;;  %v23282_v23 = vld [vmem:[%s24045_s10 + $0x130] sm:$0xff]  }
  0xed   : > { %22796 = vmatprep.subr.bf16.mxu0 %v27847_v33  ;;  %v20619_v6 = vld.sshfl [vmem:[%s24048_s11 + $0x6] sm:$0x1 pattern:$0x75316420]  ;;  %v1769_v7 = vrot.slane %v20618_v4, %v24054_v42  ;;  %v24098_v8 = vunpack.c.l.b16 %v1741_v0  ;;  %v3371_v12 = vsel %vm3370_vm2, %v3369_v57, %v3368_v1 }
  0xee   : > { %v20620_v9 = vld.sshfl [vmem:[%s24048_s11 + $0x7] sm:$0x1 pattern:$0x75316420]  ;;  %v1783_v10 = vrot.slane %v20619_v6, %v24054_v42  ;;  %v24103_v11 = vunpack.c.l.b16 %v1755_v5 }
  0xef   : > { %22621 = vmatpush3.bf16.msra.mxu1 %v23273_v48  ;;  %v20621_v14 = vld.sshfl [vmem:[%s24048_s11 + $0x12] sm:$0x1 pattern:$0x75316420]  ;;  %v1797_v15 = vrot.slane %v20620_v9, %v24054_v42  ;;  %v24109_v16 = vunpack.c.l.b16 %v1769_v7  ;;  %v3372_v17 = vrot.slane %v24098_v8, 6  ;;  %v23284_v48 = vld [vmem:[%s24045_s10 + $0x138] sm:$0xff]  }
  0xf0   : > { %22797 = vmatpush3.bf16.msra.mxu0 %v23274_v49  ;;  %22622 = vmatprep.subr.bf16.mxu1 %v27847_v33  ;;  %v20622_v18 = vld.sshfl [vmem:[%s24048_s11 + $0x13] sm:$0x1 pattern:$0x75316420]  ;;  %v1811_v19 = vrot.slane %v20621_v14, %v24054_v42  ;;  %v24114_v20 = vunpack.c.l.b16 %v1783_v10  ;;  %v3375_v21 = vrot.slane %v24103_v11, 5 }
  0xf1   : > { %22798 = vmatprep.subr.bf16.mxu0 %v27847_v33  ;;  %v20623_v24 = vld.sshfl [vmem:[%s24048_s11 + $0x14] sm:$0x1 pattern:$0x75316420]  ;;  %v1825_v25 = vrot.slane %v20622_v18, %v24054_v42  ;;  %v24122_v26 = vunpack.c.l.b16 %v1797_v15  ;;  %v3374_v27 = vsel %vm3373_vm3, %v3372_v17, %v3371_v12  ;;  %v3378_v28 = vrot.slane %v24109_v16, 4 }
  0xf2   : > { %v20624_v29 = vld.sshfl [vmem:[%s24048_s11 + $0x15] sm:$0x1 pattern:$0x75316420]  ;;  %v1839_v30 = vrot.slane %v20623_v24, %v24054_v42  ;;  %v24129_v31 = vunpack.c.l.b16 %v1811_v19  ;;  %v3377_v32 = vsel %vm3376_vm4, %v3375_v21, %v3374_v27  ;;  %v3381_v34 = vrot.slane %v24114_v20, 3 }
  0xf3   : > { %22623 = vmatpush3.bf16.msra.mxu1 %v23275_v53  ;;  %v20625_v35 = vld.sshfl [vmem:[%s24048_s11 + $0x16] sm:$0x1 pattern:$0x75316420]  ;;  %v1853_v36 = vrot.slane %v20624_v29, %v24054_v42  ;;  %v24135_v38 = vunpack.c.l.b16 %v1825_v25  ;;  %v3380_v39 = vsel %vm3379_vm5, %v3378_v28, %v3377_v32  ;;  %v3384_v40 = vrot.slane %v24122_v26, 2  ;;  %v23287_v29 = vld [vmem:[%s24045_s10] sm:$0xff]  }
  0xf4   : > { %22799 = vmatpush3.bf16.msra.mxu0 %v23276_v54  ;;  %22624 = vmatprep.subr.bf16.mxu1 %v27847_v33  ;;  %v20626_v43 = vld.sshfl [vmem:[%s24048_s11 + $0x17] sm:$0x1 pattern:$0x75316420]  ;;  %v1867_v44 = vrot.slane %v20625_v35, %v24054_v42  ;;  %v24142_v45 = vunpack.c.l.b16 %v1839_v30  ;;  %v3383_v46 = vsel %vm3382_vm6, %v3381_v34, %v3380_v39  ;;  %v3387_v47 = vrot.slane %v24129_v31, 1 }
  0xf5   : > { %22800 = vmatprep.subr.bf16.mxu0 %v27847_v33  ;;  %v20627_v49 = vld.sshfl [vmem:[%s24048_s11 + $0x18] sm:$0x1 pattern:$0x75316420]  ;;  %v1881_v50 = vrot.slane %v20626_v43, %v24054_v42  ;;  %v24150_v53 = vunpack.c.l.b16 %v1853_v36  ;;  %v3386_v54 = vsel %vm3385_vm7, %v3384_v40, %v3383_v46 }
  0xf6   : > { %v20628_v57 = vld.sshfl [vmem:[%s24048_s11 + $0x19] sm:$0x1 pattern:$0x75316420]  ;;  %v3388_v62 = vsel %vm3367_vm1, %v24135_v38, %v3387_v47  ;;  %v3389_v63 = vrot.slane %v24142_v45, 7 }
  0xf7   : > { %22625 = vmatpush3.bf16.msra.mxu1 %v23277_v58  ;;  %v1895_v58 = vrot.slane %v20627_v49, %v24054_v42  ;;  %v1909_v0 = vrot.slane %v20628_v57, %v24054_v42  ;;  %v24163_v1 = vunpack.c.l.b16 %v1881_v50  ;;  %v21365_v4 = vld.sshfl [vmem:[%s24048_s11 + $0x9] sm:$0x1 pattern:$0x75316420] }
  0xf8   : > { %22801 = vmatpush3.bf16.msra.mxu0 %v23278_v60  ;;  %22626 = vmatprep.subr.bf16.mxu1 %v27847_v33  ;;  %v24157_v60 = vunpack.c.l.b16 %v1867_v44  ;;  %v3390_v6 = vsel %vm3370_vm2, %v3389_v63, %v3388_v62  ;;  %v21366_v10 = vld.sshfl [vmem:[%s24048_s11 + $0xa] sm:$0x1 pattern:$0x75316420]  ;;  %v8887_v36 = vrot.slane %v21365_v4, %v24054_v42 }
  0xf9   : > { %22802 = vmatprep.subr.bf16.mxu0 %v27847_v33  ;;  %v24168_v5 = vunpack.c.l.b16 %v1895_v58  ;;  %v24174_v12 = vunpack.c.l.b16 %v1909_v0  ;;  %v3395_v14 = vrot.slane %v24163_v1, 4  ;;  %v21367_v17 = vld.sshfl [vmem:[%s24048_s11 + $0xb] sm:$0x1 pattern:$0x75316420] }
  0xfa   : > { %v3393_v7 = vrot.slane %v24157_v60, 5  ;;  %v21368_v35 = vld.sshfl [vmem:[%s24048_s11 + $0xc] sm:$0x1 pattern:$0x75316420]  ;;  %v8915_v43 = vrot.slane %v21367_v17, %v24054_v42  ;;  %v10442_v49 = vunpack.c.l.b16 %v8887_v36 }
  0xfb   : > { %22627 = vmatpush3.bf16.msra.mxu1 %v23279_v2  ;;  %v3391_v2 = vrot.slane %v24150_v53, 6  ;;  %v3397_v19 = vrot.slane %v24168_v5, 3  ;;  %v3399_v25 = vrot.slane %v24174_v12, 2  ;;  %v8929_v44 = vrot.slane %v21368_v35, %v24054_v42  ;;  %v23290_v0 = vld [vmem:[%s24045_s10 + $0x8] sm:$0xff]  }
  0xfc   : > { %22803 = vmatpush3.bf16.msra.mxu0 %v23280_v3  ;;  %22628 = vmatprep.subr.bf16.mxu1 %v27847_v33  ;;  %v21369_v40 = vld.sshfl [vmem:[%s24048_s11 + $0xd] sm:$0x1 pattern:$0x75316420]  ;;  %v10444_v62 = vunpack.c.l.b16 %v8915_v43 }
  0xfd   : > { %22804 = vmatprep.subr.bf16.mxu0 %v27847_v33  ;;  %v21370_v47 = vld.sshfl [vmem:[%s24048_s11 + $0xe] sm:$0x1 pattern:$0x75316420]  ;;  %v10445_v63 = vunpack.c.l.b16 %v8929_v44 }
  0xfe   : > { %v21371_v50 = vld.sshfl [vmem:[%s24048_s11 + $0xf] sm:$0x1 pattern:$0x75316420]  ;;  %v8957_v57 = vrot.slane %v21370_v47, %v24054_v42  ;;  %v10556_v17 = vrot.slane %v10444_v62, 7 }
  0xff   : > { %22629 = vmatpush3.bf16.msra.mxu1 %v23281_v13  ;;  %v3392_v13 = vsel %vm3373_vm3, %v3391_v2, %v3390_v6  ;;  %v21372_v4 = vld.sshfl [vmem:[%s24048_s11 + $0x10] sm:$0x1 pattern:$0x75316420]  ;;  %v8971_v6 = vrot.slane %v21371_v50, %v24054_v42 }
 0x100   : > { %22805 = vmatpush3.bf16.msra.mxu0 %v23282_v23  ;;  %22630 = vmatprep.subr.bf16.mxu1 %v27847_v33  ;;  %v3394_v18 = vsel %vm3376_vm4, %v3393_v7, %v3392_v13  ;;  %v10554_v7 = vrot.slane %v10442_v49, 1  ;;  %v8985_v13 = vrot.slane %v21372_v4, %v24054_v42  ;;  %v21375_v36 = vld.sshfl [vmem:[%s24048_s11 + $0x1d] sm:$0x1 pattern:$0x75316420]  ;;  %v23291_v23 = vld [vmem:[%s24045_s10 + $0x160] sm:$0xff]  }
 0x101   : > { %22806 = vmatprep.subr.bf16.mxu0 %v27847_v33  ;;  %v3396_v24 = vsel %vm3379_vm5, %v3395_v14, %v3394_v18  ;;  %v10447_v14 = vunpack.c.l.b16 %v8957_v57  ;;  %v10558_v18 = vrot.slane %v10445_v63, 6  ;;  %v9027_v44 = vrot.slane %v21375_v36, %v24054_v42  ;;  %v21377_v49 = vld.sshfl [vmem:[%s24048_s11 + $0x1f] sm:$0x1 pattern:$0x75316420]  ;;  %v23293_v63 = vld [vmem:[%s24045_s10 + $0x10] sm:$0xff]  }
 0x102   : > { %v3398_v30 = vsel %vm3382_vm6, %v3397_v19, %v3396_v24  ;;  %v21374_v19 = vld.sshfl [vmem:[%s24048_s11 + $0x1c] sm:$0x1 pattern:$0x75316420] }
 0x103   : > { %22631 = vmatpush3.bf16.msra.mxu1 %v23283_v41  ;;  %v3400_v39 = vsel %vm3385_vm7, %v3399_v25, %v3398_v30  ;;  %v8901_v41 = vrot.slane %v21366_v10, %v24054_v42  ;;  %v21373_v10 = vld.sshfl [vmem:[%s24048_s11 + $0x1b] sm:$0x1 pattern:$0x75316420]  ;;  %v10448_v25 = vunpack.c.l.b16 %v8971_v6  ;;  %v10562_v43 = vrot.slane %v10447_v14, 4 }
 0x104   : > { %22807 = vmatpush3.bf16.msra.mxu0 %v23284_v48  ;;  %22660 = vmatprep.subr.bf16.mxu1 %v27847_v33  ;;  %v3569_v46 = vpack.c.b16 %v3400_v39, %v3386_v54  ;;  %v8943_v48 = vrot.slane %v21369_v40, %v24054_v42  ;;  %v8999_v24 = vrot.slane %v21373_v10, %v24054_v42  ;;  %v10449_v40 = vunpack.c.l.b16 %v8985_v13  ;;  %v21378_v4 = vld.sshfl [vmem:[%s24048_s11 + $0x20] sm:$0x1 pattern:$0x75316420] }
 0x105   : > { %22836 = vmatprep.subr.bf16.mxu0 %v27847_v33  ;;  %v10443_v58 = vunpack.c.l.b16 %v8901_v41  ;;  %v9013_v39 = vrot.slane %v21374_v19, %v24054_v42  ;;  %v9055_v6 = vrot.slane %v21377_v49, %v24054_v42  ;;  %v21379_v13 = vld.sshfl [vmem:[%s24048_s11 + $0x21] sm:$0x1 pattern:$0x75316420]  ;;  %v9069_v14 = vrot.slane %v21378_v4, %v24054_v42  ;;  %v23296_v19 = vld [vmem:[%s24045_s10 + $0x18] sm:$0xff]  }
 0x106   : > { %22633 = vmatmul.mubr.bf16.vlgmr.msra.gmra.mrb[0].mxu1 %v3569_v46  ;;  %v10446_v54 = vunpack.c.l.b16 %v8943_v48  ;;  %v10450_v46 = vunpack.c.l.b16 %v8999_v24  ;;  %v10564_v48 = vrot.slane %v10448_v25, 3  ;;  %v10566_v62 = vrot.slane %v10449_v40, 2  ;;  %v21383_v2 = vld.sshfl [vmem:[%s24048_s11 + $0x2f] sm:$0x1 pattern:$0x75316420] }
 0x107   : > { %22636 = vmatprep.mubr.msk.bf16.mxu1 %vm23377_vm0, %v27847_v33  ;;  %22661 = vmatpush3.bf16.msra.mxu1 %v23287_v29  ;;  %v10555_v30 = vsel %vm3367_vm1, %v10443_v58, %v10554_v7  ;;  %v21376_v29 = vld.sshfl [vmem:[%s24048_s11 + $0x1e] sm:$0x1 pattern:$0x75316420]  ;;  %v10451_v57 = vunpack.c.l.b16 %v9013_v39  ;;  %v9083_v24 = vrot.slane %v21379_v13, %v24054_v42  ;;  %v10454_v25 = vunpack.c.l.b16 %v9055_v6 }
 0x108   : > { %v10560_v35 = vrot.slane %v10446_v54, 5  ;;  %22662 = vmatprep.subr.bf16.mxu1 %v27847_v33  ;;  %v10557_v41 = vsel %vm3370_vm2, %v10556_v17, %v10555_v30  ;;  %v9041_v50 = vrot.slane %v21376_v29, %v24054_v42  ;;  %v10452_v54 = vunpack.c.l.b16 %v9027_v44  ;;  %v20633_v13 = vld.sshfl [vmem:[%s24048_s11 + $0x28] sm:$0x1 pattern:$0x75316420] }
 0x109   : > { %v10559_v47 = vsel %vm3373_vm3, %v10558_v18, %v10557_v41  ;;  %v10568_v10 = vrot.slane %v10450_v46, 1  ;;  %v10455_v36 = vunpack.c.l.b16 %v9069_v14  ;;  %v20629_v41 = vld.sshfl [vmem:[%s24048_s11 + $0x24] sm:$0x1 pattern:$0x75316420]  ;;  %v10574_v44 = vrot.slane %v10454_v25, 5 }
 0x10a   : > { %v10561_v58 = vsel %vm3376_vm4, %v10560_v35, %v10559_v47  ;;  %v10453_v17 = vunpack.c.l.b16 %v9041_v50  ;;  %v10570_v39 = vrot.slane %v10452_v54, 7  ;;  %v20630_v46 = vld.sshfl [vmem:[%s24048_s11 + $0x25] sm:$0x1 pattern:$0x75316420]  ;;  %v1923_v47 = vrot.slane %v20629_v41, %v24054_v42 }
 0x10b   : > { %22663 = vmatpush3.bf16.msra.mxu1 %v23290_v0  ;;  %v10563_v7 = vsel %vm3379_vm5, %v10562_v43, %v10561_v58  ;;  %v21380_v0 = vld.sshfl [vmem:[%s24048_s11 + $0x22] sm:$0x1 pattern:$0x75316420]  ;;  %v10569_v30 = vsel %vm3367_vm1, %v10451_v57, %v10568_v10  ;;  %v10456_v43 = vunpack.c.l.b16 %v9083_v24  ;;  %v10576_v50 = vrot.slane %v10455_v36, 4 }
 0x10c   : > { %22664 = vmatprep.subr.bf16.mxu1 %v27847_v33  ;;  %v10565_v18 = vsel %vm3382_vm6, %v10564_v48, %v10563_v7  ;;  %v9097_v35 = vrot.slane %v21380_v0, %v24054_v42  ;;  %v10572_v40 = vrot.slane %v10453_v17, 6  ;;  %v10571_v49 = vsel %vm3370_vm2, %v10570_v39, %v10569_v30  ;;  %v20631_v57 = vld.sshfl [vmem:[%s24048_s11 + $0x26] sm:$0x1 pattern:$0x75316420] }
 0x10d   : > { %v10567_v29 = vsel %vm3385_vm7, %v10566_v62, %v10565_v18  ;;  %v1937_v58 = vrot.slane %v20630_v46, %v24054_v42  ;;  %v10578_v4 = vrot.slane %v10456_v43, 3  ;;  %v20632_v62 = vld.sshfl [vmem:[%s24048_s11 + $0x27] sm:$0x1 pattern:$0x75316420]  ;;  %v1951_v6 = vrot.slane %v20631_v57, %v24054_v42 }
 0x10e   : > { %v10457_v48 = vunpack.c.l.b16 %v9097_v35  ;;  %v24250_v54 = vunpack.c.l.b16 %v1923_v47  ;;  %v1965_v14 = vrot.slane %v20632_v62, %v24054_v42  ;;  %v23285_v0 = vld [vmem:[%s24045_s10 + $0x140] sm:$0xff]   ;;  %v20634_v24 = vld.sshfl [vmem:[%s24048_s11 + $0x29] sm:$0x1 pattern:$0x75316420]  ;;  %v1979_v25 = vrot.slane %v20633_v13, %v24054_v42 }
 0x10f   : > { %22665 = vmatpush3.bf16.msra.mxu1 %v23293_v63  ;;  %v10573_v63 = vsel %vm3373_vm3, %v10572_v40, %v10571_v49  ;;  %v24255_v17 = vunpack.c.l.b16 %v1937_v58  ;;  %v24261_v30 = vunpack.c.l.b16 %v1951_v6  ;;  %v20635_v39 = vld.sshfl [vmem:[%s24048_s11 + $0x2a] sm:$0x1 pattern:$0x75316420]  ;;  %v1993_v40 = vrot.slane %v20634_v24, %v24054_v42 }
 0x110   : > { %22666 = vmatprep.subr.bf16.mxu1 %v27847_v33  ;;  %v10575_v7 = vsel %vm3376_vm4, %v10574_v44, %v10573_v63  ;;  %v10580_v10 = vrot.slane %v10457_v48, 2  ;;  %v3401_v35 = vrot.slane %v24250_v54, 1  ;;  %v20636_v43 = vld.sshfl [vmem:[%s24048_s11 + $0x2b] sm:$0x1 pattern:$0x75316420]  ;;  %v2007_v44 = vrot.slane %v20635_v39, %v24054_v42 }
 0x111   : > { %v10577_v18 = vsel %vm3379_vm5, %v10576_v50, %v10575_v7  ;;  %v24273_v46 = vunpack.c.l.b16 %v1979_v25  ;;  %v20637_v49 = vld.sshfl [vmem:[%s24048_s11 + $0x36] sm:$0x1 pattern:$0x75316420]  ;;  %v2021_v50 = vrot.slane %v20636_v43, %v24054_v42  ;;  %v24279_v57 = vunpack.c.l.b16 %v1993_v40 }
 0x112   : > { %v10579_v36 = vsel %vm3382_vm6, %v10578_v4, %v10577_v18  ;;  %v3402_v47 = vsel %vm3367_vm1, %v24255_v17, %v3401_v35  ;;  %v3403_v58 = vrot.slane %v24261_v30, 7  ;;  %v20638_v63 = vld.sshfl [vmem:[%s24048_s11 + $0x37] sm:$0x1 pattern:$0x75316420]  ;;  %v2035_v4 = vrot.slane %v20637_v49, %v24054_v42 }
 0x113   : > { %22667 = vmatpush3.bf16.msra.mxu1 %v23296_v19  ;;  %v24268_v19 = vunpack.c.l.b16 %v1965_v14  ;;  %v10581_v41 = vsel %vm3385_vm7, %v10580_v10, %v10579_v36  ;;  %v24284_v62 = vunpack.c.l.b16 %v2007_v44  ;;  %v3407_v7 = vrot.slane %v24273_v46, 5  ;;  %v20639_v10 = vld.sshfl [vmem:[%s24048_s11 + $0x38] sm:$0x1 pattern:$0x75316420] }
 0x114   : > { %22668 = vmatprep.subr.bf16.mxu1 %v27847_v33  ;;  %v10750_v48 = vpack.c.b16 %v10581_v41, %v10567_v29  ;;  %v23286_v29 = vld [vmem:[%s24045_s10 + $0x148] sm:$0xff]   ;;  %v2049_v13 = vrot.slane %v20638_v63, %v24054_v42  ;;  %v24291_v14 = vunpack.c.l.b16 %v2021_v50  ;;  %v3404_v18 = vsel %vm3370_vm2, %v3403_v58, %v3402_v47  ;;  %v20640_v25 = vld.sshfl [vmem:[%s24048_s11 + $0x39] sm:$0x1 pattern:$0x75316420]  ;;  %v23298_v41 = vld [vmem:[%s24045_s10 + $0x20] sm:$0xff]  }
 0x115   : > { %v3405_v6 = vrot.slane %v24268_v19, 6  ;;  %v3409_v24 = vrot.slane %v24279_v57, 4  ;;  %v2063_v35 = vrot.slane %v20639_v10, %v24054_v42  ;;  %v24299_v36 = vunpack.c.l.b16 %v2035_v4  ;;  %v20641_v43 = vld.sshfl [vmem:[%s24048_s11 + $0x3a] sm:$0x1 pattern:$0x75316420] }
 0x116   : > { %22809 = vmatmul.mubr.bf16.vlgmr.msra.gmra.mrb[0].mxu0 %v10750_v48  ;;  %v3411_v40 = vrot.slane %v24284_v62, 3  ;;  %v24307_v44 = vunpack.c.l.b16 %v2049_v13  ;;  %v3413_v48 = vrot.slane %v24291_v14, 2  ;;  %v20642_v49 = vld.sshfl [vmem:[%s24048_s11 + $0x3b] sm:$0x1 pattern:$0x75316420]  ;;  %v2091_v50 = vrot.slane %v20641_v43, %v24054_v42 }
 0x117   : > { %22837 = vmatpush3.bf16.msra.mxu0 %v23285_v0  ;;  %22812 = vmatprep.mubr.msk.bf16.mxu0 %vm23377_vm0, %v27847_v33  ;;  %v3406_v39 = vsel %vm3373_vm3, %v3405_v6, %v3404_v18  ;;  %v2077_v0 = vrot.slane %v20640_v25, %v24054_v42  ;;  %v24313_v58 = vunpack.c.l.b16 %v2063_v35  ;;  %v3415_v4 = vrot.slane %v24299_v36, 1  ;;  %v23288_v6 = vld [vmem:[%s24045_s10 + $0x150] sm:$0xff]   ;;  %v20643_v10 = vld.sshfl [vmem:[%s24048_s11 + $0x3c] sm:$0x1 pattern:$0x75316420] }
 0x118   : > { %22838 = vmatprep.subr.bf16.mxu0 %v27847_v33  ;;  %v3408_v47 = vsel %vm3376_vm4, %v3407_v7, %v3406_v39  ;;  %22669 = vmatpush3.bf16.msra.mxu1 %v23298_v41  ;;  %v2105_v13 = vrot.slane %v20642_v49, %v24054_v42  ;;  %v20644_v25 = vld.sshfl [vmem:[%s24048_s11 + $0x3d] sm:$0x1 pattern:$0x75316420]  ;;  %v2119_v35 = vrot.slane %v20643_v10, %v24054_v42 }
 0x119   : > { %v3410_v63 = vsel %vm3379_vm5, %v3409_v24, %v3408_v47  ;;  %v24320_v18 = vunpack.c.l.b16 %v2077_v0  ;;  %22670 = vmatprep.subr.bf16.mxu1 %v27847_v33  ;;  %v24326_v24 = vunpack.c.l.b16 %v2091_v50  ;;  %v3416_v39 = vsel %vm3367_vm1, %v24307_v44, %v3415_v4  ;;  %v21381_v47 = vld.sshfl [vmem:[%s24048_s11 + $0x2d] sm:$0x1 pattern:$0x75316420] }
 0x11a   : > { %v3412_v7 = vsel %vm3382_vm6, %v3411_v40, %v3410_v63  ;;  %v2133_v41 = vrot.slane %v20644_v25, %v24054_v42  ;;  %v24331_v43 = vunpack.c.l.b16 %v2105_v13  ;;  %v3417_v0 = vrot.slane %v24313_v58, 7  ;;  %v21382_v63 = vld.sshfl [vmem:[%s24048_s11 + $0x2e] sm:$0x1 pattern:$0x75316420] }
 0x11b   : > { %22839 = vmatpush3.bf16.msra.mxu0 %v23286_v29  ;;  %v3419_v40 = vrot.slane %v24320_v18, 6  ;;  %v24337_v29 = vunpack.c.l.b16 %v2119_v35  ;;  %v3414_v49 = vsel %vm3385_vm7, %v3413_v48, %v3412_v7  ;;  %v3421_v50 = vrot.slane %v24326_v24, 5  ;;  %v21384_v7 = vld.sshfl [vmem:[%s24048_s11 + $0x30] sm:$0x1 pattern:$0x75316420] }
 0x11c   : > { %22840 = vmatprep.subr.bf16.mxu0 %v27847_v33  ;;  %v9111_v4 = vrot.slane %v21381_v47, %v24054_v42  ;;  %v24343_v10 = vunpack.c.l.b16 %v2133_v41  ;;  %v3418_v13 = vsel %vm3370_vm2, %v3417_v0, %v3416_v39  ;;  %v3423_v25 = vrot.slane %v24331_v43, 4  ;;  %v23289_v41 = vld [vmem:[%s24045_s10 + $0x158] sm:$0xff]   ;;  %v21385_v47 = vld.sshfl [vmem:[%s24048_s11 + $0x31] sm:$0x1 pattern:$0x75316420] }
 0x11d   : > { %v9125_v35 = vrot.slane %v21382_v63, %v24054_v42  ;;  %v3420_v34 = vsel %vm3373_vm3, %v3419_v40, %v3418_v13  ;;  %v3425_v48 = vrot.slane %v24337_v29, 3  ;;  %v9139_v32 = vrot.slane %v21383_v2, %v24054_v42  ;;  %v21386_v13 = vld.sshfl [vmem:[%s24048_s11 + $0x32] sm:$0x1 pattern:$0x75316420] }
 0x11e   : > { %v10458_v28 = vunpack.c.l.b16 %v9111_v4  ;;  %v3422_v39 = vsel %vm3376_vm4, %v3421_v50, %v3420_v34  ;;  %v3427_v0 = vrot.slane %v24343_v10, 2  ;;  %v9153_v63 = vrot.slane %v21384_v7, %v24054_v42  ;;  %v21387_v50 = vld.sshfl [vmem:[%s24048_s11 + $0x33] sm:$0x1 pattern:$0x75316420] }
 0x11f   : > { %22841 = vmatpush3.bf16.msra.mxu0 %v23288_v6  ;;  %v10459_v27 = vunpack.c.l.b16 %v9125_v35  ;;  %v3424_v40 = vsel %vm3379_vm5, %v3423_v25, %v3422_v39  ;;  %v9167_v2 = vrot.slane %v21385_v47, %v24054_v42  ;;  %v10460_v4 = vunpack.c.l.b16 %v9139_v32  ;;  %v21388_v7 = vld.sshfl [vmem:[%s24048_s11 + $0x34] sm:$0x1 pattern:$0x75316420] }
 0x120   : > { %22842 = vmatprep.subr.bf16.mxu0 %v27847_v33  ;;  %v10582_v6 = vrot.slane %v10458_v28, 1  ;;  %v3426_v34 = vsel %vm3382_vm6, %v3425_v48, %v3424_v40  ;;  %v9181_v21 = vrot.slane %v21386_v13, %v24054_v42  ;;  %v10461_v15 = vunpack.c.l.b16 %v9153_v63  ;;  %v21389_v28 = vld.sshfl [vmem:[%s24048_s11 + $0x3f] sm:$0x1 pattern:$0x75316420] }
 0x121   : > { %v3428_v35 = vsel %vm3385_vm7, %v3427_v0, %v3426_v34  ;;  %v9195_v9 = vrot.slane %v21387_v50, %v24054_v42  ;;  %v10462_v25 = vunpack.c.l.b16 %v9167_v2  ;;  %v9209_v48 = vrot.slane %v21388_v7, %v24054_v42  ;;  %v21390_v63 = vld.sshfl [vmem:[%s24048_s11 + $0x40] sm:$0x1 pattern:$0x75316420] }
 0x122   : > { %v10583_v39 = vsel %vm3367_vm1, %v10459_v27, %v10582_v6  ;;  %v3570_v32 = vpack.c.b16 %v3428_v35, %v3414_v49  ;;  %v10463_v47 = vunpack.c.l.b16 %v9181_v21  ;;  %v10584_v40 = vrot.slane %v10460_v4, 7  ;;  %v21391_v27 = vld.sshfl [vmem:[%s24048_s11 + $0x41] sm:$0x1 pattern:$0x75316420] }
 0x123   : > { %22843 = vmatpush3.bf16.msra.mxu0 %v23289_v41  ;;  %v9223_v0 = vrot.slane %v21389_v28, %v24054_v42  ;;  %v10464_v13 = vunpack.c.l.b16 %v9195_v9  ;;  %v10586_v34 = vrot.slane %v10461_v15, 6  ;;  %v10588_v2 = vrot.slane %v10462_v25, 5  ;;  %v21392_v4 = vld.sshfl [vmem:[%s24048_s11 + $0x42] sm:$0x1 pattern:$0x75316420] }
 0x124   : > { %22844 = vmatprep.subr.bf16.mxu0 %v27847_v33  ;;  %22637 = vmatmul.mubr.bf16.gmra.mrb[4].mxu1 %v3570_v32  ;;  %v9237_v49 = vrot.slane %v21390_v63, %v24054_v42  ;;  %v10465_v41 = vunpack.c.l.b16 %v9209_v48  ;;  %v10585_v6 = vsel %vm3370_vm2, %v10584_v40, %v10583_v39  ;;  %v10590_v21 = vrot.slane %v10463_v47, 4  ;;  %v23292_v15 = vld [vmem:[%s24045_s10 + $0x168] sm:$0xff]   ;;  %v21393_v25 = vld.sshfl [vmem:[%s24048_s11 + $0x43] sm:$0x1 pattern:$0x75316420] }
 0x125   : > { %v9251_v50 = vrot.slane %v21391_v27, %v24054_v42  ;;  %v10466_v35 = vunpack.c.l.b16 %v9223_v0  ;;  %v10587_v7 = vsel %vm3373_vm3, %v10586_v34, %v10585_v6  ;;  %v10592_v9 = vrot.slane %v10464_v13, 3  ;;  %22640 = vmatprep.mubr.msk.bf16.mxu1 %vm23377_vm0, %v27847_v33  ;;  %v21394_v47 = vld.sshfl [vmem:[%s24048_s11 + $0x44] sm:$0x1 pattern:$0x75316420] }
 0x126   : > { %v9265_v39 = vrot.slane %v21392_v4, %v24054_v42  ;;  %v10467_v32 = vunpack.c.l.b16 %v9237_v49  ;;  %v10589_v28 = vsel %vm3376_vm4, %v10588_v2, %v10587_v7  ;;  %v10594_v48 = vrot.slane %v10465_v41, 2  ;;  %v21395_v34 = vld.sshfl [vmem:[%s24048_s11 + $0x45] sm:$0x1 pattern:$0x75316420] }
 0x127   : > { %22845 = vmatpush3.bf16.msra.mxu0 %v23291_v23  ;;  %v9279_v40 = vrot.slane %v21393_v25, %v24054_v42  ;;  %v10468_v63 = vunpack.c.l.b16 %v9251_v50  ;;  %v10591_v0 = vsel %vm3379_vm5, %v10590_v21, %v10589_v28  ;;  %v10596_v13 = vrot.slane %v10466_v35, 1  ;;  %v23294_v23 = vld [vmem:[%s24045_s10 + $0x170] sm:$0xff]   ;;  %v21396_v2 = vld.sshfl [vmem:[%s24048_s11 + $0x46] sm:$0x1 pattern:$0x75316420] }
 0x128   : > { %22846 = vmatprep.subr.bf16.mxu0 %v27847_v33  ;;  %v9293_v27 = vrot.slane %v21394_v47, %v24054_v42  ;;  %v10469_v6 = vunpack.c.l.b16 %v9265_v39  ;;  %v10593_v49 = vsel %vm3382_vm6, %v10592_v9, %v10591_v0  ;;  %v9307_v41 = vrot.slane %v21395_v34, %v24054_v42  ;;  %v20645_v28 = vld.sshfl [vmem:[%s24048_s11 + $0x48] sm:$0x1 pattern:$0x75316420] }
 0x129   : > { %v10470_v4 = vunpack.c.l.b16 %v9279_v40  ;;  %v10597_v7 = vsel %vm3367_vm1, %v10467_v32, %v10596_v13  ;;  %v9321_v21 = vrot.slane %v21396_v2, %v24054_v42  ;;  %v10598_v35 = vrot.slane %v10468_v63, 7  ;;  %v20646_v0 = vld.sshfl [vmem:[%s24048_s11 + $0x49] sm:$0x1 pattern:$0x75316420] }
 0x12a   : > { %v10471_v50 = vunpack.c.l.b16 %v9293_v27  ;;  %v10600_v25 = vrot.slane %v10469_v6, 6  ;;  %v10472_v39 = vunpack.c.l.b16 %v9307_v41  ;;  %v10595_v9 = vsel %vm3385_vm7, %v10594_v48, %v10593_v49  ;;  %v20647_v34 = vld.sshfl [vmem:[%s24048_s11 + $0x4a] sm:$0x1 pattern:$0x75316420]  ;;  %v23295_v49 = vld [vmem:[%s24045_s10 + $0x178] sm:$0xff]  }
 0x12b   : > { %22847 = vmatpush3.bf16.msra.mxu0 %v23292_v15  ;;  %v10602_v47 = vrot.slane %v10470_v4, 5  ;;  %v2147_v32 = vrot.slane %v20645_v28, %v24054_v42  ;;  %v10473_v40 = vunpack.c.l.b16 %v9321_v21  ;;  %v10599_v15 = vsel %vm3370_vm2, %v10598_v35, %v10597_v7  ;;  %v20648_v2 = vld.sshfl [vmem:[%s24048_s11 + $0x4b] sm:$0x1 pattern:$0x75316420] }
 0x12c   : > { %22848 = vmatprep.subr.bf16.mxu0 %v27847_v33  ;;  %v10604_v13 = vrot.slane %v10471_v50, 4  ;;  %v2161_v63 = vrot.slane %v20646_v0, %v24054_v42  ;;  %v10601_v27 = vsel %vm3373_vm3, %v10600_v25, %v10599_v15  ;;  %v10606_v6 = vrot.slane %v10472_v39, 3  ;;  %v20649_v21 = vld.sshfl [vmem:[%s24048_s11 + $0x4c] sm:$0x1 pattern:$0x75316420] }
 0x12d   : > { %v2175_v41 = vrot.slane %v20647_v34, %v24054_v42  ;;  %v24410_v48 = vunpack.c.l.b16 %v2147_v32  ;;  %v10603_v4 = vsel %vm3376_vm4, %v10602_v47, %v10601_v27  ;;  %v10608_v7 = vrot.slane %v10473_v40, 2  ;;  %v20650_v28 = vld.sshfl [vmem:[%s24048_s11 + $0x4d] sm:$0x1 pattern:$0x75316420] }
 0x12e   : > { %v2189_v50 = vrot.slane %v20648_v2, %v24054_v42  ;;  %v24416_v35 = vunpack.c.l.b16 %v2161_v63  ;;  %v10605_v25 = vsel %vm3379_vm5, %v10604_v13, %v10603_v4  ;;  %v2203_v39 = vrot.slane %v20649_v21, %v24054_v42  ;;  %v20651_v32 = vld.sshfl [vmem:[%s24048_s11 + $0x4e] sm:$0x1 pattern:$0x75316420] }
 0x12f   : > { %22849 = vmatpush3.bf16.msra.mxu0 %v23294_v23  ;;  %v24422_v0 = vunpack.c.l.b16 %v2175_v41  ;;  %v3429_v23 = vrot.slane %v24410_v48, 1  ;;  %v10607_v47 = vsel %vm3382_vm6, %v10606_v6, %v10605_v25  ;;  %v2217_v40 = vrot.slane %v20650_v28, %v24054_v42  ;;  %v20652_v63 = vld.sshfl [vmem:[%s24048_s11 + $0x4f] sm:$0x1 pattern:$0x75316420] }
 0x130   : > { %22850 = vmatprep.subr.bf16.mxu0 %v27847_v33  ;;  %v24428_v15 = vunpack.c.l.b16 %v2189_v50  ;;  %v10609_v34 = vsel %vm3385_vm7, %v10608_v7, %v10607_v47  ;;  %v2231_v13 = vrot.slane %v20651_v32, %v24054_v42  ;;  %v24433_v27 = vunpack.c.l.b16 %v2203_v39  ;;  %v20653_v6 = vld.sshfl [vmem:[%s24048_s11 + $0x5a] sm:$0x1 pattern:$0x75316420] }
 0x131   : > { %v3430_v2 = vsel %vm3367_vm1, %v24416_v35, %v3429_v23  ;;  %v10751_v41 = vpack.c.b16 %v10609_v34, %v10595_v9  ;;  %v2245_v4 = vrot.slane %v20652_v63, %v24054_v42  ;;  %v24439_v21 = vunpack.c.l.b16 %v2217_v40  ;;  %v20654_v7 = vld.sshfl [vmem:[%s24048_s11 + $0x5b] sm:$0x1 pattern:$0x75316420] }
 0x132   : > { %v3431_v50 = vrot.slane %v24422_v0, 7  ;;  %v2259_v25 = vrot.slane %v20653_v6, %v24054_v42  ;;  %v24445_v28 = vunpack.c.l.b16 %v2231_v13  ;;  %v3435_v9 = vrot.slane %v24433_v27, 5  ;;  %v20655_v39 = vld.sshfl [vmem:[%s24048_s11 + $0x5c] sm:$0x1 pattern:$0x75316420] }
 0x133   : > { %22851 = vmatpush3.bf16.msra.mxu0 %v23295_v49  ;;  %v3433_v49 = vrot.slane %v24428_v15, 6  ;;  %v2273_v23 = vrot.slane %v20654_v7, %v24054_v42  ;;  %v24451_v47 = vunpack.c.l.b16 %v2245_v4  ;;  %v3437_v40 = vrot.slane %v24439_v21, 4  ;;  %v20656_v34 = vld.sshfl [vmem:[%s24048_s11 + $0x5d] sm:$0x1 pattern:$0x75316420] }
 0x134   : > { %22880 = vmatprep.subr.bf16.mxu0 %v27847_v33  ;;  %22813 = vmatmul.mubr.bf16.gmra.mrb[4].mxu0 %v10751_v41  ;;  %v3432_v32 = vsel %vm3370_vm2, %v3431_v50, %v3430_v2  ;;  %v2287_v63 = vrot.slane %v20655_v39, %v24054_v42  ;;  %v24459_v13 = vunpack.c.l.b16 %v2259_v25  ;;  %v3439_v6 = vrot.slane %v24445_v28, 3  ;;  %v23300_v7 = vld [vmem:[%s24045_s10 + $0x28] sm:$0xff]   ;;  %v20657_v4 = vld.sshfl [vmem:[%s24048_s11 + $0x5e] sm:$0x1 pattern:$0x75316420] }
 0x135   : > { %27912 = vst [vmem:[#allocation5_spill] sm:$0xff] %v24451_v47  ;;  %22816 = vmatprep.mubr.msk.bf16.mxu0 %vm23377_vm0, %v27847_v33  ;;  %v3434_v41 = vsel %vm3373_vm3, %v3433_v49, %v3432_v32  ;;  %v2301_v2 = vrot.slane %v20656_v34, %v24054_v42  ;;  %v24466_v50 = vunpack.c.l.b16 %v2273_v23  ;;  %v3441_v56 = vrot.slane %v24451_v47, 2  ;;  %v20658_v22 = vld.sshfl [vmem:[%s24048_s11 + $0x5f] sm:$0x1 pattern:$0x75316420]  ;;  %22671 = vmatpush3.bf16.msra.mxu1 %v23300_v7 }
 0x136   : > { %27913 = vst [vmem:[#allocation6_spill] sm:$0xff] %v24459_v13  ;;  %v3436_v3 = vsel %vm3376_vm4, %v3435_v9, %v3434_v41  ;;  %v2315_v39 = vrot.slane %v20657_v4, %v24054_v42  ;;  %v24472_v25 = vunpack.c.l.b16 %v2287_v63  ;;  %v3443_v32 = vrot.slane %v24459_v13, 1  ;;  %v20659_v61 = vld.sshfl [vmem:[%s24048_s11 + $0x60] sm:$0x1 pattern:$0x75316420]  ;;  %22672 = vmatprep.subr.bf16.mxu1 %v27847_v33 }
 0x137   : > { %27914 = vst [vmem:[#allocation7_spill] sm:$0xff] %v24466_v50  ;;  %v3438_v49 = vsel %vm3379_vm5, %v3437_v40, %v3436_v3  ;;  %v2329_v34 = vrot.slane %v20658_v22, %v24054_v42  ;;  %v24478_v23 = vunpack.c.l.b16 %v2301_v2  ;;  %v20660_v41 = vld.sshfl [vmem:[%s24048_s11 + $0x61] sm:$0x1 pattern:$0x75316420]  ;;  %v2343_v63 = vrot.slane %v20659_v61, %v24054_v42 }
 0x138   : > { %27915 = vst [vmem:[#allocation8_spill] sm:$0xff] %v24472_v25  ;;  %v3440_v9 = vsel %vm3382_vm6, %v3439_v6, %v3438_v49  ;;  %v24484_v4 = vunpack.c.l.b16 %v2315_v39  ;;  %v3444_v3 = vsel %vm3367_vm1, %v24466_v50, %v3443_v32  ;;  %v2357_v40 = vrot.slane %v20660_v41, %v24054_v42  ;;  %v21397_v2 = vld.sshfl [vmem:[%s24048_s11 + $0x51] sm:$0x1 pattern:$0x75316420] }
 0x139   : > { %27916 = vst [vmem:[#allocation9_spill] sm:$0xff] %v24478_v23  ;;  %v24489_v7 = vunpack.c.l.b16 %v2329_v34  ;;  %v3445_v22 = vrot.slane %v24472_v25, 7  ;;  %v3447_v6 = vrot.slane %v24478_v23, 6  ;;  %v24494_v49 = vunpack.c.l.b16 %v2343_v63 }
 0x13a   : > { %27917 = vst [vmem:[#allocation10_spill] sm:$0xff] %v24484_v4  ;;  %v3442_v61 = vsel %vm3385_vm7, %v3441_v56, %v3440_v9  ;;  %v3449_v39 = vrot.slane %v24484_v4, 5  ;;  %v21398_v59 = vld.sshfl [vmem:[%s24048_s11 + $0x52] sm:$0x1 pattern:$0x75316420]  ;;  %v9335_v32 = vrot.slane %v21397_v2, %v24054_v42  ;;  %v24500_v33 = vunpack.c.l.b16 %v2357_v40 }
 0x13b   : > { %27918 = vst [vmem:[#allocation11_spill] sm:$0xff] %v24489_v7  ;;  %27919 = vst [vmem:[#allocation12_spill] sm:$0xff] %v24494_v49  ;;  %v3446_v34 = vsel %vm3370_vm2, %v3445_v22, %v3444_v3  ;;  %v3451_v41 = vrot.slane %v24489_v7, 4  ;;  %v9349_v13 = vrot.slane %v21398_v59, %v24054_v42  ;;  %v3453_v56 = vrot.slane %v24494_v49, 3 }
 0x13c   : > { %27920 = vst [vmem:[#allocation13_spill] sm:$0xff] %v24500_v33  ;;  %v21399_v37 = vld.sshfl [vmem:[%s24048_s11 + $0x53] sm:$0x1 pattern:$0x75316420]  ;;  %v3448_v63 = vsel %vm3373_vm3, %v3447_v6, %v3446_v34  ;;  %v10474_v23 = vunpack.c.l.b16 %v9335_v32  ;;  %v3455_v2 = vrot.slane %v24500_v33, 2 }
 0x13d   : > { %v21400_v9 = vld.sshfl [vmem:[%s24048_s11 + $0x54] sm:$0x1 pattern:$0x75316420]  ;;  %v9363_v4 = vrot.slane %v21399_v37, %v24054_v42  ;;  %v3450_v40 = vsel %vm3376_vm4, %v3449_v39, %v3448_v63  ;;  %v10475_v7 = vunpack.c.l.b16 %v9349_v13 }
 0x13e   : > { %v21401_v3 = vld.sshfl [vmem:[%s24048_s11 + $0x55] sm:$0x1 pattern:$0x75316420]  ;;  %v9377_v22 = vrot.slane %v21400_v9, %v24054_v42  ;;  %v3452_v59 = vsel %vm3379_vm5, %v3451_v41, %v3450_v40  ;;  %v10610_v25 = vrot.slane %v10474_v23, 1 }
 0x13f   : > { %v21402_v6 = vld.sshfl [vmem:[%s24048_s11 + $0x56] sm:$0x1 pattern:$0x75316420]  ;;  %v9391_v34 = vrot.slane %v21401_v3, %v24054_v42  ;;  %v10476_v49 = vunpack.c.l.b16 %v9363_v4  ;;  %v3454_v37 = vsel %vm3382_vm6, %v3453_v56, %v3452_v59 }
 0x140   : > { %v21403_v32 = vld.sshfl [vmem:[%s24048_s11 + $0x57] sm:$0x1 pattern:$0x75316420]  ;;  %v9405_v39 = vrot.slane %v21402_v6, %v24054_v42  ;;  %v10477_v63 = vunpack.c.l.b16 %v9377_v22  ;;  %v3456_v33 = vsel %vm3385_vm7, %v3455_v2, %v3454_v37  ;;  %v10611_v41 = vsel %vm3367_vm1, %v10475_v7, %v10610_v25 }
 0x141   : > { %v21404_v9 = vld.sshfl [vmem:[%s24048_s11 + $0x58] sm:$0x1 pattern:$0x75316420]  ;;  %v9419_v13 = vrot.slane %v21403_v32, %v24054_v42  ;;  %v10478_v50 = vunpack.c.l.b16 %v9391_v34  ;;  %v3571_v40 = vpack.c.b16 %v3456_v33, %v3442_v61  ;;  %v10612_v56 = vrot.slane %v10476_v49, 7 }
 0x142   : > { %v21405_v4 = vld.sshfl [vmem:[%s24048_s11 + $0x63] sm:$0x1 pattern:$0x75316420]  ;;  %v9433_v23 = vrot.slane %v21404_v9, %v24054_v42  ;;  %v10479_v3 = vunpack.c.l.b16 %v9405_v39  ;;  %v10614_v2 = vrot.slane %v10477_v63, 6 }
 0x143   : > { %v21406_v59 = vld.sshfl [vmem:[%s24048_s11 + $0x64] sm:$0x1 pattern:$0x75316420]  ;;  %v9447_v6 = vrot.slane %v21405_v4, %v24054_v42  ;;  %v10480_v22 = vunpack.c.l.b16 %v9419_v13  ;;  %v10616_v37 = vrot.slane %v10478_v50, 5  ;;  %22641 = vmatmul.mubr.bf16.gmra.mrb[8].mxu1 %v3571_v40  ;;  %v10613_v33 = vsel %vm3370_vm2, %v10612_v56, %v10611_v41 }
 0x144   : > { %v21407_v47 = vld.sshfl [vmem:[%s24048_s11 + $0x65] sm:$0x1 pattern:$0x75316420]  ;;  %v9461_v34 = vrot.slane %v21406_v59, %v24054_v42  ;;  %v10481_v25 = vunpack.c.l.b16 %v9433_v23  ;;  %v10618_v7 = vrot.slane %v10479_v3, 4  ;;  %v10615_v39 = vsel %vm3373_vm3, %v10614_v2, %v10613_v33 }
 0x145   : > { %v21408_v61 = vld.sshfl [vmem:[%s24048_s11 + $0x66] sm:$0x1 pattern:$0x75316420]  ;;  %v9475_v49 = vrot.slane %v21407_v47, %v24054_v42  ;;  %v10482_v32 = vunpack.c.l.b16 %v9447_v6  ;;  %v10620_v9 = vrot.slane %v10480_v22, 3  ;;  %v27921_v13 = vmov 0.0  }
 0x146   : > { %22644 = vmatprep.mubr.msk.bf16.mxu1 %vm23377_vm0, %v27921_v13  ;;  %v21409_v50 = vld.sshfl [vmem:[%s24048_s11 + $0x67] sm:$0x1 pattern:$0x75316420]  ;;  %v9489_v63 = vrot.slane %v21408_v61, %v24054_v42  ;;  %v10483_v40 = vunpack.c.l.b16 %v9461_v34  ;;  %v10617_v4 = vsel %vm3376_vm4, %v10616_v37, %v10615_v39  ;;  %v10622_v41 = vrot.slane %v10481_v25, 2 }
 0x147   : > { %v21410_v23 = vld.sshfl [vmem:[%s24048_s11 + $0x68] sm:$0x1 pattern:$0x75316420]  ;;  %v9503_v3 = vrot.slane %v21409_v50, %v24054_v42  ;;  %v10484_v47 = vunpack.c.l.b16 %v9475_v49  ;;  %v10619_v56 = vsel %vm3379_vm5, %v10618_v7, %v10617_v4  ;;  %v10624_v59 = vrot.slane %v10482_v32, 1 }
 0x148   : > { %v21411_v6 = vld.sshfl [vmem:[%s24048_s11 + $0x69] sm:$0x1 pattern:$0x75316420]  ;;  %v9517_v22 = vrot.slane %v21410_v23, %v24054_v42  ;;  %v10485_v2 = vunpack.c.l.b16 %v9489_v63  ;;  %v10621_v33 = vsel %vm3382_vm6, %v10620_v9, %v10619_v56 }
 0x149   : > { %v21412_v61 = vld.sshfl [vmem:[%s24048_s11 + $0x6a] sm:$0x1 pattern:$0x75316420]  ;;  %v9531_v34 = vrot.slane %v21411_v6, %v24054_v42  ;;  %v10486_v37 = vunpack.c.l.b16 %v9503_v3  ;;  %v10625_v25 = vsel %vm3367_vm1, %v10483_v40, %v10624_v59  ;;  %v10626_v7 = vrot.slane %v10484_v47, 7 }
 0x14a   : > { %v9545_v39 = vrot.slane %v21412_v61, %v24054_v42  ;;  %v10487_v49 = vunpack.c.l.b16 %v9517_v22  ;;  %v10628_v32 = vrot.slane %v10485_v2, 6  ;;  %v20661_v50 = vld.sshfl [vmem:[%s24048_s11 + $0x6c] sm:$0x1 pattern:$0x75316420]  ;;  %v10623_v23 = vsel %vm3385_vm7, %v10622_v41, %v10621_v33 }
 0x14b   : > { %v10488_v4 = vunpack.c.l.b16 %v9531_v34  ;;  %v10630_v63 = vrot.slane %v10486_v37, 5  ;;  %v20662_v9 = vld.sshfl [vmem:[%s24048_s11 + $0x6d] sm:$0x1 pattern:$0x75316420]  ;;  %v2371_v56 = vrot.slane %v20661_v50, %v24054_v42  ;;  %v10627_v3 = vsel %vm3370_vm2, %v10626_v7, %v10625_v25 }
 0x14c   : > { %v10489_v6 = vunpack.c.l.b16 %v9545_v39  ;;  %v10632_v40 = vrot.slane %v10487_v49, 4  ;;  %v20663_v59 = vld.sshfl [vmem:[%s24048_s11 + $0x6e] sm:$0x1 pattern:$0x75316420]  ;;  %v2385_v22 = vrot.slane %v20662_v9, %v24054_v42  ;;  %v10629_v47 = vsel %vm3373_vm3, %v10628_v32, %v10627_v3 }
 0x14d   : > { %v10634_v2 = vrot.slane %v10488_v4, 3  ;;  %v20664_v61 = vld.sshfl [vmem:[%s24048_s11 + $0x6f] sm:$0x1 pattern:$0x75316420]  ;;  %v2399_v41 = vrot.slane %v20663_v59, %v24054_v42  ;;  %v24559_v33 = vunpack.c.l.b16 %v2371_v56  ;;  %v10631_v34 = vsel %vm3376_vm4, %v10630_v63, %v10629_v47 }
 0x14e   : > { %v10636_v37 = vrot.slane %v10489_v6, 2  ;;  %v20665_v39 = vld.sshfl [vmem:[%s24048_s11 + $0x70] sm:$0x1 pattern:$0x75316420]  ;;  %v2413_v25 = vrot.slane %v20664_v61, %v24054_v42  ;;  %v24564_v49 = vunpack.c.l.b16 %v2385_v22  ;;  %v10633_v7 = vsel %vm3379_vm5, %v10632_v40, %v10631_v34 }
 0x14f   : > { %27922 = vst [vmem:[#allocation14_spill] sm:$0xff] %v24559_v33  ;;  %v20666_v32 = vld.sshfl [vmem:[%s24048_s11 + $0x71] sm:$0x1 pattern:$0x75316420]  ;;  %v2427_v50 = vrot.slane %v20665_v39, %v24054_v42  ;;  %v24569_v4 = vunpack.c.l.b16 %v2399_v41  ;;  %v3457_v9 = vrot.slane %v24559_v33, 1  ;;  %v10635_v63 = vsel %vm3382_vm6, %v10634_v2, %v10633_v7 }
 0x150   : > { %v20667_v56 = vld.sshfl [vmem:[%s24048_s11 + $0x72] sm:$0x1 pattern:$0x75316420]  ;;  %v2441_v6 = vrot.slane %v20666_v32, %v24054_v42  ;;  %v24575_v3 = vunpack.c.l.b16 %v2413_v25  ;;  %v10637_v59 = vsel %vm3385_vm7, %v10636_v37, %v10635_v63 }
 0x151   : > { %27923 = vst [vmem:[#allocation15_spill] sm:$0xff] %v24569_v4  ;;  %v20668_v22 = vld.sshfl [vmem:[%s24048_s11 + $0x73] sm:$0x1 pattern:$0x75316420]  ;;  %v2455_v40 = vrot.slane %v20667_v56, %v24054_v42  ;;  %v24580_v47 = vunpack.c.l.b16 %v2427_v50  ;;  %v3458_v61 = vsel %vm3367_vm1, %v24564_v49, %v3457_v9  ;;  %v10752_v41 = vpack.c.b16 %v10637_v59, %v10623_v23 }
 0x152   : > { %27924 = vst [vmem:[#allocation16_spill] sm:$0xff] %v24575_v3  ;;  %v20669_v34 = vld.sshfl [vmem:[%s24048_s11 + $0x90] sm:$0x1 pattern:$0x75316420]  ;;  %v2469_v2 = vrot.slane %v20668_v22, %v24054_v42  ;;  %v24586_v39 = vunpack.c.l.b16 %v2441_v6  ;;  %v3459_v25 = vrot.slane %v24569_v4, 7 }
 0x153   : > { %27925 = vst [vmem:[#allocation17_spill] sm:$0xff] %v24580_v47  ;;  %v23302_v37 = vld [vmem:[%s24045_s10 + $0x30] sm:$0xff]   ;;  %v2483_v32 = vrot.slane %v20669_v34, %v24054_v42  ;;  %v24592_v63 = vunpack.c.l.b16 %v2455_v40  ;;  %v3461_v50 = vrot.slane %v24575_v3, 6  ;;  %v3463_v9 = vrot.slane %v24580_v47, 5  ;;  %22817 = vmatmul.mubr.bf16.gmra.mrb[8].mxu0 %v10752_v41  ;;  %v23303_v34 = vld [vmem:[%s24045_s10 + $0x38] sm:$0xff]  }
 0x154   : > { %27926 = vst [vmem:[#allocation18_spill] sm:$0xff] %v24586_v39  ;;  %v20670_v7 = vld.sshfl [vmem:[%s24048_s11 + $0x91] sm:$0x1 pattern:$0x75316420]  ;;  %v24598_v6 = vunpack.c.l.b16 %v2469_v2  ;;  %v3460_v59 = vsel %vm3370_vm2, %v3459_v25, %v3458_v61  ;;  %v3465_v22 = vrot.slane %v24586_v39, 4  ;;  %22673 = vmatpush3.bf16.msra.mxu1 %v23302_v37  ;;  %22820 = vmatprep.mubr.msk.bf16.mxu0 %vm23377_vm0, %v27921_v13 }
 0x155   : > { %27927 = vst [vmem:[#allocation19_spill] sm:$0xff] %v24592_v63  ;;  %v20671_v23 = vld.sshfl [vmem:[%s24048_s11 + $0x92] sm:$0x1 pattern:$0x75316420]  ;;  %v2497_v56 = vrot.slane %v20670_v7, %v24054_v42  ;;  %v24607_v41 = vunpack.c.l.b16 %v2483_v32  ;;  %v3462_v7 = vsel %vm3373_vm3, %v3461_v50, %v3460_v59  ;;  %v3467_v2 = vrot.slane %v24592_v63, 3  ;;  %22674 = vmatprep.subr.bf16.mxu1 %v27921_v13 }
 0x156   : > { %v20672_v40 = vld.sshfl [vmem:[%s24048_s11 + $0x93] sm:$0x1 pattern:$0x75316420]  ;;  %v2511_v33 = vrot.slane %v20671_v23, %v24054_v42  ;;  %v3464_v39 = vsel %vm3376_vm4, %v3463_v9, %v3462_v7  ;;  %v3469_v47 = vrot.slane %v24598_v6, 2  ;;  %v27932_v9 = vrot.slane %v24076_v55, 7 }
 0x157   : > { %27928 = vst [vmem:[#allocation20_spill] sm:$0xff] %v24607_v41  ;;  %v20673_v61 = vld.sshfl [vmem:[%s24048_s11 + $0x94] sm:$0x1 pattern:$0x75316420]  ;;  %v2525_v25 = vrot.slane %v20672_v40, %v24054_v42  ;;  %v24614_v37 = vunpack.c.l.b16 %v2497_v56  ;;  %v3466_v50 = vsel %vm3379_vm5, %v3465_v22, %v3464_v39  ;;  %v3471_v59 = vrot.slane %v24607_v41, 1 }
 0x158   : > { %v20674_v3 = vld.sshfl [vmem:[%s24048_s11 + $0x95] sm:$0x1 pattern:$0x75316420]  ;;  %v2539_v32 = vrot.slane %v20673_v61, %v24054_v42  ;;  %v24620_v23 = vunpack.c.l.b16 %v2511_v33  ;;  %v3468_v56 = vsel %vm3382_vm6, %v3467_v2, %v3466_v50  ;;  %22675 = vmatpush3.bf16.msra.mxu1 %v23303_v34  ;;  %v3721_v33 = vsel %vm3367_vm1, %v27932_v9, %v24068_v51 }
 0x159   : > { %27929 = vst [vmem:[#allocation21_spill] sm:$0xff] %v24614_v37  ;;  %v20675_v63 = vld.sshfl [vmem:[%s24048_s11 + $0x96] sm:$0x1 pattern:$0x75316420]  ;;  %v2553_v4 = vrot.slane %v20674_v3, %v24054_v42  ;;  %v24626_v40 = vunpack.c.l.b16 %v2525_v25  ;;  %v3470_v61 = vsel %vm3385_vm7, %v3469_v47, %v3468_v56  ;;  %v3472_v3 = vsel %vm3367_vm1, %v24614_v37, %v3471_v59  ;;  %22704 = vmatprep.subr.bf16.mxu1 %v27921_v13 }
 0x15a   : > { %27930 = vst [vmem:[#allocation22_spill] sm:$0xff] %v24620_v23  ;;  %v20676_v7 = vld.sshfl [vmem:[%s24048_s11 + $0x97] sm:$0x1 pattern:$0x75316420]  ;;  %v2567_v39 = vrot.slane %v20675_v63, %v24054_v42  ;;  %v24635_v22 = vunpack.c.l.b16 %v2539_v32  ;;  %v3473_v51 = vrot.slane %v24620_v23, 7 }
 0x15b   : > { %27931 = vst [vmem:[#allocation23_spill] sm:$0xff] %v24626_v40  ;;  %v2581_v34 = vrot.slane %v20676_v7, %v24054_v42  ;;  %v24642_v2 = vunpack.c.l.b16 %v2553_v4  ;;  %v3475_v55 = vrot.slane %v24626_v40, 6  ;;  %v21413_v63 = vld.sshfl [vmem:[%s24048_s11 + $0x75] sm:$0x1 pattern:$0x75316420] }
 0x15c   : > { %27933 = vst [vmem:[#allocation24_spill] sm:$0xff] %v24635_v22  ;;  %v24647_v25 = vunpack.c.l.b16 %v2567_v39  ;;  %v3477_v47 = vrot.slane %v24635_v22, 5  ;;  %v21414_v32 = vld.sshfl [vmem:[%s24048_s11 + $0x76] sm:$0x1 pattern:$0x75316420]  ;;  %v9559_v50 = vrot.slane %v21413_v63, %v24054_v42  ;;  %v3474_v9 = vsel %vm3370_vm2, %v3473_v51, %v3472_v3 }
 0x15d   : > { %27934 = vst [vmem:[#allocation25_spill] sm:$0xff] %v24642_v2  ;;  %v27936_v59 = vrot.slane %v24070_v52, 6  ;;  %v24655_v4 = vunpack.c.l.b16 %v2581_v34  ;;  %v3479_v7 = vrot.slane %v24642_v2, 4  ;;  %v9573_v39 = vrot.slane %v21414_v32, %v24054_v42 }
 0x15e   : > { %27935 = vst [vmem:[#allocation26_spill] sm:$0xff] %v24647_v25  ;;  %v21415_v41 = vld.sshfl [vmem:[%s24048_s11 + $0x77] sm:$0x1 pattern:$0x75316420]  ;;  %v3476_v22 = vsel %vm3373_vm3, %v3475_v55, %v3474_v9  ;;  %v3481_v40 = vrot.slane %v24647_v25, 3  ;;  %v10490_v23 = vunpack.c.l.b16 %v9559_v50 }
 0x15f   : > { %v3723_v56 = vsel %vm3370_vm2, %v27936_v59, %v3721_v33  ;;  %27937 = vst [vmem:[#allocation27_spill] sm:$0xff] %v24655_v4  ;;  %v21416_v63 = vld.sshfl [vmem:[%s24048_s11 + $0x78] sm:$0x1 pattern:$0x75316420]  ;;  %v9587_v52 = vrot.slane %v21415_v41, %v24054_v42  ;;  %v3478_v33 = vsel %vm3376_vm4, %v3477_v47, %v3476_v22  ;;  %v3483_v34 = vrot.slane %v24655_v4, 2 }
 0x160   : > { %v21417_v3 = vld.sshfl [vmem:[%s24048_s11 + $0x79] sm:$0x1 pattern:$0x75316420]  ;;  %v9601_v51 = vrot.slane %v21416_v63, %v24054_v42  ;;  %v10491_v59 = vunpack.c.l.b16 %v9573_v39  ;;  %v3480_v32 = vsel %vm3379_vm5, %v3479_v7, %v3478_v33  ;;  %v10638_v2 = vrot.slane %v10490_v23, 1 }
 0x161   : > { %v21418_v55 = vld.sshfl [vmem:[%s24048_s11 + $0x7a] sm:$0x1 pattern:$0x75316420]  ;;  %v9615_v9 = vrot.slane %v21417_v3, %v24054_v42  ;;  %v10492_v25 = vunpack.c.l.b16 %v9587_v52  ;;  %v3482_v41 = vsel %vm3382_vm6, %v3481_v40, %v3480_v32  ;;  %v27938_v4 = vrot.slane %v24098_v8, 5 }
 0x162   : > { %v21419_v50 = vld.sshfl [vmem:[%s24048_s11 + $0x7b] sm:$0x1 pattern:$0x75316420]  ;;  %v9629_v22 = vrot.slane %v21418_v55, %v24054_v42  ;;  %v10493_v47 = vunpack.c.l.b16 %v9601_v51  ;;  %v3484_v39 = vsel %vm3385_vm7, %v3483_v34, %v3482_v41  ;;  %v10639_v23 = vsel %vm3367_vm1, %v10491_v59, %v10638_v2 }
 0x163   : > { %v3725_v63 = vsel %vm3373_vm3, %v27938_v4, %v3723_v56  ;;  %v21420_v7 = vld.sshfl [vmem:[%s24048_s11 + $0x7c] sm:$0x1 pattern:$0x75316420]  ;;  %v9643_v33 = vrot.slane %v21419_v50, %v24054_v42  ;;  %v10494_v3 = vunpack.c.l.b16 %v9615_v9  ;;  %v3572_v52 = vpack.c.b16 %v3484_v39, %v3470_v61 }
 0x164   : > { %v21421_v40 = vld.sshfl [vmem:[%s24048_s11 + $0x99] sm:$0x1 pattern:$0x75316420]  ;;  %v9657_v32 = vrot.slane %v21420_v7, %v24054_v42  ;;  %v10495_v55 = vunpack.c.l.b16 %v9629_v22  ;;  %v10640_v51 = vrot.slane %v10492_v25, 7  ;;  %v10642_v4 = vrot.slane %v10493_v47, 6 }
 0x165   : > { %v21422_v37 = vld.sshfl [vmem:[%s24048_s11 + $0x9a] sm:$0x1 pattern:$0x75316420]  ;;  %v9671_v8 = vrot.slane %v21421_v40, %v24054_v42  ;;  %v10496_v56 = vunpack.c.l.b16 %v9643_v33  ;;  %v10644_v34 = vrot.slane %v10494_v3, 5  ;;  %22645 = vmatmul.mubr.bf16.gmra.mrb[12].mxu1 %v3572_v52 }
 0x166   : > { %v21423_v41 = vld.sshfl [vmem:[%s24048_s11 + $0x9b] sm:$0x1 pattern:$0x75316420]  ;;  %v9685_v9 = vrot.slane %v21422_v37, %v24054_v42  ;;  %v10497_v2 = vunpack.c.l.b16 %v9657_v32  ;;  %v10641_v61 = vsel %vm3370_vm2, %v10640_v51, %v10639_v23  ;;  %v10646_v59 = vrot.slane %v10495_v55, 4  ;;  %22648 = vmatprep.mubr.msk.bf16.mxu1 %vm23377_vm0, %v27921_v13 }
 0x167   : > { %v21424_v50 = vld.sshfl [vmem:[%s24048_s11 + $0x9c] sm:$0x1 pattern:$0x75316420]  ;;  %v9699_v25 = vrot.slane %v21423_v41, %v24054_v42  ;;  %v10498_v22 = vunpack.c.l.b16 %v9671_v8  ;;  %v10643_v39 = vsel %vm3373_vm3, %v10642_v4, %v10641_v61  ;;  %v10648_v7 = vrot.slane %v10496_v56, 3 }
 0x168   : > { %v21425_v47 = vld.sshfl [vmem:[%s24048_s11 + $0x9d] sm:$0x1 pattern:$0x75316420]  ;;  %v9713_v33 = vrot.slane %v21424_v50, %v24054_v42  ;;  %v10499_v37 = vunpack.c.l.b16 %v9685_v9  ;;  %v10645_v3 = vsel %vm3376_vm4, %v10644_v34, %v10643_v39  ;;  %v10650_v23 = vrot.slane %v10497_v2, 2 }
 0x169   : > { %v21426_v52 = vld.sshfl [vmem:[%s24048_s11 + $0x9e] sm:$0x1 pattern:$0x75316420]  ;;  %v9727_v40 = vrot.slane %v21425_v47, %v24054_v42  ;;  %v10500_v32 = vunpack.c.l.b16 %v9699_v25  ;;  %v10647_v55 = vsel %vm3379_vm5, %v10646_v59, %v10645_v3  ;;  %v10652_v51 = vrot.slane %v10498_v22, 1 }
 0x16a   : > { %v21427_v8 = vld.sshfl [vmem:[%s24048_s11 + $0x9f] sm:$0x1 pattern:$0x75316420]  ;;  %v9741_v56 = vrot.slane %v21426_v52, %v24054_v42  ;;  %v10501_v4 = vunpack.c.l.b16 %v9713_v33  ;;  %v10649_v41 = vsel %vm3382_vm6, %v10648_v7, %v10647_v55  ;;  %v27939_v9 = vrot.slane %v24103_v11, 4 }
 0x16b   : > { %v21428_v2 = vld.sshfl [vmem:[%s24048_s11 + $0xa0] sm:$0x1 pattern:$0x75316420]  ;;  %v9755_v61 = vrot.slane %v21427_v8, %v24054_v42  ;;  %v10502_v50 = vunpack.c.l.b16 %v9727_v40  ;;  %v10651_v59 = vsel %vm3385_vm7, %v10650_v23, %v10649_v41  ;;  %v10653_v25 = vsel %vm3367_vm1, %v10499_v37, %v10652_v51 }
 0x16c   : > { %v3727_v34 = vsel %vm3376_vm4, %v27939_v9, %v3725_v63  ;;  %v9769_v22 = vrot.slane %v21428_v2, %v24054_v42  ;;  %v10503_v39 = vunpack.c.l.b16 %v9741_v56  ;;  %v10654_v47 = vrot.slane %v10500_v32, 7  ;;  %v20677_v7 = vld.sshfl [vmem:[%s24048_s11 + $0xa2] sm:$0x1 pattern:$0x75316420] }
 0x16d   : > { %v10656_v33 = vrot.slane %v10501_v4, 6  ;;  %v10504_v3 = vunpack.c.l.b16 %v9755_v61  ;;  %v10658_v11 = vrot.slane %v10502_v50, 5  ;;  %v20678_v63 = vld.sshfl [vmem:[%s24048_s11 + $0xa3] sm:$0x1 pattern:$0x75316420]  ;;  %v2595_v52 = vrot.slane %v20677_v7, %v24054_v42 }
 0x16e   : > { %v27940_v40 = vrot.slane %v24109_v16, 3  ;;  %v10505_v23 = vunpack.c.l.b16 %v9769_v22  ;;  %v10655_v37 = vsel %vm3370_vm2, %v10654_v47, %v10653_v25  ;;  %v10660_v51 = vrot.slane %v10503_v39, 4  ;;  %v20679_v8 = vld.sshfl [vmem:[%s24048_s11 + $0xa4] sm:$0x1 pattern:$0x75316420] }
 0x16f   : > { %v2609_v32 = vrot.slane %v20678_v63, %v24054_v42  ;;  %v10657_v56 = vsel %vm3373_vm3, %v10656_v33, %v10655_v37  ;;  %v10662_v4 = vrot.slane %v10504_v3, 3  ;;  %v20680_v41 = vld.sshfl [vmem:[%s24048_s11 + $0xa5] sm:$0x1 pattern:$0x75316420]  ;;  %v2623_v9 = vrot.slane %v20679_v8, %v24054_v42 }
 0x170   : > { %v3729_v55 = vsel %vm3379_vm5, %v27940_v40, %v3727_v34  ;;  %v24723_v2 = vunpack.c.l.b16 %v2595_v52  ;;  %v10659_v16 = vsel %vm3376_vm4, %v10658_v11, %v10657_v56  ;;  %v10664_v34 = vrot.slane %v10505_v23, 2  ;;  %v20681_v61 = vld.sshfl [vmem:[%s24048_s11 + $0xa6] sm:$0x1 pattern:$0x75316420] }
 0x171   : > { %v2637_v50 = vrot.slane %v20680_v41, %v24054_v42  ;;  %v24728_v25 = vunpack.c.l.b16 %v2609_v32  ;;  %v10661_v22 = vsel %vm3379_vm5, %v10660_v51, %v10659_v16  ;;  %v20682_v39 = vld.sshfl [vmem:[%s24048_s11 + $0xa7] sm:$0x1 pattern:$0x75316420]  ;;  %v2651_v47 = vrot.slane %v20681_v61, %v24054_v42 }
 0x172   : > { %v24733_v33 = vunpack.c.l.b16 %v2623_v9  ;;  %v3485_v7 = vrot.slane %v24723_v2, 1  ;;  %v10663_v3 = vsel %vm3382_vm6, %v10662_v4, %v10661_v22  ;;  %v20683_v11 = vld.sshfl [vmem:[%s24048_s11 + $0xa8] sm:$0x1 pattern:$0x75316420]  ;;  %v2665_v63 = vrot.slane %v20682_v39, %v24054_v42 }
 0x173   : > { %v24739_v52 = vunpack.c.l.b16 %v2637_v50  ;;  %v27941_v40 = vrot.slane %v24114_v20, 2  ;;  %v10665_v37 = vsel %vm3385_vm7, %v10664_v34, %v10663_v3  ;;  %v20684_v51 = vld.sshfl [vmem:[%s24048_s11 + $0xa9] sm:$0x1 pattern:$0x75316420]  ;;  %v2679_v8 = vrot.slane %v20683_v11, %v24054_v42 }
 0x174   : > { %v24747_v32 = vunpack.c.l.b16 %v2651_v47  ;;  %v3486_v56 = vsel %vm3367_vm1, %v24728_v25, %v3485_v7  ;;  %v10753_v4 = vpack.c.b16 %v10665_v37, %v10651_v59  ;;  %v20685_v41 = vld.sshfl [vmem:[%s24048_s11 + $0xb4] sm:$0x1 pattern:$0x75316420]  ;;  %v2693_v9 = vrot.slane %v20684_v51, %v24054_v42 }
 0x175   : > { %v3731_v23 = vsel %vm3382_vm6, %v27941_v40, %v3729_v55  ;;  %v24753_v16 = vunpack.c.l.b16 %v2665_v63  ;;  %v3487_v20 = vrot.slane %v24733_v33, 7  ;;  %v20686_v55 = vld.sshfl [vmem:[%s24048_s11 + $0xb5] sm:$0x1 pattern:$0x75316420]  ;;  %v2707_v34 = vrot.slane %v20685_v41, %v24054_v42 }
 0x176   : > { %v24758_v61 = vunpack.c.l.b16 %v2679_v8  ;;  %v3489_v50 = vrot.slane %v24739_v52, 6  ;;  %v3491_v22 = vrot.slane %v24747_v32, 5  ;;  %22821 = vmatmul.mubr.bf16.gmra.mrb[12].mxu0 %v10753_v4  ;;  %v20687_v59 = vld.sshfl [vmem:[%s24048_s11 + $0xb6] sm:$0x1 pattern:$0x75316420]  ;;  %v2721_v39 = vrot.slane %v20686_v55, %v24054_v42 }
 0x177   : > { %v24764_v47 = vunpack.c.l.b16 %v2693_v9  ;;  %v3488_v7 = vsel %vm3370_vm2, %v3487_v20, %v3486_v56  ;;  %v3493_v3 = vrot.slane %v24753_v16, 4  ;;  %22852 = vmatprep.mubr.msk.bf16.mxu0 %vm23377_vm0, %v27921_v13  ;;  %v20688_v11 = vld.sshfl [vmem:[%s24048_s11 + $0xb7] sm:$0x1 pattern:$0x75316420]  ;;  %v2735_v63 = vrot.slane %v20687_v59, %v24054_v42 }
 0x178   : > { %27942 = vst [vmem:[#allocation28_spill] sm:$0xff] %v24758_v61  ;;  %v24772_v40 = vunpack.c.l.b16 %v2707_v34  ;;  %v3490_v37 = vsel %vm3373_vm3, %v3489_v50, %v3488_v7  ;;  %v3495_v51 = vrot.slane %v24758_v61, 3  ;;  %v20689_v8 = vld.sshfl [vmem:[%s24048_s11 + $0xb8] sm:$0x1 pattern:$0x75316420]  ;;  %v2749_v4 = vrot.slane %v20688_v11, %v24054_v42 }
 0x179   : > { %27943 = vst [vmem:[#allocation29_spill] sm:$0xff] %v24764_v47  ;;  %v24778_v56 = vunpack.c.l.b16 %v2721_v39  ;;  %v3492_v41 = vsel %vm3376_vm4, %v3491_v22, %v3490_v37  ;;  %v3497_v9 = vrot.slane %v24764_v47, 2  ;;  %v20690_v20 = vld.sshfl [vmem:[%s24048_s11 + $0xb9] sm:$0x1 pattern:$0x75316420]  ;;  %v2763_v55 = vrot.slane %v20689_v8, %v24054_v42 }
 0x17a   : > { %27944 = vst [vmem:[#allocation30_spill] sm:$0xff] %v24772_v40  ;;  %v24784_v59 = vunpack.c.l.b16 %v2735_v63  ;;  %v3494_v34 = vsel %vm3379_vm5, %v3493_v3, %v3492_v41  ;;  %v3499_v50 = vrot.slane %v24772_v40, 1  ;;  %v20691_v7 = vld.sshfl [vmem:[%s24048_s11 + $0xba] sm:$0x1 pattern:$0x75316420]  ;;  %v2777_v61 = vrot.slane %v20690_v20, %v24054_v42 }
 0x17b   : > { %27945 = vst [vmem:[#allocation31_spill] sm:$0xff] %v24778_v56  ;;  %v24790_v39 = vunpack.c.l.b16 %v2749_v4  ;;  %v3496_v22 = vsel %vm3382_vm6, %v3495_v51, %v3494_v34  ;;  %v27948_v11 = vrot.slane %v24122_v26, 1  ;;  %v20692_v63 = vld.sshfl [vmem:[%s24048_s11 + $0xbb] sm:$0x1 pattern:$0x75316420]  ;;  %v2791_v8 = vrot.slane %v20691_v7, %v24054_v42 }
 0x17c   : > { %27946 = vst [vmem:[#allocation32_spill] sm:$0xff] %v24784_v59  ;;  %v24800_v3 = vunpack.c.l.b16 %v2763_v55  ;;  %v3498_v41 = vsel %vm3385_vm7, %v3497_v9, %v3496_v22  ;;  %v3500_v20 = vsel %vm3367_vm1, %v24778_v56, %v3499_v50  ;;  %v2805_v4 = vrot.slane %v20692_v63, %v24054_v42  ;;  %v21613_v51 = vld.sshfl [vmem:[%s24048_s11 + $0xa] sm:$0x1 pattern:$0x75316420] }
 0x17d   : > { %27947 = vst [vmem:[#allocation33_spill] sm:$0xff] %v24790_v39  ;;  %v24796_v37 = vsel %vm3385_vm7, %v27948_v11, %v3731_v23  ;;  %v24806_v40 = vunpack.c.l.b16 %v2777_v61  ;;  %v3501_v26 = vrot.slane %v24784_v59, 7  ;;  %v3503_v23 = vrot.slane %v24790_v39, 6 }
 0x17e   : > { %27949 = vst [vmem:[#allocation34_spill] sm:$0xff] %v24800_v3  ;;  %v24811_v34 = vunpack.c.l.b16 %v2791_v8  ;;  %v3505_v55 = vrot.slane %v24800_v3, 5  ;;  %v21614_v7 = vld.sshfl [vmem:[%s24048_s11 + $0xb] sm:$0x1 pattern:$0x75316420]  ;;  %v11170_v9 = vrot.slane %v21613_v51, %v24054_v42  ;;  %v24820_v22 = vunpack.c.l.b16 %v2805_v4 }
 0x17f   : > { %27950 = vst [vmem:[#allocation35_spill] sm:$0xff] %v24806_v40  ;;  %v27952_v50 = vrot.slane %v24135_v38, 7  ;;  %v3502_v11 = vsel %vm3370_vm2, %v3501_v26, %v3500_v20  ;;  %v3507_v63 = vrot.slane %v24806_v40, 4  ;;  %v11184_v39 = vrot.slane %v21614_v7, %v24054_v42 }
 0x180   : > { %27951 = vst [vmem:[#allocation36_spill] sm:$0xff] %v24811_v34  ;;  %27953 = vst [vmem:[#allocation37_spill] sm:$0xff] %v24820_v22  ;;  %v21615_v8 = vld.sshfl [vmem:[%s24048_s11 + $0xc] sm:$0x1 pattern:$0x75316420]  ;;  %v3504_v3 = vsel %vm3373_vm3, %v3503_v23, %v3502_v11  ;;  %v12725_v56 = vunpack.c.l.b16 %v11170_v9 }
 0x181   : > { %v3735_v61 = vsel %vm3367_vm1, %v27952_v50, %v24129_v31  ;;  %v3509_v51 = vrot.slane %v24811_v34, 3  ;;  %v21616_v59 = vld.sshfl [vmem:[%s24048_s11 + $0xd] sm:$0x1 pattern:$0x75316420]  ;;  %v11198_v38 = vrot.slane %v21615_v8, %v24054_v42  ;;  %v3506_v31 = vsel %vm3376_vm4, %v3505_v55, %v3504_v3 }
 0x182   : > { %v3511_v4 = vrot.slane %v24820_v22, 2  ;;  %v21617_v20 = vld.sshfl [vmem:[%s24048_s11 + $0xe] sm:$0x1 pattern:$0x75316420]  ;;  %v11212_v26 = vrot.slane %v21616_v59, %v24054_v42  ;;  %v12726_v50 = vunpack.c.l.b16 %v11184_v39  ;;  %v3508_v7 = vsel %vm3379_vm5, %v3507_v63, %v3506_v31 }
 0x183   : > { %v21618_v23 = vld.sshfl [vmem:[%s24048_s11 + $0xf] sm:$0x1 pattern:$0x75316420]  ;;  %v11226_v11 = vrot.slane %v21617_v20, %v24054_v42  ;;  %v12727_v34 = vunpack.c.l.b16 %v11198_v38  ;;  %v27954_v40 = vrot.slane %v24142_v45, 6  ;;  %v3510_v3 = vsel %vm3382_vm6, %v3509_v51, %v3508_v7 }
 0x184   : > { %v21619_v55 = vld.sshfl [vmem:[%s24048_s11 + $0x10] sm:$0x1 pattern:$0x75316420]  ;;  %v11240_v8 = vrot.slane %v21618_v23, %v24054_v42  ;;  %v12728_v22 = vunpack.c.l.b16 %v11212_v26  ;;  %v12837_v59 = vrot.slane %v12726_v50, 7  ;;  %v3512_v39 = vsel %vm3385_vm7, %v3511_v4, %v3510_v3 }
 0x185   : > { %v3737_v9 = vsel %vm3370_vm2, %v27954_v40, %v3735_v61  ;;  %v21620_v63 = vld.sshfl [vmem:[%s24048_s11 + $0x11] sm:$0x1 pattern:$0x75316420]  ;;  %v11254_v31 = vrot.slane %v21619_v55, %v24054_v42  ;;  %v12729_v20 = vunpack.c.l.b16 %v11226_v11  ;;  %v12839_v38 = vrot.slane %v12727_v34, 6 }
 0x186   : > { %v3573_v47 = vpack.c.b16 %v3512_v39, %v3498_v41  ;;  %v21621_v45 = vld.sshfl [vmem:[%s24048_s11 + $0x1c] sm:$0x1 pattern:$0x75316420]  ;;  %v11268_v40 = vrot.slane %v21620_v63, %v24054_v42  ;;  %v12730_v61 = vunpack.c.l.b16 %v11240_v8  ;;  %v12838_v51 = vsel %vm3367_vm1, %v12837_v59, %v12725_v56 }
 0x187   : > { %v21622_v7 = vld.sshfl [vmem:[%s24048_s11 + $0x1d] sm:$0x1 pattern:$0x75316420]  ;;  %v11282_v26 = vrot.slane %v21621_v45, %v24054_v42  ;;  %v12731_v50 = vunpack.c.l.b16 %v11254_v31  ;;  %v12840_v4 = vsel %vm3370_vm2, %v12839_v38, %v12838_v51  ;;  %v12841_v23 = vrot.slane %v12728_v22, 5 }
 0x188   : > { %22649 = vmatmul.mubr.bf16.gmra.mrb[16].mxu1 %v3573_v47  ;;  %v21623_v3 = vld.sshfl [vmem:[%s24048_s11 + $0x1e] sm:$0x1 pattern:$0x75316420]  ;;  %v11296_v41 = vrot.slane %v21622_v7, %v24054_v42  ;;  %v12732_v34 = vunpack.c.l.b16 %v11268_v40  ;;  %v12843_v11 = vrot.slane %v12729_v20, 4  ;;  %v12845_v55 = vrot.slane %v12730_v61, 3 }
 0x189   : > { %v21624_v39 = vld.sshfl [vmem:[%s24048_s11 + $0x1f] sm:$0x1 pattern:$0x75316420]  ;;  %v11310_v56 = vrot.slane %v21623_v3, %v24054_v42  ;;  %v12733_v8 = vunpack.c.l.b16 %v11282_v26  ;;  %v12842_v59 = vsel %vm3373_vm3, %v12841_v23, %v12840_v4  ;;  %v12847_v63 = vrot.slane %v12731_v50, 2  ;;  %22652 = vmatprep.mubr.msk.bf16.mxu1 %vm23377_vm0, %v27921_v13 }
 0x18a   : > { %v21625_v47 = vld.sshfl [vmem:[%s24048_s11 + $0x20] sm:$0x1 pattern:$0x75316420]  ;;  %v11324_v22 = vrot.slane %v21624_v39, %v24054_v42  ;;  %v12734_v31 = vunpack.c.l.b16 %v11296_v41  ;;  %v12844_v38 = vsel %vm3376_vm4, %v12843_v11, %v12842_v59  ;;  %v12849_v20 = vrot.slane %v12732_v34, 1 }
 0x18b   : > { %v21626_v45 = vld.sshfl [vmem:[%s24048_s11 + $0x21] sm:$0x1 pattern:$0x75316420]  ;;  %v11338_v40 = vrot.slane %v21625_v47, %v24054_v42  ;;  %v12735_v61 = vunpack.c.l.b16 %v11310_v56  ;;  %v12846_v51 = vsel %vm3379_vm5, %v12845_v55, %v12844_v38  ;;  %v27955_v7 = vrot.slane %v24150_v53, 5 }
 0x18c   : > { %v21627_v50 = vld.sshfl [vmem:[%s24048_s11 + $0x22] sm:$0x1 pattern:$0x75316420]  ;;  %v11352_v4 = vrot.slane %v21626_v45, %v24054_v42  ;;  %v12736_v23 = vunpack.c.l.b16 %v11324_v22  ;;  %v12848_v3 = vsel %vm3382_vm6, %v12847_v63, %v12846_v51  ;;  %v12851_v41 = vrot.slane %v12734_v31, 7 }
 0x18d   : > { %v3739_v26 = vsel %vm3373_vm3, %v27955_v7, %v3737_v9  ;;  %v21628_v34 = vld.sshfl [vmem:[%s24048_s11 + $0x23] sm:$0x1 pattern:$0x75316420]  ;;  %v11366_v11 = vrot.slane %v21627_v50, %v24054_v42  ;;  %v12737_v39 = vunpack.c.l.b16 %v11338_v40  ;;  %v12850_v55 = vsel %vm3385_vm7, %v12849_v20, %v12848_v3 }
 0x18e   : > { %v12853_v56 = vrot.slane %v12735_v61, 6  ;;  %v11380_v53 = vrot.slane %v21628_v34, %v24054_v42  ;;  %v12738_v59 = vunpack.c.l.b16 %v11352_v4  ;;  %v12852_v9 = vsel %vm3367_vm1, %v12851_v41, %v12733_v8  ;;  %v20693_v22 = vld.sshfl [vmem:[%s24048_s11 + $0xc6] sm:$0x1 pattern:$0x75316420] }
 0x18f   : > { %v12855_v47 = vrot.slane %v12736_v23, 5  ;;  %v12739_v38 = vunpack.c.l.b16 %v11366_v11  ;;  %v12857_v31 = vrot.slane %v12737_v39, 4  ;;  %v20694_v45 = vld.sshfl [vmem:[%s24048_s11 + $0xc7] sm:$0x1 pattern:$0x75316420]  ;;  %v2819_v40 = vrot.slane %v20693_v22, %v24054_v42 }
 0x190   : > { %v12854_v63 = vsel %vm3370_vm2, %v12853_v56, %v12852_v9  ;;  %v12740_v51 = vunpack.c.l.b16 %v11380_v53  ;;  %v12859_v61 = vrot.slane %v12738_v59, 3  ;;  %v20695_v7 = vld.sshfl [vmem:[%s24048_s11 + $0xc8] sm:$0x1 pattern:$0x75316420]  ;;  %v2833_v50 = vrot.slane %v20694_v45, %v24054_v42  ;;  %v23297_v9 = vld [vmem:[%s24045_s10 + $0x180] sm:$0xff]  }
 0x191   : > { %v12856_v20 = vsel %vm3373_vm3, %v12855_v47, %v12854_v63  ;;  %v12861_v4 = vrot.slane %v12739_v38, 2  ;;  %v20696_v23 = vld.sshfl [vmem:[%s24048_s11 + $0xc9] sm:$0x1 pattern:$0x75316420]  ;;  %v2847_v3 = vrot.slane %v20695_v7, %v24054_v42  ;;  %v24886_v41 = vunpack.c.l.b16 %v2819_v40 }
 0x192   : > { %v12858_v8 = vsel %vm3376_vm4, %v12857_v31, %v12856_v20  ;;  %v12863_v11 = vrot.slane %v12740_v51, 1  ;;  %v20697_v39 = vld.sshfl [vmem:[%s24048_s11 + $0xca] sm:$0x1 pattern:$0x75316420]  ;;  %v2861_v56 = vrot.slane %v20696_v23, %v24054_v42  ;;  %v24891_v53 = vunpack.c.l.b16 %v2833_v50 }
 0x193   : > { %v12860_v34 = vsel %vm3379_vm5, %v12859_v61, %v12858_v8  ;;  %v20698_v47 = vld.sshfl [vmem:[%s24048_s11 + $0xcb] sm:$0x1 pattern:$0x75316420]  ;;  %v2875_v22 = vrot.slane %v20697_v39, %v24054_v42  ;;  %v24897_v38 = vunpack.c.l.b16 %v2847_v3  ;;  %v3513_v63 = vrot.slane %v24886_v41, 1 }
 0x194   : > { %v12862_v59 = vsel %vm3382_vm6, %v12861_v4, %v12860_v34  ;;  %v20699_v45 = vld.sshfl [vmem:[%s24048_s11 + $0xcc] sm:$0x1 pattern:$0x75316420]  ;;  %v2889_v40 = vrot.slane %v20698_v47, %v24054_v42  ;;  %v24903_v51 = vunpack.c.l.b16 %v2861_v56  ;;  %v27956_v20 = vrot.slane %v24157_v60, 4 }
 0x195   : > { %v12864_v31 = vsel %vm3385_vm7, %v12863_v11, %v12862_v59  ;;  %v20700_v50 = vld.sshfl [vmem:[%s24048_s11 + $0xcd] sm:$0x1 pattern:$0x75316420]  ;;  %v2903_v8 = vrot.slane %v20699_v45, %v24054_v42  ;;  %v24910_v4 = vunpack.c.l.b16 %v2875_v22  ;;  %v3514_v23 = vsel %vm3367_vm1, %v24891_v53, %v3513_v63 }
 0x196   : > { %v3741_v61 = vsel %vm3376_vm4, %v27956_v20, %v3739_v26  ;;  %v13033_v7 = vpack.c.b16 %v12864_v31, %v12850_v55  ;;  %v20701_v3 = vld.sshfl [vmem:[%s24048_s11 + $0xd8] sm:$0x1 pattern:$0x75316420]  ;;  %v2917_v34 = vrot.slane %v20700_v50, %v24054_v42  ;;  %v24916_v11 = vunpack.c.l.b16 %v2889_v40 }
 0x197   : > { %v3515_v60 = vrot.slane %v24897_v38, 7  ;;  %v3517_v26 = vrot.slane %v24903_v51, 6  ;;  %v20702_v55 = vld.sshfl [vmem:[%s24048_s11 + $0xd9] sm:$0x1 pattern:$0x75316420]  ;;  %v2931_v39 = vrot.slane %v20701_v3, %v24054_v42  ;;  %v24922_v56 = vunpack.c.l.b16 %v2903_v8 }
 0x198   : > { %27957 = vst [vmem:[#allocation38_spill] sm:$0xff] %v24916_v11  ;;  %22853 = vmatmul.mubr.bf16.vlgmr.msra.gmra.mrb[0].mxu0 %v13033_v7  ;;  %v3519_v59 = vrot.slane %v24910_v4, 5  ;;  %v27959_v47 = vrot.slane %v24163_v1, 3  ;;  %v2945_v31 = vrot.slane %v20702_v55, %v24054_v42  ;;  %v24932_v45 = vunpack.c.l.b16 %v2917_v34  ;;  %v23299_v7 = vld [vmem:[%s24045_s10 + $0x188] sm:$0xff]  }
 0x199   : > { %27958 = vst [vmem:[#allocation39_spill] sm:$0xff] %v24922_v56  ;;  %22881 = vmatpush3.bf16.msra.mxu0 %v23297_v9  ;;  %22856 = vmatprep.mubr.msk.bf16.mxu0 %vm23377_vm0, %v27921_v13  ;;  %v20703_v63 = vld.sshfl [vmem:[%s24048_s11 + $0xda] sm:$0x1 pattern:$0x75316420]  ;;  %v3516_v40 = vsel %vm3370_vm2, %v3515_v60, %v3514_v23  ;;  %v3521_v20 = vrot.slane %v24916_v11, 4 }
 0x19a   : > { %v3743_v22 = vsel %vm3379_vm5, %v27959_v47, %v3741_v61  ;;  %27960 = vst [vmem:[#allocation40_spill] sm:$0xff] %v24932_v45  ;;  %22882 = vmatprep.subr.bf16.mxu0 %v27921_v13  ;;  %v20704_v1 = vld.sshfl [vmem:[%s24048_s11 + $0xdb] sm:$0x1 pattern:$0x75316420]  ;;  %v2959_v9 = vrot.slane %v20703_v63, %v24054_v42  ;;  %v24940_v61 = vunpack.c.l.b16 %v2931_v39  ;;  %v3518_v50 = vsel %vm3373_vm3, %v3517_v26, %v3516_v40  ;;  %v23301_v40 = vld [vmem:[%s24045_s10 + $0x190] sm:$0xff]  }
 0x19b   : > { %v3523_v8 = vrot.slane %v24922_v56, 3  ;;  %v20705_v3 = vld.sshfl [vmem:[%s24048_s11 + $0xdc] sm:$0x1 pattern:$0x75316420]  ;;  %v2973_v34 = vrot.slane %v20704_v1, %v24054_v42  ;;  %v24946_v23 = vunpack.c.l.b16 %v2945_v31  ;;  %v3520_v60 = vsel %vm3376_vm4, %v3519_v59, %v3518_v50 }
 0x19c   : > { %27961 = vst [vmem:[#allocation41_spill] sm:$0xff] %v24940_v61  ;;  %v3525_v55 = vrot.slane %v24932_v45, 2  ;;  %v20706_v47 = vld.sshfl [vmem:[%s24048_s11 + $0xdd] sm:$0x1 pattern:$0x75316420]  ;;  %v2987_v11 = vrot.slane %v20705_v3, %v24054_v42  ;;  %v24952_v63 = vunpack.c.l.b16 %v2959_v9  ;;  %v3522_v39 = vsel %vm3379_vm5, %v3521_v20, %v3520_v60 }
 0x19d   : > { %27962 = vst [vmem:[#allocation42_spill] sm:$0xff] %v24946_v23  ;;  %v3527_v26 = vrot.slane %v24940_v61, 1  ;;  %v20707_v56 = vld.sshfl [vmem:[%s24048_s11 + $0xde] sm:$0x1 pattern:$0x75316420]  ;;  %v3001_v1 = vrot.slane %v20706_v47, %v24054_v42  ;;  %v24959_v31 = vunpack.c.l.b16 %v2973_v34  ;;  %v3524_v59 = vsel %vm3382_vm6, %v3523_v8, %v3522_v39  ;;  %22883 = vmatpush3.bf16.msra.mxu0 %v23299_v7 }
 0x19e   : > { %27963 = vst [vmem:[#allocation43_spill] sm:$0xff] %v24952_v63  ;;  %v27965_v50 = vrot.slane %v24168_v5, 2  ;;  %v20708_v3 = vld.sshfl [vmem:[%s24048_s11 + $0xdf] sm:$0x1 pattern:$0x75316420]  ;;  %v3015_v20 = vrot.slane %v20707_v56, %v24054_v42  ;;  %v24967_v60 = vunpack.c.l.b16 %v2987_v11  ;;  %v3526_v61 = vsel %vm3385_vm7, %v3525_v55, %v3524_v59  ;;  %22884 = vmatprep.subr.bf16.mxu0 %v27921_v13 }
 0x19f   : > { %27964 = vst [vmem:[#allocation44_spill] sm:$0xff] %v24959_v31  ;;  %v3528_v34 = vsel %vm3367_vm1, %v24946_v23, %v3527_v26  ;;  %v3029_v8 = vrot.slane %v20708_v3, %v24054_v42  ;;  %v24974_v7 = vunpack.c.l.b16 %v3001_v1  ;;  %v3529_v5 = vrot.slane %v24952_v63, 7  ;;  %v21629_v11 = vld.sshfl [vmem:[%s24048_s11 + $0x2e] sm:$0x1 pattern:$0x75316420] }
 0x1a0   : > { %v3745_v9 = vsel %vm3382_vm6, %v27965_v50, %v3743_v22  ;;  %27966 = vst [vmem:[#allocation45_spill] sm:$0xff] %v24967_v60  ;;  %v3531_v22 = vrot.slane %v24959_v31, 6  ;;  %v24979_v56 = vunpack.c.l.b16 %v3015_v20  ;;  %v3533_v55 = vrot.slane %v24967_v60, 5  ;;  %v23304_v60 = vld [vmem:[%s24045_s10 + $0x198] sm:$0xff]  }
 0x1a1   : > { %27967 = vst [vmem:[#allocation46_spill] sm:$0xff] %v24974_v7  ;;  %v21630_v47 = vld.sshfl [vmem:[%s24048_s11 + $0x2f] sm:$0x1 pattern:$0x75316420]  ;;  %v11394_v39 = vrot.slane %v21629_v11, %v24054_v42  ;;  %v27969_v26 = vrot.slane %v24174_v12, 1  ;;  %v24989_v1 = vunpack.c.l.b16 %v3029_v8  ;;  %v3530_v50 = vsel %vm3370_vm2, %v3529_v5, %v3528_v34  ;;  %22885 = vmatpush3.bf16.msra.mxu0 %v23301_v40 }
 0x1a2   : > { %27968 = vst [vmem:[#allocation47_spill] sm:$0xff] %v24979_v56  ;;  %v3535_v3 = vrot.slane %v24974_v7, 4  ;;  %v21631_v31 = vld.sshfl [vmem:[%s24048_s11 + $0x30] sm:$0x1 pattern:$0x75316420]  ;;  %v11408_v20 = vrot.slane %v21630_v47, %v24054_v42  ;;  %v3532_v11 = vsel %vm3373_vm3, %v3531_v22, %v3530_v50  ;;  %22886 = vmatprep.subr.bf16.mxu0 %v27921_v13 }
 0x1a3   : > { %v24987_v59 = vsel %vm3385_vm7, %v27969_v26, %v3745_v9  ;;  %27970 = vst [vmem:[#allocation48_spill] sm:$0xff] %v24989_v1  ;;  %v3537_v12 = vrot.slane %v24979_v56, 3  ;;  %v21632_v9 = vld.sshfl [vmem:[%s24048_s11 + $0x31] sm:$0x1 pattern:$0x75316420]  ;;  %v11422_v26 = vrot.slane %v21631_v31, %v24054_v42  ;;  %v12741_v8 = vunpack.c.l.b16 %v11394_v39 }
 0x1a4   : > { %v3534_v34 = vsel %vm3376_vm4, %v3533_v55, %v3532_v11  ;;  %v3539_v5 = vrot.slane %v24989_v1, 2  ;;  %v21633_v7 = vld.sshfl [vmem:[%s24048_s11 + $0x32] sm:$0x1 pattern:$0x75316420]  ;;  %v11436_v40 = vrot.slane %v21632_v9, %v24054_v42  ;;  %v12742_v47 = vunpack.c.l.b16 %v11408_v20  ;;  %v23305_v20 = vld [vmem:[%s24045_s10 + $0x1a0] sm:$0xff]  }
 0x1a5   : > { %v3536_v22 = vsel %vm3379_vm5, %v3535_v3, %v3534_v34  ;;  %v21634_v50 = vld.sshfl [vmem:[%s24048_s11 + $0x33] sm:$0x1 pattern:$0x75316420]  ;;  %v11450_v56 = vrot.slane %v21633_v7, %v24054_v42  ;;  %v12743_v63 = vunpack.c.l.b16 %v11422_v26  ;;  %22887 = vmatpush3.bf16.msra.mxu0 %v23304_v60 }
 0x1a6   : > { %v3538_v55 = vsel %vm3382_vm6, %v3537_v12, %v3536_v22  ;;  %v21635_v39 = vld.sshfl [vmem:[%s24048_s11 + $0x34] sm:$0x1 pattern:$0x75316420]  ;;  %v11464_v11 = vrot.slane %v21634_v50, %v24054_v42  ;;  %v12744_v1 = vunpack.c.l.b16 %v11436_v40  ;;  %v12865_v23 = vrot.slane %v12742_v47, 7  ;;  %22888 = vmatprep.subr.bf16.mxu0 %v27921_v13 }
 0x1a7   : > { %v3540_v3 = vsel %vm3385_vm7, %v3539_v5, %v3538_v55  ;;  %v21636_v9 = vld.sshfl [vmem:[%s24048_s11 + $0x35] sm:$0x1 pattern:$0x75316420]  ;;  %v11478_v7 = vrot.slane %v21635_v39, %v24054_v42  ;;  %v12745_v26 = vunpack.c.l.b16 %v11450_v56  ;;  %v12867_v34 = vrot.slane %v12743_v63, 6  ;;  %v23307_v56 = vld [vmem:[%s24045_s10 + $0x1a8] sm:$0xff]  }
 0x1a8   : > { %v3574_v12 = vpack.c.b16 %v3540_v3, %v3526_v61  ;;  %v21637_v22 = vld.sshfl [vmem:[%s24048_s11 + $0x40] sm:$0x1 pattern:$0x75316420]  ;;  %v11492_v50 = vrot.slane %v21636_v9, %v24054_v42  ;;  %v12746_v40 = vunpack.c.l.b16 %v11464_v11  ;;  %v12866_v60 = vsel %vm3367_vm1, %v12865_v23, %v12741_v8 }
 0x1a9   : > { %v21638_v47 = vld.sshfl [vmem:[%s24048_s11 + $0x41] sm:$0x1 pattern:$0x75316420]  ;;  %v11506_v5 = vrot.slane %v21637_v22, %v24054_v42  ;;  %v12747_v55 = vunpack.c.l.b16 %v11478_v7  ;;  %v12868_v31 = vsel %vm3370_vm2, %v12867_v34, %v12866_v60  ;;  %v12869_v39 = vrot.slane %v12744_v1, 5  ;;  %22889 = vmatpush3.bf16.msra.mxu0 %v23305_v20 }
 0x1aa   : > { %22653 = vmatmul.mubr.bf16.gmra.mrb[20].mxu1 %v3574_v12  ;;  %v21639_v63 = vld.sshfl [vmem:[%s24048_s11 + $0x42] sm:$0x1 pattern:$0x75316420]  ;;  %v11520_v61 = vrot.slane %v21638_v47, %v24054_v42  ;;  %v12748_v3 = vunpack.c.l.b16 %v11492_v50  ;;  %v12871_v9 = vrot.slane %v12745_v26, 4  ;;  %v12873_v45 = vrot.slane %v12746_v40, 3  ;;  %22890 = vmatprep.subr.bf16.mxu0 %v27921_v13 }
 0x1ab   : > { %v21640_v11 = vld.sshfl [vmem:[%s24048_s11 + $0x43] sm:$0x1 pattern:$0x75316420]  ;;  %v11534_v23 = vrot.slane %v21639_v63, %v24054_v42  ;;  %v12749_v8 = vunpack.c.l.b16 %v11506_v5  ;;  %v12870_v7 = vsel %vm3373_vm3, %v12869_v39, %v12868_v31  ;;  %v12875_v34 = vrot.slane %v12747_v55, 2  ;;  %22656 = vmatprep.mubr.msk.bf16.mxu1 %vm23377_vm0, %v27921_v13 }
 0x1ac   : > { %v21641_v1 = vld.sshfl [vmem:[%s24048_s11 + $0x44] sm:$0x1 pattern:$0x75316420]  ;;  %v11548_v12 = vrot.slane %v21640_v11, %v24054_v42  ;;  %v12750_v26 = vunpack.c.l.b16 %v11520_v61  ;;  %v12872_v20 = vsel %vm3376_vm4, %v12871_v9, %v12870_v7  ;;  %v12877_v22 = vrot.slane %v12748_v3, 1  ;;  %v23309_v61 = vld [vmem:[%s24045_s10 + $0x1b0] sm:$0xff]  }
 0x1ad   : > { %v21642_v50 = vld.sshfl [vmem:[%s24048_s11 + $0x45] sm:$0x1 pattern:$0x75316420]  ;;  %v11562_v40 = vrot.slane %v21641_v1, %v24054_v42  ;;  %v12751_v60 = vunpack.c.l.b16 %v11534_v23  ;;  %v12874_v31 = vsel %vm3379_vm5, %v12873_v45, %v12872_v20  ;;  %v3748_v47 = vrot.slane %v24255_v17, 7  ;;  %22891 = vmatpush3.bf16.msra.mxu0 %v23307_v56 }
 0x1ae   : > { %v21643_v5 = vld.sshfl [vmem:[%s24048_s11 + $0x46] sm:$0x1 pattern:$0x75316420]  ;;  %v11576_v55 = vrot.slane %v21642_v50, %v24054_v42  ;;  %v12752_v39 = vunpack.c.l.b16 %v11548_v12  ;;  %v12876_v63 = vsel %vm3382_vm6, %v12875_v34, %v12874_v31  ;;  %v12879_v11 = vrot.slane %v12750_v26, 7  ;;  %22892 = vmatprep.subr.bf16.mxu0 %v27921_v13 }
 0x1af   : > { %v21644_v3 = vld.sshfl [vmem:[%s24048_s11 + $0x47] sm:$0x1 pattern:$0x75316420]  ;;  %v11590_v9 = vrot.slane %v21643_v5, %v24054_v42  ;;  %v12753_v7 = vunpack.c.l.b16 %v11562_v40  ;;  %v12878_v23 = vsel %vm3385_vm7, %v12877_v22, %v12876_v63  ;;  %v12881_v45 = vrot.slane %v12751_v60, 6 }
 0x1b0   : > { %v11604_v17 = vrot.slane %v21644_v3, %v24054_v42  ;;  %v12754_v1 = vunpack.c.l.b16 %v11576_v55  ;;  %v12880_v34 = vsel %vm3367_vm1, %v12879_v11, %v12749_v8  ;;  %v12883_v12 = vrot.slane %v12752_v39, 5  ;;  %v20709_v56 = vld.sshfl [vmem:[%s24048_s11 + $0xea] sm:$0x1 pattern:$0x75316420]  ;;  %v23311_v8 = vld [vmem:[%s24045_s10 + $0x1b8] sm:$0xff]  }
 0x1b1   : > { %v12755_v26 = vunpack.c.l.b16 %v11590_v9  ;;  %v12882_v20 = vsel %vm3370_vm2, %v12881_v45, %v12880_v34  ;;  %v12885_v50 = vrot.slane %v12753_v7, 4  ;;  %v20710_v40 = vld.sshfl [vmem:[%s24048_s11 + $0xeb] sm:$0x1 pattern:$0x75316420]  ;;  %v3043_v22 = vrot.slane %v20709_v56, %v24054_v42  ;;  %22893 = vmatpush3.bf16.msra.mxu0 %v23309_v61 }
 0x1b2   : > { %v12756_v60 = vunpack.c.l.b16 %v11604_v17  ;;  %v12884_v31 = vsel %vm3373_vm3, %v12883_v12, %v12882_v20  ;;  %v12887_v5 = vrot.slane %v12754_v1, 3  ;;  %v20711_v63 = vld.sshfl [vmem:[%s24048_s11 + $0xec] sm:$0x1 pattern:$0x75316420]  ;;  %v3057_v55 = vrot.slane %v20710_v40, %v24054_v42  ;;  %22894 = vmatprep.subr.bf16.mxu0 %v27921_v13 }
 0x1b3   : > { %v12886_v39 = vsel %vm3376_vm4, %v12885_v50, %v12884_v31  ;;  %v12889_v11 = vrot.slane %v12755_v26, 2  ;;  %v20712_v3 = vld.sshfl [vmem:[%s24048_s11 + $0xed] sm:$0x1 pattern:$0x75316420]  ;;  %v3071_v9 = vrot.slane %v20711_v63, %v24054_v42  ;;  %v25061_v7 = vunpack.c.l.b16 %v3043_v22 }
 0x1b4   : > { %v12888_v45 = vsel %vm3379_vm5, %v12887_v5, %v12886_v39  ;;  %v12891_v17 = vrot.slane %v12756_v60, 1  ;;  %v20713_v1 = vld.sshfl [vmem:[%s24048_s11 + $0xee] sm:$0x1 pattern:$0x75316420]  ;;  %v3085_v34 = vrot.slane %v20712_v3, %v24054_v42  ;;  %v25067_v61 = vunpack.c.l.b16 %v3057_v55 }
 0x1b5   : > { %v12890_v12 = vsel %vm3382_vm6, %v12889_v11, %v12888_v45  ;;  %v20714_v56 = vld.sshfl [vmem:[%s24048_s11 + $0xef] sm:$0x1 pattern:$0x75316420]  ;;  %v3099_v26 = vrot.slane %v20713_v1, %v24054_v42  ;;  %v25072_v20 = vunpack.c.l.b16 %v3071_v9  ;;  %v3541_v50 = vrot.slane %v25061_v7, 1  ;;  %22895 = vmatpush3.bf16.msra.mxu0 %v23311_v8 }
 0x1b6   : > { %v12892_v40 = vsel %vm3385_vm7, %v12891_v17, %v12890_v12  ;;  %v20715_v22 = vld.sshfl [vmem:[%s24048_s11 + $0xf0] sm:$0x1 pattern:$0x75316420]  ;;  %v3113_v60 = vrot.slane %v20714_v56, %v24054_v42  ;;  %v25078_v31 = vunpack.c.l.b16 %v3085_v34  ;;  %v3749_v5 = vsel %vm3367_vm1, %v3748_v47, %v24250_v54  ;;  %22924 = vmatprep.subr.bf16.mxu0 %v27921_v13 }
 0x1b7   : > { %v13034_v63 = vpack.c.b16 %v12892_v40, %v12878_v23  ;;  %v20716_v55 = vld.sshfl [vmem:[%s24048_s11 + $0xf1] sm:$0x1 pattern:$0x75316420]  ;;  %v3127_v39 = vrot.slane %v20715_v22, %v24054_v42  ;;  %v25084_v11 = vunpack.c.l.b16 %v3099_v26  ;;  %v3542_v3 = vsel %vm3367_vm1, %v25067_v61, %v3541_v50 }
 0x1b8   : > { %27971 = vst [vmem:[#allocation49_spill] sm:$0xff] %v25078_v31  ;;  %v20717_v9 = vld.sshfl [vmem:[%s24048_s11 + $0xfc] sm:$0x1 pattern:$0x75316420]  ;;  %v3141_v45 = vrot.slane %v20716_v55, %v24054_v42  ;;  %v25091_v17 = vunpack.c.l.b16 %v3113_v60  ;;  %v3543_v54 = vrot.slane %v25072_v20, 7 }
 0x1b9   : > { %27972 = vst [vmem:[#allocation50_spill] sm:$0xff] %v25084_v11  ;;  %v3545_v47 = vrot.slane %v25078_v31, 6  ;;  %22857 = vmatmul.mubr.bf16.gmra.mrb[4].mxu0 %v13034_v63  ;;  %v20718_v23 = vld.sshfl [vmem:[%s24048_s11 + $0xfd] sm:$0x1 pattern:$0x75316420]  ;;  %v3155_v8 = vrot.slane %v20717_v9, %v24054_v42  ;;  %v25097_v1 = vunpack.c.l.b16 %v3127_v39 }
 0x1ba   : > { %27973 = vst [vmem:[#allocation51_spill] sm:$0xff] %v25091_v17  ;;  %v3547_v34 = vrot.slane %v25084_v11, 5  ;;  %v3750_v12 = vrot.slane %v24261_v30, 6  ;;  %22860 = vmatprep.mubr.msk.bf16.mxu0 %vm23377_vm0, %v27921_v13  ;;  %v3169_v26 = vrot.slane %v20718_v23, %v24054_v42  ;;  %v25105_v50 = vunpack.c.l.b16 %v3141_v45 }
 0x1bb   : > { %27974 = vst [vmem:[#allocation52_spill] sm:$0xff] %v25097_v1  ;;  %v20719_v56 = vld.sshfl [vmem:[%s24048_s11 + $0xfe] sm:$0x1 pattern:$0x75316420]  ;;  %v3544_v40 = vsel %vm3370_vm2, %v3543_v54, %v3542_v3  ;;  %v3549_v22 = vrot.slane %v25091_v17, 4  ;;  %v25111_v55 = vunpack.c.l.b16 %v3155_v8 }
 0x1bc   : > { %27975 = vst [vmem:[#allocation53_spill] sm:$0xff] %v25105_v50  ;;  %v20720_v60 = vld.sshfl [vmem:[%s24048_s11 + $0xff] sm:$0x1 pattern:$0x75316420]  ;;  %v3183_v63 = vrot.slane %v20719_v56, %v24054_v42  ;;  %v3546_v30 = vsel %vm3373_vm3, %v3545_v47, %v3544_v40  ;;  %v3551_v39 = vrot.slane %v25097_v1, 3  ;;  %v25117_v45 = vunpack.c.l.b16 %v3169_v26 }
 0x1bd   : > { %27976 = vst [vmem:[#allocation54_spill] sm:$0xff] %v25111_v55  ;;  %v20721_v9 = vld.sshfl [vmem:[%s24048_s11 + $0x100] sm:$0x1 pattern:$0x75316420]  ;;  %v3197_v23 = vrot.slane %v20720_v60, %v24054_v42  ;;  %v3548_v3 = vsel %vm3376_vm4, %v3547_v34, %v3546_v30  ;;  %v3553_v54 = vrot.slane %v25105_v50, 2  ;;  %v3751_v60 = vsel %vm3370_vm2, %v3750_v12, %v3749_v5 }
 0x1be   : > { %27977 = vst [vmem:[#allocation55_spill] sm:$0xff] %v25117_v45  ;;  %v20722_v17 = vld.sshfl [vmem:[%s24048_s11 + $0x101] sm:$0x1 pattern:$0x75316420]  ;;  %v3211_v11 = vrot.slane %v20721_v9, %v24054_v42  ;;  %v25123_v56 = vunpack.c.l.b16 %v3183_v63  ;;  %v3550_v8 = vsel %vm3379_vm5, %v3549_v22, %v3548_v3  ;;  %v3555_v47 = vrot.slane %v25111_v55, 1 }
 0x1bf   : > { %v20723_v40 = vld.sshfl [vmem:[%s24048_s11 + $0x102] sm:$0x1 pattern:$0x75316420]  ;;  %v3225_v1 = vrot.slane %v20722_v17, %v24054_v42  ;;  %v25129_v26 = vunpack.c.l.b16 %v3197_v23  ;;  %v3552_v34 = vsel %vm3382_vm6, %v3551_v39, %v3550_v8 }
 0x1c0   : > { %27978 = vst [vmem:[#allocation56_spill] sm:$0xff] %v25123_v56  ;;  %v20724_v30 = vld.sshfl [vmem:[%s24048_s11 + $0x103] sm:$0x1 pattern:$0x75316420]  ;;  %v3239_v9 = vrot.slane %v20723_v40, %v24054_v42  ;;  %v25135_v63 = vunpack.c.l.b16 %v3211_v11  ;;  %v3554_v22 = vsel %vm3385_vm7, %v3553_v54, %v3552_v34  ;;  %v3556_v3 = vsel %vm3367_vm1, %v25117_v45, %v3555_v47 }
 0x1c1   : > { %27979 = vst [vmem:[#allocation57_spill] sm:$0xff] %v25129_v26  ;;  %v3253_v17 = vrot.slane %v20724_v30, %v24054_v42  ;;  %v25141_v55 = vunpack.c.l.b16 %v3225_v1  ;;  %v3557_v39 = vrot.slane %v25123_v56, 7  ;;  %v3559_v5 = vrot.slane %v25129_v26, 6 }
 0x1c2   : > { %27980 = vst [vmem:[#allocation58_spill] sm:$0xff] %v25135_v63  ;;  %v21645_v12 = vld.sshfl [vmem:[%s24048_s11 + $0x52] sm:$0x1 pattern:$0x75316420]  ;;  %v25146_v23 = vunpack.c.l.b16 %v3239_v9  ;;  %v3561_v11 = vrot.slane %v25135_v63, 5 }
 0x1c3   : > { %27981 = vst [vmem:[#allocation59_spill] sm:$0xff] %v25141_v55  ;;  %v21646_v8 = vld.sshfl [vmem:[%s24048_s11 + $0x53] sm:$0x1 pattern:$0x75316420]  ;;  %v11618_v54 = vrot.slane %v21645_v12, %v24054_v42  ;;  %v3752_v47 = vrot.slane %v24268_v19, 5  ;;  %v25152_v40 = vunpack.c.l.b16 %v3253_v17  ;;  %v3558_v1 = vsel %vm3370_vm2, %v3557_v39, %v3556_v3 }
 0x1c4   : > { %27982 = vst [vmem:[#allocation60_spill] sm:$0xff] %v25146_v23  ;;  %v3563_v34 = vrot.slane %v25141_v55, 4  ;;  %v21647_v30 = vld.sshfl [vmem:[%s24048_s11 + $0x54] sm:$0x1 pattern:$0x75316420]  ;;  %v11632_v26 = vrot.slane %v21646_v8, %v24054_v42  ;;  %v3560_v9 = vsel %vm3373_vm3, %v3559_v5, %v3558_v1 }
 0x1c5   : > { %27983 = vst [vmem:[#allocation61_spill] sm:$0xff] %v25152_v40  ;;  %v3565_v63 = vrot.slane %v25146_v23, 3  ;;  %v21648_v56 = vld.sshfl [vmem:[%s24048_s11 + $0x55] sm:$0x1 pattern:$0x75316420]  ;;  %v11646_v12 = vrot.slane %v21647_v30, %v24054_v42  ;;  %v12757_v45 = vunpack.c.l.b16 %v11618_v54  ;;  %v3562_v19 = vsel %vm3376_vm4, %v3561_v11, %v3560_v9 }
 0x1c6   : > { %v3567_v17 = vrot.slane %v25152_v40, 2  ;;  %v21649_v3 = vld.sshfl [vmem:[%s24048_s11 + $0x56] sm:$0x1 pattern:$0x75316420]  ;;  %v11660_v39 = vrot.slane %v21648_v56, %v24054_v42  ;;  %v12758_v55 = vunpack.c.l.b16 %v11632_v26  ;;  %v3564_v8 = vsel %vm3379_vm5, %v3563_v34, %v3562_v19 }
 0x1c7   : > { %v21650_v5 = vld.sshfl [vmem:[%s24048_s11 + $0x57] sm:$0x1 pattern:$0x75316420]  ;;  %v11674_v1 = vrot.slane %v21649_v3, %v24054_v42  ;;  %v12759_v23 = vunpack.c.l.b16 %v11646_v12  ;;  %v25170_v50 = vsel %vm3373_vm3, %v3752_v47, %v3751_v60  ;;  %v3566_v11 = vsel %vm3382_vm6, %v3565_v63, %v3564_v8 }
 0x1c8   : > { %v21651_v54 = vld.sshfl [vmem:[%s24048_s11 + $0x58] sm:$0x1 pattern:$0x75316420]  ;;  %v11688_v30 = vrot.slane %v21650_v5, %v24054_v42  ;;  %v12760_v9 = vunpack.c.l.b16 %v11660_v39  ;;  %v12893_v40 = vrot.slane %v12758_v55, 7  ;;  %v3568_v56 = vsel %vm3385_vm7, %v3567_v17, %v3566_v11 }
 0x1c9   : > { %v21652_v26 = vld.sshfl [vmem:[%s24048_s11 + $0x59] sm:$0x1 pattern:$0x75316420]  ;;  %v11702_v34 = vrot.slane %v21651_v54, %v24054_v42  ;;  %v12761_v19 = vunpack.c.l.b16 %v11674_v1  ;;  %v12895_v3 = vrot.slane %v12759_v23, 6  ;;  %v3575_v12 = vpack.c.b16 %v3568_v56, %v3554_v22 }
 0x1ca   : > { %v21653_v60 = vld.sshfl [vmem:[%s24048_s11 + $0x64] sm:$0x1 pattern:$0x75316420]  ;;  %v11716_v47 = vrot.slane %v21652_v26, %v24054_v42  ;;  %v12762_v31 = vunpack.c.l.b16 %v11688_v30  ;;  %v12894_v63 = vsel %vm3367_vm1, %v12893_v40, %v12757_v45  ;;  %v12897_v5 = vrot.slane %v12760_v9, 5 }
 0x1cb   : > { %v21654_v8 = vld.sshfl [vmem:[%s24048_s11 + $0x65] sm:$0x1 pattern:$0x75316420]  ;;  %v11730_v39 = vrot.slane %v21653_v60, %v24054_v42  ;;  %v12763_v55 = vunpack.c.l.b16 %v11702_v34  ;;  %v12896_v17 = vsel %vm3370_vm2, %v12895_v3, %v12894_v63  ;;  %22657 = vmatmul.mubr.bf16.gmra.mrb[24].mxu1 %v3575_v12  ;;  %v12899_v1 = vrot.slane %v12761_v19, 4 }
 0x1cc   : > { %v21655_v11 = vld.sshfl [vmem:[%s24048_s11 + $0x66] sm:$0x1 pattern:$0x75316420]  ;;  %v11744_v22 = vrot.slane %v21654_v8, %v24054_v42  ;;  %v12764_v23 = vunpack.c.l.b16 %v11716_v47  ;;  %v12901_v54 = vrot.slane %v12762_v31, 3  ;;  %v12898_v30 = vsel %vm3373_vm3, %v12897_v5, %v12896_v17  ;;  %22676 = vmatprep.mubr.msk.bf16.mxu1 %vm23377_vm0, %v27921_v13 }
 0x1cd   : > { %v21656_v56 = vld.sshfl [vmem:[%s24048_s11 + $0x67] sm:$0x1 pattern:$0x75316420]  ;;  %v11758_v45 = vrot.slane %v21655_v11, %v24054_v42  ;;  %v12765_v40 = vunpack.c.l.b16 %v11730_v39  ;;  %v12903_v26 = vrot.slane %v12763_v55, 2  ;;  %v12900_v12 = vsel %vm3376_vm4, %v12899_v1, %v12898_v30 }
 0x1ce   : > { %v21657_v9 = vld.sshfl [vmem:[%s24048_s11 + $0x68] sm:$0x1 pattern:$0x75316420]  ;;  %v11772_v34 = vrot.slane %v21656_v56, %v24054_v42  ;;  %v12766_v3 = vunpack.c.l.b16 %v11744_v22  ;;  %v12905_v19 = vrot.slane %v12764_v23, 1  ;;  %v12902_v63 = vsel %vm3379_vm5, %v12901_v54, %v12900_v12  ;;  %v23306_v54 = vld [vmem:[%s24045_s10 + $0x80] sm:$0xff]  }
 0x1cf   : > { %v21658_v31 = vld.sshfl [vmem:[%s24048_s11 + $0x69] sm:$0x1 pattern:$0x75316420]  ;;  %v11786_v60 = vrot.slane %v21657_v9, %v24054_v42  ;;  %v12767_v47 = vunpack.c.l.b16 %v11758_v45  ;;  %v3754_v8 = vrot.slane %v24273_v46, 4  ;;  %v12904_v5 = vsel %vm3382_vm6, %v12903_v26, %v12902_v63 }
 0x1d0   : > { %v21659_v39 = vld.sshfl [vmem:[%s24048_s11 + $0x6a] sm:$0x1 pattern:$0x75316420]  ;;  %v11800_v55 = vrot.slane %v21658_v31, %v24054_v42  ;;  %v12768_v17 = vunpack.c.l.b16 %v11772_v34  ;;  %v12907_v11 = vrot.slane %v12766_v3, 7  ;;  %v12906_v56 = vsel %vm3385_vm7, %v12905_v19, %v12904_v5 }
 0x1d1   : > { %v21660_v22 = vld.sshfl [vmem:[%s24048_s11 + $0x6b] sm:$0x1 pattern:$0x75316420]  ;;  %v11814_v23 = vrot.slane %v21659_v39, %v24054_v42  ;;  %v12769_v1 = vunpack.c.l.b16 %v11786_v60  ;;  %v12909_v45 = vrot.slane %v12767_v47, 6 }
 0x1d2   : > { %v11828_v46 = vrot.slane %v21660_v22, %v24054_v42  ;;  %v12770_v30 = vunpack.c.l.b16 %v11800_v55  ;;  %v12908_v9 = vsel %vm3367_vm1, %v12907_v11, %v12765_v40  ;;  %v12911_v34 = vrot.slane %v12768_v17, 5  ;;  %v21661_v12 = vld.sshfl [vmem:[%s24048_s11 + $0x76] sm:$0x1 pattern:$0x75316420] }
 0x1d3   : > { %v12771_v26 = vunpack.c.l.b16 %v11814_v23  ;;  %v12910_v3 = vsel %vm3370_vm2, %v12909_v45, %v12908_v9  ;;  %v12913_v31 = vrot.slane %v12769_v1, 4  ;;  %v21662_v63 = vld.sshfl [vmem:[%s24048_s11 + $0x77] sm:$0x1 pattern:$0x75316420]  ;;  %v11842_v60 = vrot.slane %v21661_v12, %v24054_v42  ;;  %v23308_v45 = vld [vmem:[%s24045_s10 + $0x88] sm:$0xff]  }
 0x1d4   : > { %v12772_v19 = vunpack.c.l.b16 %v11828_v46  ;;  %v12912_v47 = vsel %vm3373_vm3, %v12911_v34, %v12910_v3  ;;  %v12915_v39 = vrot.slane %v12770_v30, 3  ;;  %v27984_v55 = vpack.c.b16 %v24987_v59, %v24796_v37  ;;  %v21663_v40 = vld.sshfl [vmem:[%s24048_s11 + $0x78] sm:$0x1 pattern:$0x75316420] }
 0x1d5   : > { %v11856_v17 = vrot.slane %v21662_v63, %v24054_v42  ;;  %v12914_v5 = vsel %vm3376_vm4, %v12913_v31, %v12912_v47  ;;  %v12917_v11 = vrot.slane %v12771_v26, 2  ;;  %v21664_v22 = vld.sshfl [vmem:[%s24048_s11 + $0x79] sm:$0x1 pattern:$0x75316420]  ;;  %v11870_v23 = vrot.slane %v21663_v40, %v24054_v42 }
 0x1d6   : > { %22677 = vmatmul.mubr.bf16.vlgmr.msra.gmra.mrb[0].mxu1 %v27984_v55  ;;  %v12773_v1 = vunpack.c.l.b16 %v11842_v60  ;;  %v12916_v37 = vsel %vm3379_vm5, %v12915_v39, %v12914_v5  ;;  %v12919_v59 = vrot.slane %v12772_v19, 1  ;;  %v21665_v46 = vld.sshfl [vmem:[%s24048_s11 + $0x7a] sm:$0x1 pattern:$0x75316420]  ;;  %v11884_v30 = vrot.slane %v21664_v22, %v24054_v42 }
 0x1d7   : > { %22680 = vmatprep.mubr.msk.bf16.mxu1 %vm23377_vm0, %v27921_v13  ;;  %22705 = vmatpush3.bf16.msra.mxu1 %v23306_v54  ;;  %v12774_v9 = vunpack.c.l.b16 %v11856_v17  ;;  %v12918_v34 = vsel %vm3382_vm6, %v12917_v11, %v12916_v37  ;;  %v21666_v12 = vld.sshfl [vmem:[%s24048_s11 + $0x7b] sm:$0x1 pattern:$0x75316420]  ;;  %v11898_v26 = vrot.slane %v21665_v46, %v24054_v42  ;;  %v12775_v3 = vunpack.c.l.b16 %v11870_v23  ;;  %v23310_v11 = vld [vmem:[%s24045_s10 + $0x90] sm:$0xff]  }
 0x1d8   : > { %22706 = vmatprep.subr.bf16.mxu1 %v27921_v13  ;;  %v3755_v54 = vsel %vm3376_vm4, %v3754_v8, %v25170_v50  ;;  %v12920_v31 = vsel %vm3385_vm7, %v12919_v59, %v12918_v34  ;;  %v21667_v63 = vld.sshfl [vmem:[%s24048_s11 + $0x7c] sm:$0x1 pattern:$0x75316420]  ;;  %v11912_v60 = vrot.slane %v21666_v12, %v24054_v42  ;;  %v12776_v19 = vunpack.c.l.b16 %v11884_v30 }
 0x1d9   : > { %v12921_v47 = vrot.slane %v12774_v9, 7  ;;  %v13035_v39 = vpack.c.b16 %v12920_v31, %v12906_v56  ;;  %v21668_v55 = vld.sshfl [vmem:[%s24048_s11 + $0x7d] sm:$0x1 pattern:$0x75316420]  ;;  %v11926_v40 = vrot.slane %v21667_v63, %v24054_v42  ;;  %v12777_v17 = vunpack.c.l.b16 %v11898_v26 }
 0x1da   : > { %v12923_v5 = vrot.slane %v12775_v3, 6  ;;  %v21669_v22 = vld.sshfl [vmem:[%s24048_s11 + $0x9a] sm:$0x1 pattern:$0x75316420]  ;;  %v11940_v50 = vrot.slane %v21668_v55, %v24054_v42  ;;  %v12778_v8 = vunpack.c.l.b16 %v11912_v60  ;;  %v12925_v37 = vrot.slane %v12776_v19, 5 }
 0x1db   : > { %22707 = vmatpush3.bf16.msra.mxu1 %v23308_v45  ;;  %v12922_v23 = vsel %vm3367_vm1, %v12921_v47, %v12773_v1  ;;  %22861 = vmatmul.mubr.bf16.gmra.mrb[8].mxu0 %v13035_v39  ;;  %v21670_v56 = vld.sshfl [vmem:[%s24048_s11 + $0x9b] sm:$0x1 pattern:$0x75316420]  ;;  %v11954_v59 = vrot.slane %v21669_v22, %v24054_v42  ;;  %v12779_v46 = vunpack.c.l.b16 %v11926_v40  ;;  %v12927_v30 = vrot.slane %v12777_v17, 4 }
 0x1dc   : > { %22708 = vmatprep.subr.bf16.mxu1 %v27921_v13  ;;  %v12924_v45 = vsel %vm3370_vm2, %v12923_v5, %v12922_v23  ;;  %22864 = vmatprep.mubr.msk.bf16.mxu0 %vm23377_vm0, %v27921_v13  ;;  %v21671_v9 = vld.sshfl [vmem:[%s24048_s11 + $0x9c] sm:$0x1 pattern:$0x75316420]  ;;  %v11968_v34 = vrot.slane %v21670_v56, %v24054_v42  ;;  %v12780_v1 = vunpack.c.l.b16 %v11940_v50  ;;  %v12929_v26 = vrot.slane %v12778_v8, 3 }
 0x1dd   : > { %v12926_v12 = vsel %vm3373_vm3, %v12925_v37, %v12924_v45  ;;  %v21672_v3 = vld.sshfl [vmem:[%s24048_s11 + $0x9d] sm:$0x1 pattern:$0x75316420]  ;;  %v11982_v31 = vrot.slane %v21671_v9, %v24054_v42  ;;  %v12781_v63 = vunpack.c.l.b16 %v11954_v59  ;;  %v12931_v19 = vrot.slane %v12779_v46, 2 }
 0x1de   : > { %v12928_v60 = vsel %vm3376_vm4, %v12927_v30, %v12926_v12  ;;  %v23312_v47 = vld [vmem:[%s24045_s10 + $0x98] sm:$0xff]   ;;  %v11996_v55 = vrot.slane %v21672_v3, %v24054_v42  ;;  %v12782_v40 = vunpack.c.l.b16 %v11968_v34  ;;  %v12933_v5 = vrot.slane %v12780_v1, 1  ;;  %v21675_v37 = vld.sshfl [vmem:[%s24048_s11 + $0xa0] sm:$0x1 pattern:$0x75316420] }
 0x1df   : > { %22709 = vmatpush3.bf16.msra.mxu1 %v23310_v11  ;;  %v21673_v39 = vld.sshfl [vmem:[%s24048_s11 + $0x9e] sm:$0x1 pattern:$0x75316420]  ;;  %v12930_v17 = vsel %vm3379_vm5, %v12929_v26, %v12928_v60  ;;  %v12783_v8 = vunpack.c.l.b16 %v11982_v31  ;;  %v3756_v11 = vrot.slane %v24279_v57, 3  ;;  %v12038_v9 = vrot.slane %v21675_v37, %v24054_v42  ;;  %v23314_v26 = vld [vmem:[%s24045_s10 + $0xa0] sm:$0xff]  }
 0x1e0   : > { %22710 = vmatprep.subr.bf16.mxu1 %v27921_v13  ;;  %v21674_v22 = vld.sshfl [vmem:[%s24048_s11 + $0x9f] sm:$0x1 pattern:$0x75316420]  ;;  %v12010_v50 = vrot.slane %v21673_v39, %v24054_v42  ;;  %v12932_v23 = vsel %vm3382_vm6, %v12931_v19, %v12930_v17  ;;  %v12784_v59 = vunpack.c.l.b16 %v11996_v55  ;;  %v12935_v45 = vrot.slane %v12782_v40, 7 }
 0x1e1   : > { %v12024_v56 = vrot.slane %v21674_v22, %v24054_v42  ;;  %v12934_v46 = vsel %vm3385_vm7, %v12933_v5, %v12932_v23  ;;  %v21676_v30 = vld.sshfl [vmem:[%s24048_s11 + $0xa1] sm:$0x1 pattern:$0x75316420]  ;;  %v12937_v1 = vrot.slane %v12783_v8, 6  ;;  %v3757_v12 = vsel %vm3379_vm5, %v3756_v11, %v3755_v54 }
 0x1e2   : > { %v12785_v34 = vunpack.c.l.b16 %v12010_v50  ;;  %v12052_v57 = vrot.slane %v21676_v30, %v24054_v42  ;;  %v12936_v31 = vsel %vm3367_vm1, %v12935_v45, %v12781_v63  ;;  %v12939_v60 = vrot.slane %v12784_v59, 5  ;;  %v21677_v22 = vld.sshfl [vmem:[%s24048_s11 + $0xac] sm:$0x1 pattern:$0x75316420] }
 0x1e3   : > { %22711 = vmatpush3.bf16.msra.mxu1 %v23312_v47  ;;  %v12786_v3 = vunpack.c.l.b16 %v12024_v56  ;;  %v12787_v19 = vunpack.c.l.b16 %v12038_v9  ;;  %v12938_v39 = vsel %vm3370_vm2, %v12937_v1, %v12936_v31  ;;  %v3758_v54 = vrot.slane %v24284_v62, 2  ;;  %v23316_v47 = vld [vmem:[%s24045_s10 + $0xa8] sm:$0xff]   ;;  %v21681_v9 = vld.sshfl [vmem:[%s24048_s11 + $0xb0] sm:$0x1 pattern:$0x75316420] }
 0x1e4   : > { %22712 = vmatprep.subr.bf16.mxu1 %v27921_v13  ;;  %v12941_v55 = vrot.slane %v12785_v34, 4  ;;  %v12788_v40 = vunpack.c.l.b16 %v12052_v57  ;;  %v12940_v17 = vsel %vm3373_vm3, %v12939_v60, %v12938_v39  ;;  %v3760_v63 = vrot.slane %v24291_v14, 1  ;;  %v21678_v37 = vld.sshfl [vmem:[%s24048_s11 + $0xad] sm:$0x1 pattern:$0x75316420] }
 0x1e5   : > { %v12943_v5 = vrot.slane %v12786_v3, 3  ;;  %v12945_v8 = vrot.slane %v12787_v19, 2  ;;  %v3759_v23 = vsel %vm3382_vm6, %v3758_v54, %v3757_v12  ;;  %v3762_v11 = vrot.slane %v24307_v44, 7 }
 0x1e6   : > { %v12942_v50 = vsel %vm3376_vm4, %v12941_v55, %v12940_v17  ;;  %v21679_v56 = vld.sshfl [vmem:[%s24048_s11 + $0xae] sm:$0x1 pattern:$0x75316420]  ;;  %v12947_v45 = vrot.slane %v12788_v40, 1  ;;  %v3761_v30 = vsel %vm3385_vm7, %v3760_v63, %v3759_v23  ;;  %v3764_v14 = vrot.slane %v24313_v58, 6 }
 0x1e7   : > { %v21680_v62 = vld.sshfl [vmem:[%s24048_s11 + $0xaf] sm:$0x1 pattern:$0x75316420]  ;;  %22713 = vmatpush3.bf16.msra.mxu1 %v23314_v26  ;;  %v12944_v59 = vsel %vm3379_vm5, %v12943_v5, %v12942_v50  ;;  %v3763_v44 = vsel %vm3367_vm1, %v3762_v11, %v24299_v36  ;;  %v3766_v1 = vrot.slane %v24320_v18, 5  ;;  %v3768_v12 = vrot.slane %v24326_v24, 4 }
 0x1e8   : > { %22714 = vmatprep.subr.bf16.mxu1 %v27921_v13  ;;  %v12946_v34 = vsel %vm3382_vm6, %v12945_v8, %v12944_v59  ;;  %v21682_v26 = vld.sshfl [vmem:[%s24048_s11 + $0xb1] sm:$0x1 pattern:$0x75316420]  ;;  %v3765_v3 = vsel %vm3370_vm2, %v3764_v14, %v3763_v44  ;;  %v3770_v58 = vrot.slane %v24331_v43, 3  ;;  %v3772_v31 = vrot.slane %v24337_v29, 2 }
 0x1e9   : > { %v12948_v57 = vsel %vm3385_vm7, %v12947_v45, %v12946_v34  ;;  %v21683_v60 = vld.sshfl [vmem:[%s24048_s11 + $0xb2] sm:$0x1 pattern:$0x75316420]  ;;  %v3767_v39 = vsel %vm3373_vm3, %v3766_v1, %v3765_v3  ;;  %v3774_v36 = vrot.slane %v24343_v10, 1  ;;  %v12066_v18 = vrot.slane %v21677_v22, %v24054_v42 }
 0x1ea   : > { %v13036_v19 = vpack.c.b16 %v12948_v57, %v12934_v46  ;;  %v21684_v55 = vld.sshfl [vmem:[%s24048_s11 + $0xb3] sm:$0x1 pattern:$0x75316420]  ;;  %v3769_v24 = vsel %vm3376_vm4, %v3768_v12, %v3767_v39  ;;  %v12080_v40 = vrot.slane %v21678_v37, %v24054_v42  ;;  %v12094_v43 = vrot.slane %v21679_v56, %v24054_v42 }
 0x1eb   : > { %22715 = vmatpush3.bf16.msra.mxu1 %v23316_v47  ;;  %v21685_v54 = vld.sshfl [vmem:[%s24048_s11 + $0xbe] sm:$0x1 pattern:$0x75316420]  ;;  %v12108_v29 = vrot.slane %v21680_v62, %v24054_v42  ;;  %v3771_v10 = vsel %vm3379_vm5, %v3770_v58, %v3769_v24  ;;  %v12122_v17 = vrot.slane %v21681_v9, %v24054_v42  ;;  %v12136_v47 = vrot.slane %v21682_v26, %v24054_v42 }
 0x1ec   : > { %22716 = vmatprep.subr.bf16.mxu1 %v27921_v13  ;;  %22865 = vmatmul.mubr.bf16.gmra.mrb[12].mxu0 %v13036_v19  ;;  %v21686_v46 = vld.sshfl [vmem:[%s24048_s11 + $0xbf] sm:$0x1 pattern:$0x75316420]  ;;  %v12150_v5 = vrot.slane %v21683_v60, %v24054_v42  ;;  %v3773_v63 = vsel %vm3382_vm6, %v3772_v31, %v3771_v10  ;;  %v12164_v50 = vrot.slane %v21684_v55, %v24054_v42  ;;  %v12789_v62 = vunpack.c.l.b16 %v12066_v18 }
 0x1ed   : > { %22868 = vmatprep.mubr.msk.bf16.mxu0 %vm23377_vm0, %v27921_v13  ;;  %v21687_v22 = vld.sshfl [vmem:[%s24048_s11 + $0xc0] sm:$0x1 pattern:$0x75316420]  ;;  %v12178_v8 = vrot.slane %v21685_v54, %v24054_v42  ;;  %v12192_v23 = vrot.slane %v21686_v46, %v24054_v42  ;;  %v3775_v11 = vsel %vm3385_vm7, %v3774_v36, %v3773_v63  ;;  %v12790_v59 = vunpack.c.l.b16 %v12080_v40 }
 0x1ee   : > { %v21688_v37 = vld.sshfl [vmem:[%s24048_s11 + $0xc1] sm:$0x1 pattern:$0x75316420]  ;;  %v12206_v56 = vrot.slane %v21687_v22, %v24054_v42  ;;  %v3917_v45 = vpack.c.b16 %v3775_v11, %v3761_v30  ;;  %v12791_v34 = vunpack.c.l.b16 %v12094_v43  ;;  %v12792_v44 = vunpack.c.l.b16 %v12108_v29 }
 0x1ef   : > { %v21689_v14 = vld.sshfl [vmem:[%s24048_s11 + $0xc2] sm:$0x1 pattern:$0x75316420]  ;;  %v12220_v9 = vrot.slane %v21688_v37, %v24054_v42  ;;  %v12793_v26 = vunpack.c.l.b16 %v12122_v17  ;;  %v12794_v57 = vunpack.c.l.b16 %v12136_v47  ;;  %v12795_v3 = vunpack.c.l.b16 %v12150_v5  ;;  %v23318_v5 = vld [vmem:[%s24045_s10 + $0xb0] sm:$0xff]  }
 0x1f0   : > { %v21690_v1 = vld.sshfl [vmem:[%s24048_s11 + $0xc3] sm:$0x1 pattern:$0x75316420]  ;;  %v12234_v12 = vrot.slane %v21689_v14, %v24054_v42  ;;  %22681 = vmatmul.mubr.bf16.gmra.mrb[4].mxu1 %v3917_v45  ;;  %v12796_v60 = vunpack.c.l.b16 %v12164_v50  ;;  %v12797_v19 = vunpack.c.l.b16 %v12178_v8  ;;  %v12798_v30 = vunpack.c.l.b16 %v12192_v23  ;;  %v23319_v45 = vld [vmem:[%s24045_s10 + $0xb8] sm:$0xff]  }
 0x1f1   : > { %v21691_v58 = vld.sshfl [vmem:[%s24048_s11 + $0xc4] sm:$0x1 pattern:$0x75316420]  ;;  %v12248_v31 = vrot.slane %v21690_v1, %v24054_v42  ;;  %v12799_v55 = vunpack.c.l.b16 %v12206_v56  ;;  %v12800_v18 = vunpack.c.l.b16 %v12220_v9  ;;  %22684 = vmatprep.mubr.msk.bf16.mxu1 %vm23377_vm0, %v27921_v13  ;;  %v12949_v43 = vrot.slane %v12790_v59, 7  ;;  %22717 = vmatpush3.bf16.msra.mxu1 %v23318_v5 }
 0x1f2   : > { %v21692_v39 = vld.sshfl [vmem:[%s24048_s11 + $0xc5] sm:$0x1 pattern:$0x75316420]  ;;  %v12262_v36 = vrot.slane %v21691_v58, %v24054_v42  ;;  %v12801_v24 = vunpack.c.l.b16 %v12234_v12  ;;  %v12951_v29 = vrot.slane %v12791_v34, 6  ;;  %v12953_v46 = vrot.slane %v12792_v44, 5  ;;  %22718 = vmatprep.subr.bf16.mxu1 %v27921_v13 }
 0x1f3   : > { %v12276_v54 = vrot.slane %v21692_v39, %v24054_v42  ;;  %v12802_v40 = vunpack.c.l.b16 %v12248_v31  ;;  %v12955_v17 = vrot.slane %v12793_v26, 4  ;;  %v12957_v47 = vrot.slane %v12794_v57, 3  ;;  %v21697_v5 = vld.sshfl [vmem:[%s24048_s11 + $0xd4] sm:$0x1 pattern:$0x75316420] }
 0x1f4   : > { %v12803_v10 = vunpack.c.l.b16 %v12262_v36  ;;  %v12950_v22 = vsel %vm3367_vm1, %v12949_v43, %v12789_v62  ;;  %v12959_v50 = vrot.slane %v12795_v3, 2  ;;  %v12961_v8 = vrot.slane %v12796_v60, 1 }
 0x1f5   : > { %v12804_v63 = vunpack.c.l.b16 %v12276_v54  ;;  %v12952_v23 = vsel %vm3370_vm2, %v12951_v29, %v12950_v22  ;;  %v12963_v11 = vrot.slane %v12798_v30, 7  ;;  %v12965_v37 = vrot.slane %v12799_v55, 6  ;;  %22719 = vmatpush3.bf16.msra.mxu1 %v23319_v45  ;;  %v27985_v55 = vld [vmem:[#allocation5_spill] sm:$0xff]  ;;  %v27986_v29 = vld [vmem:[#allocation7_spill] sm:$0xff] }
 0x1f6   : > { %v12967_v56 = vrot.slane %v12800_v18, 5  ;;  %v12954_v59 = vsel %vm3373_vm3, %v12953_v46, %v12952_v23  ;;  %v12969_v14 = vrot.slane %v12801_v24, 4  ;;  %v12971_v9 = vrot.slane %v12802_v40, 3  ;;  %22748 = vmatprep.subr.bf16.mxu1 %v27921_v13  ;;  %v27987_v46 = vld [vmem:[#allocation8_spill] sm:$0xff]  ;;  %v27989_v23 = vld [vmem:[#allocation10_spill] sm:$0xff] }
 0x1f7   : > { %v12973_v34 = vrot.slane %v12803_v10, 2  ;;  %v12956_v44 = vsel %vm3376_vm4, %v12955_v17, %v12954_v59  ;;  %v12964_v62 = vsel %vm3367_vm1, %v12963_v11, %v12797_v19  ;;  %v12975_v1 = vrot.slane %v12804_v63, 1  ;;  %v21693_v24 = vld.sshfl [vmem:[%s24048_s11 + $0xd0] sm:$0x1 pattern:$0x75316420] }
 0x1f8   : > { %v3776_v12 = vrot.slane %v24416_v35, 7  ;;  %v12958_v26 = vsel %vm3379_vm5, %v12957_v47, %v12956_v44  ;;  %v12966_v57 = vsel %vm3370_vm2, %v12965_v37, %v12964_v62  ;;  %v3778_v3 = vrot.slane %v24422_v0, 6  ;;  %v21694_v54 = vld.sshfl [vmem:[%s24048_s11 + $0xd1] sm:$0x1 pattern:$0x75316420] }
 0x1f9   : > { %v3780_v58 = vrot.slane %v24428_v15, 5  ;;  %v12960_v31 = vsel %vm3382_vm6, %v12959_v50, %v12958_v26  ;;  %v12968_v60 = vsel %vm3373_vm3, %v12967_v56, %v12966_v57  ;;  %v3782_v35 = vrot.slane %v24433_v27, 4  ;;  %v21695_v40 = vld.sshfl [vmem:[%s24048_s11 + $0xd2] sm:$0x1 pattern:$0x75316420] }
 0x1fa   : > { %v3777_v19 = vsel %vm3367_vm1, %v3776_v12, %v24410_v48  ;;  %v12962_v30 = vsel %vm3385_vm7, %v12961_v8, %v12960_v31  ;;  %v12970_v0 = vsel %vm3376_vm4, %v12969_v14, %v12968_v60  ;;  %v3784_v39 = vrot.slane %v24439_v21, 3  ;;  %v21696_v47 = vld.sshfl [vmem:[%s24048_s11 + $0xd3] sm:$0x1 pattern:$0x75316420]  ;;  %v27988_v50 = vld [vmem:[#allocation9_spill] sm:$0xff] }
 0x1fb   : > { %v3779_v15 = vsel %vm3370_vm2, %v3778_v3, %v3777_v19  ;;  %v12972_v36 = vsel %vm3379_vm5, %v12971_v9, %v12970_v0  ;;  %v3786_v27 = vrot.slane %v24445_v28, 2  ;;  %v3788_v18 = vrot.slane %v27985_v55, 1  ;;  %v21698_v28 = vld.sshfl [vmem:[%s24048_s11 + $0xd5] sm:$0x1 pattern:$0x75316420] }
 0x1fc   : > { %v3781_v48 = vsel %vm3373_vm3, %v3780_v58, %v3779_v15  ;;  %v12974_v43 = vsel %vm3382_vm6, %v12973_v34, %v12972_v36  ;;  %v3790_v10 = vrot.slane %v27986_v29, 7  ;;  %v3792_v17 = vrot.slane %v27987_v46, 6  ;;  %v21699_v37 = vld.sshfl [vmem:[%s24048_s11 + $0xd6] sm:$0x1 pattern:$0x75316420] }
 0x1fd   : > { %v3783_v21 = vsel %vm3376_vm4, %v3782_v35, %v3781_v48  ;;  %v12976_v63 = vsel %vm3385_vm7, %v12975_v1, %v12974_v43  ;;  %v3794_v8 = vrot.slane %v27988_v50, 5  ;;  %v3796_v11 = vrot.slane %v27989_v23, 4  ;;  %v21700_v56 = vld.sshfl [vmem:[%s24048_s11 + $0xd7] sm:$0x1 pattern:$0x75316420] }
 0x1fe   : > { %v3785_v22 = vsel %vm3379_vm5, %v3784_v39, %v3783_v21  ;;  %v21701_v45 = vld.sshfl [vmem:[%s24048_s11 + $0xe2] sm:$0x1 pattern:$0x75316420]  ;;  %v13037_v59 = vpack.c.b16 %v12976_v63, %v12962_v30  ;;  %v27990_v9 = vld [vmem:[#allocation6_spill] sm:$0xff]  ;;  %v27991_v44 = vld [vmem:[#allocation11_spill] sm:$0xff]  ;;  %v12290_v30 = vrot.slane %v21693_v24, %v24054_v42  ;;  %v12304_v0 = vrot.slane %v21694_v54, %v24054_v42 }
 0x1ff   : > { %v3787_v14 = vsel %vm3382_vm6, %v3786_v27, %v3785_v22  ;;  %v3791_v34 = vsel %vm3367_vm1, %v3790_v10, %v27990_v9  ;;  %v3798_v62 = vrot.slane %v27991_v44, 3  ;;  %v21702_v1 = vld.sshfl [vmem:[%s24048_s11 + $0xe3] sm:$0x1 pattern:$0x75316420]  ;;  %v27993_v58 = vld [vmem:[#allocation13_spill] sm:$0xff]  ;;  %v12318_v15 = vrot.slane %v21695_v40, %v24054_v42 }
 0x200   : > { %v3789_v12 = vsel %vm3385_vm7, %v3788_v18, %v3787_v14  ;;  %v3793_v26 = vsel %vm3370_vm2, %v3792_v17, %v3791_v34  ;;  %v27992_v57 = vld [vmem:[#allocation12_spill] sm:$0xff]  ;;  %v3802_v31 = vrot.slane %v27993_v58, 1  ;;  %22869 = vmatmul.mubr.bf16.gmra.mrb[16].mxu0 %v13037_v59  ;;  %v12332_v48 = vrot.slane %v21696_v47, %v24054_v42  ;;  %v21707_v29 = vld.sshfl [vmem:[%s24048_s11 + $0xe8] sm:$0x1 pattern:$0x75316420] }
 0x201   : > { %v3800_v3 = vrot.slane %v27992_v57, 2  ;;  %v21703_v60 = vld.sshfl [vmem:[%s24048_s11 + $0xe4] sm:$0x1 pattern:$0x75316420]  ;;  %v3795_v19 = vsel %vm3373_vm3, %v3794_v8, %v3793_v26  ;;  %22872 = vmatprep.mubr.msk.bf16.mxu0 %vm23377_vm0, %v27921_v13  ;;  %v12346_v27 = vrot.slane %v21697_v5, %v24054_v42  ;;  %v12360_v55 = vrot.slane %v21698_v28, %v24054_v42 }
 0x202   : > { %v21704_v35 = vld.sshfl [vmem:[%s24048_s11 + $0xe5] sm:$0x1 pattern:$0x75316420]  ;;  %v3797_v39 = vsel %vm3376_vm4, %v3796_v11, %v3795_v19  ;;  %v12374_v54 = vrot.slane %v21699_v37, %v24054_v42  ;;  %v12388_v40 = vrot.slane %v21700_v56, %v24054_v42  ;;  %v12402_v43 = vrot.slane %v21701_v45, %v24054_v42 }
 0x203   : > { %v21705_v36 = vld.sshfl [vmem:[%s24048_s11 + $0xe6] sm:$0x1 pattern:$0x75316420]  ;;  %v3799_v18 = vsel %vm3379_vm5, %v3798_v62, %v3797_v39  ;;  %v12416_v10 = vrot.slane %v21702_v1, %v24054_v42  ;;  %v12430_v46 = vrot.slane %v21703_v60, %v24054_v42  ;;  %v12444_v17 = vrot.slane %v21704_v35, %v24054_v42 }
 0x204   : > { %v21706_v24 = vld.sshfl [vmem:[%s24048_s11 + $0xe7] sm:$0x1 pattern:$0x75316420]  ;;  %v3801_v21 = vsel %vm3382_vm6, %v3800_v3, %v3799_v18  ;;  %v12458_v28 = vrot.slane %v21705_v36, %v24054_v42  ;;  %v12486_v22 = vrot.slane %v21707_v29, %v24054_v42  ;;  %v12805_v23 = vunpack.c.l.b16 %v12290_v30 }
 0x205   : > { %v3803_v47 = vsel %vm3385_vm7, %v3802_v31, %v3801_v21  ;;  %v21708_v5 = vld.sshfl [vmem:[%s24048_s11 + $0xe9] sm:$0x1 pattern:$0x75316420]  ;;  %v12472_v63 = vrot.slane %v21706_v24, %v24054_v42  ;;  %v12806_v11 = vunpack.c.l.b16 %v12304_v0  ;;  %v12807_v37 = vunpack.c.l.b16 %v12318_v15 }
 0x206   : > { %v3918_v50 = vpack.c.b16 %v3803_v47, %v3789_v12  ;;  %v12500_v8 = vrot.slane %v21708_v5, %v24054_v42  ;;  %v12808_v56 = vunpack.c.l.b16 %v12332_v48  ;;  %v12809_v45 = vunpack.c.l.b16 %v12346_v27 }
 0x207   : > { %v12810_v59 = vunpack.c.l.b16 %v12360_v55  ;;  %v12811_v14 = vunpack.c.l.b16 %v12374_v54  ;;  %v12812_v9 = vunpack.c.l.b16 %v12388_v40  ;;  %v12813_v34 = vunpack.c.l.b16 %v12402_v43 }
 0x208   : > { %22685 = vmatmul.mubr.bf16.gmra.mrb[8].mxu1 %v3918_v50  ;;  %v12814_v44 = vunpack.c.l.b16 %v12416_v10  ;;  %v12815_v62 = vunpack.c.l.b16 %v12430_v46  ;;  %v12816_v1 = vunpack.c.l.b16 %v12444_v17  ;;  %v12817_v26 = vunpack.c.l.b16 %v12458_v28  ;;  %v27994_v46 = vld [vmem:[#allocation15_spill] sm:$0xff]  ;;  %v27995_v28 = vld [vmem:[#allocation16_spill] sm:$0xff] }
 0x209   : > { %v12818_v57 = vunpack.c.l.b16 %v12472_v63  ;;  %22688 = vmatprep.mubr.msk.bf16.mxu1 %vm23377_vm0, %v27921_v13  ;;  %v12819_v12 = vunpack.c.l.b16 %v12486_v22  ;;  %v12820_v3 = vunpack.c.l.b16 %v12500_v8  ;;  %v12977_v58 = vrot.slane %v12806_v11, 7  ;;  %v27996_v22 = vld [vmem:[#allocation17_spill] sm:$0xff]  ;;  %v27997_v11 = vld [vmem:[#allocation14_spill] sm:$0xff] }
 0x20a   : > { %v12979_v31 = vrot.slane %v12807_v37, 6  ;;  %v12981_v60 = vrot.slane %v12808_v56, 5  ;;  %v12983_v19 = vrot.slane %v12809_v45, 4  ;;  %v12985_v35 = vrot.slane %v12810_v59, 3  ;;  %v27998_v37 = vld [vmem:[#allocation18_spill] sm:$0xff] }
 0x20b   : > { %v12987_v30 = vrot.slane %v12811_v14, 2  ;;  %v12978_v0 = vsel %vm3367_vm1, %v12977_v58, %v12805_v23  ;;  %v12989_v15 = vrot.slane %v12812_v9, 1  ;;  %v12991_v39 = vrot.slane %v12814_v44, 7  ;;  %v27999_v9 = vld [vmem:[#allocation19_spill] sm:$0xff] }
 0x20c   : > { %v12993_v36 = vrot.slane %v12815_v62, 6  ;;  %v12980_v48 = vsel %vm3370_vm2, %v12979_v31, %v12978_v0  ;;  %v12995_v27 = vrot.slane %v12816_v1, 5  ;;  %v12997_v55 = vrot.slane %v12817_v26, 4  ;;  %v28002_v0 = vld [vmem:[#allocation23_spill] sm:$0xff] }
 0x20d   : > { %v12999_v18 = vrot.slane %v12818_v57, 3  ;;  %v12982_v24 = vsel %vm3373_vm3, %v12981_v60, %v12980_v48  ;;  %v12992_v54 = vsel %vm3367_vm1, %v12991_v39, %v12813_v34  ;;  %v13001_v40 = vrot.slane %v12819_v12, 2  ;;  %v21709_v44 = vld.sshfl [vmem:[%s24048_s11 + $0xf4] sm:$0x1 pattern:$0x75316420] }
 0x20e   : > { %v13003_v43 = vrot.slane %v12820_v3, 1  ;;  %v12984_v21 = vsel %vm3376_vm4, %v12983_v19, %v12982_v24  ;;  %v12994_v29 = vsel %vm3370_vm2, %v12993_v36, %v12992_v54  ;;  %v3804_v10 = vrot.slane %v24564_v49, 7  ;;  %v28000_v57 = vld [vmem:[#allocation21_spill] sm:$0xff]  ;;  %v28004_v24 = vld [vmem:[#allocation24_spill] sm:$0xff] }
 0x20f   : > { %v3806_v17 = vrot.slane %v27994_v46, 6  ;;  %v12986_v47 = vsel %vm3379_vm5, %v12985_v35, %v12984_v21  ;;  %v12996_v5 = vsel %vm3373_vm3, %v12995_v27, %v12994_v29  ;;  %v3808_v63 = vrot.slane %v27995_v28, 5  ;;  %v21710_v3 = vld.sshfl [vmem:[%s24048_s11 + $0xf5] sm:$0x1 pattern:$0x75316420] }
 0x210   : > { %v3810_v50 = vrot.slane %v27996_v22, 4  ;;  %v12988_v8 = vsel %vm3382_vm6, %v12987_v30, %v12986_v47  ;;  %v12998_v23 = vsel %vm3376_vm4, %v12997_v55, %v12996_v5  ;;  %v3805_v49 = vsel %vm3367_vm1, %v3804_v10, %v27997_v11  ;;  %v21711_v58 = vld.sshfl [vmem:[%s24048_s11 + $0xf6] sm:$0x1 pattern:$0x75316420]  ;;  %v28003_v55 = vld [vmem:[#allocation20_spill] sm:$0xff] }
 0x211   : > { %v3812_v56 = vrot.slane %v27998_v37, 3  ;;  %v12990_v45 = vsel %vm3385_vm7, %v12989_v15, %v12988_v8  ;;  %v13000_v59 = vsel %vm3379_vm5, %v12999_v18, %v12998_v23  ;;  %v3807_v14 = vsel %vm3370_vm2, %v3806_v17, %v3805_v49  ;;  %v21712_v31 = vld.sshfl [vmem:[%s24048_s11 + $0xf7] sm:$0x1 pattern:$0x75316420]  ;;  %v28005_v46 = vld [vmem:[#allocation25_spill] sm:$0xff] }
 0x212   : > { %v3814_v34 = vrot.slane %v27999_v9, 2  ;;  %v13002_v62 = vsel %vm3382_vm6, %v13001_v40, %v13000_v59  ;;  %v3809_v1 = vsel %vm3373_vm3, %v3808_v63, %v3807_v14  ;;  %v3816_v26 = vrot.slane %v24598_v6, 1  ;;  %v28001_v35 = vld [vmem:[#allocation22_spill] sm:$0xff]  ;;  %v28007_v23 = vld [vmem:[#allocation27_spill] sm:$0xff] }
 0x213   : > { %v3818_v12 = vrot.slane %v28000_v57, 7  ;;  %v13004_v60 = vsel %vm3385_vm7, %v13003_v43, %v13002_v62  ;;  %v3811_v19 = vsel %vm3376_vm4, %v3810_v50, %v3809_v1  ;;  %v3820_v30 = vrot.slane %v28001_v35, 6  ;;  %v21713_v39 = vld.sshfl [vmem:[%s24048_s11 + $0xf8] sm:$0x1 pattern:$0x75316420] }
 0x214   : > { %v3822_v15 = vrot.slane %v28002_v0, 5  ;;  %v21714_v6 = vld.sshfl [vmem:[%s24048_s11 + $0xf9] sm:$0x1 pattern:$0x75316420]  ;;  %v13038_v48 = vpack.c.b16 %v13004_v60, %v12990_v45  ;;  %v3813_v27 = vsel %vm3379_vm5, %v3812_v56, %v3811_v19  ;;  %v3824_v54 = vrot.slane %v28004_v24, 4 }
 0x215   : > { %v21715_v36 = vld.sshfl [vmem:[%s24048_s11 + $0xfa] sm:$0x1 pattern:$0x75316420]  ;;  %v3819_v18 = vsel %vm3367_vm1, %v3818_v12, %v28003_v55  ;;  %v3815_v29 = vsel %vm3382_vm6, %v3814_v34, %v3813_v27  ;;  %v3826_v17 = vrot.slane %v28005_v46, 3  ;;  %v28006_v47 = vld [vmem:[#allocation26_spill] sm:$0xff]  ;;  %v12514_v37 = vrot.slane %v21709_v44, %v24054_v42 }
 0x216   : > { %v21716_v40 = vld.sshfl [vmem:[%s24048_s11 + $0xfb] sm:$0x1 pattern:$0x75316420]  ;;  %v3821_v10 = vsel %vm3370_vm2, %v3820_v30, %v3819_v18  ;;  %v3828_v5 = vrot.slane %v28006_v47, 2  ;;  %22873 = vmatmul.mubr.bf16.gmra.mrb[20].mxu0 %v13038_v48  ;;  %v3817_v50 = vsel %vm3385_vm7, %v3816_v26, %v3815_v29  ;;  %v3830_v11 = vrot.slane %v28007_v23, 1 }
 0x217   : > { %v21717_v43 = vld.sshfl [vmem:[%s24048_s11 + $0x106] sm:$0x1 pattern:$0x75316420]  ;;  %v3823_v8 = vsel %vm3373_vm3, %v3822_v15, %v3821_v10  ;;  %22876 = vmatprep.mubr.msk.bf16.mxu0 %vm23377_vm0, %v27921_v13  ;;  %v12528_v59 = vrot.slane %v21710_v3, %v24054_v42  ;;  %v12542_v14 = vrot.slane %v21711_v58, %v24054_v42  ;;  %v12556_v9 = vrot.slane %v21712_v31, %v24054_v42 }
 0x218   : > { %v21718_v21 = vld.sshfl [vmem:[%s24048_s11 + $0x107] sm:$0x1 pattern:$0x75316420]  ;;  %v3825_v56 = vsel %vm3376_vm4, %v3824_v54, %v3823_v8  ;;  %v12570_v1 = vrot.slane %v21713_v39, %v24054_v42  ;;  %v12584_v26 = vrot.slane %v21714_v6, %v24054_v42  ;;  %v12598_v44 = vrot.slane %v21715_v36, %v24054_v42 }
 0x219   : > { %v21719_v28 = vld.sshfl [vmem:[%s24048_s11 + $0x108] sm:$0x1 pattern:$0x75316420]  ;;  %v3827_v34 = vsel %vm3379_vm5, %v3826_v17, %v3825_v56  ;;  %v12612_v12 = vrot.slane %v21716_v40, %v24054_v42  ;;  %v12626_v60 = vrot.slane %v21717_v43, %v24054_v42  ;;  %v12640_v3 = vrot.slane %v21718_v21, %v24054_v42 }
 0x21a   : > { %v21720_v63 = vld.sshfl [vmem:[%s24048_s11 + $0x109] sm:$0x1 pattern:$0x75316420]  ;;  %v3829_v57 = vsel %vm3382_vm6, %v3828_v5, %v3827_v34  ;;  %v12654_v31 = vrot.slane %v21719_v28, %v24054_v42  ;;  %v12821_v6 = vunpack.c.l.b16 %v12514_v37  ;;  %v12822_v36 = vunpack.c.l.b16 %v12528_v59 }
 0x21b   : > { %v21721_v22 = vld.sshfl [vmem:[%s24048_s11 + $0x10a] sm:$0x1 pattern:$0x75316420]  ;;  %v3831_v58 = vsel %vm3385_vm7, %v3830_v11, %v3829_v57  ;;  %v12668_v19 = vrot.slane %v21720_v63, %v24054_v42  ;;  %v12823_v48 = vunpack.c.l.b16 %v12542_v14  ;;  %v12824_v27 = vunpack.c.l.b16 %v12556_v9 }
 0x21c   : > { %v21722_v49 = vld.sshfl [vmem:[%s24048_s11 + $0x10b] sm:$0x1 pattern:$0x75316420]  ;;  %v12682_v35 = vrot.slane %v21721_v22, %v24054_v42  ;;  %v3919_v30 = vpack.c.b16 %v3831_v58, %v3817_v50  ;;  %v12825_v55 = vunpack.c.l.b16 %v12570_v1  ;;  %v12826_v18 = vunpack.c.l.b16 %v12584_v26 }
 0x21d   : > { %v21723_v45 = vld.sshfl [vmem:[%s24048_s11 + $0x10c] sm:$0x1 pattern:$0x75316420]  ;;  %v12696_v0 = vrot.slane %v21722_v49, %v24054_v42  ;;  %v12827_v24 = vunpack.c.l.b16 %v12598_v44  ;;  %v12828_v54 = vunpack.c.l.b16 %v12612_v12  ;;  %v12829_v40 = vunpack.c.l.b16 %v12626_v60 }
 0x21e   : > { %v21724_v62 = vld.sshfl [vmem:[%s24048_s11 + $0x10d] sm:$0x1 pattern:$0x75316420]  ;;  %v12710_v15 = vrot.slane %v21723_v45, %v24054_v42  ;;  %22689 = vmatmul.mubr.bf16.gmra.mrb[12].mxu1 %v3919_v30  ;;  %v12830_v43 = vunpack.c.l.b16 %v12640_v3  ;;  %v12831_v21 = vunpack.c.l.b16 %v12654_v31  ;;  %v12832_v29 = vunpack.c.l.b16 %v12668_v19 }
 0x21f   : > { %v12724_v39 = vrot.slane %v21724_v62, %v24054_v42  ;;  %22692 = vmatprep.mubr.msk.bf16.mxu1 %vm23377_vm0, %v27921_v13  ;;  %v12833_v10 = vunpack.c.l.b16 %v12682_v35  ;;  %v12834_v46 = vunpack.c.l.b16 %v12696_v0  ;;  %v13005_v5 = vrot.slane %v12822_v36, 7  ;;  %v21862_v36 = vld.sshfl [vmem:[%s24048_s11 + $0x13] sm:$0x1 pattern:$0x75316420] }
 0x220   : > { %v12835_v17 = vunpack.c.l.b16 %v12710_v15  ;;  %v13007_v28 = vrot.slane %v12823_v48, 6  ;;  %v13009_v63 = vrot.slane %v12824_v27, 5  ;;  %v13011_v22 = vrot.slane %v12825_v55, 4 }
 0x221   : > { %v12836_v47 = vunpack.c.l.b16 %v12724_v39  ;;  %v13013_v50 = vrot.slane %v12826_v18, 3  ;;  %v13015_v8 = vrot.slane %v12827_v24, 2  ;;  %v13017_v23 = vrot.slane %v12828_v54, 1  ;;  %v28009_v18 = vld [vmem:[#allocation29_spill] sm:$0xff]  ;;  %v28010_v24 = vld [vmem:[#allocation31_spill] sm:$0xff] }
 0x222   : > { %v13019_v11 = vrot.slane %v12830_v43, 7  ;;  %v13006_v49 = vsel %vm3367_vm1, %v13005_v5, %v12821_v6  ;;  %v13021_v37 = vrot.slane %v12831_v21, 6  ;;  %v13023_v56 = vrot.slane %v12832_v29, 5 }
 0x223   : > { %v13025_v45 = vrot.slane %v12833_v10, 4  ;;  %v13008_v59 = vsel %vm3370_vm2, %v13007_v28, %v13006_v49  ;;  %v13027_v9 = vrot.slane %v12834_v46, 3  ;;  %v13029_v34 = vrot.slane %v12835_v17, 2  ;;  %v28011_v46 = vld [vmem:[#allocation32_spill] sm:$0xff] }
 0x224   : > { %v13020_v14 = vsel %vm3367_vm1, %v13019_v11, %v12829_v40  ;;  %v13010_v62 = vsel %vm3373_vm3, %v13009_v63, %v13008_v59  ;;  %v13031_v26 = vrot.slane %v12836_v47, 1  ;;  %v3832_v44 = vrot.slane %v24728_v25, 7  ;;  %v21861_v6 = vld.sshfl [vmem:[%s24048_s11 + $0x12] sm:$0x1 pattern:$0x75316420] }
 0x225   : > { %v13022_v1 = vsel %vm3370_vm2, %v13021_v37, %v13020_v14  ;;  %v13012_v57 = vsel %vm3376_vm4, %v13011_v22, %v13010_v62  ;;  %v3834_v60 = vrot.slane %v24733_v33, 6  ;;  %v3836_v3 = vrot.slane %v24739_v52, 5  ;;  %v21863_v48 = vld.sshfl [vmem:[%s24048_s11 + $0x14] sm:$0x1 pattern:$0x75316420] }
 0x226   : > { %v13024_v12 = vsel %vm3373_vm3, %v13023_v56, %v13022_v1  ;;  %v13014_v58 = vsel %vm3379_vm5, %v13013_v50, %v13012_v57  ;;  %v3833_v19 = vsel %vm3367_vm1, %v3832_v44, %v24723_v2  ;;  %v3838_v25 = vrot.slane %v24747_v32, 4  ;;  %v28008_v2 = vld [vmem:[#allocation28_spill] sm:$0xff]  ;;  %v21864_v40 = vld.sshfl [vmem:[%s24048_s11 + $0x15] sm:$0x1 pattern:$0x75316420] }
 0x227   : > { %v13026_v31 = vsel %vm3376_vm4, %v13025_v45, %v13024_v12  ;;  %v13016_v35 = vsel %vm3382_vm6, %v13015_v8, %v13014_v58  ;;  %v3835_v33 = vsel %vm3370_vm2, %v3834_v60, %v3833_v19  ;;  %v3840_v52 = vrot.slane %v24753_v16, 3  ;;  %v21865_v43 = vld.sshfl [vmem:[%s24048_s11 + $0x16] sm:$0x1 pattern:$0x75316420]  ;;  %v28012_v47 = vld [vmem:[#allocation33_spill] sm:$0xff] }
 0x228   : > { %v13028_v30 = vsel %vm3379_vm5, %v13027_v9, %v13026_v31  ;;  %v13018_v0 = vsel %vm3385_vm7, %v13017_v23, %v13016_v35  ;;  %v3837_v39 = vsel %vm3373_vm3, %v3836_v3, %v3835_v33  ;;  %v3842_v32 = vrot.slane %v28008_v2, 2  ;;  %v21866_v21 = vld.sshfl [vmem:[%s24048_s11 + $0x17] sm:$0x1 pattern:$0x75316420]  ;;  %v28015_v37 = vld [vmem:[#allocation35_spill] sm:$0xff] }
 0x229   : > { %v13030_v15 = vsel %vm3382_vm6, %v13029_v34, %v13028_v30  ;;  %v3839_v55 = vsel %vm3376_vm4, %v3838_v25, %v3837_v39  ;;  %v3844_v16 = vrot.slane %v28009_v18, 1  ;;  %v3846_v54 = vrot.slane %v28010_v24, 7  ;;  %v21867_v28 = vld.sshfl [vmem:[%s24048_s11 + $0x18] sm:$0x1 pattern:$0x75316420] }
 0x22a   : > { %v13032_v27 = vsel %vm3385_vm7, %v13031_v26, %v13030_v15  ;;  %v3841_v10 = vsel %vm3379_vm5, %v3840_v52, %v3839_v55  ;;  %v3848_v17 = vrot.slane %v28011_v46, 6  ;;  %v3850_v5 = vrot.slane %v28012_v47, 5  ;;  %v21868_v63 = vld.sshfl [vmem:[%s24048_s11 + $0x19] sm:$0x1 pattern:$0x75316420] }
 0x22b   : > { %v13039_v29 = vpack.c.b16 %v13032_v27, %v13018_v0  ;;  %v21869_v22 = vld.sshfl [vmem:[%s24048_s11 + $0x24] sm:$0x1 pattern:$0x75316420]  ;;  %v3843_v50 = vsel %vm3382_vm6, %v3842_v32, %v3841_v10  ;;  %v28013_v8 = vld [vmem:[#allocation30_spill] sm:$0xff]  ;;  %v3854_v56 = vrot.slane %v28015_v37, 3  ;;  %v13453_v3 = vrot.slane %v21861_v6, %v24054_v42 }
 0x22c   : > { %v3847_v23 = vsel %vm3367_vm1, %v3846_v54, %v28013_v8  ;;  %v28014_v11 = vld [vmem:[#allocation34_spill] sm:$0xff]  ;;  %v21870_v45 = vld.sshfl [vmem:[%s24048_s11 + $0x25] sm:$0x1 pattern:$0x75316420]  ;;  %v3845_v9 = vsel %vm3385_vm7, %v3844_v16, %v3843_v50  ;;  %v28017_v26 = vld [vmem:[#allocation37_spill] sm:$0xff]  ;;  %v13467_v58 = vrot.slane %v21862_v36, %v24054_v42  ;;  %v13481_v31 = vrot.slane %v21863_v48, %v24054_v42 }
 0x22d   : > { %v3852_v49 = vrot.slane %v28014_v11, 4  ;;  %v21871_v59 = vld.sshfl [vmem:[%s24048_s11 + $0x26] sm:$0x1 pattern:$0x75316420]  ;;  %22877 = vmatmul.mubr.bf16.gmra.mrb[24].mxu0 %v13039_v29  ;;  %v3849_v34 = vsel %vm3370_vm2, %v3848_v17, %v3847_v23  ;;  %v3858_v44 = vrot.slane %v28017_v26, 1  ;;  %v13495_v35 = vrot.slane %v21864_v40, %v24054_v42 }
 0x22e   : > { %v21872_v14 = vld.sshfl [vmem:[%s24048_s11 + $0x27] sm:$0x1 pattern:$0x75316420]  ;;  %22896 = vmatprep.mubr.msk.bf16.mxu0 %vm23377_vm0, %v27921_v13  ;;  %v3851_v12 = vsel %vm3373_vm3, %v3850_v5, %v3849_v34  ;;  %v13509_v30 = vrot.slane %v21865_v43, %v24054_v42  ;;  %v13523_v33 = vrot.slane %v21866_v21, %v24054_v42  ;;  %v13537_v15 = vrot.slane %v21867_v28, %v24054_v42 }
 0x22f   : > { %v28016_v62 = vld [vmem:[#allocation36_spill] sm:$0xff]  ;;  %v21873_v57 = vld.sshfl [vmem:[%s24048_s11 + $0x28] sm:$0x1 pattern:$0x75316420]  ;;  %v3853_v19 = vsel %vm3376_vm4, %v3852_v49, %v3851_v12  ;;  %v13551_v39 = vrot.slane %v21868_v63, %v24054_v42  ;;  %v13565_v2 = vrot.slane %v21869_v22, %v24054_v42  ;;  %v13579_v6 = vrot.slane %v21870_v45, %v24054_v42 }
 0x230   : > { %v3856_v1 = vrot.slane %v28016_v62, 2  ;;  %v21874_v60 = vld.sshfl [vmem:[%s24048_s11 + $0x29] sm:$0x1 pattern:$0x75316420]  ;;  %v3855_v52 = vsel %vm3379_vm5, %v3854_v56, %v3853_v19  ;;  %v13593_v36 = vrot.slane %v21871_v59, %v24054_v42  ;;  %v13607_v48 = vrot.slane %v21872_v14, %v24054_v42 }
 0x231   : > { %v21875_v25 = vld.sshfl [vmem:[%s24048_s11 + $0x2a] sm:$0x1 pattern:$0x75316420]  ;;  %v13621_v55 = vrot.slane %v21873_v57, %v24054_v42  ;;  %v13635_v18 = vrot.slane %v21874_v60, %v24054_v42  ;;  %v15008_v40 = vunpack.c.l.b16 %v13453_v3  ;;  %v25578_v43 = vunpack.c.l.b16 %v13467_v58 }
 0x232   : > { %v21876_v0 = vld.sshfl [vmem:[%s24048_s11 + $0x2b] sm:$0x1 pattern:$0x75316420]  ;;  %v3857_v32 = vsel %vm3382_vm6, %v3856_v1, %v3855_v52  ;;  %v13649_v16 = vrot.slane %v21875_v25, %v24054_v42  ;;  %v25580_v21 = vunpack.c.l.b16 %v13481_v31  ;;  %v25582_v29 = vunpack.c.l.b16 %v13495_v35 }
 0x233   : > { %v3859_v27 = vsel %vm3385_vm7, %v3858_v44, %v3857_v32  ;;  %v13663_v54 = vrot.slane %v21876_v0, %v24054_v42  ;;  %v25584_v10 = vunpack.c.l.b16 %v13509_v30  ;;  %v25586_v46 = vunpack.c.l.b16 %v13523_v33 }
 0x234   : > { %v3920_v24 = vpack.c.b16 %v3859_v27, %v3845_v9  ;;  %v25588_v17 = vunpack.c.l.b16 %v13537_v15  ;;  %v25590_v47 = vunpack.c.l.b16 %v13551_v39  ;;  %v15016_v5 = vunpack.c.l.b16 %v13565_v2 }
 0x235   : > { %v25592_v28 = vunpack.c.l.b16 %v13579_v6  ;;  %v25594_v63 = vunpack.c.l.b16 %v13593_v36  ;;  %v25596_v22 = vunpack.c.l.b16 %v13607_v48  ;;  %v25598_v50 = vunpack.c.l.b16 %v13621_v55  ;;  %v28019_v48 = vld [vmem:[#allocation39_spill] sm:$0xff]  ;;  %v25645_v55 = vld.sshfl [vmem:[%s24048_s11 + $0x36] sm:$0x1 pattern:$0x75316420] }
 0x236   : > { %22693 = vmatmul.mubr.bf16.gmra.mrb[16].mxu1 %v3920_v24  ;;  %v25600_v8 = vunpack.c.l.b16 %v13635_v18  ;;  %v25604_v23 = vunpack.c.l.b16 %v13649_v16  ;;  %v25606_v11 = vunpack.c.l.b16 %v13663_v54  ;;  %v15120_v49 = vrot.slane %v25578_v43, 7  ;;  %v28020_v16 = vld [vmem:[#allocation40_spill] sm:$0xff]  ;;  %v28021_v54 = vld [vmem:[#allocation42_spill] sm:$0xff] }
 0x237   : > { %22696 = vmatprep.mubr.msk.bf16.mxu1 %vm23377_vm0, %v27921_v13  ;;  %v15122_v37 = vrot.slane %v25580_v21, 6  ;;  %v15124_v56 = vrot.slane %v25582_v29, 5  ;;  %v15126_v45 = vrot.slane %v25584_v10, 4  ;;  %v15128_v59 = vrot.slane %v25586_v46, 3 }
 0x238   : > { %v15130_v14 = vrot.slane %v25588_v17, 2  ;;  %v15121_v9 = vsel %vm3367_vm1, %v15120_v49, %v15008_v40  ;;  %v15132_v34 = vrot.slane %v25590_v47, 1  ;;  %v15134_v62 = vrot.slane %v25592_v28, 7 }
 0x239   : > { %v15136_v1 = vrot.slane %v25594_v63, 6  ;;  %v15123_v26 = vsel %vm3370_vm2, %v15122_v37, %v15121_v9  ;;  %v15138_v44 = vrot.slane %v25596_v22, 5  ;;  %v15140_v57 = vrot.slane %v25598_v50, 4 }
 0x23a   : > { %v15142_v12 = vrot.slane %v25600_v8, 3  ;;  %v15125_v60 = vsel %vm3373_vm3, %v15124_v56, %v15123_v26  ;;  %v15135_v3 = vsel %vm3367_vm1, %v15134_v62, %v15016_v5  ;;  %v15144_v58 = vrot.slane %v25604_v23, 2  ;;  %v21878_v5 = vld.sshfl [vmem:[%s24048_s11 + $0x37] sm:$0x1 pattern:$0x75316420] }
 0x23b   : > { %v15146_v31 = vrot.slane %v25606_v11, 1  ;;  %v15127_v19 = vsel %vm3376_vm4, %v15126_v45, %v15125_v60  ;;  %v15137_v25 = vsel %vm3370_vm2, %v15136_v1, %v15135_v3  ;;  %v3860_v35 = vrot.slane %v24891_v53, 7  ;;  %v28018_v53 = vld [vmem:[#allocation38_spill] sm:$0xff]  ;;  %v28022_v45 = vld [vmem:[#allocation43_spill] sm:$0xff]  ;;  %v28025_v60 = vld [vmem:[#allocation45_spill] sm:$0xff] }
 0x23c   : > { %v3862_v30 = vrot.slane %v24897_v38, 6  ;;  %v15129_v33 = vsel %vm3379_vm5, %v15128_v59, %v15127_v19  ;;  %v15139_v52 = vsel %vm3373_vm3, %v15138_v44, %v15137_v25  ;;  %v3864_v0 = vrot.slane %v24903_v51, 5  ;;  %v23313_v51 = vld [vmem:[%s24045_s10 + $0x1c0] sm:$0xff]  }
 0x23d   : > { %v3866_v15 = vrot.slane %v24910_v4, 4  ;;  %v15131_v39 = vsel %vm3382_vm6, %v15130_v14, %v15129_v33  ;;  %v15141_v2 = vsel %vm3376_vm4, %v15140_v57, %v15139_v52  ;;  %v3861_v32 = vsel %vm3367_vm1, %v3860_v35, %v24886_v41  ;;  %v21879_v49 = vld.sshfl [vmem:[%s24048_s11 + $0x38] sm:$0x1 pattern:$0x75316420]  ;;  %v28023_v14 = vld [vmem:[#allocation44_spill] sm:$0xff] }
 0x23e   : > { %v3868_v6 = vrot.slane %v28018_v53, 3  ;;  %v15133_v38 = vsel %vm3385_vm7, %v15132_v34, %v15131_v39  ;;  %v15143_v36 = vsel %vm3379_vm5, %v15142_v12, %v15141_v2  ;;  %v3863_v4 = vsel %vm3370_vm2, %v3862_v30, %v3861_v32  ;;  %v21880_v34 = vld.sshfl [vmem:[%s24048_s11 + $0x39] sm:$0x1 pattern:$0x75316420]  ;;  %v28024_v57 = vld [vmem:[#allocation41_spill] sm:$0xff] }
 0x23f   : > { %v3870_v27 = vrot.slane %v28019_v48, 2  ;;  %v15145_v18 = vsel %vm3382_vm6, %v15144_v58, %v15143_v36  ;;  %v3865_v41 = vsel %vm3373_vm3, %v3864_v0, %v3863_v4  ;;  %v3872_v24 = vrot.slane %v28020_v16, 1  ;;  %v21881_v62 = vld.sshfl [vmem:[%s24048_s11 + $0x3a] sm:$0x1 pattern:$0x75316420] }
 0x240   : > { %v3874_v40 = vrot.slane %v28021_v54, 7  ;;  %v15147_v37 = vsel %vm3385_vm7, %v15146_v31, %v15145_v18  ;;  %v3867_v56 = vsel %vm3376_vm4, %v3866_v15, %v3865_v41  ;;  %v3876_v59 = vrot.slane %v28022_v45, 6  ;;  %v21882_v1 = vld.sshfl [vmem:[%s24048_s11 + $0x3b] sm:$0x1 pattern:$0x75316420] }
 0x241   : > { %v3878_v9 = vrot.slane %v28023_v14, 5  ;;  %v15316_v26 = vpack.c.b16 %v15147_v37, %v15133_v38  ;;  %v3869_v44 = vsel %vm3379_vm5, %v3868_v6, %v3867_v56  ;;  %v3880_v3 = vrot.slane %v28025_v60, 4  ;;  %v21883_v58 = vld.sshfl [vmem:[%s24048_s11 + $0x3c] sm:$0x1 pattern:$0x75316420] }
 0x242   : > { %v3875_v12 = vsel %vm3367_vm1, %v3874_v40, %v28024_v57  ;;  %v21884_v31 = vld.sshfl [vmem:[%s24048_s11 + $0x3d] sm:$0x1 pattern:$0x75316420]  ;;  %v3871_v25 = vsel %vm3382_vm6, %v3870_v27, %v3869_v44  ;;  %v28026_v30 = vld [vmem:[#allocation46_spill] sm:$0xff]  ;;  %v28028_v6 = vld [vmem:[#allocation48_spill] sm:$0xff]  ;;  %v13677_v4 = vrot.slane %v25645_v55, %v24054_v42  ;;  %v13691_v18 = vrot.slane %v21878_v5, %v24054_v42 }
 0x243   : > { %v21885_v19 = vld.sshfl [vmem:[%s24048_s11 + $0x48] sm:$0x1 pattern:$0x75316420]  ;;  %v3877_v35 = vsel %vm3370_vm2, %v3876_v59, %v3875_v12  ;;  %v3882_v33 = vrot.slane %v28026_v30, 3  ;;  %v28027_v52 = vld [vmem:[#allocation47_spill] sm:$0xff]  ;;  %22897 = vmatmul.mubr.bf16.vlgmr.msra.gmra.mrb[0].mxu0 %v15316_v26  ;;  %v3873_v32 = vsel %vm3385_vm7, %v3872_v24, %v3871_v25  ;;  %v13705_v41 = vrot.slane %v21879_v49, %v24054_v42 }
 0x244   : > { %v3884_v0 = vrot.slane %v28027_v52, 2  ;;  %v21886_v15 = vld.sshfl [vmem:[%s24048_s11 + $0x49] sm:$0x1 pattern:$0x75316420]  ;;  %v3879_v53 = vsel %vm3373_vm3, %v3878_v9, %v3877_v35  ;;  %v3886_v38 = vrot.slane %v28028_v6, 1  ;;  %22925 = vmatpush3.bf16.msra.mxu0 %v23313_v51  ;;  %22900 = vmatprep.mubr.msk.bf16.mxu0 %vm23377_vm0, %v27921_v13  ;;  %v13719_v51 = vrot.slane %v21880_v34, %v24054_v42 }
 0x245   : > { %v21887_v39 = vld.sshfl [vmem:[%s24048_s11 + $0x4a] sm:$0x1 pattern:$0x75316420]  ;;  %v3881_v48 = vsel %vm3376_vm4, %v3880_v3, %v3879_v53  ;;  %v3888_v24 = vrot.slane %v25067_v61, 7  ;;  %22926 = vmatprep.subr.bf16.mxu0 %v27921_v13  ;;  %v13733_v40 = vrot.slane %v21881_v62, %v24054_v42  ;;  %v13747_v37 = vrot.slane %v21882_v1, %v24054_v42  ;;  %v23317_v12 = vld [vmem:[%s24045_s10 + $0x1d0] sm:$0xff]  }
 0x246   : > { %v21888_v2 = vld.sshfl [vmem:[%s24048_s11 + $0x4b] sm:$0x1 pattern:$0x75316420]  ;;  %v3883_v54 = vsel %vm3379_vm5, %v3882_v33, %v3881_v48  ;;  %v13761_v49 = vrot.slane %v21883_v58, %v24054_v42  ;;  %v13775_v45 = vrot.slane %v21884_v31, %v24054_v42  ;;  %v13789_v59 = vrot.slane %v21885_v19, %v24054_v42  ;;  %v23320_v6 = vld [vmem:[%s24045_s10 + $0x1d8] sm:$0xff]  }
 0x247   : > { %v21889_v36 = vld.sshfl [vmem:[%s24048_s11 + $0x4c] sm:$0x1 pattern:$0x75316420]  ;;  %v3885_v56 = vsel %vm3382_vm6, %v3884_v0, %v3883_v54  ;;  %v13803_v9 = vrot.slane %v21886_v15, %v24054_v42  ;;  %v13817_v34 = vrot.slane %v21887_v39, %v24054_v42  ;;  %v13831_v62 = vrot.slane %v21888_v2, %v24054_v42 }
 0x248   : > { %v21890_v27 = vld.sshfl [vmem:[%s24048_s11 + $0x4d] sm:$0x1 pattern:$0x75316420]  ;;  %v3887_v14 = vsel %vm3385_vm7, %v3886_v38, %v3885_v56  ;;  %v13845_v1 = vrot.slane %v21889_v36, %v24054_v42  ;;  %v15024_v3 = vunpack.c.l.b16 %v13677_v4  ;;  %v25708_v58 = vunpack.c.l.b16 %v13691_v18 }
 0x249   : > { %v23315_v16 = vld [vmem:[%s24045_s10 + $0x1c8] sm:$0xff]   ;;  %v3921_v26 = vpack.c.b16 %v3887_v14, %v3873_v32  ;;  %v13859_v44 = vrot.slane %v21890_v27, %v24054_v42  ;;  %v25710_v31 = vunpack.c.l.b16 %v13705_v41  ;;  %v25713_v19 = vunpack.c.l.b16 %v13719_v51 }
 0x24a   : > { %v21891_v55 = vld.sshfl [vmem:[%s24048_s11 + $0x4e] sm:$0x1 pattern:$0x75316420]  ;;  %22927 = vmatpush3.bf16.msra.mxu0 %v23315_v16  ;;  %v25715_v25 = vunpack.c.l.b16 %v13733_v40  ;;  %v25717_v35 = vunpack.c.l.b16 %v13747_v37  ;;  %v25719_v30 = vunpack.c.l.b16 %v13761_v49  ;;  %v25721_v33 = vunpack.c.l.b16 %v13775_v45  ;;  %v23321_v45 = vld [vmem:[%s24045_s10 + $0x1e0] sm:$0xff]  }
 0x24b   : > { %v21892_v5 = vld.sshfl [vmem:[%s24048_s11 + $0x4f] sm:$0x1 pattern:$0x75316420]  ;;  %v13873_v57 = vrot.slane %v21891_v55, %v24054_v42  ;;  %22928 = vmatprep.subr.bf16.mxu0 %v27921_v13  ;;  %22697 = vmatmul.mubr.bf16.gmra.mrb[20].mxu1 %v3921_v26  ;;  %v15032_v52 = vunpack.c.l.b16 %v13789_v59  ;;  %v15033_v0 = vunpack.c.l.b16 %v13803_v9  ;;  %v15034_v15 = vunpack.c.l.b16 %v13817_v34 }
 0x24c   : > { %v13887_v60 = vrot.slane %v21892_v5, %v24054_v42  ;;  %22700 = vmatprep.mubr.msk.bf16.mxu1 %vm23377_vm0, %v27921_v13  ;;  %v15035_v39 = vunpack.c.l.b16 %v13831_v62  ;;  %v15036_v2 = vunpack.c.l.b16 %v13845_v1  ;;  %v15037_v32 = vunpack.c.l.b16 %v13859_v44  ;;  %v28029_v44 = vld [vmem:[#allocation49_spill] sm:$0xff] }
 0x24d   : > { %v15038_v53 = vunpack.c.l.b16 %v13873_v57  ;;  %v15148_v36 = vrot.slane %v25708_v58, 7  ;;  %v15150_v4 = vrot.slane %v25710_v31, 6  ;;  %v15152_v48 = vrot.slane %v25713_v19, 5 }
 0x24e   : > { %22929 = vmatpush3.bf16.msra.mxu0 %v23317_v12  ;;  %v15039_v38 = vunpack.c.l.b16 %v13887_v60  ;;  %v15154_v27 = vrot.slane %v25715_v25, 4  ;;  %v15156_v18 = vrot.slane %v25717_v35, 3  ;;  %v15158_v41 = vrot.slane %v25719_v30, 2  ;;  %v28030_v60 = vld [vmem:[#allocation50_spill] sm:$0xff] }
 0x24f   : > { %22930 = vmatprep.subr.bf16.mxu0 %v27921_v13  ;;  %v15160_v16 = vrot.slane %v25721_v33, 1  ;;  %v15149_v54 = vsel %vm3367_vm1, %v15148_v36, %v15024_v3  ;;  %v15162_v55 = vrot.slane %v15033_v0, 7  ;;  %v15164_v51 = vrot.slane %v15034_v15, 6 }
 0x250   : > { %v15166_v40 = vrot.slane %v15035_v39, 5  ;;  %v15151_v37 = vsel %vm3370_vm2, %v15150_v4, %v15149_v54  ;;  %v15168_v56 = vrot.slane %v15036_v2, 4  ;;  %v15170_v5 = vrot.slane %v15037_v32, 3  ;;  %v23323_v2 = vld [vmem:[%s24045_s10 + $0x1e8] sm:$0xff]  }
 0x251   : > { %v15172_v49 = vrot.slane %v15038_v53, 2  ;;  %v15153_v59 = vsel %vm3373_vm3, %v15152_v48, %v15151_v37  ;;  %v15163_v14 = vsel %vm3367_vm1, %v15162_v55, %v15032_v52  ;;  %v15174_v9 = vrot.slane %v15039_v38, 1  ;;  %v28033_v38 = vld [vmem:[#allocation53_spill] sm:$0xff]  ;;  %v28035_v55 = vld [vmem:[#allocation56_spill] sm:$0xff] }
 0x252   : > { %22931 = vmatpush3.bf16.msra.mxu0 %v23320_v6  ;;  %v3889_v34 = vsel %vm3367_vm1, %v3888_v24, %v25061_v7  ;;  %v15155_v62 = vsel %vm3376_vm4, %v15154_v27, %v15153_v59  ;;  %v15165_v26 = vsel %vm3370_vm2, %v15164_v51, %v15163_v14  ;;  %v3890_v1 = vrot.slane %v25072_v20, 6  ;;  %v28031_v7 = vld [vmem:[#allocation51_spill] sm:$0xff]  ;;  %v28032_v20 = vld [vmem:[#allocation52_spill] sm:$0xff]  ;;  %v28036_v59 = vld [vmem:[#allocation57_spill] sm:$0xff] }
 0x253   : > { %22932 = vmatprep.subr.bf16.mxu0 %v27921_v13  ;;  %v3892_v57 = vrot.slane %v28029_v44, 5  ;;  %v15157_v12 = vsel %vm3379_vm5, %v15156_v18, %v15155_v62  ;;  %v15167_v61 = vsel %vm3373_vm3, %v15166_v40, %v15165_v26  ;;  %v3894_v3 = vrot.slane %v28030_v60, 4  ;;  %v25762_v4 = vld.sshfl [vmem:[%s24048_s11 + $0x5a] sm:$0x1 pattern:$0x75316420] }
 0x254   : > { %v3896_v24 = vrot.slane %v28031_v7, 3  ;;  %v15159_v52 = vsel %vm3382_vm6, %v15158_v41, %v15157_v12  ;;  %v15169_v0 = vsel %vm3376_vm4, %v15168_v56, %v15167_v61  ;;  %v3891_v15 = vsel %vm3370_vm2, %v3890_v1, %v3889_v34  ;;  %v25765_v48 = vld.sshfl [vmem:[%s24048_s11 + $0x5b] sm:$0x1 pattern:$0x75316420]  ;;  %v28038_v12 = vld [vmem:[#allocation54_spill] sm:$0xff] }
 0x255   : > { %v3898_v39 = vrot.slane %v28032_v20, 2  ;;  %v15161_v32 = vsel %vm3385_vm7, %v15160_v16, %v15159_v52  ;;  %v15171_v53 = vsel %vm3379_vm5, %v15170_v5, %v15169_v0  ;;  %v3893_v6 = vsel %vm3373_vm3, %v3892_v57, %v3891_v15  ;;  %v25768_v27 = vld.sshfl [vmem:[%s24048_s11 + $0x5c] sm:$0x1 pattern:$0x75316420]  ;;  %v23325_v52 = vld [vmem:[%s24045_s10 + $0x1f0] sm:$0xff]  }
 0x256   : > { %22933 = vmatpush3.bf16.msra.mxu0 %v23321_v45  ;;  %v3900_v36 = vrot.slane %v28033_v38, 1  ;;  %v15173_v18 = vsel %vm3382_vm6, %v15172_v49, %v15171_v53  ;;  %v3895_v41 = vsel %vm3376_vm4, %v3894_v3, %v3893_v6  ;;  %v28034_v16 = vld [vmem:[#allocation55_spill] sm:$0xff]  ;;  %v3904_v51 = vrot.slane %v28035_v55, 6  ;;  %v28037_v49 = vld [vmem:[#allocation58_spill] sm:$0xff]  ;;  %v28040_v20 = vld [vmem:[#allocation60_spill] sm:$0xff] }
 0x257   : > { %22934 = vmatprep.subr.bf16.mxu0 %v27921_v13  ;;  %v3902_v54 = vrot.slane %v28034_v16, 7  ;;  %v21896_v40 = vld.sshfl [vmem:[%s24048_s11 + $0x5d] sm:$0x1 pattern:$0x75316420]  ;;  %v15175_v5 = vsel %vm3385_vm7, %v15174_v9, %v15173_v18  ;;  %v3897_v45 = vsel %vm3379_vm5, %v3896_v24, %v3895_v41  ;;  %v3906_v14 = vrot.slane %v28036_v59, 5 }
 0x258   : > { %v21897_v37 = vld.sshfl [vmem:[%s24048_s11 + $0x5e] sm:$0x1 pattern:$0x75316420]  ;;  %v3908_v34 = vrot.slane %v28037_v49, 4  ;;  %v15317_v44 = vpack.c.b16 %v15175_v5, %v15161_v32  ;;  %v3899_v57 = vsel %vm3382_vm6, %v3898_v39, %v3897_v45  ;;  %v3912_v32 = vrot.slane %v28040_v20, 2 }
 0x259   : > { %v21898_v56 = vld.sshfl [vmem:[%s24048_s11 + $0x5f] sm:$0x1 pattern:$0x75316420]  ;;  %v3903_v61 = vsel %vm3367_vm1, %v3902_v54, %v28038_v12  ;;  %v3901_v0 = vsel %vm3385_vm7, %v3900_v36, %v3899_v57  ;;  %v28041_v53 = vld [vmem:[#allocation61_spill] sm:$0xff]  ;;  %v13915_v36 = vrot.slane %v25765_v48, %v24054_v42  ;;  %v13929_v41 = vrot.slane %v25768_v27, %v24054_v42 }
 0x25a   : > { %v21899_v62 = vld.sshfl [vmem:[%s24048_s11 + $0x60] sm:$0x1 pattern:$0x75316420]  ;;  %v28039_v60 = vld [vmem:[#allocation59_spill] sm:$0xff]  ;;  %22935 = vmatpush3.bf16.msra.mxu0 %v23323_v2  ;;  %v3905_v15 = vsel %vm3370_vm2, %v3904_v51, %v3903_v61  ;;  %v3914_v39 = vrot.slane %v28041_v53, 1  ;;  %v13901_v2 = vrot.slane %v25762_v4, %v24054_v42  ;;  %v13943_v55 = vrot.slane %v21896_v40, %v24054_v42 }
 0x25b   : > { %v21900_v26 = vld.sshfl [vmem:[%s24048_s11 + $0x61] sm:$0x1 pattern:$0x75316420]  ;;  %v3910_v3 = vrot.slane %v28039_v60, 3  ;;  %22936 = vmatprep.subr.bf16.mxu0 %v27921_v13  ;;  %22901 = vmatmul.mubr.bf16.gmra.mrb[4].mxu0 %v15317_v44  ;;  %v3907_v38 = vsel %vm3373_vm3, %v3906_v14, %v3905_v15  ;;  %v13957_v51 = vrot.slane %v21897_v37, %v24054_v42  ;;  %v13971_v5 = vrot.slane %v21898_v56, %v24054_v42  ;;  %v23327_v14 = vld [vmem:[%s24045_s10 + $0x1f8] sm:$0xff]  }
 0x25c   : > { %v21901_v1 = vld.sshfl [vmem:[%s24048_s11 + $0x6c] sm:$0x1 pattern:$0x75316420]  ;;  %22904 = vmatprep.mubr.msk.bf16.mxu0 %vm23377_vm0, %v27921_v13  ;;  %v3909_v16 = vsel %vm3376_vm4, %v3908_v34, %v3907_v38  ;;  %v13985_v48 = vrot.slane %v21899_v62, %v24054_v42  ;;  %v13999_v59 = vrot.slane %v21900_v26, %v24054_v42  ;;  %v15040_v12 = vunpack.c.l.b16 %v13901_v2 }
 0x25d   : > { %v21902_v9 = vld.sshfl [vmem:[%s24048_s11 + $0x6d] sm:$0x1 pattern:$0x75316420]  ;;  %v3911_v4 = vsel %vm3379_vm5, %v3910_v3, %v3909_v16  ;;  %v14013_v27 = vrot.slane %v21901_v1, %v24054_v42  ;;  %v25830_v61 = vunpack.c.l.b16 %v13915_v36  ;;  %v25832_v60 = vunpack.c.l.b16 %v13929_v41 }
 0x25e   : > { %v21903_v7 = vld.sshfl [vmem:[%s24048_s11 + $0x6e] sm:$0x1 pattern:$0x75316420]  ;;  %22937 = vmatpush3.bf16.msra.mxu0 %v23325_v52  ;;  %v3913_v49 = vsel %vm3382_vm6, %v3912_v32, %v3911_v4  ;;  %v14027_v34 = vrot.slane %v21902_v9, %v24054_v42  ;;  %v25834_v3 = vunpack.c.l.b16 %v13943_v55  ;;  %v25836_v9 = vunpack.c.l.b16 %v13957_v51 }
 0x25f   : > { %v21904_v24 = vld.sshfl [vmem:[%s24048_s11 + $0x6f] sm:$0x1 pattern:$0x75316420]  ;;  %v14041_v40 = vrot.slane %v21903_v7, %v24054_v42  ;;  %22938 = vmatprep.subr.bf16.mxu0 %v27921_v13  ;;  %v3915_v56 = vsel %vm3385_vm7, %v3914_v39, %v3913_v49  ;;  %v25838_v7 = vunpack.c.l.b16 %v13971_v5  ;;  %v25842_v52 = vunpack.c.l.b16 %v13999_v59 }
 0x260   : > { %v21905_v6 = vld.sshfl [vmem:[%s24048_s11 + $0x70] sm:$0x1 pattern:$0x75316420]  ;;  %v14055_v37 = vrot.slane %v21904_v24, %v24054_v42  ;;  %v3922_v44 = vpack.c.b16 %v3915_v56, %v3901_v0  ;;  %v25840_v24 = vunpack.c.l.b16 %v13985_v48  ;;  %v15048_v0 = vunpack.c.l.b16 %v14013_v27 }
 0x261   : > { %v21906_v18 = vld.sshfl [vmem:[%s24048_s11 + $0x71] sm:$0x1 pattern:$0x75316420]  ;;  %v14069_v62 = vrot.slane %v21905_v6, %v24054_v42  ;;  %v15049_v15 = vunpack.c.l.b16 %v14027_v34  ;;  %v15050_v20 = vunpack.c.l.b16 %v14041_v40  ;;  %v15178_v2 = vrot.slane %v25832_v60, 6 }
 0x262   : > { %v21907_v54 = vld.sshfl [vmem:[%s24048_s11 + $0x72] sm:$0x1 pattern:$0x75316420]  ;;  %v14083_v26 = vrot.slane %v21906_v18, %v24054_v42  ;;  %22939 = vmatpush3.bf16.msra.mxu0 %v23327_v14  ;;  %22701 = vmatmul.mubr.bf16.gmra.mrb[24].mxu1 %v3922_v44  ;;  %v15051_v32 = vunpack.c.l.b16 %v14055_v37  ;;  %v15176_v18 = vrot.slane %v25830_v61, 7  ;;  %v15180_v16 = vrot.slane %v25834_v3, 5 }
 0x263   : > { %v21908_v45 = vld.sshfl [vmem:[%s24048_s11 + $0x73] sm:$0x1 pattern:$0x75316420]  ;;  %v14097_v1 = vrot.slane %v21907_v54, %v24054_v42  ;;  %22968 = vmatprep.subr.bf16.mxu0 %v27921_v13  ;;  %v15052_v53 = vunpack.c.l.b16 %v14069_v62  ;;  %22720 = vmatprep.mubr.msk.bf16.mxu1 %vm23377_vm0, %v27921_v13  ;;  %v15182_v54 = vrot.slane %v25836_v9, 4  ;;  %v15184_v55 = vrot.slane %v25838_v7, 3 }
 0x264   : > { %v14111_v57 = vrot.slane %v21908_v45, %v24054_v42  ;;  %v15053_v39 = vunpack.c.l.b16 %v14083_v26  ;;  %v20869_v36 = vld.sshfl [vmem:[%s24048_s11 + $0x1] sm:$0x1 pattern:$0x75316420]  ;;  %v15186_v51 = vrot.slane %v25840_v24, 2  ;;  %v15177_v45 = vsel %vm3367_vm1, %v15176_v18, %v15040_v12 }
 0x265   : > { %v15054_v6 = vunpack.c.l.b16 %v14097_v1  ;;  %v20870_v41 = vld.sshfl [vmem:[%s24048_s11 + $0x2] sm:$0x1 pattern:$0x75316420]  ;;  %v15188_v48 = vrot.slane %v25842_v52, 1  ;;  %v15190_v59 = vrot.slane %v15049_v15, 7  ;;  %v15179_v34 = vsel %vm3370_vm2, %v15178_v2, %v15177_v45 }
 0x266   : > { %v15055_v38 = vunpack.c.l.b16 %v14111_v57  ;;  %v20871_v5 = vld.sshfl [vmem:[%s24048_s11 + $0x3] sm:$0x1 pattern:$0x75316420]  ;;  %v15192_v27 = vrot.slane %v15050_v20, 6  ;;  %v15194_v40 = vrot.slane %v15051_v32, 5  ;;  %v15181_v62 = vsel %vm3373_vm3, %v15180_v16, %v15179_v34 }
 0x267   : > { %v20872_v4 = vld.sshfl [vmem:[%s24048_s11 + $0x4] sm:$0x1 pattern:$0x75316420]  ;;  %v15196_v37 = vrot.slane %v15052_v53, 4  ;;  %v15198_v56 = vrot.slane %v15053_v39, 3  ;;  %v15191_v26 = vsel %vm3367_vm1, %v15190_v59, %v15048_v0  ;;  %v15183_v12 = vsel %vm3376_vm4, %v15182_v54, %v15181_v62 }
 0x268   : > { %v20873_v14 = vld.sshfl [vmem:[%s24048_s11 + $0x5] sm:$0x1 pattern:$0x75316420]  ;;  %v15200_v1 = vrot.slane %v15054_v6, 2  ;;  %v15202_v44 = vrot.slane %v15055_v38, 1  ;;  %v15193_v15 = vsel %vm3370_vm2, %v15192_v27, %v15191_v26  ;;  %v4322_v18 = vrot.slane %v20869_v36, %v24054_v42 }
 0x269   : > { %v20874_v49 = vld.sshfl [vmem:[%s24048_s11 + $0x6] sm:$0x1 pattern:$0x75316420]  ;;  %v4336_v2 = vrot.slane %v20870_v41, %v24054_v42  ;;  %v15185_v32 = vsel %vm3379_vm5, %v15184_v55, %v15183_v12  ;;  %v15195_v53 = vsel %vm3373_vm3, %v15194_v40, %v15193_v15  ;;  %v4350_v16 = vrot.slane %v20871_v5, %v24054_v42 }
 0x26a   : > { %v20875_v57 = vld.sshfl [vmem:[%s24048_s11 + $0x7] sm:$0x1 pattern:$0x75316420]  ;;  %v4364_v0 = vrot.slane %v20872_v4, %v24054_v42  ;;  %v15187_v6 = vsel %vm3382_vm6, %v15186_v51, %v15185_v32  ;;  %v15197_v38 = vsel %vm3376_vm4, %v15196_v37, %v15195_v53  ;;  %v4378_v54 = vrot.slane %v20873_v14, %v24054_v42 }
 0x26b   : > { %v20876_v20 = vld.sshfl [vmem:[%s24048_s11 + $0x8] sm:$0x1 pattern:$0x75316420]  ;;  %v4392_v45 = vrot.slane %v20874_v49, %v24054_v42  ;;  %v15189_v36 = vsel %vm3385_vm7, %v15188_v48, %v15187_v6  ;;  %v15199_v41 = vsel %vm3379_vm5, %v15198_v56, %v15197_v38  ;;  %v4406_v55 = vrot.slane %v20875_v57, %v24054_v42 }
 0x26c   : > { %v20884_v39 = vld.sshfl [vmem:[%s24048_s11 + $0x1a] sm:$0x1 pattern:$0x75316420]  ;;  %v4420_v59 = vrot.slane %v20876_v20, %v24054_v42  ;;  %v15201_v5 = vsel %vm3382_vm6, %v15200_v1, %v15199_v41  ;;  %v5877_v51 = vunpack.c.l.b16 %v4322_v18  ;;  %v5878_v27 = vunpack.c.l.b16 %v4336_v2 }
 0x26d   : > { %v4532_v4 = vrot.slane %v20884_v39, %v24054_v42  ;;  %v15203_v14 = vsel %vm3385_vm7, %v15202_v44, %v15201_v5  ;;  %v5879_v49 = vunpack.c.l.b16 %v4350_v16  ;;  %v5880_v34 = vunpack.c.l.b16 %v4364_v0  ;;  %v25887_v26 = vld.sshfl [vmem:[%s24048_s11 + $0x7e] sm:$0x1 pattern:$0x75316420] }
 0x26e   : > { %v5881_v48 = vunpack.c.l.b16 %v4378_v54  ;;  %v15318_v40 = vpack.c.b16 %v15203_v14, %v15189_v36  ;;  %v5882_v37 = vunpack.c.l.b16 %v4392_v45  ;;  %v5883_v56 = vunpack.c.l.b16 %v4406_v55  ;;  %v21910_v20 = vld.sshfl [vmem:[%s24048_s11 + $0x7f] sm:$0x1 pattern:$0x75316420] }
 0x26f   : > { %v5884_v62 = vunpack.c.l.b16 %v4420_v59  ;;  %v5892_v1 = vunpack.c.l.b16 %v4532_v4  ;;  %v5989_v57 = vrot.slane %v5878_v27, 7  ;;  %v5991_v12 = vrot.slane %v5879_v49, 6  ;;  %v21911_v18 = vld.sshfl [vmem:[%s24048_s11 + $0x80] sm:$0x1 pattern:$0x75316420] }
 0x270   : > { %v5993_v15 = vrot.slane %v5880_v34, 5  ;;  %22905 = vmatmul.mubr.bf16.gmra.mrb[8].mxu0 %v15318_v40  ;;  %v5995_v44 = vrot.slane %v5881_v48, 4  ;;  %v5997_v2 = vrot.slane %v5882_v37, 3  ;;  %v5999_v32 = vrot.slane %v5883_v56, 2 }
 0x271   : > { %v6001_v53 = vrot.slane %v5884_v62, 1  ;;  %v21912_v39 = vld.sshfl [vmem:[%s24048_s11 + $0x81] sm:$0x1 pattern:$0x75316420]  ;;  %22908 = vmatprep.mubr.msk.bf16.mxu0 %vm23377_vm0, %v27921_v13  ;;  %v5990_v0 = vsel %vm3367_vm1, %v5989_v57, %v5877_v51  ;;  %v6003_v6 = vrot.slane %v25580_v21, 7  ;;  %v14139_v48 = vrot.slane %v21910_v20, %v24054_v42 }
 0x272   : > { %v21913_v16 = vld.sshfl [vmem:[%s24048_s11 + $0x82] sm:$0x1 pattern:$0x75316420]  ;;  %v6005_v38 = vrot.slane %v25582_v29, 6  ;;  %v6007_v54 = vrot.slane %v25584_v10, 5  ;;  %v5992_v41 = vsel %vm3370_vm2, %v5991_v12, %v5990_v0  ;;  %v14153_v40 = vrot.slane %v21911_v18, %v24054_v42 }
 0x273   : > { %v21914_v45 = vld.sshfl [vmem:[%s24048_s11 + $0x83] sm:$0x1 pattern:$0x75316420]  ;;  %v6009_v55 = vrot.slane %v25586_v46, 4  ;;  %v6011_v59 = vrot.slane %v25588_v17, 3  ;;  %v5994_v21 = vsel %vm3373_vm3, %v5993_v15, %v5992_v41  ;;  %v6004_v29 = vsel %vm3367_vm1, %v6003_v6, %v25578_v43 }
 0x274   : > { %v21915_v36 = vld.sshfl [vmem:[%s24048_s11 + $0x84] sm:$0x1 pattern:$0x75316420]  ;;  %v6013_v5 = vrot.slane %v25590_v47, 2  ;;  %v6015_v10 = vrot.slane %v5892_v1, 1  ;;  %v14125_v46 = vrot.slane %v25887_v26, %v24054_v42  ;;  %v5996_v17 = vsel %vm3376_vm4, %v5995_v44, %v5994_v21 }
 0x275   : > { %v21916_v4 = vld.sshfl [vmem:[%s24048_s11 + $0x85] sm:$0x1 pattern:$0x75316420]  ;;  %v6006_v47 = vsel %vm3370_vm2, %v6005_v38, %v6004_v29  ;;  %v5998_v43 = vsel %vm3379_vm5, %v5997_v2, %v5996_v17  ;;  %v14167_v62 = vrot.slane %v21912_v39, %v24054_v42  ;;  %v14181_v1 = vrot.slane %v21913_v16, %v24054_v42 }
 0x276   : > { %v21917_v51 = vld.sshfl [vmem:[%s24048_s11 + $0xa2] sm:$0x1 pattern:$0x75316420]  ;;  %v6008_v37 = vsel %vm3373_vm3, %v6007_v54, %v6006_v47  ;;  %v6000_v26 = vsel %vm3382_vm6, %v5999_v32, %v5998_v43  ;;  %v14195_v15 = vrot.slane %v21914_v45, %v24054_v42  ;;  %v14209_v20 = vrot.slane %v21915_v36, %v24054_v42 }
 0x277   : > { %v21918_v27 = vld.sshfl [vmem:[%s24048_s11 + $0xa3] sm:$0x1 pattern:$0x75316420]  ;;  %v6010_v57 = vsel %vm3376_vm4, %v6009_v55, %v6008_v37  ;;  %v6002_v18 = vsel %vm3385_vm7, %v6001_v53, %v6000_v26  ;;  %v14223_v0 = vrot.slane %v21916_v4, %v24054_v42  ;;  %v14237_v39 = vrot.slane %v21917_v51, %v24054_v42 }
 0x278   : > { %v21919_v14 = vld.sshfl [vmem:[%s24048_s11 + $0xa4] sm:$0x1 pattern:$0x75316420]  ;;  %v6012_v44 = vsel %vm3379_vm5, %v6011_v59, %v6010_v57  ;;  %v14251_v32 = vrot.slane %v21918_v27, %v24054_v42  ;;  %v15056_v4 = vunpack.c.l.b16 %v14125_v46  ;;  %v15058_v51 = vunpack.c.l.b16 %v14153_v40  ;;  %v23324_v46 = vld [vmem:[%s24045_s10 + $0xc8] sm:$0xff]  }
 0x279   : > { %v21920_v49 = vld.sshfl [vmem:[%s24048_s11 + $0xa5] sm:$0x1 pattern:$0x75316420]  ;;  %v6014_v16 = vsel %vm3382_vm6, %v6013_v5, %v6012_v44  ;;  %v14265_v6 = vrot.slane %v21919_v14, %v24054_v42  ;;  %v15057_v5 = vunpack.c.l.b16 %v14139_v48  ;;  %v15059_v21 = vunpack.c.l.b16 %v14167_v62 }
 0x27a   : > { %v21921_v34 = vld.sshfl [vmem:[%s24048_s11 + $0xa6] sm:$0x1 pattern:$0x75316420]  ;;  %v14279_v38 = vrot.slane %v21920_v49, %v24054_v42  ;;  %v6016_v54 = vsel %vm3385_vm7, %v6015_v10, %v6014_v16  ;;  %v15060_v29 = vunpack.c.l.b16 %v14181_v1  ;;  %v15061_v27 = vunpack.c.l.b16 %v14195_v15 }
 0x27b   : > { %v21922_v56 = vld.sshfl [vmem:[%s24048_s11 + $0xa7] sm:$0x1 pattern:$0x75316420]  ;;  %v14293_v45 = vrot.slane %v21921_v34, %v24054_v42  ;;  %v6185_v55 = vpack.c.b16 %v6016_v54, %v6002_v18  ;;  %v15062_v10 = vunpack.c.l.b16 %v14209_v20  ;;  %v15063_v14 = vunpack.c.l.b16 %v14223_v0 }
 0x27c   : > { %v21923_v12 = vld.sshfl [vmem:[%s24048_s11 + $0xa8] sm:$0x1 pattern:$0x75316420]  ;;  %v14307_v53 = vrot.slane %v21922_v56, %v24054_v42  ;;  %v23322_v41 = vld [vmem:[%s24045_s10 + $0xc0] sm:$0xff]   ;;  %v15064_v49 = vunpack.c.l.b16 %v14237_v39  ;;  %v15065_v17 = vunpack.c.l.b16 %v14251_v32  ;;  %v15066_v47 = vunpack.c.l.b16 %v14265_v6 }
 0x27d   : > { %v21924_v2 = vld.sshfl [vmem:[%s24048_s11 + $0xa9] sm:$0x1 pattern:$0x75316420]  ;;  %v14321_v36 = vrot.slane %v21923_v12, %v24054_v42  ;;  %22721 = vmatmul.mubr.bf16.vlgmr.msra.gmra.mrb[0].mxu1 %v6185_v55  ;;  %v15067_v34 = vunpack.c.l.b16 %v14279_v38  ;;  %v15068_v43 = vunpack.c.l.b16 %v14293_v45  ;;  %v15204_v56 = vrot.slane %v15057_v5, 7  ;;  %v23326_v38 = vld [vmem:[%s24045_s10 + $0xd0] sm:$0xff]  }
 0x27e   : > { %v14335_v59 = vrot.slane %v21924_v2, %v24054_v42  ;;  %v15069_v37 = vunpack.c.l.b16 %v14307_v53  ;;  %22724 = vmatprep.mubr.msk.bf16.mxu1 %vm23377_vm0, %v27921_v13  ;;  %22749 = vmatpush3.bf16.msra.mxu1 %v23322_v41  ;;  %v15206_v62 = vrot.slane %v15058_v51, 6  ;;  %v20892_v1 = vld.sshfl [vmem:[%s24048_s11 + $0x2c] sm:$0x1 pattern:$0x75316420]  ;;  %v15208_v57 = vrot.slane %v15059_v21, 5 }
 0x27f   : > { %v15070_v48 = vunpack.c.l.b16 %v14321_v36  ;;  %v20900_v26 = vld.sshfl [vmem:[%s24048_s11 + $0x3e] sm:$0x1 pattern:$0x75316420]  ;;  %22750 = vmatprep.subr.bf16.mxu1 %v27921_v13  ;;  %v15210_v12 = vrot.slane %v15060_v29, 4  ;;  %v15212_v15 = vrot.slane %v15061_v27, 3  ;;  %v15205_v18 = vsel %vm3367_vm1, %v15204_v56, %v15056_v4 }
 0x280   : > { %v15071_v40 = vunpack.c.l.b16 %v14335_v59  ;;  %v15214_v20 = vrot.slane %v15062_v10, 2  ;;  %v15216_v44 = vrot.slane %v15063_v14, 1  ;;  %v15218_v2 = vrot.slane %v15065_v17, 7  ;;  %v23328_v17 = vld [vmem:[%s24045_s10 + $0xd8] sm:$0xff]  }
 0x281   : > { %v15220_v0 = vrot.slane %v15066_v47, 6  ;;  %v15207_v39 = vsel %vm3370_vm2, %v15206_v62, %v15205_v18  ;;  %v15222_v16 = vrot.slane %v15067_v34, 5  ;;  %v15224_v32 = vrot.slane %v15068_v43, 4 }
 0x282   : > { %v15226_v6 = vrot.slane %v15069_v37, 3  ;;  %22751 = vmatpush3.bf16.msra.mxu1 %v23324_v46  ;;  %v15209_v54 = vsel %vm3373_vm3, %v15208_v57, %v15207_v39  ;;  %v15219_v45 = vsel %vm3367_vm1, %v15218_v2, %v15064_v49  ;;  %v15228_v53 = vrot.slane %v15070_v48, 2  ;;  %v25982_v56 = vld.sshfl [vmem:[%s24048_s11 + $0xb5] sm:$0x1 pattern:$0x75316420] }
 0x283   : > { %v15230_v36 = vrot.slane %v15071_v40, 1  ;;  %22752 = vmatprep.subr.bf16.mxu1 %v27921_v13  ;;  %v15211_v41 = vsel %vm3376_vm4, %v15210_v12, %v15209_v54  ;;  %v15221_v55 = vsel %vm3370_vm2, %v15220_v0, %v15219_v45  ;;  %v4644_v59 = vrot.slane %v20892_v1, %v24054_v42  ;;  %v21925_v40 = vld.sshfl [vmem:[%s24048_s11 + $0xb4] sm:$0x1 pattern:$0x75316420]  ;;  %v23330_v12 = vld [vmem:[%s24045_s10 + $0xe0] sm:$0xff]  }
 0x284   : > { %v4756_v4 = vrot.slane %v20900_v26, %v24054_v42  ;;  %v15213_v5 = vsel %vm3379_vm5, %v15212_v15, %v15211_v41  ;;  %v15223_v51 = vsel %vm3373_vm3, %v15222_v16, %v15221_v55  ;;  %v6017_v21 = vrot.slane %v25594_v63, 7  ;;  %v21927_v26 = vld.sshfl [vmem:[%s24048_s11 + $0xb6] sm:$0x1 pattern:$0x75316420] }
 0x285   : > { %v6019_v29 = vrot.slane %v25596_v22, 6  ;;  %v15215_v27 = vsel %vm3382_vm6, %v15214_v20, %v15213_v5  ;;  %v15225_v10 = vsel %vm3376_vm4, %v15224_v32, %v15223_v51  ;;  %v5900_v14 = vunpack.c.l.b16 %v4644_v59  ;;  %v21928_v57 = vld.sshfl [vmem:[%s24048_s11 + $0xb7] sm:$0x1 pattern:$0x75316420] }
 0x286   : > { %v25967_v49 = vunpack.c.l.b16 %v4756_v4  ;;  %22753 = vmatpush3.bf16.msra.mxu1 %v23326_v38  ;;  %v15217_v47 = vsel %vm3385_vm7, %v15216_v44, %v15215_v27  ;;  %v15227_v34 = vsel %vm3379_vm5, %v15226_v6, %v15225_v10  ;;  %v6018_v63 = vsel %vm3367_vm1, %v6017_v21, %v25592_v28  ;;  %v21930_v44 = vld.sshfl [vmem:[%s24048_s11 + $0xb9] sm:$0x1 pattern:$0x75316420] }
 0x287   : > { %v6021_v22 = vrot.slane %v25598_v50, 5  ;;  %22754 = vmatprep.subr.bf16.mxu1 %v27921_v13  ;;  %v15229_v43 = vsel %vm3382_vm6, %v15228_v53, %v15227_v34  ;;  %v6020_v37 = vsel %vm3370_vm2, %v6019_v29, %v6018_v63  ;;  %v6023_v46 = vrot.slane %v25600_v8, 4  ;;  %v21929_v8 = vld.sshfl [vmem:[%s24048_s11 + $0xb8] sm:$0x1 pattern:$0x75316420] }
 0x288   : > { %v6025_v48 = vrot.slane %v25604_v23, 3  ;;  %v15231_v28 = vsel %vm3385_vm7, %v15230_v36, %v15229_v43  ;;  %v6027_v62 = vrot.slane %v25606_v11, 2  ;;  %v6029_v1 = vrot.slane %v5900_v14, 1 }
 0x289   : > { %v6022_v50 = vsel %vm3373_vm3, %v6021_v22, %v6020_v37  ;;  %v15319_v23 = vpack.c.b16 %v15231_v28, %v15217_v47  ;;  %v6031_v20 = vrot.slane %v25710_v31, 7  ;;  %v6033_v18 = vrot.slane %v25713_v19, 6  ;;  %v21931_v2 = vld.sshfl [vmem:[%s24048_s11 + $0xba] sm:$0x1 pattern:$0x75316420] }
 0x28a   : > { %v6024_v15 = vsel %vm3376_vm4, %v6023_v46, %v6022_v50  ;;  %v21932_v0 = vld.sshfl [vmem:[%s24048_s11 + $0xbb] sm:$0x1 pattern:$0x75316420]  ;;  %22755 = vmatpush3.bf16.msra.mxu1 %v23328_v17  ;;  %v6035_v39 = vrot.slane %v25715_v25, 5  ;;  %v6037_v16 = vrot.slane %v25717_v35, 4  ;;  %v14349_v55 = vrot.slane %v21925_v40, %v24054_v42 }
 0x28b   : > { %v6026_v11 = vsel %vm3379_vm5, %v6025_v48, %v6024_v15  ;;  %v6039_v32 = vrot.slane %v25719_v30, 3  ;;  %v21933_v6 = vld.sshfl [vmem:[%s24048_s11 + $0xc6] sm:$0x1 pattern:$0x75316420]  ;;  %22756 = vmatprep.subr.bf16.mxu1 %v27921_v13  ;;  %22909 = vmatmul.mubr.bf16.gmra.mrb[12].mxu0 %v15319_v23  ;;  %v6032_v54 = vsel %vm3367_vm1, %v6031_v20, %v25708_v58  ;;  %v6041_v45 = vrot.slane %v25721_v33, 2 }
 0x28c   : > { %v21934_v38 = vld.sshfl [vmem:[%s24048_s11 + $0xc7] sm:$0x1 pattern:$0x75316420]  ;;  %v6028_v19 = vsel %vm3382_vm6, %v6027_v62, %v6026_v11  ;;  %v6043_v25 = vrot.slane %v25967_v49, 1  ;;  %22912 = vmatprep.mubr.msk.bf16.mxu0 %vm23377_vm0, %v27921_v13  ;;  %v6034_v36 = vsel %vm3370_vm2, %v6033_v18, %v6032_v54  ;;  %v14363_v58 = vrot.slane %v25982_v56, %v24054_v42 }
 0x28d   : > { %v21935_v31 = vld.sshfl [vmem:[%s24048_s11 + $0xc8] sm:$0x1 pattern:$0x75316420]  ;;  %v6030_v30 = vsel %vm3385_vm7, %v6029_v1, %v6028_v19  ;;  %v6036_v33 = vsel %vm3373_vm3, %v6035_v39, %v6034_v36  ;;  %v14377_v4 = vrot.slane %v21927_v26, %v24054_v42  ;;  %v14391_v5 = vrot.slane %v21928_v57, %v24054_v42 }
 0x28e   : > { %v21936_v35 = vld.sshfl [vmem:[%s24048_s11 + $0xc9] sm:$0x1 pattern:$0x75316420]  ;;  %v14405_v51 = vrot.slane %v21929_v8, %v24054_v42  ;;  %22757 = vmatpush3.bf16.msra.mxu1 %v23330_v12  ;;  %v6038_v21 = vsel %vm3376_vm4, %v6037_v16, %v6036_v33  ;;  %v14419_v27 = vrot.slane %v21930_v44, %v24054_v42  ;;  %v14433_v10 = vrot.slane %v21931_v2, %v24054_v42 }
 0x28f   : > { %v21937_v53 = vld.sshfl [vmem:[%s24048_s11 + $0xca] sm:$0x1 pattern:$0x75316420]  ;;  %v14447_v14 = vrot.slane %v21932_v0, %v24054_v42  ;;  %22758 = vmatprep.subr.bf16.mxu1 %v27921_v13  ;;  %v6040_v49 = vsel %vm3379_vm5, %v6039_v32, %v6038_v21  ;;  %v14461_v17 = vrot.slane %v21933_v6, %v24054_v42  ;;  %v14475_v47 = vrot.slane %v21934_v38, %v24054_v42 }
 0x290   : > { %v21938_v41 = vld.sshfl [vmem:[%s24048_s11 + $0xcb] sm:$0x1 pattern:$0x75316420]  ;;  %v14489_v34 = vrot.slane %v21935_v31, %v24054_v42  ;;  %v6042_v63 = vsel %vm3382_vm6, %v6041_v45, %v6040_v49  ;;  %v14503_v22 = vrot.slane %v21936_v35, %v24054_v42  ;;  %v14517_v43 = vrot.slane %v21937_v53, %v24054_v42 }
 0x291   : > { %v21939_v59 = vld.sshfl [vmem:[%s24048_s11 + $0xcc] sm:$0x1 pattern:$0x75316420]  ;;  %v14531_v37 = vrot.slane %v21938_v41, %v24054_v42  ;;  %v6044_v46 = vsel %vm3385_vm7, %v6043_v25, %v6042_v63  ;;  %v15072_v56 = vunpack.c.l.b16 %v14349_v55  ;;  %v26042_v50 = vunpack.c.l.b16 %v14363_v58 }
 0x292   : > { %v21940_v29 = vld.sshfl [vmem:[%s24048_s11 + $0xcd] sm:$0x1 pattern:$0x75316420]  ;;  %v14545_v48 = vrot.slane %v21939_v59, %v24054_v42  ;;  %v6186_v28 = vpack.c.b16 %v6044_v46, %v6030_v30  ;;  %v26044_v62 = vunpack.c.l.b16 %v14377_v4  ;;  %v26046_v1 = vunpack.c.l.b16 %v14391_v5 }
 0x293   : > { %v14559_v40 = vrot.slane %v21940_v29, %v24054_v42  ;;  %v23332_v26 = vld [vmem:[%s24045_s10 + $0xe8] sm:$0xff]   ;;  %v26049_v57 = vunpack.c.l.b16 %v14405_v51  ;;  %v26051_v8 = vunpack.c.l.b16 %v14419_v27  ;;  %v26053_v12 = vunpack.c.l.b16 %v14433_v10  ;;  %v20908_v49 = vld.sshfl [vmem:[%s24048_s11 + $0x50] sm:$0x1 pattern:$0x75316420] }
 0x294   : > { %v26055_v23 = vunpack.c.l.b16 %v14447_v14  ;;  %22725 = vmatmul.mubr.bf16.gmra.mrb[4].mxu1 %v6186_v28  ;;  %v15080_v15 = vunpack.c.l.b16 %v14461_v17  ;;  %v15081_v20 = vunpack.c.l.b16 %v14475_v47  ;;  %v15082_v18 = vunpack.c.l.b16 %v14489_v34  ;;  %v20901_v16 = vld.sshfl [vmem:[%s24048_s11 + $0x49] sm:$0x1 pattern:$0x75316420] }
 0x295   : > { %v15083_v44 = vunpack.c.l.b16 %v14503_v22  ;;  %v15084_v2 = vunpack.c.l.b16 %v14517_v43  ;;  %v15085_v0 = vunpack.c.l.b16 %v14531_v37  ;;  %v15086_v11 = vunpack.c.l.b16 %v14545_v48  ;;  %22728 = vmatprep.mubr.msk.bf16.mxu1 %vm23377_vm0, %v27921_v13  ;;  %22759 = vmatpush3.bf16.msra.mxu1 %v23332_v26  ;;  %v20902_v19 = vld.sshfl [vmem:[%s24048_s11 + $0x4a] sm:$0x1 pattern:$0x75316420] }
 0x296   : > { %v15087_v39 = vunpack.c.l.b16 %v14559_v40  ;;  %v15232_v32 = vrot.slane %v26042_v50, 7  ;;  %v15234_v6 = vrot.slane %v26044_v62, 6  ;;  %v15236_v38 = vrot.slane %v26046_v1, 5  ;;  %22760 = vmatprep.subr.bf16.mxu1 %v27921_v13 }
 0x297   : > { %v15238_v31 = vrot.slane %v26049_v57, 4  ;;  %v20903_v54 = vld.sshfl [vmem:[%s24048_s11 + $0x4b] sm:$0x1 pattern:$0x75316420]  ;;  %v15240_v45 = vrot.slane %v26051_v8, 3  ;;  %v4770_v17 = vrot.slane %v20901_v16, %v24054_v42  ;;  %v4784_v22 = vrot.slane %v20902_v19, %v24054_v42 }
 0x298   : > { %v15242_v25 = vrot.slane %v26053_v12, 2  ;;  %v15244_v35 = vrot.slane %v26055_v23, 1  ;;  %v15246_v53 = vrot.slane %v15081_v20, 7  ;;  %v15233_v41 = vsel %vm3367_vm1, %v15232_v32, %v15072_v56 }
 0x299   : > { %v20904_v30 = vld.sshfl [vmem:[%s24048_s11 + $0x4c] sm:$0x1 pattern:$0x75316420]  ;;  %v15248_v55 = vrot.slane %v15082_v18, 6  ;;  %v15250_v58 = vrot.slane %v15083_v44, 5  ;;  %v15235_v4 = vsel %vm3370_vm2, %v15234_v6, %v15233_v41  ;;  %v4798_v43 = vrot.slane %v20903_v54, %v24054_v42 }
 0x29a   : > { %v20905_v36 = vld.sshfl [vmem:[%s24048_s11 + $0x4d] sm:$0x1 pattern:$0x75316420]  ;;  %v15252_v33 = vrot.slane %v15084_v2, 4  ;;  %v15247_v5 = vsel %vm3367_vm1, %v15246_v53, %v15080_v15  ;;  %v15254_v51 = vrot.slane %v15085_v0, 3  ;;  %v15237_v27 = vsel %vm3373_vm3, %v15236_v38, %v15235_v4 }
 0x29b   : > { %v20906_v59 = vld.sshfl [vmem:[%s24048_s11 + $0x4e] sm:$0x1 pattern:$0x75316420]  ;;  %v15256_v21 = vrot.slane %v15086_v11, 2  ;;  %v15249_v10 = vsel %vm3370_vm2, %v15248_v55, %v15247_v5  ;;  %v15258_v14 = vrot.slane %v15087_v39, 1  ;;  %v15239_v47 = vsel %vm3376_vm4, %v15238_v31, %v15237_v27 }
 0x29c   : > { %v20907_v29 = vld.sshfl [vmem:[%s24048_s11 + $0x4f] sm:$0x1 pattern:$0x75316420]  ;;  %v15251_v34 = vsel %vm3373_vm3, %v15250_v58, %v15249_v10  ;;  %v15241_v37 = vsel %vm3379_vm5, %v15240_v45, %v15239_v47  ;;  %v4812_v48 = vrot.slane %v20904_v30, %v24054_v42  ;;  %v4826_v40 = vrot.slane %v20905_v36, %v24054_v42 }
 0x29d   : > { %v20916_v63 = vld.sshfl [vmem:[%s24048_s11 + $0x62] sm:$0x1 pattern:$0x75316420]  ;;  %v15253_v46 = vsel %vm3376_vm4, %v15252_v33, %v15251_v34  ;;  %v15243_v56 = vsel %vm3382_vm6, %v15242_v25, %v15241_v37  ;;  %v4840_v26 = vrot.slane %v20906_v59, %v24054_v42  ;;  %v4854_v15 = vrot.slane %v20907_v29, %v24054_v42 }
 0x29e   : > { %v15255_v28 = vsel %vm3379_vm5, %v15254_v51, %v15253_v46  ;;  %v15245_v20 = vsel %vm3385_vm7, %v15244_v35, %v15243_v56  ;;  %v4868_v44 = vrot.slane %v20908_v49, %v24054_v42  ;;  %v4980_v2 = vrot.slane %v20916_v63, %v24054_v42  ;;  %v26100_v35 = vld.sshfl [vmem:[%s24048_s11 + $0xd8] sm:$0x1 pattern:$0x75316420] }
 0x29f   : > { %v15257_v18 = vsel %vm3382_vm6, %v15256_v21, %v15255_v28  ;;  %v5909_v11 = vunpack.c.l.b16 %v4770_v17  ;;  %v5910_v39 = vunpack.c.l.b16 %v4784_v22  ;;  %v5911_v16 = vunpack.c.l.b16 %v4798_v43  ;;  %v21942_v55 = vld.sshfl [vmem:[%s24048_s11 + $0xd9] sm:$0x1 pattern:$0x75316420] }
 0x2a0   : > { %v15259_v0 = vsel %vm3385_vm7, %v15258_v14, %v15257_v18  ;;  %v5912_v6 = vunpack.c.l.b16 %v4812_v48  ;;  %v5913_v38 = vunpack.c.l.b16 %v4826_v40  ;;  %v5914_v31 = vunpack.c.l.b16 %v4840_v26  ;;  %v21943_v58 = vld.sshfl [vmem:[%s24048_s11 + $0xda] sm:$0x1 pattern:$0x75316420] }
 0x2a1   : > { %v15320_v32 = vpack.c.b16 %v15259_v0, %v15245_v20  ;;  %v5915_v19 = vunpack.c.l.b16 %v4854_v15  ;;  %v5916_v54 = vunpack.c.l.b16 %v4868_v44  ;;  %v5924_v45 = vunpack.c.l.b16 %v4980_v2  ;;  %v21944_v51 = vld.sshfl [vmem:[%s24048_s11 + $0xdb] sm:$0x1 pattern:$0x75316420] }
 0x2a2   : > { %v6045_v25 = vrot.slane %v5910_v39, 7  ;;  %v6047_v53 = vrot.slane %v5911_v16, 6  ;;  %v6049_v30 = vrot.slane %v5912_v6, 5  ;;  %v6051_v36 = vrot.slane %v5913_v38, 4 }
 0x2a3   : > { %22913 = vmatmul.mubr.bf16.gmra.mrb[16].mxu0 %v15320_v32  ;;  %v6053_v41 = vrot.slane %v5914_v31, 3  ;;  %v6055_v59 = vrot.slane %v5915_v19, 2  ;;  %v6057_v4 = vrot.slane %v5916_v54, 1  ;;  %v6059_v5 = vrot.slane %v25832_v60, 7 }
 0x2a4   : > { %22916 = vmatprep.mubr.msk.bf16.mxu0 %vm23377_vm0, %v27921_v13  ;;  %v6046_v33 = vsel %vm3367_vm1, %v6045_v25, %v5909_v11  ;;  %v21945_v21 = vld.sshfl [vmem:[%s24048_s11 + $0xdc] sm:$0x1 pattern:$0x75316420]  ;;  %v6061_v27 = vrot.slane %v25834_v3, 6  ;;  %v6063_v10 = vrot.slane %v25836_v9, 5  ;;  %v14587_v28 = vrot.slane %v21942_v55, %v24054_v42 }
 0x2a5   : > { %v6048_v29 = vsel %vm3370_vm2, %v6047_v53, %v6046_v33  ;;  %v6065_v14 = vrot.slane %v25838_v7, 4  ;;  %v21946_v49 = vld.sshfl [vmem:[%s24048_s11 + $0xdd] sm:$0x1 pattern:$0x75316420]  ;;  %v6060_v60 = vsel %vm3367_vm1, %v6059_v5, %v25830_v61  ;;  %v6067_v34 = vrot.slane %v25840_v24, 3 }
 0x2a6   : > { %v21947_v17 = vld.sshfl [vmem:[%s24048_s11 + $0xde] sm:$0x1 pattern:$0x75316420]  ;;  %v6050_v47 = vsel %vm3373_vm3, %v6049_v30, %v6048_v29  ;;  %v6069_v63 = vrot.slane %v25842_v52, 2  ;;  %v6062_v7 = vsel %vm3370_vm2, %v6061_v27, %v6060_v60  ;;  %v6071_v37 = vrot.slane %v5924_v45, 1 }
 0x2a7   : > { %v21948_v22 = vld.sshfl [vmem:[%s24048_s11 + $0xdf] sm:$0x1 pattern:$0x75316420]  ;;  %v6052_v9 = vsel %vm3376_vm4, %v6051_v36, %v6050_v47  ;;  %v14573_v61 = vrot.slane %v26100_v35, %v24054_v42  ;;  %v6064_v52 = vsel %vm3373_vm3, %v6063_v10, %v6062_v7  ;;  %v14601_v26 = vrot.slane %v21943_v58, %v24054_v42  ;;  %v23334_v55 = vld [vmem:[%s24045_s10 + $0xf0] sm:$0xff]  }
 0x2a8   : > { %v21949_v3 = vld.sshfl [vmem:[%s24048_s11 + $0xea] sm:$0x1 pattern:$0x75316420]  ;;  %v6054_v24 = vsel %vm3379_vm5, %v6053_v41, %v6052_v9  ;;  %v6066_v20 = vsel %vm3376_vm4, %v6065_v14, %v6064_v52  ;;  %v14615_v44 = vrot.slane %v21944_v51, %v24054_v42  ;;  %v14629_v2 = vrot.slane %v21945_v21, %v24054_v42  ;;  %22761 = vmatpush3.bf16.msra.mxu1 %v23334_v55 }
 0x2a9   : > { %v21950_v43 = vld.sshfl [vmem:[%s24048_s11 + $0xeb] sm:$0x1 pattern:$0x75316420]  ;;  %v6056_v15 = vsel %vm3382_vm6, %v6055_v59, %v6054_v24  ;;  %v6068_v11 = vsel %vm3379_vm5, %v6067_v34, %v6066_v20  ;;  %v14643_v16 = vrot.slane %v21946_v49, %v24054_v42  ;;  %v14657_v32 = vrot.slane %v21947_v17, %v24054_v42  ;;  %v23335_v17 = vld [vmem:[%s24045_s10 + $0xf8] sm:$0xff]   ;;  %22762 = vmatprep.subr.bf16.mxu1 %v27921_v13 }
 0x2aa   : > { %v21951_v46 = vld.sshfl [vmem:[%s24048_s11 + $0xec] sm:$0x1 pattern:$0x75316420]  ;;  %v6058_v0 = vsel %vm3385_vm7, %v6057_v4, %v6056_v15  ;;  %v6070_v6 = vsel %vm3382_vm6, %v6069_v63, %v6068_v11  ;;  %v14671_v38 = vrot.slane %v21948_v22, %v24054_v42  ;;  %v14685_v31 = vrot.slane %v21949_v3, %v24054_v42 }
 0x2ab   : > { %v21952_v48 = vld.sshfl [vmem:[%s24048_s11 + $0xed] sm:$0x1 pattern:$0x75316420]  ;;  %v14699_v19 = vrot.slane %v21950_v43, %v24054_v42  ;;  %v6072_v54 = vsel %vm3385_vm7, %v6071_v37, %v6070_v6  ;;  %v14713_v45 = vrot.slane %v21951_v46, %v24054_v42  ;;  %v15088_v58 = vunpack.c.l.b16 %v14573_v61 }
 0x2ac   : > { %v21953_v40 = vld.sshfl [vmem:[%s24048_s11 + $0xee] sm:$0x1 pattern:$0x75316420]  ;;  %v14727_v25 = vrot.slane %v21952_v48, %v24054_v42  ;;  %v6187_v53 = vpack.c.b16 %v6072_v54, %v6058_v0  ;;  %v26158_v33 = vunpack.c.l.b16 %v14587_v28  ;;  %v26160_v59 = vunpack.c.l.b16 %v14601_v26  ;;  %22763 = vmatpush3.bf16.msra.mxu1 %v23335_v17 }
 0x2ad   : > { %v21954_v56 = vld.sshfl [vmem:[%s24048_s11 + $0xef] sm:$0x1 pattern:$0x75316420]  ;;  %v14741_v35 = vrot.slane %v21953_v40, %v24054_v42  ;;  %v26162_v4 = vunpack.c.l.b16 %v14615_v44  ;;  %v26164_v5 = vunpack.c.l.b16 %v14629_v2  ;;  %v26166_v51 = vunpack.c.l.b16 %v14643_v16  ;;  %23012 = vmatprep.subr.bf16.mxu1 %v27921_v13 }
 0x2ae   : > { %v21955_v18 = vld.sshfl [vmem:[%s24048_s11 + $0xf0] sm:$0x1 pattern:$0x75316420]  ;;  %v14755_v30 = vrot.slane %v21954_v56, %v24054_v42  ;;  %22729 = vmatmul.mubr.bf16.gmra.mrb[8].mxu1 %v6187_v53  ;;  %v26168_v21 = vunpack.c.l.b16 %v14657_v32  ;;  %v26170_v29 = vunpack.c.l.b16 %v14671_v38  ;;  %v15096_v27 = vunpack.c.l.b16 %v14685_v31 }
 0x2af   : > { %v21956_v39 = vld.sshfl [vmem:[%s24048_s11 + $0xf1] sm:$0x1 pattern:$0x75316420]  ;;  %v14769_v36 = vrot.slane %v21955_v18, %v24054_v42  ;;  %v15097_v10 = vunpack.c.l.b16 %v14699_v19  ;;  %v15098_v14 = vunpack.c.l.b16 %v14713_v45  ;;  %v15099_v49 = vunpack.c.l.b16 %v14727_v25  ;;  %22732 = vmatprep.mubr.msk.bf16.mxu1 %vm23377_vm0, %v27921_v13 }
 0x2b0   : > { %v14783_v41 = vrot.slane %v21956_v39, %v24054_v42  ;;  %v15100_v47 = vunpack.c.l.b16 %v14741_v35  ;;  %v15101_v60 = vunpack.c.l.b16 %v14755_v30  ;;  %v26176_v22 = vld.sshfl [vmem:[%s24048_s11 + $0x6d] sm:$0x1 pattern:$0x75316420]  ;;  %v15260_v3 = vrot.slane %v26158_v33, 7 }
 0x2b1   : > { %v15102_v34 = vunpack.c.l.b16 %v14769_v36  ;;  %v15262_v43 = vrot.slane %v26160_v59, 6  ;;  %v15264_v9 = vrot.slane %v26162_v4, 5  ;;  %v15266_v7 = vrot.slane %v26164_v5, 4 }
 0x2b2   : > { %v15103_v63 = vunpack.c.l.b16 %v14783_v41  ;;  %v20918_v37 = vld.sshfl [vmem:[%s24048_s11 + $0x6e] sm:$0x1 pattern:$0x75316420]  ;;  %v15268_v48 = vrot.slane %v26166_v51, 3  ;;  %v15270_v40 = vrot.slane %v26168_v21, 2  ;;  %v15261_v28 = vsel %vm3367_vm1, %v15260_v3, %v15088_v58 }
 0x2b3   : > { %v20919_v46 = vld.sshfl [vmem:[%s24048_s11 + $0x6f] sm:$0x1 pattern:$0x75316420]  ;;  %v15272_v61 = vrot.slane %v26170_v29, 1  ;;  %v15274_v24 = vrot.slane %v15097_v10, 7  ;;  %v15263_v2 = vsel %vm3370_vm2, %v15262_v43, %v15261_v28  ;;  %v4994_v25 = vrot.slane %v26176_v22, %v24054_v42 }
 0x2b4   : > { %v20920_v52 = vld.sshfl [vmem:[%s24048_s11 + $0x70] sm:$0x1 pattern:$0x75316420]  ;;  %v15276_v26 = vrot.slane %v15098_v14, 6  ;;  %v15278_v15 = vrot.slane %v15099_v49, 5  ;;  %v15265_v6 = vsel %vm3373_vm3, %v15264_v9, %v15263_v2  ;;  %v5008_v36 = vrot.slane %v20918_v37, %v24054_v42 }
 0x2b5   : > { %v20921_v56 = vld.sshfl [vmem:[%s24048_s11 + $0x71] sm:$0x1 pattern:$0x75316420]  ;;  %v15280_v20 = vrot.slane %v15100_v47, 4  ;;  %v15275_v0 = vsel %vm3367_vm1, %v15274_v24, %v15096_v27  ;;  %v15282_v11 = vrot.slane %v15101_v60, 3  ;;  %v15267_v35 = vsel %vm3376_vm4, %v15266_v7, %v15265_v6 }
 0x2b6   : > { %v20922_v18 = vld.sshfl [vmem:[%s24048_s11 + $0x72] sm:$0x1 pattern:$0x75316420]  ;;  %v15284_v39 = vrot.slane %v15102_v34, 2  ;;  %v15277_v38 = vsel %vm3370_vm2, %v15276_v26, %v15275_v0  ;;  %v15286_v31 = vrot.slane %v15103_v63, 1  ;;  %v5022_v41 = vrot.slane %v20919_v46, %v24054_v42 }
 0x2b7   : > { %v20923_v44 = vld.sshfl [vmem:[%s24048_s11 + $0x73] sm:$0x1 pattern:$0x75316420]  ;;  %v15279_v53 = vsel %vm3373_vm3, %v15278_v15, %v15277_v38  ;;  %v15269_v55 = vsel %vm3379_vm5, %v15268_v48, %v15267_v35  ;;  %v5036_v10 = vrot.slane %v20920_v52, %v24054_v42  ;;  %v5050_v14 = vrot.slane %v20921_v56, %v24054_v42 }
 0x2b8   : > { %v20924_v16 = vld.sshfl [vmem:[%s24048_s11 + $0x74] sm:$0x1 pattern:$0x75316420]  ;;  %v15281_v58 = vsel %vm3376_vm4, %v15280_v20, %v15279_v53  ;;  %v15271_v49 = vsel %vm3382_vm6, %v15270_v40, %v15269_v55  ;;  %v5064_v60 = vrot.slane %v20922_v18, %v24054_v42  ;;  %v5078_v34 = vrot.slane %v20923_v44, %v24054_v42 }
 0x2b9   : > { %v20925_v32 = vld.sshfl [vmem:[%s24048_s11 + $0x91] sm:$0x1 pattern:$0x75316420]  ;;  %v15283_v17 = vsel %vm3379_vm5, %v15282_v11, %v15281_v58  ;;  %v15273_v63 = vsel %vm3385_vm7, %v15272_v61, %v15271_v49  ;;  %v5092_v43 = vrot.slane %v20924_v16, %v24054_v42  ;;  %v5925_v28 = vunpack.c.l.b16 %v4994_v25 }
 0x2ba   : > { %v20926_v19 = vld.sshfl [vmem:[%s24048_s11 + $0x92] sm:$0x1 pattern:$0x75316420]  ;;  %v15285_v22 = vsel %vm3382_vm6, %v15284_v39, %v15283_v17  ;;  %v5106_v9 = vrot.slane %v20925_v32, %v24054_v42  ;;  %v5926_v26 = vunpack.c.l.b16 %v5008_v36  ;;  %v5927_v15 = vunpack.c.l.b16 %v5022_v41 }
 0x2bb   : > { %v20927_v54 = vld.sshfl [vmem:[%s24048_s11 + $0x93] sm:$0x1 pattern:$0x75316420]  ;;  %v15287_v7 = vsel %vm3385_vm7, %v15286_v31, %v15285_v22  ;;  %v5120_v37 = vrot.slane %v20926_v19, %v24054_v42  ;;  %v5928_v20 = vunpack.c.l.b16 %v5036_v10  ;;  %v5929_v18 = vunpack.c.l.b16 %v5050_v14 }
 0x2bc   : > { %v20928_v45 = vld.sshfl [vmem:[%s24048_s11 + $0x94] sm:$0x1 pattern:$0x75316420]  ;;  %v5134_v46 = vrot.slane %v20927_v54, %v24054_v42  ;;  %v15321_v40 = vpack.c.b16 %v15287_v7, %v15273_v63  ;;  %v5930_v44 = vunpack.c.l.b16 %v5064_v60  ;;  %v5931_v2 = vunpack.c.l.b16 %v5078_v34 }
 0x2bd   : > { %v20929_v30 = vld.sshfl [vmem:[%s24048_s11 + $0x95] sm:$0x1 pattern:$0x75316420]  ;;  %v5148_v48 = vrot.slane %v20928_v45, %v24054_v42  ;;  %v5932_v0 = vunpack.c.l.b16 %v5092_v43  ;;  %v5933_v11 = vunpack.c.l.b16 %v5106_v9  ;;  %v5934_v39 = vunpack.c.l.b16 %v5120_v37 }
 0x2be   : > { %v20930_v27 = vld.sshfl [vmem:[%s24048_s11 + $0x96] sm:$0x1 pattern:$0x75316420]  ;;  %v5162_v24 = vrot.slane %v20929_v30, %v24054_v42  ;;  %22917 = vmatmul.mubr.bf16.gmra.mrb[20].mxu0 %v15321_v40  ;;  %v5935_v16 = vunpack.c.l.b16 %v5134_v46  ;;  %v6073_v45 = vrot.slane %v5926_v26, 7  ;;  %v6075_v25 = vrot.slane %v5927_v15, 6 }
 0x2bf   : > { %v20931_v47 = vld.sshfl [vmem:[%s24048_s11 + $0x97] sm:$0x1 pattern:$0x75316420]  ;;  %v5176_v61 = vrot.slane %v20930_v27, %v24054_v42  ;;  %22920 = vmatprep.mubr.msk.bf16.mxu0 %vm23377_vm0, %v27921_v13  ;;  %v5936_v32 = vunpack.c.l.b16 %v5148_v48  ;;  %v6077_v35 = vrot.slane %v5928_v20, 5  ;;  %v6079_v36 = vrot.slane %v5929_v18, 4 }
 0x2c0   : > { %v20932_v3 = vld.sshfl [vmem:[%s24048_s11 + $0x98] sm:$0x1 pattern:$0x75316420]  ;;  %v5190_v52 = vrot.slane %v20931_v47, %v24054_v42  ;;  %v5937_v6 = vunpack.c.l.b16 %v5162_v24  ;;  %v6081_v41 = vrot.slane %v5930_v44, 3  ;;  %v6083_v55 = vrot.slane %v5931_v2, 2 }
 0x2c1   : > { %v5204_v56 = vrot.slane %v20932_v3, %v24054_v42  ;;  %v5938_v38 = vunpack.c.l.b16 %v5176_v61  ;;  %v21957_v19 = vld.sshfl [vmem:[%s24048_s11 + $0xfc] sm:$0x1 pattern:$0x75316420]  ;;  %v6085_v58 = vrot.slane %v5932_v0, 1  ;;  %v6074_v14 = vsel %vm3367_vm1, %v6073_v45, %v5925_v28 }
 0x2c2   : > { %v5939_v31 = vunpack.c.l.b16 %v5190_v52  ;;  %v21958_v53 = vld.sshfl [vmem:[%s24048_s11 + $0xfd] sm:$0x1 pattern:$0x75316420]  ;;  %v6087_v49 = vrot.slane %v5934_v39, 7  ;;  %v6089_v17 = vrot.slane %v5935_v16, 6  ;;  %v6076_v34 = vsel %vm3370_vm2, %v6075_v25, %v6074_v14 }
 0x2c3   : > { %v5940_v54 = vunpack.c.l.b16 %v5204_v56  ;;  %v21959_v30 = vld.sshfl [vmem:[%s24048_s11 + $0xfe] sm:$0x1 pattern:$0x75316420]  ;;  %v6091_v47 = vrot.slane %v5936_v32, 5  ;;  %v6093_v63 = vrot.slane %v5937_v6, 4  ;;  %v6078_v43 = vsel %vm3373_vm3, %v6077_v35, %v6076_v34 }
 0x2c4   : > { %v21960_v27 = vld.sshfl [vmem:[%s24048_s11 + $0xff] sm:$0x1 pattern:$0x75316420]  ;;  %v6095_v22 = vrot.slane %v5938_v38, 3  ;;  %v6097_v3 = vrot.slane %v5939_v31, 2  ;;  %v6088_v9 = vsel %vm3367_vm1, %v6087_v49, %v5933_v11  ;;  %v14797_v46 = vrot.slane %v21957_v19, %v24054_v42 }
 0x2c5   : > { %v21961_v10 = vld.sshfl [vmem:[%s24048_s11 + $0x100] sm:$0x1 pattern:$0x75316420]  ;;  %v6099_v7 = vrot.slane %v5940_v54, 1  ;;  %v6080_v48 = vsel %vm3376_vm4, %v6079_v36, %v6078_v43  ;;  %v6090_v40 = vsel %vm3370_vm2, %v6089_v17, %v6088_v9  ;;  %v14811_v61 = vrot.slane %v21958_v53, %v24054_v42 }
 0x2c6   : > { %v21962_v60 = vld.sshfl [vmem:[%s24048_s11 + $0x101] sm:$0x1 pattern:$0x75316420]  ;;  %v14825_v52 = vrot.slane %v21959_v30, %v24054_v42  ;;  %v6082_v56 = vsel %vm3379_vm5, %v6081_v41, %v6080_v48  ;;  %v6092_v28 = vsel %vm3373_vm3, %v6091_v47, %v6090_v40  ;;  %v14839_v15 = vrot.slane %v21960_v27, %v24054_v42 }
 0x2c7   : > { %v21963_v37 = vld.sshfl [vmem:[%s24048_s11 + $0x102] sm:$0x1 pattern:$0x75316420]  ;;  %v14853_v20 = vrot.slane %v21961_v10, %v24054_v42  ;;  %v6084_v18 = vsel %vm3382_vm6, %v6083_v55, %v6082_v56  ;;  %v6094_v44 = vsel %vm3376_vm4, %v6093_v63, %v6092_v28  ;;  %v14867_v0 = vrot.slane %v21962_v60, %v24054_v42 }
 0x2c8   : > { %v21964_v24 = vld.sshfl [vmem:[%s24048_s11 + $0x103] sm:$0x1 pattern:$0x75316420]  ;;  %v14881_v11 = vrot.slane %v21963_v37, %v24054_v42  ;;  %v6086_v39 = vsel %vm3385_vm7, %v6085_v58, %v6084_v18  ;;  %v6096_v16 = vsel %vm3379_vm5, %v6095_v22, %v6094_v44  ;;  %v15104_v25 = vunpack.c.l.b16 %v14797_v46 }
 0x2c9   : > { %v21965_v26 = vld.sshfl [vmem:[%s24048_s11 + $0x10e] sm:$0x1 pattern:$0x75316420]  ;;  %v14895_v6 = vrot.slane %v21964_v24, %v24054_v42  ;;  %v6098_v31 = vsel %vm3382_vm6, %v6097_v3, %v6096_v16  ;;  %v26274_v36 = vunpack.c.l.b16 %v14811_v61  ;;  %v26276_v41 = vunpack.c.l.b16 %v14825_v52 }
 0x2ca   : > { %v21966_v2 = vld.sshfl [vmem:[%s24048_s11 + $0x10f] sm:$0x1 pattern:$0x75316420]  ;;  %v14909_v38 = vrot.slane %v21965_v26, %v24054_v42  ;;  %v6100_v35 = vsel %vm3385_vm7, %v6099_v7, %v6098_v31  ;;  %v26280_v10 = vunpack.c.l.b16 %v14839_v15  ;;  %v26282_v14 = vunpack.c.l.b16 %v14853_v20 }
 0x2cb   : > { %v21967_v32 = vld.sshfl [vmem:[%s24048_s11 + $0x110] sm:$0x1 pattern:$0x75316420]  ;;  %v14923_v54 = vrot.slane %v21966_v2, %v24054_v42  ;;  %v6188_v55 = vpack.c.b16 %v6100_v35, %v6086_v39  ;;  %v26286_v47 = vunpack.c.l.b16 %v14867_v0  ;;  %v26288_v60 = vunpack.c.l.b16 %v14881_v11 }
 0x2cc   : > { %v21968_v19 = vld.sshfl [vmem:[%s24048_s11 + $0x111] sm:$0x1 pattern:$0x75316420]  ;;  %v14937_v45 = vrot.slane %v21967_v32, %v24054_v42  ;;  %v26290_v34 = vunpack.c.l.b16 %v14895_v6  ;;  %v15112_v3 = vunpack.c.l.b16 %v14909_v38  ;;  %v15288_v24 = vrot.slane %v26274_v36, 7 }
 0x2cd   : > { %v21969_v53 = vld.sshfl [vmem:[%s24048_s11 + $0x112] sm:$0x1 pattern:$0x75316420]  ;;  %v14951_v30 = vrot.slane %v21968_v19, %v24054_v42  ;;  %22733 = vmatmul.mubr.bf16.gmra.mrb[12].mxu1 %v6188_v55  ;;  %v15113_v43 = vunpack.c.l.b16 %v14923_v54  ;;  %v15290_v61 = vrot.slane %v26276_v41, 6  ;;  %v15292_v52 = vrot.slane %v26280_v10, 5 }
 0x2ce   : > { %v21970_v58 = vld.sshfl [vmem:[%s24048_s11 + $0x113] sm:$0x1 pattern:$0x75316420]  ;;  %v14965_v27 = vrot.slane %v21969_v53, %v24054_v42  ;;  %v15114_v9 = vunpack.c.l.b16 %v14937_v45  ;;  %22736 = vmatprep.mubr.msk.bf16.mxu1 %vm23377_vm0, %v27921_v13  ;;  %v15294_v26 = vrot.slane %v26282_v14, 4  ;;  %v15296_v15 = vrot.slane %v26286_v47, 3 }
 0x2cf   : > { %v21971_v49 = vld.sshfl [vmem:[%s24048_s11 + $0x114] sm:$0x1 pattern:$0x75316420]  ;;  %v14979_v17 = vrot.slane %v21970_v58, %v24054_v42  ;;  %v15115_v37 = vunpack.c.l.b16 %v14951_v30  ;;  %v15298_v20 = vrot.slane %v26288_v60, 2  ;;  %v15289_v18 = vsel %vm3367_vm1, %v15288_v24, %v15104_v25 }
 0x2d0   : > { %v21972_v63 = vld.sshfl [vmem:[%s24048_s11 + $0x115] sm:$0x1 pattern:$0x75316420]  ;;  %v14993_v22 = vrot.slane %v21971_v49, %v24054_v42  ;;  %v15116_v46 = vunpack.c.l.b16 %v14965_v27  ;;  %v15300_v44 = vrot.slane %v26290_v34, 1  ;;  %v15302_v2 = vrot.slane %v15113_v43, 7 }
 0x2d1   : > { %v15007_v7 = vrot.slane %v21972_v63, %v24054_v42  ;;  %v15117_v48 = vunpack.c.l.b16 %v14979_v17  ;;  %v20933_v56 = vld.sshfl [vmem:[%s24048_s11 + $0xa3] sm:$0x1 pattern:$0x75316420]  ;;  %v15304_v0 = vrot.slane %v15114_v9, 6  ;;  %v15291_v11 = vsel %vm3370_vm2, %v15290_v61, %v15289_v18 }
 0x2d2   : > { %v15118_v40 = vunpack.c.l.b16 %v14993_v22  ;;  %v15306_v39 = vrot.slane %v15115_v37, 5  ;;  %v15308_v16 = vrot.slane %v15116_v46, 4  ;;  %v15293_v6 = vsel %vm3373_vm3, %v15292_v52, %v15291_v11  ;;  %v20934_v54 = vld.sshfl [vmem:[%s24048_s11 + $0xa4] sm:$0x1 pattern:$0x75316420] }
 0x2d3   : > { %v15119_v28 = vunpack.c.l.b16 %v15007_v7  ;;  %v15310_v32 = vrot.slane %v15117_v48, 3  ;;  %v15303_v38 = vsel %vm3367_vm1, %v15302_v2, %v15112_v3  ;;  %v15295_v45 = vsel %vm3376_vm4, %v15294_v26, %v15293_v6  ;;  %v20935_v35 = vld.sshfl [vmem:[%s24048_s11 + $0xa5] sm:$0x1 pattern:$0x75316420] }
 0x2d4   : > { %v15312_v31 = vrot.slane %v15118_v40, 2  ;;  %v15305_v25 = vsel %vm3370_vm2, %v15304_v0, %v15303_v38  ;;  %v5218_v53 = vrot.slane %v20933_v56, %v24054_v42  ;;  %v5232_v30 = vrot.slane %v20934_v54, %v24054_v42  ;;  %v20936_v27 = vld.sshfl [vmem:[%s24048_s11 + $0xa6] sm:$0x1 pattern:$0x75316420] }
 0x2d5   : > { %v15314_v19 = vrot.slane %v15119_v28, 1  ;;  %v15297_v55 = vsel %vm3379_vm5, %v15296_v15, %v15295_v45  ;;  %v15307_v58 = vsel %vm3373_vm3, %v15306_v39, %v15305_v25  ;;  %v5246_v49 = vrot.slane %v20935_v35, %v24054_v42  ;;  %v20937_v3 = vld.sshfl [vmem:[%s24048_s11 + $0xa7] sm:$0x1 pattern:$0x75316420] }
 0x2d6   : > { %v6115_v17 = vrot.slane %v26044_v62, 7  ;;  %v15299_v63 = vsel %vm3382_vm6, %v15298_v20, %v15297_v55  ;;  %v15309_v22 = vsel %vm3376_vm4, %v15308_v16, %v15307_v58  ;;  %v5260_v43 = vrot.slane %v20936_v27, %v24054_v42  ;;  %v20938_v46 = vld.sshfl [vmem:[%s24048_s11 + $0xa8] sm:$0x1 pattern:$0x75316420] }
 0x2d7   : > { %v5941_v9 = vunpack.c.l.b16 %v5218_v53  ;;  %v15301_v7 = vsel %vm3385_vm7, %v15300_v44, %v15299_v63  ;;  %v15311_v37 = vsel %vm3379_vm5, %v15310_v32, %v15309_v22  ;;  %v5274_v48 = vrot.slane %v20937_v3, %v24054_v42  ;;  %v20939_v24 = vld.sshfl [vmem:[%s24048_s11 + $0xa9] sm:$0x1 pattern:$0x75316420] }
 0x2d8   : > { %v5942_v40 = vunpack.c.l.b16 %v5232_v30  ;;  %v15313_v62 = vsel %vm3382_vm6, %v15312_v31, %v15311_v37  ;;  %v5288_v61 = vrot.slane %v20938_v46, %v24054_v42  ;;  %v5943_v52 = vunpack.c.l.b16 %v5246_v49  ;;  %v20940_v26 = vld.sshfl [vmem:[%s24048_s11 + $0xaa] sm:$0x1 pattern:$0x75316420] }
 0x2d9   : > { %v5944_v56 = vunpack.c.l.b16 %v5260_v43  ;;  %v15315_v28 = vsel %vm3385_vm7, %v15314_v19, %v15313_v62  ;;  %v5302_v15 = vrot.slane %v20939_v24, %v24054_v42  ;;  %v5945_v20 = vunpack.c.l.b16 %v5274_v48  ;;  %v20948_v2 = vld.sshfl [vmem:[%s24048_s11 + $0xbc] sm:$0x1 pattern:$0x75316420] }
 0x2da   : > { %v6101_v18 = vrot.slane %v5942_v40, 7  ;;  %v15322_v44 = vpack.c.b16 %v15315_v28, %v15301_v7  ;;  %v5316_v0 = vrot.slane %v20940_v26, %v24054_v42  ;;  %v5946_v11 = vunpack.c.l.b16 %v5288_v61  ;;  %v22109_v31 = vld.sshfl [vmem:[%s24048_s11 + $0x12] sm:$0x1 pattern:$0x75316420] }
 0x2db   : > { %v6103_v39 = vrot.slane %v5943_v52, 6  ;;  %v5428_v16 = vrot.slane %v20948_v2, %v24054_v42  ;;  %v5947_v32 = vunpack.c.l.b16 %v5302_v15  ;;  %v6105_v38 = vrot.slane %v5944_v56, 5  ;;  %v22110_v35 = vld.sshfl [vmem:[%s24048_s11 + $0x13] sm:$0x1 pattern:$0x75316420] }
 0x2dc   : > { %v6102_v6 = vsel %vm3367_vm1, %v6101_v18, %v5941_v9  ;;  %22921 = vmatmul.mubr.bf16.gmra.mrb[24].mxu0 %v15322_v44  ;;  %v5948_v19 = vunpack.c.l.b16 %v5316_v0  ;;  %v6107_v45 = vrot.slane %v5945_v20, 4  ;;  %v6109_v25 = vrot.slane %v5946_v11, 3  ;;  %v22111_v27 = vld.sshfl [vmem:[%s24048_s11 + $0x14] sm:$0x1 pattern:$0x75316420] }
 0x2dd   : > { %v6104_v54 = vsel %vm3370_vm2, %v6103_v39, %v6102_v6  ;;  %22940 = vmatprep.mubr.msk.bf16.mxu0 %vm23377_vm0, %v27921_v13  ;;  %v5956_v53 = vunpack.c.l.b16 %v5428_v16  ;;  %v6111_v55 = vrot.slane %v5947_v32, 2  ;;  %v6116_v58 = vsel %vm3367_vm1, %v6115_v17, %v26042_v50  ;;  %v22112_v48 = vld.sshfl [vmem:[%s24048_s11 + $0x15] sm:$0x1 pattern:$0x75316420] }
 0x2de   : > { %v6106_v30 = vsel %vm3373_vm3, %v6105_v38, %v6104_v54  ;;  %v6113_v63 = vrot.slane %v5948_v19, 1  ;;  %v6117_v22 = vrot.slane %v26046_v1, 6  ;;  %v6119_v3 = vrot.slane %v26049_v57, 5 }
 0x2df   : > { %v6108_v49 = vsel %vm3376_vm4, %v6107_v45, %v6106_v30  ;;  %v6121_v9 = vrot.slane %v26051_v8, 4  ;;  %v6123_v7 = vrot.slane %v26053_v12, 3  ;;  %v6125_v37 = vrot.slane %v26055_v23, 2 }
 0x2e0   : > { %v6110_v43 = vsel %vm3379_vm5, %v6109_v25, %v6108_v49  ;;  %v6118_v17 = vsel %vm3370_vm2, %v6117_v22, %v6116_v58  ;;  %v6127_v46 = vrot.slane %v5956_v53, 1  ;;  %v15735_v1 = vrot.slane %v22109_v31, %v24054_v42  ;;  %v22113_v62 = vld.sshfl [vmem:[%s24048_s11 + $0x16] sm:$0x1 pattern:$0x75316420] }
 0x2e1   : > { %v6112_v50 = vsel %vm3382_vm6, %v6111_v55, %v6110_v43  ;;  %v6120_v40 = vsel %vm3373_vm3, %v6119_v3, %v6118_v17  ;;  %v15749_v8 = vrot.slane %v22110_v35, %v24054_v42  ;;  %v15763_v12 = vrot.slane %v22111_v27, %v24054_v42  ;;  %v22114_v24 = vld.sshfl [vmem:[%s24048_s11 + $0x17] sm:$0x1 pattern:$0x75316420] }
 0x2e2   : > { %v6114_v57 = vsel %vm3385_vm7, %v6113_v63, %v6112_v50  ;;  %v6122_v23 = vsel %vm3376_vm4, %v6121_v9, %v6120_v40  ;;  %v15777_v61 = vrot.slane %v22112_v48, %v24054_v42  ;;  %v15791_v52 = vrot.slane %v22113_v62, %v24054_v42  ;;  %v22115_v26 = vld.sshfl [vmem:[%s24048_s11 + $0x18] sm:$0x1 pattern:$0x75316420] }
 0x2e3   : > { %v17290_v56 = vunpack.c.l.b16 %v15735_v1  ;;  %v6124_v28 = vsel %vm3379_vm5, %v6123_v7, %v6122_v23  ;;  %v15805_v15 = vrot.slane %v22114_v24, %v24054_v42  ;;  %v17291_v20 = vunpack.c.l.b16 %v15749_v8  ;;  %v22116_v2 = vld.sshfl [vmem:[%s24048_s11 + $0x19] sm:$0x1 pattern:$0x75316420] }
 0x2e4   : > { %v17292_v18 = vunpack.c.l.b16 %v15763_v12  ;;  %v6126_v44 = vsel %vm3382_vm6, %v6125_v37, %v6124_v28  ;;  %v15819_v0 = vrot.slane %v22115_v26, %v24054_v42  ;;  %v17293_v11 = vunpack.c.l.b16 %v15777_v61  ;;  %v22117_v32 = vld.sshfl [vmem:[%s24048_s11 + $0x24] sm:$0x1 pattern:$0x75316420] }
 0x2e5   : > { %v17294_v39 = vunpack.c.l.b16 %v15791_v52  ;;  %v6128_v16 = vsel %vm3385_vm7, %v6127_v46, %v6126_v44  ;;  %v15833_v6 = vrot.slane %v22116_v2, %v24054_v42  ;;  %v17295_v38 = vunpack.c.l.b16 %v15805_v15  ;;  %v22118_v54 = vld.sshfl [vmem:[%s24048_s11 + $0x25] sm:$0x1 pattern:$0x75316420] }
 0x2e6   : > { %v17402_v31 = vrot.slane %v17290_v56, 1  ;;  %v6189_v19 = vpack.c.b16 %v6128_v16, %v6114_v57  ;;  %v15847_v45 = vrot.slane %v22117_v32, %v24054_v42  ;;  %v17296_v25 = vunpack.c.l.b16 %v15819_v0  ;;  %v22119_v53 = vld.sshfl [vmem:[%s24048_s11 + $0x26] sm:$0x1 pattern:$0x75316420] }
 0x2e7   : > { %v17404_v35 = vrot.slane %v17292_v18, 7  ;;  %v15861_v30 = vrot.slane %v22118_v54, %v24054_v42  ;;  %v17297_v55 = vunpack.c.l.b16 %v15833_v6  ;;  %v17406_v27 = vrot.slane %v17293_v11, 6  ;;  %v22120_v49 = vld.sshfl [vmem:[%s24048_s11 + $0x27] sm:$0x1 pattern:$0x75316420] }
 0x2e8   : > { %v17403_v58 = vsel %vm3367_vm1, %v17291_v20, %v17402_v31  ;;  %22737 = vmatmul.mubr.bf16.gmra.mrb[16].mxu1 %v6189_v19  ;;  %v15875_v63 = vrot.slane %v22119_v53, %v24054_v42  ;;  %v17298_v22 = vunpack.c.l.b16 %v15847_v45  ;;  %v17408_v43 = vrot.slane %v17294_v39, 5  ;;  %v22121_v9 = vld.sshfl [vmem:[%s24048_s11 + $0x28] sm:$0x1 pattern:$0x75316420] }
 0x2e9   : > { %v17405_v3 = vsel %vm3370_vm2, %v17404_v35, %v17403_v58  ;;  %v15889_v7 = vrot.slane %v22120_v49, %v24054_v42  ;;  %v17299_v37 = vunpack.c.l.b16 %v15861_v30  ;;  %v17410_v17 = vrot.slane %v17295_v38, 4  ;;  %22740 = vmatprep.mubr.msk.bf16.mxu1 %vm23377_vm0, %v27921_v13  ;;  %v22122_v46 = vld.sshfl [vmem:[%s24048_s11 + $0x29] sm:$0x1 pattern:$0x75316420] }
 0x2ea   : > { %v17407_v50 = vsel %vm3373_vm3, %v17406_v27, %v17405_v3  ;;  %v15903_v48 = vrot.slane %v22121_v9, %v24054_v42  ;;  %v17300_v1 = vunpack.c.l.b16 %v15875_v63  ;;  %v17412_v40 = vrot.slane %v17296_v25, 3  ;;  %v22123_v62 = vld.sshfl [vmem:[%s24048_s11 + $0x2a] sm:$0x1 pattern:$0x75316420] }
 0x2eb   : > { %v17409_v57 = vsel %vm3376_vm4, %v17408_v43, %v17407_v50  ;;  %v15917_v8 = vrot.slane %v22122_v46, %v24054_v42  ;;  %v17301_v12 = vunpack.c.l.b16 %v15889_v7  ;;  %v17414_v24 = vrot.slane %v17297_v55, 2  ;;  %v22124_v61 = vld.sshfl [vmem:[%s24048_s11 + $0x2b] sm:$0x1 pattern:$0x75316420] }
 0x2ec   : > { %v17411_v23 = vsel %vm3379_vm5, %v17410_v17, %v17409_v57  ;;  %v15931_v52 = vrot.slane %v22123_v62, %v24054_v42  ;;  %v17302_v56 = vunpack.c.l.b16 %v15903_v48  ;;  %v17416_v26 = vrot.slane %v17298_v22, 1  ;;  %v20949_v2 = vld.sshfl [vmem:[%s24048_s11 + $0xc7] sm:$0x1 pattern:$0x75316420] }
 0x2ed   : > { %v17413_v28 = vsel %vm3382_vm6, %v17412_v40, %v17411_v23  ;;  %v15945_v15 = vrot.slane %v22124_v61, %v24054_v42  ;;  %v17303_v20 = vunpack.c.l.b16 %v15917_v8  ;;  %v17418_v44 = vrot.slane %v17300_v1, 7  ;;  %v20950_v32 = vld.sshfl [vmem:[%s24048_s11 + $0xc8] sm:$0x1 pattern:$0x75316420]  ;;  %v23329_v57 = vld [vmem:[%s24045_s10 + $0x200] sm:$0xff]  }
 0x2ee   : > { %v17415_v18 = vsel %vm3385_vm7, %v17414_v24, %v17413_v28  ;;  %v17304_v0 = vunpack.c.l.b16 %v15931_v52  ;;  %v17417_v11 = vsel %vm3367_vm1, %v17299_v37, %v17416_v26  ;;  %v17420_v39 = vrot.slane %v17301_v12, 6  ;;  %v20951_v19 = vld.sshfl [vmem:[%s24048_s11 + $0xc9] sm:$0x1 pattern:$0x75316420] }
 0x2ef   : > { %v17422_v16 = vrot.slane %v17302_v56, 5  ;;  %v17305_v6 = vunpack.c.l.b16 %v15945_v15  ;;  %v17419_v38 = vsel %vm3370_vm2, %v17418_v44, %v17417_v11  ;;  %v17424_v31 = vrot.slane %v17303_v20, 4  ;;  %v20952_v35 = vld.sshfl [vmem:[%s24048_s11 + $0xca] sm:$0x1 pattern:$0x75316420] }
 0x2f0   : > { %v5442_v54 = vrot.slane %v20949_v2, %v24054_v42  ;;  %v17421_v45 = vsel %vm3373_vm3, %v17420_v39, %v17419_v38  ;;  %v17426_v25 = vrot.slane %v17304_v0, 3  ;;  %v5456_v53 = vrot.slane %v20950_v32, %v24054_v42  ;;  %v20953_v27 = vld.sshfl [vmem:[%s24048_s11 + $0xcb] sm:$0x1 pattern:$0x75316420] }
 0x2f1   : > { %v5470_v30 = vrot.slane %v20951_v19, %v24054_v42  ;;  %v17423_v55 = vsel %vm3376_vm4, %v17422_v16, %v17421_v45  ;;  %v17428_v58 = vrot.slane %v17305_v6, 2  ;;  %v5484_v49 = vrot.slane %v20952_v35, %v24054_v42  ;;  %v20954_v3 = vld.sshfl [vmem:[%s24048_s11 + $0xcc] sm:$0x1 pattern:$0x75316420] }
 0x2f2   : > { %v5957_v63 = vunpack.c.l.b16 %v5442_v54  ;;  %v17425_v22 = vsel %vm3379_vm5, %v17424_v31, %v17423_v55  ;;  %v5498_v43 = vrot.slane %v20953_v27, %v24054_v42  ;;  %v5958_v9 = vunpack.c.l.b16 %v5456_v53  ;;  %v20955_v50 = vld.sshfl [vmem:[%s24048_s11 + $0xcd] sm:$0x1 pattern:$0x75316420] }
 0x2f3   : > { %v5959_v7 = vunpack.c.l.b16 %v5470_v30  ;;  %v17427_v37 = vsel %vm3382_vm6, %v17426_v25, %v17425_v22  ;;  %v5512_v17 = vrot.slane %v20954_v3, %v24054_v42  ;;  %v5960_v46 = vunpack.c.l.b16 %v5484_v49  ;;  %v20956_v40 = vld.sshfl [vmem:[%s24048_s11 + $0xce] sm:$0x1 pattern:$0x75316420] }
 0x2f4   : > { %v6143_v48 = vrot.slane %v26160_v59, 7  ;;  %v17429_v1 = vsel %vm3385_vm7, %v17428_v58, %v17427_v37  ;;  %v5526_v62 = vrot.slane %v20955_v50, %v24054_v42  ;;  %v5961_v8 = vunpack.c.l.b16 %v5498_v43  ;;  %v20964_v24 = vld.sshfl [vmem:[%s24048_s11 + $0xe0] sm:$0x1 pattern:$0x75316420]  ;;  %v23331_v31 = vld [vmem:[%s24045_s10 + $0x208] sm:$0xff]  }
 0x2f5   : > { %v6129_v12 = vrot.slane %v5958_v9, 7  ;;  %v17598_v23 = vpack.c.b16 %v17429_v1, %v17415_v18  ;;  %v5540_v61 = vrot.slane %v20956_v40, %v24054_v42  ;;  %v5962_v52 = vunpack.c.l.b16 %v5512_v17  ;;  %v22125_v20 = vld.sshfl [vmem:[%s24048_s11 + $0x36] sm:$0x1 pattern:$0x75316420] }
 0x2f6   : > { %v6131_v56 = vrot.slane %v5959_v7, 6  ;;  %v5652_v28 = vrot.slane %v20964_v24, %v24054_v42  ;;  %v5963_v26 = vunpack.c.l.b16 %v5526_v62  ;;  %v6133_v15 = vrot.slane %v5960_v46, 5  ;;  %v22126_v11 = vld.sshfl [vmem:[%s24048_s11 + $0x37] sm:$0x1 pattern:$0x75316420] }
 0x2f7   : > { %v6130_v59 = vsel %vm3367_vm1, %v6129_v12, %v5957_v63  ;;  %22941 = vmatmul.mubr.bf16.vlgmr.msra.gmra.mrb[0].mxu0 %v17598_v23  ;;  %v5964_v44 = vunpack.c.l.b16 %v5540_v61  ;;  %v6135_v0 = vrot.slane %v5961_v8, 4  ;;  %v6137_v18 = vrot.slane %v5962_v52, 3  ;;  %v22127_v38 = vld.sshfl [vmem:[%s24048_s11 + $0x38] sm:$0x1 pattern:$0x75316420] }
 0x2f8   : > { %v6132_v2 = vsel %vm3370_vm2, %v6131_v56, %v6130_v59  ;;  %22969 = vmatpush3.bf16.msra.mxu0 %v23329_v57  ;;  %22944 = vmatprep.mubr.msk.bf16.mxu0 %vm23377_vm0, %v27921_v13  ;;  %v5972_v39 = vunpack.c.l.b16 %v5652_v28  ;;  %v6139_v32 = vrot.slane %v5963_v26, 2  ;;  %v6144_v6 = vsel %vm3367_vm1, %v6143_v48, %v26158_v33  ;;  %v22128_v49 = vld.sshfl [vmem:[%s24048_s11 + $0x39] sm:$0x1 pattern:$0x75316420] }
 0x2f9   : > { %v6134_v16 = vsel %vm3373_vm3, %v6133_v15, %v6132_v2  ;;  %22970 = vmatprep.subr.bf16.mxu0 %v27921_v13  ;;  %v6141_v54 = vrot.slane %v5964_v44, 1  ;;  %v6145_v45 = vrot.slane %v26162_v4, 6  ;;  %v6147_v25 = vrot.slane %v26164_v5, 5  ;;  %v23336_v28 = vld [vmem:[%s24045_s10 + $0x218] sm:$0xff]  }
 0x2fa   : > { %v6136_v19 = vsel %vm3376_vm4, %v6135_v0, %v6134_v16  ;;  %v6149_v53 = vrot.slane %v26166_v51, 4  ;;  %v6151_v33 = vrot.slane %v26168_v21, 3  ;;  %v6153_v30 = vrot.slane %v26170_v29, 2  ;;  %v23333_v29 = vld [vmem:[%s24045_s10 + $0x210] sm:$0xff]  }
 0x2fb   : > { %v6138_v35 = vsel %vm3379_vm5, %v6137_v18, %v6136_v19  ;;  %v6146_v58 = vsel %vm3370_vm2, %v6145_v45, %v6144_v6  ;;  %v6155_v27 = vrot.slane %v5972_v39, 1  ;;  %v15959_v4 = vrot.slane %v22125_v20, %v24054_v42  ;;  %v22129_v22 = vld.sshfl [vmem:[%s24048_s11 + $0x3a] sm:$0x1 pattern:$0x75316420] }
 0x2fc   : > { %v6140_v55 = vsel %vm3382_vm6, %v6139_v32, %v6138_v35  ;;  %v6148_v63 = vsel %vm3373_vm3, %v6147_v25, %v6146_v58  ;;  %v15973_v51 = vrot.slane %v22126_v11, %v24054_v42  ;;  %v15987_v21 = vrot.slane %v22127_v38, %v24054_v42  ;;  %22971 = vmatpush3.bf16.msra.mxu0 %v23331_v31  ;;  %v22130_v43 = vld.sshfl [vmem:[%s24048_s11 + $0x3b] sm:$0x1 pattern:$0x75316420] }
 0x2fd   : > { %v6142_v5 = vsel %vm3385_vm7, %v6141_v54, %v6140_v55  ;;  %v6150_v3 = vsel %vm3376_vm4, %v6149_v53, %v6148_v63  ;;  %v16001_v9 = vrot.slane %v22128_v49, %v24054_v42  ;;  %v16015_v7 = vrot.slane %v22129_v22, %v24054_v42  ;;  %22972 = vmatprep.subr.bf16.mxu0 %v27921_v13  ;;  %v22131_v17 = vld.sshfl [vmem:[%s24048_s11 + $0x3c] sm:$0x1 pattern:$0x75316420]  ;;  %v23337_v53 = vld [vmem:[%s24045_s10 + $0x220] sm:$0xff]  }
 0x2fe   : > { %v17306_v37 = vunpack.c.l.b16 %v15959_v4  ;;  %v6152_v50 = vsel %vm3379_vm5, %v6151_v33, %v6150_v3  ;;  %v16029_v46 = vrot.slane %v22130_v43, %v24054_v42  ;;  %v17307_v48 = vunpack.c.l.b16 %v15973_v51  ;;  %v22132_v40 = vld.sshfl [vmem:[%s24048_s11 + $0x3d] sm:$0x1 pattern:$0x75316420] }
 0x2ff   : > { %v17308_v1 = vunpack.c.l.b16 %v15987_v21  ;;  %v6154_v57 = vsel %vm3382_vm6, %v6153_v30, %v6152_v50  ;;  %v16043_v62 = vrot.slane %v22131_v17, %v24054_v42  ;;  %v17309_v8 = vunpack.c.l.b16 %v16001_v9  ;;  %v22133_v24 = vld.sshfl [vmem:[%s24048_s11 + $0x48] sm:$0x1 pattern:$0x75316420] }
 0x300   : > { %v17310_v12 = vunpack.c.l.b16 %v16015_v7  ;;  %v6156_v23 = vsel %vm3385_vm7, %v6155_v27, %v6154_v57  ;;  %v16057_v61 = vrot.slane %v22132_v40, %v24054_v42  ;;  %v17311_v52 = vunpack.c.l.b16 %v16029_v46  ;;  %22973 = vmatpush3.bf16.msra.mxu0 %v23333_v29  ;;  %v22134_v59 = vld.sshfl [vmem:[%s24048_s11 + $0x49] sm:$0x1 pattern:$0x75316420] }
 0x301   : > { %v17430_v56 = vrot.slane %v17306_v37, 1  ;;  %v6190_v26 = vpack.c.b16 %v6156_v23, %v6142_v5  ;;  %v16071_v15 = vrot.slane %v22133_v24, %v24054_v42  ;;  %v17312_v20 = vunpack.c.l.b16 %v16043_v62  ;;  %22974 = vmatprep.subr.bf16.mxu0 %v27921_v13  ;;  %v22135_v2 = vld.sshfl [vmem:[%s24048_s11 + $0x4a] sm:$0x1 pattern:$0x75316420] }
 0x302   : > { %v17432_v44 = vrot.slane %v17308_v1, 7  ;;  %v16085_v0 = vrot.slane %v22134_v59, %v24054_v42  ;;  %v17313_v18 = vunpack.c.l.b16 %v16057_v61  ;;  %v17434_v39 = vrot.slane %v17309_v8, 6  ;;  %v22136_v16 = vld.sshfl [vmem:[%s24048_s11 + $0x4b] sm:$0x1 pattern:$0x75316420] }
 0x303   : > { %v17431_v11 = vsel %vm3367_vm1, %v17307_v48, %v17430_v56  ;;  %22741 = vmatmul.mubr.bf16.gmra.mrb[20].mxu1 %v6190_v26  ;;  %v16099_v32 = vrot.slane %v22135_v2, %v24054_v42  ;;  %v17314_v6 = vunpack.c.l.b16 %v16071_v15  ;;  %v17436_v31 = vrot.slane %v17310_v12, 5  ;;  %v22137_v19 = vld.sshfl [vmem:[%s24048_s11 + $0x4c] sm:$0x1 pattern:$0x75316420] }
 0x304   : > { %v17433_v38 = vsel %vm3370_vm2, %v17432_v44, %v17431_v11  ;;  %v16113_v54 = vrot.slane %v22136_v16, %v24054_v42  ;;  %v17315_v45 = vunpack.c.l.b16 %v16085_v0  ;;  %v17438_v35 = vrot.slane %v17311_v52, 4  ;;  %22744 = vmatprep.mubr.msk.bf16.mxu1 %vm23377_vm0, %v27921_v13  ;;  %22975 = vmatpush3.bf16.msra.mxu0 %v23336_v28  ;;  %v22138_v33 = vld.sshfl [vmem:[%s24048_s11 + $0x4d] sm:$0x1 pattern:$0x75316420] }
 0x305   : > { %v17435_v25 = vsel %vm3373_vm3, %v17434_v39, %v17433_v38  ;;  %v16127_v30 = vrot.slane %v22137_v19, %v24054_v42  ;;  %v17316_v55 = vunpack.c.l.b16 %v16099_v32  ;;  %v17440_v27 = vrot.slane %v17312_v20, 3  ;;  %22976 = vmatprep.subr.bf16.mxu0 %v27921_v13  ;;  %v22139_v49 = vld.sshfl [vmem:[%s24048_s11 + $0x4e] sm:$0x1 pattern:$0x75316420] }
 0x306   : > { %v17437_v58 = vsel %vm3376_vm4, %v17436_v31, %v17435_v25  ;;  %v16141_v4 = vrot.slane %v22138_v33, %v24054_v42  ;;  %v17317_v5 = vunpack.c.l.b16 %v16113_v54  ;;  %v17442_v22 = vrot.slane %v17313_v18, 2  ;;  %v22140_v51 = vld.sshfl [vmem:[%s24048_s11 + $0x4f] sm:$0x1 pattern:$0x75316420] }
 0x307   : > { %v17439_v63 = vsel %vm3379_vm5, %v17438_v35, %v17437_v58  ;;  %v16155_v21 = vrot.slane %v22139_v49, %v24054_v42  ;;  %v17318_v29 = vunpack.c.l.b16 %v16127_v30  ;;  %v17444_v43 = vrot.slane %v17314_v6, 1  ;;  %v20965_v17 = vld.sshfl [vmem:[%s24048_s11 + $0xeb] sm:$0x1 pattern:$0x75316420]  ;;  %v23339_v6 = vld [vmem:[%s24045_s10 + $0x230] sm:$0xff]  }
 0x308   : > { %v17441_v3 = vsel %vm3382_vm6, %v17440_v27, %v17439_v63  ;;  %v16169_v9 = vrot.slane %v22140_v51, %v24054_v42  ;;  %v17319_v7 = vunpack.c.l.b16 %v16141_v4  ;;  %v17446_v50 = vrot.slane %v17316_v55, 7  ;;  %22977 = vmatpush3.bf16.msra.mxu0 %v23337_v53  ;;  %v23338_v46 = vld [vmem:[%s24045_s10 + $0x228] sm:$0xff]   ;;  %v20970_v11 = vld.sshfl [vmem:[%s24048_s11 + $0xf0] sm:$0x1 pattern:$0x75316420] }
 0x309   : > { %v17443_v37 = vsel %vm3385_vm7, %v17442_v22, %v17441_v3  ;;  %v17320_v48 = vunpack.c.l.b16 %v16155_v21  ;;  %v17445_v1 = vsel %vm3367_vm1, %v17315_v45, %v17444_v43  ;;  %v17448_v57 = vrot.slane %v17317_v5, 6  ;;  %v20966_v62 = vld.sshfl [vmem:[%s24048_s11 + $0xec] sm:$0x1 pattern:$0x75316420]  ;;  %22978 = vmatprep.subr.bf16.mxu0 %v27921_v13 }
 0x30a   : > { %v17450_v40 = vrot.slane %v17318_v29, 5  ;;  %v17321_v8 = vunpack.c.l.b16 %v16169_v9  ;;  %v17447_v12 = vsel %vm3370_vm2, %v17446_v50, %v17445_v1  ;;  %v17452_v23 = vrot.slane %v17319_v7, 4  ;;  %v20967_v24 = vld.sshfl [vmem:[%s24048_s11 + $0xed] sm:$0x1 pattern:$0x75316420] }
 0x30b   : > { %v5666_v61 = vrot.slane %v20965_v17, %v24054_v42  ;;  %v17449_v52 = vsel %vm3373_vm3, %v17448_v57, %v17447_v12  ;;  %v17454_v56 = vrot.slane %v17320_v48, 3  ;;  %v20968_v28 = vld.sshfl [vmem:[%s24048_s11 + $0xee] sm:$0x1 pattern:$0x75316420]  ;;  %v5680_v26 = vrot.slane %v20966_v62, %v24054_v42 }
 0x30c   : > { %v5694_v59 = vrot.slane %v20967_v24, %v24054_v42  ;;  %v17451_v15 = vsel %vm3376_vm4, %v17450_v40, %v17449_v52  ;;  %v17456_v20 = vrot.slane %v17321_v8, 2  ;;  %v20969_v44 = vld.sshfl [vmem:[%s24048_s11 + $0xef] sm:$0x1 pattern:$0x75316420]  ;;  %v5708_v2 = vrot.slane %v20968_v28, %v24054_v42  ;;  %22979 = vmatpush3.bf16.msra.mxu0 %v23338_v46 }
 0x30d   : > { %v5973_v0 = vunpack.c.l.b16 %v5666_v61  ;;  %v17453_v18 = vsel %vm3379_vm5, %v17452_v23, %v17451_v15  ;;  %v5722_v39 = vrot.slane %v20969_v44, %v24054_v42  ;;  %v5974_v16 = vunpack.c.l.b16 %v5680_v26  ;;  %22980 = vmatprep.subr.bf16.mxu0 %v27921_v13  ;;  %v20971_v31 = vld.sshfl [vmem:[%s24048_s11 + $0xf1] sm:$0x1 pattern:$0x75316420] }
 0x30e   : > { %v5975_v32 = vunpack.c.l.b16 %v5694_v59  ;;  %v17455_v38 = vsel %vm3382_vm6, %v17454_v56, %v17453_v18  ;;  %v5736_v19 = vrot.slane %v20970_v11, %v24054_v42  ;;  %v5976_v54 = vunpack.c.l.b16 %v5708_v2  ;;  %v20972_v35 = vld.sshfl [vmem:[%s24048_s11 + $0xf2] sm:$0x1 pattern:$0x75316420] }
 0x30f   : > { %v6171_v45 = vrot.slane %v26276_v41, 7  ;;  %v17457_v25 = vsel %vm3385_vm7, %v17456_v20, %v17455_v38  ;;  %v5750_v53 = vrot.slane %v20971_v31, %v24054_v42  ;;  %v5977_v33 = vunpack.c.l.b16 %v5722_v39  ;;  %v20980_v58 = vld.sshfl [vmem:[%s24048_s11 + $0x104] sm:$0x1 pattern:$0x75316420] }
 0x310   : > { %v6157_v30 = vrot.slane %v5974_v16, 7  ;;  %v17599_v55 = vpack.c.b16 %v17457_v25, %v17443_v37  ;;  %v5764_v27 = vrot.slane %v20972_v35, %v24054_v42  ;;  %v5978_v49 = vunpack.c.l.b16 %v5736_v19  ;;  %22981 = vmatpush3.bf16.msra.mxu0 %v23339_v6  ;;  %v22141_v51 = vld.sshfl [vmem:[%s24048_s11 + $0x5a] sm:$0x1 pattern:$0x75316420] }
 0x311   : > { %v6159_v4 = vrot.slane %v5975_v32, 6  ;;  %v5876_v5 = vrot.slane %v20980_v58, %v24054_v42  ;;  %v5979_v63 = vunpack.c.l.b16 %v5750_v53  ;;  %v6161_v22 = vrot.slane %v5976_v54, 5  ;;  %22982 = vmatprep.subr.bf16.mxu0 %v27921_v13  ;;  %v22142_v9 = vld.sshfl [vmem:[%s24048_s11 + $0x5b] sm:$0x1 pattern:$0x75316420] }
 0x312   : > { %v6158_v41 = vsel %vm3367_vm1, %v6157_v30, %v5973_v0  ;;  %22945 = vmatmul.mubr.bf16.gmra.mrb[4].mxu0 %v17599_v55  ;;  %v5980_v21 = vunpack.c.l.b16 %v5764_v27  ;;  %v6163_v3 = vrot.slane %v5977_v33, 4  ;;  %v6165_v43 = vrot.slane %v5978_v49, 3  ;;  %v22143_v46 = vld.sshfl [vmem:[%s24048_s11 + $0x5c] sm:$0x1 pattern:$0x75316420] }
 0x313   : > { %v6160_v29 = vsel %vm3370_vm2, %v6159_v4, %v6158_v41  ;;  %22948 = vmatprep.mubr.msk.bf16.mxu0 %vm23377_vm0, %v27921_v13  ;;  %v5988_v7 = vunpack.c.l.b16 %v5876_v5  ;;  %v6167_v50 = vrot.slane %v5979_v63, 2  ;;  %v6172_v17 = vsel %vm3367_vm1, %v6171_v45, %v26274_v36  ;;  %v22144_v52 = vld.sshfl [vmem:[%s24048_s11 + $0x5d] sm:$0x1 pattern:$0x75316420] }
 0x314   : > { %v6162_v37 = vsel %vm3373_vm3, %v6161_v22, %v6160_v29  ;;  %v6169_v1 = vrot.slane %v5980_v21, 1  ;;  %v6173_v57 = vrot.slane %v26280_v10, 6  ;;  %v6175_v40 = vrot.slane %v26282_v14, 5 }
 0x315   : > { %v6164_v48 = vsel %vm3376_vm4, %v6163_v3, %v6162_v37  ;;  %v6177_v8 = vrot.slane %v26286_v47, 4  ;;  %v6179_v12 = vrot.slane %v26288_v60, 3  ;;  %v6181_v23 = vrot.slane %v26290_v34, 2 }
 0x316   : > { %v6166_v62 = vsel %vm3379_vm5, %v6165_v43, %v6164_v48  ;;  %v6174_v24 = vsel %vm3370_vm2, %v6173_v57, %v6172_v17  ;;  %v6183_v61 = vrot.slane %v5988_v7, 1  ;;  %v16183_v10 = vrot.slane %v22141_v51, %v24054_v42  ;;  %v22145_v28 = vld.sshfl [vmem:[%s24048_s11 + $0x5e] sm:$0x1 pattern:$0x75316420] }
 0x317   : > { %v6168_v36 = vsel %vm3382_vm6, %v6167_v50, %v6166_v62  ;;  %v6176_v56 = vsel %vm3373_vm3, %v6175_v40, %v6174_v24  ;;  %v16197_v47 = vrot.slane %v22142_v9, %v24054_v42  ;;  %v16211_v60 = vrot.slane %v22143_v46, %v24054_v42  ;;  %v22146_v26 = vld.sshfl [vmem:[%s24048_s11 + $0x5f] sm:$0x1 pattern:$0x75316420] }
 0x318   : > { %v6170_v14 = vsel %vm3385_vm7, %v6169_v1, %v6168_v36  ;;  %v6178_v34 = vsel %vm3376_vm4, %v6177_v8, %v6176_v56  ;;  %v16225_v59 = vrot.slane %v22144_v52, %v24054_v42  ;;  %v16239_v15 = vrot.slane %v22145_v28, %v24054_v42  ;;  %v22147_v2 = vld.sshfl [vmem:[%s24048_s11 + $0x60] sm:$0x1 pattern:$0x75316420] }
 0x319   : > { %v17322_v20 = vunpack.c.l.b16 %v16183_v10  ;;  %v6180_v44 = vsel %vm3379_vm5, %v6179_v12, %v6178_v34  ;;  %v16253_v0 = vrot.slane %v22146_v26, %v24054_v42  ;;  %v17323_v18 = vunpack.c.l.b16 %v16197_v47  ;;  %v22148_v16 = vld.sshfl [vmem:[%s24048_s11 + $0x61] sm:$0x1 pattern:$0x75316420] }
 0x31a   : > { %v17324_v11 = vunpack.c.l.b16 %v16211_v60  ;;  %v6182_v39 = vsel %vm3382_vm6, %v6181_v23, %v6180_v44  ;;  %v16267_v32 = vrot.slane %v22147_v2, %v24054_v42  ;;  %v17325_v6 = vunpack.c.l.b16 %v16225_v59  ;;  %v22149_v19 = vld.sshfl [vmem:[%s24048_s11 + $0x6c] sm:$0x1 pattern:$0x75316420] }
 0x31b   : > { %v17326_v38 = vunpack.c.l.b16 %v16239_v15  ;;  %v6184_v31 = vsel %vm3385_vm7, %v6183_v61, %v6182_v39  ;;  %v16281_v54 = vrot.slane %v22148_v16, %v24054_v42  ;;  %v17327_v45 = vunpack.c.l.b16 %v16253_v0  ;;  %v22150_v53 = vld.sshfl [vmem:[%s24048_s11 + $0x6d] sm:$0x1 pattern:$0x75316420] }
 0x31c   : > { %v17458_v25 = vrot.slane %v17322_v20, 1  ;;  %v6191_v35 = vpack.c.b16 %v6184_v31, %v6170_v14  ;;  %v16295_v33 = vrot.slane %v22149_v19, %v24054_v42  ;;  %v17328_v30 = vunpack.c.l.b16 %v16267_v32  ;;  %v22151_v58 = vld.sshfl [vmem:[%s24048_s11 + $0x6e] sm:$0x1 pattern:$0x75316420] }
 0x31d   : > { %v17460_v55 = vrot.slane %v17324_v11, 7  ;;  %v16309_v27 = vrot.slane %v22150_v53, %v24054_v42  ;;  %v17329_v49 = vunpack.c.l.b16 %v16281_v54  ;;  %v17462_v5 = vrot.slane %v17325_v6, 6  ;;  %v22152_v63 = vld.sshfl [vmem:[%s24048_s11 + $0x6f] sm:$0x1 pattern:$0x75316420] }
 0x31e   : > { %v17459_v4 = vsel %vm3367_vm1, %v17323_v18, %v17458_v25  ;;  %22745 = vmatmul.mubr.bf16.gmra.mrb[24].mxu1 %v6191_v35  ;;  %v16323_v41 = vrot.slane %v22151_v58, %v24054_v42  ;;  %v17330_v22 = vunpack.c.l.b16 %v16295_v33  ;;  %v17464_v21 = vrot.slane %v17326_v38, 5  ;;  %v22153_v29 = vld.sshfl [vmem:[%s24048_s11 + $0x70] sm:$0x1 pattern:$0x75316420] }
 0x31f   : > { %v17461_v51 = vsel %vm3370_vm2, %v17460_v55, %v17459_v4  ;;  %v16337_v3 = vrot.slane %v22152_v63, %v24054_v42  ;;  %v17331_v43 = vunpack.c.l.b16 %v16309_v27  ;;  %v17466_v7 = vrot.slane %v17327_v45, 4  ;;  %22764 = vmatprep.mubr.msk.bf16.mxu1 %vm23377_vm0, %v27921_v13  ;;  %v22154_v37 = vld.sshfl [vmem:[%s24048_s11 + $0x71] sm:$0x1 pattern:$0x75316420] }
 0x320   : > { %v17463_v9 = vsel %vm3373_vm3, %v17462_v5, %v17461_v51  ;;  %v16351_v50 = vrot.slane %v22153_v29, %v24054_v42  ;;  %v17332_v17 = vunpack.c.l.b16 %v16323_v41  ;;  %v17468_v48 = vrot.slane %v17328_v30, 3  ;;  %v22155_v1 = vld.sshfl [vmem:[%s24048_s11 + $0x72] sm:$0x1 pattern:$0x75316420] }
 0x321   : > { %v17465_v46 = vsel %vm3376_vm4, %v17464_v21, %v17463_v9  ;;  %v16365_v57 = vrot.slane %v22154_v37, %v24054_v42  ;;  %v17333_v40 = vunpack.c.l.b16 %v16337_v3  ;;  %v17470_v8 = vrot.slane %v17329_v49, 2  ;;  %v22156_v12 = vld.sshfl [vmem:[%s24048_s11 + $0x73] sm:$0x1 pattern:$0x75316420] }
 0x322   : > { %v17467_v62 = vsel %vm3379_vm5, %v17466_v7, %v17465_v46  ;;  %v16379_v23 = vrot.slane %v22155_v1, %v24054_v42  ;;  %v17334_v36 = vunpack.c.l.b16 %v16351_v50  ;;  %v17472_v61 = vrot.slane %v17330_v22, 1  ;;  %v21117_v28 = vld.sshfl [vmem:[%s24048_s11 + $0x9] sm:$0x1 pattern:$0x75316420] }
 0x323   : > { %v17469_v24 = vsel %vm3382_vm6, %v17468_v48, %v17467_v62  ;;  %v16393_v52 = vrot.slane %v22156_v12, %v24054_v42  ;;  %v17335_v10 = vunpack.c.l.b16 %v16365_v57  ;;  %v17474_v56 = vrot.slane %v17332_v17, 7  ;;  %v21118_v59 = vld.sshfl [vmem:[%s24048_s11 + $0xa] sm:$0x1 pattern:$0x75316420] }
 0x324   : > { %v17471_v14 = vsel %vm3385_vm7, %v17470_v8, %v17469_v24  ;;  %v17336_v47 = vunpack.c.l.b16 %v16379_v23  ;;  %v17473_v60 = vsel %vm3367_vm1, %v17331_v43, %v17472_v61  ;;  %v17476_v34 = vrot.slane %v17333_v40, 6  ;;  %v21119_v2 = vld.sshfl [vmem:[%s24048_s11 + $0xb] sm:$0x1 pattern:$0x75316420]  ;;  %v23340_v40 = vld [vmem:[%s24045_s10 + $0x238] sm:$0xff]  }
 0x325   : > { %v17478_v26 = vrot.slane %v17334_v36, 5  ;;  %v17337_v15 = vunpack.c.l.b16 %v16393_v52  ;;  %v17475_v20 = vsel %vm3370_vm2, %v17474_v56, %v17473_v60  ;;  %v17480_v44 = vrot.slane %v17335_v10, 4  ;;  %v21120_v39 = vld.sshfl [vmem:[%s24048_s11 + $0xc] sm:$0x1 pattern:$0x75316420]  ;;  %22983 = vmatpush3.bf16.msra.mxu0 %v23340_v40 }
 0x326   : > { %v6605_v0 = vrot.slane %v21117_v28, %v24054_v42  ;;  %v17477_v18 = vsel %vm3373_vm3, %v17476_v34, %v17475_v20  ;;  %v17482_v11 = vrot.slane %v17336_v47, 3  ;;  %v6619_v16 = vrot.slane %v21118_v59, %v24054_v42  ;;  %v21121_v31 = vld.sshfl [vmem:[%s24048_s11 + $0xd] sm:$0x1 pattern:$0x75316420] }
 0x327   : > { %v6633_v32 = vrot.slane %v21119_v2, %v24054_v42  ;;  %v17479_v6 = vsel %vm3376_vm4, %v17478_v26, %v17477_v18  ;;  %v17484_v38 = vrot.slane %v17337_v15, 2  ;;  %v6647_v19 = vrot.slane %v21120_v39, %v24054_v42  ;;  %v21122_v25 = vld.sshfl [vmem:[%s24048_s11 + $0xe] sm:$0x1 pattern:$0x75316420] }
 0x328   : > { %v8160_v54 = vunpack.c.l.b16 %v6605_v0  ;;  %v17481_v45 = vsel %vm3379_vm5, %v17480_v44, %v17479_v6  ;;  %v6661_v35 = vrot.slane %v21121_v31, %v24054_v42  ;;  %v8161_v53 = vunpack.c.l.b16 %v6619_v16  ;;  %v21123_v55 = vld.sshfl [vmem:[%s24048_s11 + $0xf] sm:$0x1 pattern:$0x75316420] }
 0x329   : > { %v8162_v33 = vunpack.c.l.b16 %v6633_v32  ;;  %v17483_v30 = vsel %vm3382_vm6, %v17482_v11, %v17481_v45  ;;  %v6675_v58 = vrot.slane %v21122_v25, %v24054_v42  ;;  %v8163_v27 = vunpack.c.l.b16 %v6647_v19  ;;  %v21124_v4 = vld.sshfl [vmem:[%s24048_s11 + $0x10] sm:$0x1 pattern:$0x75316420] }
 0x32a   : > { %v17485_v49 = vsel %vm3385_vm7, %v17484_v38, %v17483_v30  ;;  %v6689_v5 = vrot.slane %v21123_v55, %v24054_v42  ;;  %v8164_v63 = vunpack.c.l.b16 %v6661_v35  ;;  %v8272_v41 = vrot.slane %v8161_v53, 7  ;;  %v21125_v51 = vld.sshfl [vmem:[%s24048_s11 + $0x1b] sm:$0x1 pattern:$0x75316420] }
 0x32b   : > { %v17600_v22 = vpack.c.b16 %v17485_v49, %v17471_v14  ;;  %v6703_v21 = vrot.slane %v21124_v4, %v24054_v42  ;;  %v8165_v29 = vunpack.c.l.b16 %v6675_v58  ;;  %v8274_v3 = vrot.slane %v8162_v33, 6  ;;  %v21126_v43 = vld.sshfl [vmem:[%s24048_s11 + $0x1c] sm:$0x1 pattern:$0x75316420] }
 0x32c   : > { %v6717_v9 = vrot.slane %v21125_v51, %v24054_v42  ;;  %v8166_v7 = vunpack.c.l.b16 %v6689_v5  ;;  %v8273_v37 = vsel %vm3367_vm1, %v8272_v41, %v8160_v54  ;;  %v8276_v50 = vrot.slane %v8163_v27, 5  ;;  %v21127_v17 = vld.sshfl [vmem:[%s24048_s11 + $0x1d] sm:$0x1 pattern:$0x75316420] }
 0x32d   : > { %22949 = vmatmul.mubr.bf16.gmra.mrb[8].mxu0 %v17600_v22  ;;  %v6731_v46 = vrot.slane %v21126_v43, %v24054_v42  ;;  %v8167_v48 = vunpack.c.l.b16 %v6703_v21  ;;  %v8275_v1 = vsel %vm3370_vm2, %v8274_v3, %v8273_v37  ;;  %v8278_v57 = vrot.slane %v8164_v63, 4  ;;  %v21128_v62 = vld.sshfl [vmem:[%s24048_s11 + $0x1e] sm:$0x1 pattern:$0x75316420] }
 0x32e   : > { %22952 = vmatprep.mubr.msk.bf16.mxu0 %vm23377_vm0, %v27921_v13  ;;  %v6745_v8 = vrot.slane %v21127_v17, %v24054_v42  ;;  %v8168_v12 = vunpack.c.l.b16 %v6717_v9  ;;  %v8277_v23 = vsel %vm3373_vm3, %v8276_v50, %v8275_v1  ;;  %v8280_v36 = vrot.slane %v8165_v29, 3  ;;  %v21129_v24 = vld.sshfl [vmem:[%s24048_s11 + $0x1f] sm:$0x1 pattern:$0x75316420] }
 0x32f   : > { %v6759_v61 = vrot.slane %v21128_v62, %v24054_v42  ;;  %v8169_v52 = vunpack.c.l.b16 %v6731_v46  ;;  %v8279_v10 = vsel %vm3376_vm4, %v8278_v57, %v8277_v23  ;;  %v8282_v14 = vrot.slane %v8166_v7, 2  ;;  %v21130_v56 = vld.sshfl [vmem:[%s24048_s11 + $0x20] sm:$0x1 pattern:$0x75316420] }
 0x330   : > { %v6773_v28 = vrot.slane %v21129_v24, %v24054_v42  ;;  %v8170_v47 = vunpack.c.l.b16 %v6745_v8  ;;  %v8281_v60 = vsel %vm3379_vm5, %v8280_v36, %v8279_v10  ;;  %v8284_v34 = vrot.slane %v8167_v48, 1  ;;  %v21131_v26 = vld.sshfl [vmem:[%s24048_s11 + $0x21] sm:$0x1 pattern:$0x75316420] }
 0x331   : > { %v6787_v59 = vrot.slane %v21130_v56, %v24054_v42  ;;  %v8171_v15 = vunpack.c.l.b16 %v6759_v61  ;;  %v8283_v20 = vsel %vm3382_vm6, %v8282_v14, %v8281_v60  ;;  %v8286_v44 = vrot.slane %v8169_v52, 7  ;;  %v21132_v2 = vld.sshfl [vmem:[%s24048_s11 + $0x22] sm:$0x1 pattern:$0x75316420] }
 0x332   : > { %v6801_v0 = vrot.slane %v21131_v26, %v24054_v42  ;;  %v8172_v18 = vunpack.c.l.b16 %v6773_v28  ;;  %v8285_v11 = vsel %vm3385_vm7, %v8284_v34, %v8283_v20  ;;  %v8288_v39 = vrot.slane %v8170_v47, 6  ;;  %v22157_v31 = vld.sshfl [vmem:[%s24048_s11 + $0x7e] sm:$0x1 pattern:$0x75316420]  ;;  %v23343_v26 = vld [vmem:[%s24045_s10 + $0x100] sm:$0xff]  }
 0x333   : > { %v6815_v16 = vrot.slane %v21132_v2, %v24054_v42  ;;  %v8173_v32 = vunpack.c.l.b16 %v6787_v59  ;;  %v8287_v6 = vsel %vm3367_vm1, %v8286_v44, %v8168_v12  ;;  %v8290_v38 = vrot.slane %v8171_v15, 5  ;;  %v22158_v25 = vld.sshfl [vmem:[%s24048_s11 + $0x7f] sm:$0x1 pattern:$0x75316420] }
 0x334   : > { %v8174_v19 = vunpack.c.l.b16 %v6801_v0  ;;  %v8289_v54 = vsel %vm3370_vm2, %v8288_v39, %v8287_v6  ;;  %v8292_v45 = vrot.slane %v8172_v18, 4  ;;  %v16407_v35 = vrot.slane %v22157_v31, %v24054_v42  ;;  %v22159_v55 = vld.sshfl [vmem:[%s24048_s11 + $0x80] sm:$0x1 pattern:$0x75316420] }
 0x335   : > { %v8175_v53 = vunpack.c.l.b16 %v6815_v16  ;;  %v8291_v33 = vsel %vm3373_vm3, %v8290_v38, %v8289_v54  ;;  %v8294_v30 = vrot.slane %v8173_v32, 3  ;;  %v16421_v58 = vrot.slane %v22158_v25, %v24054_v42  ;;  %v22160_v4 = vld.sshfl [vmem:[%s24048_s11 + $0x81] sm:$0x1 pattern:$0x75316420] }
 0x336   : > { %v8293_v27 = vsel %vm3376_vm4, %v8292_v45, %v8291_v33  ;;  %v8296_v49 = vrot.slane %v8174_v19, 2  ;;  %v16435_v5 = vrot.slane %v22159_v55, %v24054_v42  ;;  %v17338_v63 = vunpack.c.l.b16 %v16407_v35  ;;  %v22161_v51 = vld.sshfl [vmem:[%s24048_s11 + $0x82] sm:$0x1 pattern:$0x75316420]  ;;  %v23344_v35 = vld [vmem:[%s24045_s10 + $0x108] sm:$0xff]  }
 0x337   : > { %v8295_v41 = vsel %vm3379_vm5, %v8294_v30, %v8293_v27  ;;  %v8298_v22 = vrot.slane %v8175_v53, 1  ;;  %v16449_v21 = vrot.slane %v22160_v4, %v24054_v42  ;;  %v17339_v29 = vunpack.c.l.b16 %v16421_v58  ;;  %v22162_v43 = vld.sshfl [vmem:[%s24048_s11 + $0x83] sm:$0x1 pattern:$0x75316420] }
 0x338   : > { %v8297_v3 = vsel %vm3382_vm6, %v8296_v49, %v8295_v41  ;;  %v16463_v9 = vrot.slane %v22161_v51, %v24054_v42  ;;  %v17340_v7 = vunpack.c.l.b16 %v16435_v5  ;;  %v17486_v37 = vrot.slane %v17338_v63, 1  ;;  %v22163_v17 = vld.sshfl [vmem:[%s24048_s11 + $0x84] sm:$0x1 pattern:$0x75316420] }
 0x339   : > { %v8299_v50 = vsel %vm3385_vm7, %v8298_v22, %v8297_v3  ;;  %v16477_v46 = vrot.slane %v22162_v43, %v24054_v42  ;;  %v17341_v48 = vunpack.c.l.b16 %v16449_v21  ;;  %v22164_v57 = vld.sshfl [vmem:[%s24048_s11 + $0x85] sm:$0x1 pattern:$0x75316420]  ;;  %v16491_v40 = vrot.slane %v22163_v17, %v24054_v42 }
 0x33a   : > { %v8468_v1 = vpack.c.b16 %v8299_v50, %v8285_v11  ;;  %v17342_v62 = vunpack.c.l.b16 %v16463_v9  ;;  %v17487_v8 = vsel %vm3367_vm1, %v17339_v29, %v17486_v37  ;;  %v22165_v12 = vld.sshfl [vmem:[%s24048_s11 + $0xa2] sm:$0x1 pattern:$0x75316420]  ;;  %v16505_v23 = vrot.slane %v22164_v57, %v24054_v42  ;;  %v23345_v50 = vld [vmem:[%s24045_s10 + $0x110] sm:$0xff]  }
 0x33b   : > { %v17343_v36 = vunpack.c.l.b16 %v16477_v46  ;;  %v17488_v24 = vrot.slane %v17340_v7, 7  ;;  %v17490_v61 = vrot.slane %v17341_v48, 6  ;;  %v22166_v52 = vld.sshfl [vmem:[%s24048_s11 + $0xa3] sm:$0x1 pattern:$0x75316420]  ;;  %v16519_v10 = vrot.slane %v22165_v12, %v24054_v42 }
 0x33c   : > { %22765 = vmatmul.mubr.bf16.vlgmr.msra.gmra.mrb[0].mxu1 %v8468_v1  ;;  %v17344_v14 = vunpack.c.l.b16 %v16491_v40  ;;  %v17492_v56 = vrot.slane %v17342_v62, 5  ;;  %v22167_v28 = vld.sshfl [vmem:[%s24048_s11 + $0xa4] sm:$0x1 pattern:$0x75316420]  ;;  %v16533_v47 = vrot.slane %v22166_v52, %v24054_v42  ;;  %v17345_v20 = vunpack.c.l.b16 %v16505_v23 }
 0x33d   : > { %v17489_v60 = vsel %vm3370_vm2, %v17488_v24, %v17487_v8  ;;  %v17494_v34 = vrot.slane %v17343_v36, 4  ;;  %22768 = vmatprep.mubr.msk.bf16.mxu1 %vm23377_vm0, %v27921_v13  ;;  %23020 = vmatpush3.bf16.msra.mxu1 %v23343_v26  ;;  %v22168_v59 = vld.sshfl [vmem:[%s24048_s11 + $0xa5] sm:$0x1 pattern:$0x75316420]  ;;  %v16547_v15 = vrot.slane %v22167_v28, %v24054_v42  ;;  %v17346_v44 = vunpack.c.l.b16 %v16519_v10 }
 0x33e   : > { %v17491_v2 = vsel %vm3373_vm3, %v17490_v61, %v17489_v60  ;;  %23013 = vmatprep.subr.bf16.mxu1 %v27921_v13  ;;  %v22169_v0 = vld.sshfl [vmem:[%s24048_s11 + $0xa6] sm:$0x1 pattern:$0x75316420]  ;;  %v16561_v18 = vrot.slane %v22168_v59, %v24054_v42  ;;  %v17347_v11 = vunpack.c.l.b16 %v16533_v47  ;;  %v17496_v38 = vrot.slane %v17344_v14, 3 }
 0x33f   : > { %v17493_v39 = vsel %vm3376_vm4, %v17492_v56, %v17491_v2  ;;  %v22170_v16 = vld.sshfl [vmem:[%s24048_s11 + $0xa7] sm:$0x1 pattern:$0x75316420]  ;;  %v16575_v32 = vrot.slane %v22169_v0, %v24054_v42  ;;  %v17348_v6 = vunpack.c.l.b16 %v16547_v15  ;;  %v17500_v31 = vrot.slane %v17346_v44, 1 }
 0x340   : > { %v22171_v19 = vld.sshfl [vmem:[%s24048_s11 + $0xa8] sm:$0x1 pattern:$0x75316420]  ;;  %v16589_v54 = vrot.slane %v22170_v16, %v24054_v42  ;;  %v17349_v45 = vunpack.c.l.b16 %v16561_v18  ;;  %v17495_v25 = vsel %vm3379_vm5, %v17494_v34, %v17493_v39  ;;  %v17498_v55 = vrot.slane %v17345_v20, 2  ;;  %v23346_v34 = vld [vmem:[%s24045_s10 + $0x118] sm:$0xff]  }
 0x341   : > { %23021 = vmatpush3.bf16.msra.mxu1 %v23344_v35  ;;  %v22172_v53 = vld.sshfl [vmem:[%s24048_s11 + $0xa9] sm:$0x1 pattern:$0x75316420]  ;;  %v16603_v33 = vrot.slane %v22171_v19, %v24054_v42  ;;  %v17350_v30 = vunpack.c.l.b16 %v16575_v32  ;;  %v17501_v58 = vsel %vm3367_vm1, %v17347_v11, %v17500_v31  ;;  %v17502_v4 = vrot.slane %v17348_v6, 7 }
 0x342   : > { %23014 = vmatprep.subr.bf16.mxu1 %v27921_v13  ;;  %v16617_v27 = vrot.slane %v22172_v53, %v24054_v42  ;;  %v17351_v49 = vunpack.c.l.b16 %v16589_v54  ;;  %v17504_v5 = vrot.slane %v17349_v45, 6  ;;  %v21133_v63 = vld.sshfl [vmem:[%s24048_s11 + $0x2d] sm:$0x1 pattern:$0x75316420]  ;;  %v17497_v22 = vsel %vm3382_vm6, %v17496_v38, %v17495_v25  ;;  %v23347_v53 = vld [vmem:[%s24045_s10 + $0x120] sm:$0xff]  }
 0x343   : > { %v17352_v41 = vunpack.c.l.b16 %v16603_v33  ;;  %v17506_v51 = vrot.slane %v17350_v30, 5  ;;  %v21134_v21 = vld.sshfl [vmem:[%s24048_s11 + $0x2e] sm:$0x1 pattern:$0x75316420]  ;;  %v6829_v29 = vrot.slane %v21133_v63, %v24054_v42  ;;  %v17503_v43 = vsel %vm3370_vm2, %v17502_v4, %v17501_v58 }
 0x344   : > { %v17353_v3 = vunpack.c.l.b16 %v16617_v27  ;;  %v17508_v9 = vrot.slane %v17351_v49, 4  ;;  %v21135_v7 = vld.sshfl [vmem:[%s24048_s11 + $0x2f] sm:$0x1 pattern:$0x75316420]  ;;  %v6843_v37 = vrot.slane %v21134_v21, %v24054_v42  ;;  %v17505_v17 = vsel %vm3373_vm3, %v17504_v5, %v17503_v43 }
 0x345   : > { %23022 = vmatpush3.bf16.msra.mxu1 %v23345_v50  ;;  %v17510_v46 = vrot.slane %v17352_v41, 3  ;;  %v21136_v48 = vld.sshfl [vmem:[%s24048_s11 + $0x30] sm:$0x1 pattern:$0x75316420]  ;;  %v6857_v1 = vrot.slane %v21135_v7, %v24054_v42  ;;  %v8176_v57 = vunpack.c.l.b16 %v6829_v29  ;;  %v17507_v40 = vsel %vm3376_vm4, %v17506_v51, %v17505_v17  ;;  %v23348_v50 = vld [vmem:[%s24045_s10 + $0x128] sm:$0xff]  }
 0x346   : > { %23015 = vmatprep.subr.bf16.mxu1 %v27921_v13  ;;  %v17512_v62 = vrot.slane %v17353_v3, 2  ;;  %v21137_v8 = vld.sshfl [vmem:[%s24048_s11 + $0x31] sm:$0x1 pattern:$0x75316420]  ;;  %v6871_v12 = vrot.slane %v21136_v48, %v24054_v42  ;;  %v8177_v23 = vunpack.c.l.b16 %v6843_v37  ;;  %v17499_v36 = vsel %vm3385_vm7, %v17498_v55, %v17497_v22 }
 0x347   : > { %v17509_v24 = vsel %vm3379_vm5, %v17508_v9, %v17507_v40  ;;  %v21138_v61 = vld.sshfl [vmem:[%s24048_s11 + $0x32] sm:$0x1 pattern:$0x75316420]  ;;  %v6885_v52 = vrot.slane %v21137_v8, %v24054_v42  ;;  %v8178_v10 = vunpack.c.l.b16 %v6857_v1 }
 0x348   : > { %v17511_v14 = vsel %vm3382_vm6, %v17510_v46, %v17509_v24  ;;  %v21139_v56 = vld.sshfl [vmem:[%s24048_s11 + $0x33] sm:$0x1 pattern:$0x75316420]  ;;  %v6899_v28 = vrot.slane %v21138_v61, %v24054_v42  ;;  %v8179_v47 = vunpack.c.l.b16 %v6871_v12  ;;  %v8300_v60 = vrot.slane %v8177_v23, 7 }
 0x349   : > { %23023 = vmatpush3.bf16.msra.mxu1 %v23346_v34  ;;  %v17513_v26 = vsel %vm3385_vm7, %v17512_v62, %v17511_v14  ;;  %v21140_v59 = vld.sshfl [vmem:[%s24048_s11 + $0x34] sm:$0x1 pattern:$0x75316420]  ;;  %v6913_v15 = vrot.slane %v21139_v56, %v24054_v42  ;;  %v8180_v20 = vunpack.c.l.b16 %v6885_v52  ;;  %v8302_v44 = vrot.slane %v8178_v10, 6 }
 0x34a   : > { %23016 = vmatprep.subr.bf16.mxu1 %v27921_v13  ;;  %v17601_v2 = vpack.c.b16 %v17513_v26, %v17499_v36  ;;  %v21141_v0 = vld.sshfl [vmem:[%s24048_s11 + $0x3f] sm:$0x1 pattern:$0x75316420]  ;;  %v6927_v18 = vrot.slane %v21140_v59, %v24054_v42  ;;  %v8181_v11 = vunpack.c.l.b16 %v6899_v28  ;;  %v8301_v39 = vsel %vm3367_vm1, %v8300_v60, %v8176_v57  ;;  %v23349_v34 = vld [vmem:[%s24045_s10 + $0x130] sm:$0xff]  }
 0x34b   : > { %v21142_v16 = vld.sshfl [vmem:[%s24048_s11 + $0x40] sm:$0x1 pattern:$0x75316420]  ;;  %v6941_v32 = vrot.slane %v21141_v0, %v24054_v42  ;;  %v8182_v6 = vunpack.c.l.b16 %v6913_v15  ;;  %v8303_v38 = vsel %vm3370_vm2, %v8302_v44, %v8301_v39  ;;  %v8304_v31 = vrot.slane %v8179_v47, 5 }
 0x34c   : > { %22953 = vmatmul.mubr.bf16.gmra.mrb[12].mxu0 %v17601_v2  ;;  %v21143_v19 = vld.sshfl [vmem:[%s24048_s11 + $0x41] sm:$0x1 pattern:$0x75316420]  ;;  %v6955_v54 = vrot.slane %v21142_v16, %v24054_v42  ;;  %v8183_v45 = vunpack.c.l.b16 %v6927_v18  ;;  %v8306_v25 = vrot.slane %v8180_v20, 4  ;;  %v8308_v35 = vrot.slane %v8181_v11, 3 }
 0x34d   : > { %23024 = vmatpush3.bf16.msra.mxu1 %v23347_v53  ;;  %22956 = vmatprep.mubr.msk.bf16.mxu0 %vm23377_vm0, %v27921_v13  ;;  %v21144_v33 = vld.sshfl [vmem:[%s24048_s11 + $0x42] sm:$0x1 pattern:$0x75316420]  ;;  %v6969_v30 = vrot.slane %v21143_v19, %v24054_v42  ;;  %v8184_v55 = vunpack.c.l.b16 %v6941_v32  ;;  %v8305_v58 = vsel %vm3373_vm3, %v8304_v31, %v8303_v38  ;;  %v8310_v27 = vrot.slane %v8182_v6, 2 }
 0x34e   : > { %23017 = vmatprep.subr.bf16.mxu1 %v27921_v13  ;;  %v21145_v49 = vld.sshfl [vmem:[%s24048_s11 + $0x43] sm:$0x1 pattern:$0x75316420]  ;;  %v6983_v4 = vrot.slane %v21144_v33, %v24054_v42  ;;  %v8185_v5 = vunpack.c.l.b16 %v6955_v54  ;;  %v8307_v63 = vsel %vm3376_vm4, %v8306_v25, %v8305_v58  ;;  %v8312_v41 = vrot.slane %v8183_v45, 1 }
 0x34f   : > { %v21146_v22 = vld.sshfl [vmem:[%s24048_s11 + $0x44] sm:$0x1 pattern:$0x75316420]  ;;  %v6997_v51 = vrot.slane %v21145_v49, %v24054_v42  ;;  %v8186_v21 = vunpack.c.l.b16 %v6969_v30  ;;  %v8309_v29 = vsel %vm3379_vm5, %v8308_v35, %v8307_v63  ;;  %v23350_v35 = vld [vmem:[%s24045_s10 + $0x138] sm:$0xff]  }
 0x350   : > { %v21147_v3 = vld.sshfl [vmem:[%s24048_s11 + $0x45] sm:$0x1 pattern:$0x75316420]  ;;  %v7011_v43 = vrot.slane %v21146_v22, %v24054_v42  ;;  %v8187_v9 = vunpack.c.l.b16 %v6983_v4  ;;  %v8311_v7 = vsel %vm3382_vm6, %v8310_v27, %v8309_v29  ;;  %v8314_v37 = vrot.slane %v8185_v5, 7 }
 0x351   : > { %23025 = vmatpush3.bf16.msra.mxu1 %v23348_v50  ;;  %v21148_v17 = vld.sshfl [vmem:[%s24048_s11 + $0x46] sm:$0x1 pattern:$0x75316420]  ;;  %v7025_v46 = vrot.slane %v21147_v3, %v24054_v42  ;;  %v8188_v48 = vunpack.c.l.b16 %v6997_v51  ;;  %v8313_v1 = vsel %vm3385_vm7, %v8312_v41, %v8311_v7  ;;  %v8316_v57 = vrot.slane %v8186_v21, 6 }
 0x352   : > { %23018 = vmatprep.subr.bf16.mxu1 %v27921_v13  ;;  %v7039_v40 = vrot.slane %v21148_v17, %v24054_v42  ;;  %v8189_v62 = vunpack.c.l.b16 %v7011_v43  ;;  %v8315_v8 = vsel %vm3367_vm1, %v8314_v37, %v8184_v55  ;;  %v8318_v12 = vrot.slane %v8187_v9, 5  ;;  %v22173_v23 = vld.sshfl [vmem:[%s24048_s11 + $0xb4] sm:$0x1 pattern:$0x75316420] }
 0x353   : > { %v8190_v36 = vunpack.c.l.b16 %v7025_v46  ;;  %v8317_v24 = vsel %vm3370_vm2, %v8316_v57, %v8315_v8  ;;  %v8320_v61 = vrot.slane %v8188_v48, 4  ;;  %v22174_v52 = vld.sshfl [vmem:[%s24048_s11 + $0xb5] sm:$0x1 pattern:$0x75316420]  ;;  %v16631_v10 = vrot.slane %v22173_v23, %v24054_v42 }
 0x354   : > { %v8191_v14 = vunpack.c.l.b16 %v7039_v40  ;;  %v8319_v56 = vsel %vm3373_vm3, %v8318_v12, %v8317_v24  ;;  %v8322_v28 = vrot.slane %v8189_v62, 3  ;;  %v22175_v47 = vld.sshfl [vmem:[%s24048_s11 + $0xb6] sm:$0x1 pattern:$0x75316420]  ;;  %v16645_v60 = vrot.slane %v22174_v52, %v24054_v42 }
 0x355   : > { %23026 = vmatpush3.bf16.msra.mxu1 %v23349_v34  ;;  %v8321_v26 = vsel %vm3376_vm4, %v8320_v61, %v8319_v56  ;;  %v8324_v59 = vrot.slane %v8190_v36, 2  ;;  %v22176_v15 = vld.sshfl [vmem:[%s24048_s11 + $0xb7] sm:$0x1 pattern:$0x75316420]  ;;  %v16659_v20 = vrot.slane %v22175_v47, %v24054_v42  ;;  %v17354_v44 = vunpack.c.l.b16 %v16631_v10 }
 0x356   : > { %23019 = vmatprep.subr.bf16.mxu1 %v27921_v13  ;;  %v8323_v2 = vsel %vm3379_vm5, %v8322_v28, %v8321_v26  ;;  %v8326_v0 = vrot.slane %v8191_v14, 1  ;;  %v22177_v18 = vld.sshfl [vmem:[%s24048_s11 + $0xb8] sm:$0x1 pattern:$0x75316420]  ;;  %v16673_v11 = vrot.slane %v22176_v15, %v24054_v42  ;;  %v17355_v39 = vunpack.c.l.b16 %v16645_v60 }
 0x357   : > { %v8325_v16 = vsel %vm3382_vm6, %v8324_v59, %v8323_v2  ;;  %v22178_v32 = vld.sshfl [vmem:[%s24048_s11 + $0xb9] sm:$0x1 pattern:$0x75316420]  ;;  %v16687_v6 = vrot.slane %v22177_v18, %v24054_v42  ;;  %v17356_v38 = vunpack.c.l.b16 %v16659_v20  ;;  %v17514_v31 = vrot.slane %v17354_v44, 1 }
 0x358   : > { %v8327_v19 = vsel %vm3385_vm7, %v8326_v0, %v8325_v16  ;;  %v22179_v54 = vld.sshfl [vmem:[%s24048_s11 + $0xba] sm:$0x1 pattern:$0x75316420]  ;;  %v16701_v45 = vrot.slane %v22178_v32, %v24054_v42  ;;  %v17357_v25 = vunpack.c.l.b16 %v16673_v11 }
 0x359   : > { %23027 = vmatpush3.bf16.msra.mxu1 %v23350_v35  ;;  %v8469_v53 = vpack.c.b16 %v8327_v19, %v8313_v1  ;;  %v22180_v33 = vld.sshfl [vmem:[%s24048_s11 + $0xbb] sm:$0x1 pattern:$0x75316420]  ;;  %v16715_v30 = vrot.slane %v22179_v54, %v24054_v42  ;;  %v17358_v55 = vunpack.c.l.b16 %v16687_v6  ;;  %v17515_v58 = vsel %vm3367_vm1, %v17355_v39, %v17514_v31 }
 0x35a   : > { %v22181_v27 = vld.sshfl [vmem:[%s24048_s11 + $0xc6] sm:$0x1 pattern:$0x75316420]  ;;  %v16729_v49 = vrot.slane %v22180_v33, %v24054_v42  ;;  %v17359_v4 = vunpack.c.l.b16 %v16701_v45  ;;  %v17516_v5 = vrot.slane %v17356_v38, 7  ;;  %v17518_v63 = vrot.slane %v17357_v25, 6 }
 0x35b   : > { %22769 = vmatmul.mubr.bf16.gmra.mrb[4].mxu1 %v8469_v53  ;;  %v22182_v41 = vld.sshfl [vmem:[%s24048_s11 + $0xc7] sm:$0x1 pattern:$0x75316420]  ;;  %v16743_v22 = vrot.slane %v22181_v27, %v24054_v42  ;;  %v17360_v51 = vunpack.c.l.b16 %v16715_v30  ;;  %v17520_v21 = vrot.slane %v17358_v55, 5 }
 0x35c   : > { %v22183_v29 = vld.sshfl [vmem:[%s24048_s11 + $0xc8] sm:$0x1 pattern:$0x75316420]  ;;  %v16757_v3 = vrot.slane %v22182_v41, %v24054_v42  ;;  %v17517_v43 = vsel %vm3370_vm2, %v17516_v5, %v17515_v58  ;;  %v17522_v9 = vrot.slane %v17359_v4, 4  ;;  %22772 = vmatprep.mubr.msk.bf16.mxu1 %vm23377_vm0, %v27921_v13  ;;  %v17361_v50 = vunpack.c.l.b16 %v16729_v49 }
 0x35d   : > { %v22184_v7 = vld.sshfl [vmem:[%s24048_s11 + $0xc9] sm:$0x1 pattern:$0x75316420]  ;;  %v16771_v37 = vrot.slane %v22183_v29, %v24054_v42  ;;  %v17362_v17 = vunpack.c.l.b16 %v16743_v22  ;;  %v17519_v46 = vsel %vm3373_vm3, %v17518_v63, %v17517_v43  ;;  %v17524_v23 = vrot.slane %v17360_v51, 3 }
 0x35e   : > { %v22185_v48 = vld.sshfl [vmem:[%s24048_s11 + $0xca] sm:$0x1 pattern:$0x75316420]  ;;  %v16785_v1 = vrot.slane %v22184_v7, %v24054_v42  ;;  %v17363_v57 = vunpack.c.l.b16 %v16757_v3  ;;  %v17521_v40 = vsel %vm3376_vm4, %v17520_v21, %v17519_v46  ;;  %v17526_v47 = vrot.slane %v17361_v50, 2 }
 0x35f   : > { %v22186_v62 = vld.sshfl [vmem:[%s24048_s11 + $0xcb] sm:$0x1 pattern:$0x75316420]  ;;  %v16799_v8 = vrot.slane %v22185_v48, %v24054_v42  ;;  %v17364_v12 = vunpack.c.l.b16 %v16771_v37  ;;  %v17528_v36 = vrot.slane %v17362_v17, 1  ;;  %v17523_v10 = vsel %vm3379_vm5, %v17522_v9, %v17521_v40 }
 0x360   : > { %v22187_v24 = vld.sshfl [vmem:[%s24048_s11 + $0xcc] sm:$0x1 pattern:$0x75316420]  ;;  %v16813_v61 = vrot.slane %v22186_v62, %v24054_v42  ;;  %v17365_v52 = vunpack.c.l.b16 %v16785_v1  ;;  %v17525_v2 = vsel %vm3382_vm6, %v17524_v23, %v17523_v10 }
 0x361   : > { %v22188_v14 = vld.sshfl [vmem:[%s24048_s11 + $0xcd] sm:$0x1 pattern:$0x75316420]  ;;  %v16827_v56 = vrot.slane %v22187_v24, %v24054_v42  ;;  %v17366_v28 = vunpack.c.l.b16 %v16799_v8  ;;  %v17529_v60 = vsel %vm3367_vm1, %v17363_v57, %v17528_v36  ;;  %v17530_v59 = vrot.slane %v17364_v12, 7 }
 0x362   : > { %v16841_v34 = vrot.slane %v22188_v14, %v24054_v42  ;;  %v17367_v26 = vunpack.c.l.b16 %v16813_v61  ;;  %v17532_v15 = vrot.slane %v17365_v52, 6  ;;  %v21149_v20 = vld.sshfl [vmem:[%s24048_s11 + $0x51] sm:$0x1 pattern:$0x75316420]  ;;  %v17527_v58 = vsel %vm3385_vm7, %v17526_v47, %v17525_v2 }
 0x363   : > { %v17368_v44 = vunpack.c.l.b16 %v16827_v56  ;;  %v17534_v0 = vrot.slane %v17366_v28, 5  ;;  %v21150_v18 = vld.sshfl [vmem:[%s24048_s11 + $0x52] sm:$0x1 pattern:$0x75316420]  ;;  %v7053_v11 = vrot.slane %v21149_v20, %v24054_v42  ;;  %v17531_v16 = vsel %vm3370_vm2, %v17530_v59, %v17529_v60 }
 0x364   : > { %v17369_v39 = vunpack.c.l.b16 %v16841_v34  ;;  %v17536_v32 = vrot.slane %v17367_v26, 4  ;;  %v21151_v6 = vld.sshfl [vmem:[%s24048_s11 + $0x53] sm:$0x1 pattern:$0x75316420]  ;;  %v7067_v38 = vrot.slane %v21150_v18, %v24054_v42  ;;  %v17533_v31 = vsel %vm3373_vm3, %v17532_v15, %v17531_v16 }
 0x365   : > { %v17538_v19 = vrot.slane %v17368_v44, 3  ;;  %v21152_v54 = vld.sshfl [vmem:[%s24048_s11 + $0x54] sm:$0x1 pattern:$0x75316420]  ;;  %v7081_v45 = vrot.slane %v21151_v6, %v24054_v42  ;;  %v8192_v25 = vunpack.c.l.b16 %v7053_v11  ;;  %v17535_v35 = vsel %vm3376_vm4, %v17534_v0, %v17533_v31 }
 0x366   : > { %v17540_v53 = vrot.slane %v17369_v39, 2  ;;  %v21153_v33 = vld.sshfl [vmem:[%s24048_s11 + $0x55] sm:$0x1 pattern:$0x75316420]  ;;  %v7095_v30 = vrot.slane %v21152_v54, %v24054_v42  ;;  %v8193_v55 = vunpack.c.l.b16 %v7067_v38  ;;  %v17537_v27 = vsel %vm3379_vm5, %v17536_v32, %v17535_v35 }
 0x367   : > { %v21154_v49 = vld.sshfl [vmem:[%s24048_s11 + $0x56] sm:$0x1 pattern:$0x75316420]  ;;  %v7109_v4 = vrot.slane %v21153_v33, %v24054_v42  ;;  %v8194_v5 = vunpack.c.l.b16 %v7081_v45  ;;  %v17539_v63 = vsel %vm3382_vm6, %v17538_v19, %v17537_v27 }
 0x368   : > { %v21155_v41 = vld.sshfl [vmem:[%s24048_s11 + $0x57] sm:$0x1 pattern:$0x75316420]  ;;  %v7123_v22 = vrot.slane %v21154_v49, %v24054_v42  ;;  %v8195_v51 = vunpack.c.l.b16 %v7095_v30  ;;  %v8328_v21 = vrot.slane %v8193_v55, 7  ;;  %v17541_v29 = vsel %vm3385_vm7, %v17540_v53, %v17539_v63 }
 0x369   : > { %v21156_v3 = vld.sshfl [vmem:[%s24048_s11 + $0x58] sm:$0x1 pattern:$0x75316420]  ;;  %v7137_v43 = vrot.slane %v21155_v41, %v24054_v42  ;;  %v8196_v9 = vunpack.c.l.b16 %v7109_v4  ;;  %v8330_v7 = vrot.slane %v8194_v5, 6  ;;  %v17602_v37 = vpack.c.b16 %v17541_v29, %v17527_v58 }
 0x36a   : > { %v21157_v50 = vld.sshfl [vmem:[%s24048_s11 + $0x63] sm:$0x1 pattern:$0x75316420]  ;;  %v7151_v17 = vrot.slane %v21156_v3, %v24054_v42  ;;  %v8197_v46 = vunpack.c.l.b16 %v7123_v22  ;;  %v8329_v48 = vsel %vm3367_vm1, %v8328_v21, %v8192_v25  ;;  %v8332_v8 = vrot.slane %v8195_v51, 5 }
 0x36b   : > { %v21158_v1 = vld.sshfl [vmem:[%s24048_s11 + $0x64] sm:$0x1 pattern:$0x75316420]  ;;  %v7165_v57 = vrot.slane %v21157_v50, %v24054_v42  ;;  %v8198_v40 = vunpack.c.l.b16 %v7137_v43  ;;  %v8331_v62 = vsel %vm3370_vm2, %v8330_v7, %v8329_v48  ;;  %22957 = vmatmul.mubr.bf16.gmra.mrb[16].mxu0 %v17602_v37  ;;  %v8334_v24 = vrot.slane %v8196_v9, 4 }
 0x36c   : > { %v21159_v12 = vld.sshfl [vmem:[%s24048_s11 + $0x65] sm:$0x1 pattern:$0x75316420]  ;;  %v7179_v23 = vrot.slane %v21158_v1, %v24054_v42  ;;  %v8199_v36 = vunpack.c.l.b16 %v7151_v17  ;;  %v8336_v61 = vrot.slane %v8197_v46, 3  ;;  %22960 = vmatprep.mubr.msk.bf16.mxu0 %vm23377_vm0, %v27921_v13  ;;  %v8333_v56 = vsel %vm3373_vm3, %v8332_v8, %v8331_v62 }
 0x36d   : > { %v21160_v52 = vld.sshfl [vmem:[%s24048_s11 + $0x66] sm:$0x1 pattern:$0x75316420]  ;;  %v7193_v10 = vrot.slane %v21159_v12, %v24054_v42  ;;  %v8200_v14 = vunpack.c.l.b16 %v7165_v57  ;;  %v8338_v28 = vrot.slane %v8198_v40, 2  ;;  %v8335_v26 = vsel %vm3376_vm4, %v8334_v24, %v8333_v56 }
 0x36e   : > { %v21161_v47 = vld.sshfl [vmem:[%s24048_s11 + $0x67] sm:$0x1 pattern:$0x75316420]  ;;  %v7207_v60 = vrot.slane %v21160_v52, %v24054_v42  ;;  %v8201_v34 = vunpack.c.l.b16 %v7179_v23  ;;  %v8340_v59 = vrot.slane %v8199_v36, 1  ;;  %v8337_v2 = vsel %vm3379_vm5, %v8336_v61, %v8335_v26 }
 0x36f   : > { %v21162_v15 = vld.sshfl [vmem:[%s24048_s11 + $0x68] sm:$0x1 pattern:$0x75316420]  ;;  %v7221_v20 = vrot.slane %v21161_v47, %v24054_v42  ;;  %v8202_v44 = vunpack.c.l.b16 %v7193_v10  ;;  %v8339_v39 = vsel %vm3382_vm6, %v8338_v28, %v8337_v2 }
 0x370   : > { %v21163_v0 = vld.sshfl [vmem:[%s24048_s11 + $0x69] sm:$0x1 pattern:$0x75316420]  ;;  %v7235_v18 = vrot.slane %v21162_v15, %v24054_v42  ;;  %v8203_v11 = vunpack.c.l.b16 %v7207_v60  ;;  %v8342_v16 = vrot.slane %v8201_v34, 7  ;;  %v8341_v31 = vsel %vm3385_vm7, %v8340_v59, %v8339_v39 }
 0x371   : > { %v21164_v32 = vld.sshfl [vmem:[%s24048_s11 + $0x6a] sm:$0x1 pattern:$0x75316420]  ;;  %v7249_v6 = vrot.slane %v21163_v0, %v24054_v42  ;;  %v8204_v38 = vunpack.c.l.b16 %v7221_v20  ;;  %v8344_v19 = vrot.slane %v8202_v44, 6 }
 0x372   : > { %v7263_v54 = vrot.slane %v21164_v32, %v24054_v42  ;;  %v8205_v45 = vunpack.c.l.b16 %v7235_v18  ;;  %v8343_v25 = vsel %vm3367_vm1, %v8342_v16, %v8200_v14  ;;  %v8346_v35 = vrot.slane %v8203_v11, 5  ;;  %v22189_v53 = vld.sshfl [vmem:[%s24048_s11 + $0xd8] sm:$0x1 pattern:$0x75316420] }
 0x373   : > { %v8206_v33 = vunpack.c.l.b16 %v7249_v6  ;;  %v8345_v30 = vsel %vm3370_vm2, %v8344_v19, %v8343_v25  ;;  %v8348_v55 = vrot.slane %v8204_v38, 4  ;;  %v22190_v58 = vld.sshfl [vmem:[%s24048_s11 + $0xd9] sm:$0x1 pattern:$0x75316420]  ;;  %v16855_v27 = vrot.slane %v22189_v53, %v24054_v42 }
 0x374   : > { %v8207_v49 = vunpack.c.l.b16 %v7263_v54  ;;  %v8347_v4 = vsel %vm3373_vm3, %v8346_v35, %v8345_v30  ;;  %v8350_v5 = vrot.slane %v8205_v45, 3  ;;  %v22191_v63 = vld.sshfl [vmem:[%s24048_s11 + $0xda] sm:$0x1 pattern:$0x75316420]  ;;  %v16869_v41 = vrot.slane %v22190_v58, %v24054_v42 }
 0x375   : > { %v8349_v22 = vsel %vm3376_vm4, %v8348_v55, %v8347_v4  ;;  %v8352_v51 = vrot.slane %v8206_v33, 2  ;;  %v22192_v21 = vld.sshfl [vmem:[%s24048_s11 + $0xdb] sm:$0x1 pattern:$0x75316420]  ;;  %v16883_v29 = vrot.slane %v22191_v63, %v24054_v42  ;;  %v17370_v3 = vunpack.c.l.b16 %v16855_v27 }
 0x376   : > { %v8351_v43 = vsel %vm3379_vm5, %v8350_v5, %v8349_v22  ;;  %v8354_v9 = vrot.slane %v8207_v49, 1  ;;  %v22193_v7 = vld.sshfl [vmem:[%s24048_s11 + $0xdc] sm:$0x1 pattern:$0x75316420]  ;;  %v16897_v37 = vrot.slane %v22192_v21, %v24054_v42  ;;  %v17371_v50 = vunpack.c.l.b16 %v16869_v41 }
 0x377   : > { %v8353_v17 = vsel %vm3382_vm6, %v8352_v51, %v8351_v43  ;;  %v22194_v46 = vld.sshfl [vmem:[%s24048_s11 + $0xdd] sm:$0x1 pattern:$0x75316420]  ;;  %v16911_v48 = vrot.slane %v22193_v7, %v24054_v42  ;;  %v17372_v1 = vunpack.c.l.b16 %v16883_v29  ;;  %v17542_v57 = vrot.slane %v17370_v3, 1 }
 0x378   : > { %v8355_v40 = vsel %vm3385_vm7, %v8354_v9, %v8353_v17  ;;  %v22195_v62 = vld.sshfl [vmem:[%s24048_s11 + $0xde] sm:$0x1 pattern:$0x75316420]  ;;  %v16925_v8 = vrot.slane %v22194_v46, %v24054_v42  ;;  %v17373_v12 = vunpack.c.l.b16 %v16897_v37 }
 0x379   : > { %v8470_v23 = vpack.c.b16 %v8355_v40, %v8341_v31  ;;  %v22196_v36 = vld.sshfl [vmem:[%s24048_s11 + $0xdf] sm:$0x1 pattern:$0x75316420]  ;;  %v16939_v24 = vrot.slane %v22195_v62, %v24054_v42  ;;  %v17374_v61 = vunpack.c.l.b16 %v16911_v48  ;;  %v17543_v52 = vsel %vm3367_vm1, %v17371_v50, %v17542_v57 }
 0x37a   : > { %v22197_v10 = vld.sshfl [vmem:[%s24048_s11 + $0xea] sm:$0x1 pattern:$0x75316420]  ;;  %v16953_v14 = vrot.slane %v22196_v36, %v24054_v42  ;;  %v17375_v56 = vunpack.c.l.b16 %v16925_v8  ;;  %v17544_v28 = vrot.slane %v17372_v1, 7  ;;  %v17546_v47 = vrot.slane %v17373_v12, 6 }
 0x37b   : > { %22773 = vmatmul.mubr.bf16.gmra.mrb[8].mxu1 %v8470_v23  ;;  %v22198_v60 = vld.sshfl [vmem:[%s24048_s11 + $0xeb] sm:$0x1 pattern:$0x75316420]  ;;  %v16967_v34 = vrot.slane %v22197_v10, %v24054_v42  ;;  %v17376_v26 = vunpack.c.l.b16 %v16939_v24  ;;  %v17548_v59 = vrot.slane %v17374_v61, 5 }
 0x37c   : > { %v22199_v15 = vld.sshfl [vmem:[%s24048_s11 + $0xec] sm:$0x1 pattern:$0x75316420]  ;;  %v16981_v20 = vrot.slane %v22198_v60, %v24054_v42  ;;  %v17545_v44 = vsel %vm3370_vm2, %v17544_v28, %v17543_v52  ;;  %v17550_v2 = vrot.slane %v17375_v56, 4  ;;  %22776 = vmatprep.mubr.msk.bf16.mxu1 %vm23377_vm0, %v27921_v13  ;;  %v17377_v11 = vunpack.c.l.b16 %v16953_v14 }
 0x37d   : > { %v22200_v0 = vld.sshfl [vmem:[%s24048_s11 + $0xed] sm:$0x1 pattern:$0x75316420]  ;;  %v16995_v18 = vrot.slane %v22199_v15, %v24054_v42  ;;  %v17378_v39 = vunpack.c.l.b16 %v16967_v34  ;;  %v17547_v16 = vsel %vm3373_vm3, %v17546_v47, %v17545_v44  ;;  %v17552_v25 = vrot.slane %v17376_v26, 3 }
 0x37e   : > { %v22201_v32 = vld.sshfl [vmem:[%s24048_s11 + $0xee] sm:$0x1 pattern:$0x75316420]  ;;  %v17009_v6 = vrot.slane %v22200_v0, %v24054_v42  ;;  %v17379_v38 = vunpack.c.l.b16 %v16981_v20  ;;  %v17549_v31 = vsel %vm3376_vm4, %v17548_v59, %v17547_v16  ;;  %v17554_v4 = vrot.slane %v17377_v11, 2 }
 0x37f   : > { %v22202_v19 = vld.sshfl [vmem:[%s24048_s11 + $0xef] sm:$0x1 pattern:$0x75316420]  ;;  %v17023_v54 = vrot.slane %v22201_v32, %v24054_v42  ;;  %v17380_v45 = vunpack.c.l.b16 %v16995_v18  ;;  %v17556_v35 = vrot.slane %v17378_v39, 1  ;;  %v17551_v55 = vsel %vm3379_vm5, %v17550_v2, %v17549_v31 }
 0x380   : > { %v22203_v53 = vld.sshfl [vmem:[%s24048_s11 + $0xf0] sm:$0x1 pattern:$0x75316420]  ;;  %v17037_v33 = vrot.slane %v22202_v19, %v24054_v42  ;;  %v17381_v30 = vunpack.c.l.b16 %v17009_v6  ;;  %v17553_v3 = vsel %vm3382_vm6, %v17552_v25, %v17551_v55 }
 0x381   : > { %v22204_v58 = vld.sshfl [vmem:[%s24048_s11 + $0xf1] sm:$0x1 pattern:$0x75316420]  ;;  %v17051_v27 = vrot.slane %v22203_v53, %v24054_v42  ;;  %v17382_v49 = vunpack.c.l.b16 %v17023_v54  ;;  %v17557_v5 = vsel %vm3367_vm1, %v17379_v38, %v17556_v35  ;;  %v17558_v22 = vrot.slane %v17380_v45, 7 }
 0x382   : > { %v17065_v63 = vrot.slane %v22204_v58, %v24054_v42  ;;  %v17383_v41 = vunpack.c.l.b16 %v17037_v33  ;;  %v17560_v51 = vrot.slane %v17381_v30, 6  ;;  %v21165_v21 = vld.sshfl [vmem:[%s24048_s11 + $0x75] sm:$0x1 pattern:$0x75316420]  ;;  %v17555_v52 = vsel %vm3385_vm7, %v17554_v4, %v17553_v3 }
 0x383   : > { %v17384_v29 = vunpack.c.l.b16 %v17051_v27  ;;  %v17562_v43 = vrot.slane %v17382_v49, 5  ;;  %v21166_v9 = vld.sshfl [vmem:[%s24048_s11 + $0x76] sm:$0x1 pattern:$0x75316420]  ;;  %v7277_v7 = vrot.slane %v21165_v21, %v24054_v42  ;;  %v17559_v50 = vsel %vm3370_vm2, %v17558_v22, %v17557_v5 }
 0x384   : > { %v17385_v37 = vunpack.c.l.b16 %v17065_v63  ;;  %v17564_v17 = vrot.slane %v17383_v41, 4  ;;  %v21167_v46 = vld.sshfl [vmem:[%s24048_s11 + $0x77] sm:$0x1 pattern:$0x75316420]  ;;  %v7291_v48 = vrot.slane %v21166_v9, %v24054_v42  ;;  %v17561_v1 = vsel %vm3373_vm3, %v17560_v51, %v17559_v50 }
 0x385   : > { %v17566_v57 = vrot.slane %v17384_v29, 3  ;;  %v21168_v40 = vld.sshfl [vmem:[%s24048_s11 + $0x78] sm:$0x1 pattern:$0x75316420]  ;;  %v7305_v62 = vrot.slane %v21167_v46, %v24054_v42  ;;  %v8208_v8 = vunpack.c.l.b16 %v7277_v7  ;;  %v17563_v12 = vsel %vm3376_vm4, %v17562_v43, %v17561_v1 }
 0x386   : > { %v17568_v23 = vrot.slane %v17385_v37, 2  ;;  %v21169_v36 = vld.sshfl [vmem:[%s24048_s11 + $0x79] sm:$0x1 pattern:$0x75316420]  ;;  %v7319_v24 = vrot.slane %v21168_v40, %v24054_v42  ;;  %v8209_v61 = vunpack.c.l.b16 %v7291_v48  ;;  %v17565_v10 = vsel %vm3379_vm5, %v17564_v17, %v17563_v12 }
 0x387   : > { %v21170_v14 = vld.sshfl [vmem:[%s24048_s11 + $0x7a] sm:$0x1 pattern:$0x75316420]  ;;  %v7333_v56 = vrot.slane %v21169_v36, %v24054_v42  ;;  %v8210_v28 = vunpack.c.l.b16 %v7305_v62  ;;  %v17567_v47 = vsel %vm3382_vm6, %v17566_v57, %v17565_v10 }
 0x388   : > { %v21171_v60 = vld.sshfl [vmem:[%s24048_s11 + $0x7b] sm:$0x1 pattern:$0x75316420]  ;;  %v7347_v34 = vrot.slane %v21170_v14, %v24054_v42  ;;  %v8211_v26 = vunpack.c.l.b16 %v7319_v24  ;;  %v8356_v59 = vrot.slane %v8209_v61, 7  ;;  %v17569_v15 = vsel %vm3385_vm7, %v17568_v23, %v17567_v47 }
 0x389   : > { %v21172_v20 = vld.sshfl [vmem:[%s24048_s11 + $0x7c] sm:$0x1 pattern:$0x75316420]  ;;  %v7361_v44 = vrot.slane %v21171_v60, %v24054_v42  ;;  %v8212_v2 = vunpack.c.l.b16 %v7333_v56  ;;  %v8358_v0 = vrot.slane %v8210_v28, 6  ;;  %v17603_v18 = vpack.c.b16 %v17569_v15, %v17555_v52 }
 0x38a   : > { %v21173_v11 = vld.sshfl [vmem:[%s24048_s11 + $0x99] sm:$0x1 pattern:$0x75316420]  ;;  %v7375_v39 = vrot.slane %v21172_v20, %v24054_v42  ;;  %v8213_v16 = vunpack.c.l.b16 %v7347_v34  ;;  %v8357_v32 = vsel %vm3367_vm1, %v8356_v59, %v8208_v8  ;;  %v8360_v54 = vrot.slane %v8211_v26, 5 }
 0x38b   : > { %v21174_v6 = vld.sshfl [vmem:[%s24048_s11 + $0x9a] sm:$0x1 pattern:$0x75316420]  ;;  %v7389_v38 = vrot.slane %v21173_v11, %v24054_v42  ;;  %v8214_v31 = vunpack.c.l.b16 %v7361_v44  ;;  %v8359_v19 = vsel %vm3370_vm2, %v8358_v0, %v8357_v32  ;;  %22961 = vmatmul.mubr.bf16.gmra.mrb[20].mxu0 %v17603_v18  ;;  %v8362_v53 = vrot.slane %v8212_v2, 4 }
 0x38c   : > { %v21175_v45 = vld.sshfl [vmem:[%s24048_s11 + $0x9b] sm:$0x1 pattern:$0x75316420]  ;;  %v7403_v25 = vrot.slane %v21174_v6, %v24054_v42  ;;  %v8215_v35 = vunpack.c.l.b16 %v7375_v39  ;;  %v8364_v33 = vrot.slane %v8213_v16, 3  ;;  %22964 = vmatprep.mubr.msk.bf16.mxu0 %vm23377_vm0, %v27921_v13  ;;  %v8361_v27 = vsel %vm3373_vm3, %v8360_v54, %v8359_v19 }
 0x38d   : > { %v21176_v30 = vld.sshfl [vmem:[%s24048_s11 + $0x9c] sm:$0x1 pattern:$0x75316420]  ;;  %v7417_v55 = vrot.slane %v21175_v45, %v24054_v42  ;;  %v8216_v58 = vunpack.c.l.b16 %v7389_v38  ;;  %v8366_v49 = vrot.slane %v8214_v31, 2  ;;  %v8363_v41 = vsel %vm3376_vm4, %v8362_v53, %v8361_v27 }
 0x38e   : > { %v21177_v4 = vld.sshfl [vmem:[%s24048_s11 + $0x9d] sm:$0x1 pattern:$0x75316420]  ;;  %v7431_v5 = vrot.slane %v21176_v30, %v24054_v42  ;;  %v8217_v63 = vunpack.c.l.b16 %v7403_v25  ;;  %v8368_v22 = vrot.slane %v8215_v35, 1  ;;  %v8365_v3 = vsel %vm3379_vm5, %v8364_v33, %v8363_v41 }
 0x38f   : > { %v21178_v51 = vld.sshfl [vmem:[%s24048_s11 + $0x9e] sm:$0x1 pattern:$0x75316420]  ;;  %v7445_v21 = vrot.slane %v21177_v4, %v24054_v42  ;;  %v8218_v29 = vunpack.c.l.b16 %v7417_v55  ;;  %v8367_v37 = vsel %vm3382_vm6, %v8366_v49, %v8365_v3 }
 0x390   : > { %v21179_v43 = vld.sshfl [vmem:[%s24048_s11 + $0x9f] sm:$0x1 pattern:$0x75316420]  ;;  %v7459_v9 = vrot.slane %v21178_v51, %v24054_v42  ;;  %v8219_v7 = vunpack.c.l.b16 %v7431_v5  ;;  %v8370_v50 = vrot.slane %v8217_v63, 7  ;;  %v8369_v1 = vsel %vm3385_vm7, %v8368_v22, %v8367_v37 }
 0x391   : > { %v21180_v17 = vld.sshfl [vmem:[%s24048_s11 + $0xa0] sm:$0x1 pattern:$0x75316420]  ;;  %v7473_v46 = vrot.slane %v21179_v43, %v24054_v42  ;;  %v8220_v48 = vunpack.c.l.b16 %v7445_v21  ;;  %v8372_v57 = vrot.slane %v8218_v29, 6 }
 0x392   : > { %v7487_v40 = vrot.slane %v21180_v17, %v24054_v42  ;;  %v8221_v62 = vunpack.c.l.b16 %v7459_v9  ;;  %v8371_v8 = vsel %vm3367_vm1, %v8370_v50, %v8216_v58  ;;  %v8374_v12 = vrot.slane %v8219_v7, 5  ;;  %v22205_v23 = vld.sshfl [vmem:[%s24048_s11 + $0xfc] sm:$0x1 pattern:$0x75316420] }
 0x393   : > { %v8222_v36 = vunpack.c.l.b16 %v7473_v46  ;;  %v8373_v24 = vsel %vm3370_vm2, %v8372_v57, %v8371_v8  ;;  %v8376_v61 = vrot.slane %v8220_v48, 4  ;;  %v22206_v52 = vld.sshfl [vmem:[%s24048_s11 + $0xfd] sm:$0x1 pattern:$0x75316420]  ;;  %v17079_v10 = vrot.slane %v22205_v23, %v24054_v42 }
 0x394   : > { %v8223_v14 = vunpack.c.l.b16 %v7487_v40  ;;  %v8375_v56 = vsel %vm3373_vm3, %v8374_v12, %v8373_v24  ;;  %v8378_v28 = vrot.slane %v8221_v62, 3  ;;  %v22207_v47 = vld.sshfl [vmem:[%s24048_s11 + $0xfe] sm:$0x1 pattern:$0x75316420]  ;;  %v17093_v60 = vrot.slane %v22206_v52, %v24054_v42 }
 0x395   : > { %v8377_v34 = vsel %vm3376_vm4, %v8376_v61, %v8375_v56  ;;  %v8380_v26 = vrot.slane %v8222_v36, 2  ;;  %v22208_v59 = vld.sshfl [vmem:[%s24048_s11 + $0xff] sm:$0x1 pattern:$0x75316420]  ;;  %v17107_v15 = vrot.slane %v22207_v47, %v24054_v42  ;;  %v17386_v20 = vunpack.c.l.b16 %v17079_v10 }
 0x396   : > { %v8379_v44 = vsel %vm3379_vm5, %v8378_v28, %v8377_v34  ;;  %v8382_v2 = vrot.slane %v8223_v14, 1  ;;  %v22209_v0 = vld.sshfl [vmem:[%s24048_s11 + $0x100] sm:$0x1 pattern:$0x75316420]  ;;  %v17121_v18 = vrot.slane %v22208_v59, %v24054_v42  ;;  %v17387_v11 = vunpack.c.l.b16 %v17093_v60 }
 0x397   : > { %v8381_v39 = vsel %vm3382_vm6, %v8380_v26, %v8379_v44  ;;  %v22210_v16 = vld.sshfl [vmem:[%s24048_s11 + $0x101] sm:$0x1 pattern:$0x75316420]  ;;  %v17135_v32 = vrot.slane %v22209_v0, %v24054_v42  ;;  %v17388_v6 = vunpack.c.l.b16 %v17107_v15  ;;  %v17570_v38 = vrot.slane %v17386_v20, 1 }
 0x398   : > { %v8383_v31 = vsel %vm3385_vm7, %v8382_v2, %v8381_v39  ;;  %v22211_v19 = vld.sshfl [vmem:[%s24048_s11 + $0x102] sm:$0x1 pattern:$0x75316420]  ;;  %v17149_v54 = vrot.slane %v22210_v16, %v24054_v42  ;;  %v17389_v45 = vunpack.c.l.b16 %v17121_v18 }
 0x399   : > { %v8471_v25 = vpack.c.b16 %v8383_v31, %v8369_v1  ;;  %v22212_v35 = vld.sshfl [vmem:[%s24048_s11 + $0x103] sm:$0x1 pattern:$0x75316420]  ;;  %v17163_v53 = vrot.slane %v22211_v19, %v24054_v42  ;;  %v17390_v33 = vunpack.c.l.b16 %v17135_v32  ;;  %v17571_v30 = vsel %vm3367_vm1, %v17387_v11, %v17570_v38 }
 0x39a   : > { %v22213_v55 = vld.sshfl [vmem:[%s24048_s11 + $0x10e] sm:$0x1 pattern:$0x75316420]  ;;  %v17177_v58 = vrot.slane %v22212_v35, %v24054_v42  ;;  %v17391_v27 = vunpack.c.l.b16 %v17149_v54  ;;  %v17572_v49 = vrot.slane %v17388_v6, 7  ;;  %v17574_v4 = vrot.slane %v17389_v45, 6 }
 0x39b   : > { %22777 = vmatmul.mubr.bf16.gmra.mrb[12].mxu1 %v8471_v25  ;;  %v22214_v5 = vld.sshfl [vmem:[%s24048_s11 + $0x10f] sm:$0x1 pattern:$0x75316420]  ;;  %v17191_v63 = vrot.slane %v22213_v55, %v24054_v42  ;;  %v17392_v41 = vunpack.c.l.b16 %v17163_v53  ;;  %v17576_v22 = vrot.slane %v17390_v33, 5 }
 0x39c   : > { %v22215_v51 = vld.sshfl [vmem:[%s24048_s11 + $0x110] sm:$0x1 pattern:$0x75316420]  ;;  %v17205_v21 = vrot.slane %v22214_v5, %v24054_v42  ;;  %v17393_v29 = vunpack.c.l.b16 %v17177_v58  ;;  %v17573_v3 = vsel %vm3370_vm2, %v17572_v49, %v17571_v30  ;;  %v17578_v43 = vrot.slane %v17391_v27, 4  ;;  %22780 = vmatprep.mubr.msk.bf16.mxu1 %vm23377_vm0, %v27921_v13 }
 0x39d   : > { %v22216_v9 = vld.sshfl [vmem:[%s24048_s11 + $0x111] sm:$0x1 pattern:$0x75316420]  ;;  %v17219_v7 = vrot.slane %v22215_v51, %v24054_v42  ;;  %v17394_v37 = vunpack.c.l.b16 %v17191_v63  ;;  %v17575_v50 = vsel %vm3373_vm3, %v17574_v4, %v17573_v3  ;;  %v17580_v17 = vrot.slane %v17392_v41, 3 }
 0x39e   : > { %v22217_v46 = vld.sshfl [vmem:[%s24048_s11 + $0x112] sm:$0x1 pattern:$0x75316420]  ;;  %v17233_v48 = vrot.slane %v22216_v9, %v24054_v42  ;;  %v17395_v1 = vunpack.c.l.b16 %v17205_v21  ;;  %v17577_v57 = vsel %vm3376_vm4, %v17576_v22, %v17575_v50  ;;  %v17582_v40 = vrot.slane %v17393_v29, 2 }
 0x39f   : > { %v22218_v62 = vld.sshfl [vmem:[%s24048_s11 + $0x113] sm:$0x1 pattern:$0x75316420]  ;;  %v17247_v8 = vrot.slane %v22217_v46, %v24054_v42  ;;  %v17396_v12 = vunpack.c.l.b16 %v17219_v7  ;;  %v17579_v23 = vsel %vm3379_vm5, %v17578_v43, %v17577_v57  ;;  %v17584_v36 = vrot.slane %v17394_v37, 1 }
 0x3a0   : > { %v22219_v24 = vld.sshfl [vmem:[%s24048_s11 + $0x114] sm:$0x1 pattern:$0x75316420]  ;;  %v17261_v61 = vrot.slane %v22218_v62, %v24054_v42  ;;  %v17397_v52 = vunpack.c.l.b16 %v17233_v48  ;;  %v17581_v10 = vsel %vm3382_vm6, %v17580_v17, %v17579_v23 }
 0x3a1   : > { %v22220_v14 = vld.sshfl [vmem:[%s24048_s11 + $0x115] sm:$0x1 pattern:$0x75316420]  ;;  %v17275_v56 = vrot.slane %v22219_v24, %v24054_v42  ;;  %v17398_v28 = vunpack.c.l.b16 %v17247_v8  ;;  %v17585_v47 = vsel %vm3367_vm1, %v17395_v1, %v17584_v36  ;;  %v17586_v26 = vrot.slane %v17396_v12, 7 }
 0x3a2   : > { %v17289_v60 = vrot.slane %v22220_v14, %v24054_v42  ;;  %v17399_v34 = vunpack.c.l.b16 %v17261_v61  ;;  %v17588_v59 = vrot.slane %v17397_v52, 6  ;;  %v21181_v15 = vld.sshfl [vmem:[%s24048_s11 + $0xab] sm:$0x1 pattern:$0x75316420]  ;;  %v17583_v44 = vsel %vm3385_vm7, %v17582_v40, %v17581_v10 }
 0x3a3   : > { %v17400_v20 = vunpack.c.l.b16 %v17275_v56  ;;  %v17590_v2 = vrot.slane %v17398_v28, 5  ;;  %v21182_v0 = vld.sshfl [vmem:[%s24048_s11 + $0xac] sm:$0x1 pattern:$0x75316420]  ;;  %v7501_v18 = vrot.slane %v21181_v15, %v24054_v42  ;;  %v17587_v39 = vsel %vm3370_vm2, %v17586_v26, %v17585_v47 }
 0x3a4   : > { %v17401_v11 = vunpack.c.l.b16 %v17289_v60  ;;  %v17592_v16 = vrot.slane %v17399_v34, 4  ;;  %v21183_v32 = vld.sshfl [vmem:[%s24048_s11 + $0xad] sm:$0x1 pattern:$0x75316420]  ;;  %v7515_v6 = vrot.slane %v21182_v0, %v24054_v42  ;;  %v17589_v38 = vsel %vm3373_vm3, %v17588_v59, %v17587_v39 }
 0x3a5   : > { %v17594_v31 = vrot.slane %v17400_v20, 3  ;;  %v21184_v19 = vld.sshfl [vmem:[%s24048_s11 + $0xae] sm:$0x1 pattern:$0x75316420]  ;;  %v7529_v54 = vrot.slane %v21183_v32, %v24054_v42  ;;  %v8224_v45 = vunpack.c.l.b16 %v7501_v18  ;;  %v17591_v25 = vsel %vm3376_vm4, %v17590_v2, %v17589_v38 }
 0x3a6   : > { %v17596_v35 = vrot.slane %v17401_v11, 2  ;;  %v21185_v53 = vld.sshfl [vmem:[%s24048_s11 + $0xaf] sm:$0x1 pattern:$0x75316420]  ;;  %v7543_v33 = vrot.slane %v21184_v19, %v24054_v42  ;;  %v8225_v30 = vunpack.c.l.b16 %v7515_v6  ;;  %v17593_v55 = vsel %vm3379_vm5, %v17592_v16, %v17591_v25 }
 0x3a7   : > { %v21186_v58 = vld.sshfl [vmem:[%s24048_s11 + $0xb0] sm:$0x1 pattern:$0x75316420]  ;;  %v7557_v27 = vrot.slane %v21185_v53, %v24054_v42  ;;  %v27008_v49 = vunpack.c.l.b16 %v7529_v54  ;;  %v10666_v4 = vrot.slane %v8224_v45, 1  ;;  %v17595_v5 = vsel %vm3382_vm6, %v17594_v31, %v17593_v55 }
 0x3a8   : > { %v21187_v63 = vld.sshfl [vmem:[%s24048_s11 + $0xb1] sm:$0x1 pattern:$0x75316420]  ;;  %v7571_v41 = vrot.slane %v21186_v58, %v24054_v42  ;;  %v27013_v22 = vunpack.c.l.b16 %v7543_v33  ;;  %v8384_v51 = vrot.slane %v8225_v30, 7  ;;  %v17597_v21 = vsel %vm3385_vm7, %v17596_v35, %v17595_v5 }
 0x3a9   : > { %v21188_v29 = vld.sshfl [vmem:[%s24048_s11 + $0xb2] sm:$0x1 pattern:$0x75316420]  ;;  %v7585_v3 = vrot.slane %v21187_v63, %v24054_v42  ;;  %v27018_v43 = vunpack.c.l.b16 %v7557_v27  ;;  %v8386_v9 = vrot.slane %v27008_v49, 6  ;;  %v17604_v7 = vpack.c.b16 %v17597_v21, %v17583_v44 }
 0x3aa   : > { %v21189_v37 = vld.sshfl [vmem:[%s24048_s11 + $0xbd] sm:$0x1 pattern:$0x75316420]  ;;  %v7599_v50 = vrot.slane %v21188_v29, %v24054_v42  ;;  %v27023_v17 = vunpack.c.l.b16 %v7571_v41  ;;  %v8385_v46 = vsel %vm3367_vm1, %v8384_v51, %v8224_v45  ;;  %v8388_v62 = vrot.slane %v27013_v22, 5 }
 0x3ab   : > { %v21190_v48 = vld.sshfl [vmem:[%s24048_s11 + $0xbe] sm:$0x1 pattern:$0x75316420]  ;;  %v7613_v1 = vrot.slane %v21189_v37, %v24054_v42  ;;  %v27028_v57 = vunpack.c.l.b16 %v7585_v3  ;;  %v8387_v40 = vsel %vm3370_vm2, %v8386_v9, %v8385_v46  ;;  %22965 = vmatmul.mubr.bf16.gmra.mrb[24].mxu0 %v17604_v7  ;;  %v8390_v36 = vrot.slane %v27018_v43, 4 }
 0x3ac   : > { %v21191_v8 = vld.sshfl [vmem:[%s24048_s11 + $0xbf] sm:$0x1 pattern:$0x75316420]  ;;  %v7627_v12 = vrot.slane %v21190_v48, %v24054_v42  ;;  %v27034_v23 = vunpack.c.l.b16 %v7599_v50  ;;  %v8392_v24 = vrot.slane %v27023_v17, 3  ;;  %22984 = vmatprep.mubr.msk.bf16.mxu0 %vm23377_vm0, %v27921_v13  ;;  %v8389_v14 = vsel %vm3373_vm3, %v8388_v62, %v8387_v40 }
 0x3ad   : > { %v21192_v61 = vld.sshfl [vmem:[%s24048_s11 + $0xc0] sm:$0x1 pattern:$0x75316420]  ;;  %v7641_v52 = vrot.slane %v21191_v8, %v24054_v42  ;;  %v27042_v10 = vunpack.c.l.b16 %v7613_v1  ;;  %v8394_v56 = vrot.slane %v27028_v57, 2  ;;  %v8391_v34 = vsel %vm3376_vm4, %v8390_v36, %v8389_v14 }
 0x3ae   : > { %v21193_v28 = vld.sshfl [vmem:[%s24048_s11 + $0xc1] sm:$0x1 pattern:$0x75316420]  ;;  %v7655_v47 = vrot.slane %v21192_v61, %v24054_v42  ;;  %v27048_v60 = vunpack.c.l.b16 %v7627_v12  ;;  %v8396_v26 = vrot.slane %v27034_v23, 1  ;;  %v8393_v44 = vsel %vm3379_vm5, %v8392_v24, %v8391_v34 }
 0x3af   : > { %v21194_v59 = vld.sshfl [vmem:[%s24048_s11 + $0xc2] sm:$0x1 pattern:$0x75316420]  ;;  %v7669_v15 = vrot.slane %v21193_v28, %v24054_v42  ;;  %v27054_v20 = vunpack.c.l.b16 %v7641_v52  ;;  %v27058_v2 = vsel %vm3367_vm1, %v8225_v30, %v10666_v4  ;;  %v8395_v39 = vsel %vm3382_vm6, %v8394_v56, %v8393_v44 }
 0x3b0   : > { %v21195_v0 = vld.sshfl [vmem:[%s24048_s11 + $0xc3] sm:$0x1 pattern:$0x75316420]  ;;  %v7683_v18 = vrot.slane %v21194_v59, %v24054_v42  ;;  %v27062_v11 = vunpack.c.l.b16 %v7655_v47  ;;  %v8398_v16 = vrot.slane %v27048_v60, 7  ;;  %v8397_v31 = vsel %vm3385_vm7, %v8396_v26, %v8395_v39 }
 0x3b1   : > { %v21196_v32 = vld.sshfl [vmem:[%s24048_s11 + $0xc4] sm:$0x1 pattern:$0x75316420]  ;;  %v7697_v6 = vrot.slane %v21195_v0, %v24054_v42  ;;  %v27068_v38 = vunpack.c.l.b16 %v7669_v15  ;;  %v8400_v19 = vrot.slane %v27054_v20, 6  ;;  %v10668_v36 = vrot.slane %v27008_v49, 7 }
 0x3b2   : > { %v7711_v54 = vrot.slane %v21196_v32, %v24054_v42  ;;  %v27073_v45 = vunpack.c.l.b16 %v7683_v18  ;;  %v8399_v25 = vsel %vm3367_vm1, %v8398_v16, %v27042_v10  ;;  %v8402_v35 = vrot.slane %v27062_v11, 5  ;;  %v22357_v53 = vld.sshfl [vmem:[%s24048_s11 + $0x13] sm:$0x1 pattern:$0x75316420] }
 0x3b3   : > { %v27079_v33 = vunpack.c.l.b16 %v7697_v6  ;;  %v8401_v30 = vsel %vm3370_vm2, %v8400_v19, %v8399_v25  ;;  %v8404_v55 = vrot.slane %v27068_v38, 4  ;;  %v22358_v58 = vld.sshfl [vmem:[%s24048_s11 + $0x14] sm:$0x1 pattern:$0x75316420]  ;;  %v18018_v27 = vrot.slane %v22357_v53, %v24054_v42 }
 0x3b4   : > { %v27085_v4 = vunpack.c.l.b16 %v7711_v54  ;;  %v8403_v5 = vsel %vm3373_vm3, %v8402_v35, %v8401_v30  ;;  %v8406_v63 = vrot.slane %v27073_v45, 3  ;;  %v22359_v41 = vld.sshfl [vmem:[%s24048_s11 + $0x15] sm:$0x1 pattern:$0x75316420]  ;;  %v18032_v51 = vrot.slane %v22358_v58, %v24054_v42 }
 0x3b5   : > { %v8405_v21 = vsel %vm3376_vm4, %v8404_v55, %v8403_v5  ;;  %v8408_v29 = vrot.slane %v27079_v33, 2  ;;  %v22360_v3 = vld.sshfl [vmem:[%s24048_s11 + $0x16] sm:$0x1 pattern:$0x75316420]  ;;  %v18046_v9 = vrot.slane %v22359_v41, %v24054_v42  ;;  %v19573_v7 = vunpack.c.l.b16 %v18018_v27 }
 0x3b6   : > { %v8407_v37 = vsel %vm3379_vm5, %v8406_v63, %v8405_v21  ;;  %v8410_v50 = vrot.slane %v27085_v4, 1  ;;  %v22361_v46 = vld.sshfl [vmem:[%s24048_s11 + $0x17] sm:$0x1 pattern:$0x75316420]  ;;  %v18060_v48 = vrot.slane %v22360_v3, %v24054_v42  ;;  %v19574_v1 = vunpack.c.l.b16 %v18032_v51 }
 0x3b7   : > { %v8409_v40 = vsel %vm3382_vm6, %v8408_v29, %v8407_v37  ;;  %v22362_v62 = vld.sshfl [vmem:[%s24048_s11 + $0x18] sm:$0x1 pattern:$0x75316420]  ;;  %v18074_v8 = vrot.slane %v22361_v46, %v24054_v42  ;;  %v19575_v12 = vunpack.c.l.b16 %v18046_v9 }
 0x3b8   : > { %v8411_v24 = vsel %vm3385_vm7, %v8410_v50, %v8409_v40  ;;  %v22363_v61 = vld.sshfl [vmem:[%s24048_s11 + $0x19] sm:$0x1 pattern:$0x75316420]  ;;  %v18088_v52 = vrot.slane %v22362_v62, %v24054_v42  ;;  %v19576_v14 = vunpack.c.l.b16 %v18060_v48  ;;  %v19685_v56 = vrot.slane %v19574_v1, 7 }
 0x3b9   : > { %v8472_v28 = vpack.c.b16 %v8411_v24, %v8397_v31  ;;  %v22364_v47 = vld.sshfl [vmem:[%s24048_s11 + $0x1a] sm:$0x1 pattern:$0x75316420]  ;;  %v18102_v34 = vrot.slane %v22363_v61, %v24054_v42  ;;  %v19577_v26 = vunpack.c.l.b16 %v18074_v8  ;;  %v19687_v59 = vrot.slane %v19575_v12, 6 }
 0x3ba   : > { %v22365_v15 = vld.sshfl [vmem:[%s24048_s11 + $0x25] sm:$0x1 pattern:$0x75316420]  ;;  %v18116_v44 = vrot.slane %v22364_v47, %v24054_v42  ;;  %v19578_v49 = vunpack.c.l.b16 %v18088_v52  ;;  %v19686_v0 = vsel %vm3367_vm1, %v19685_v56, %v19573_v7  ;;  %v19689_v18 = vrot.slane %v19576_v14, 5 }
 0x3bb   : > { %22781 = vmatmul.mubr.bf16.gmra.mrb[16].mxu1 %v8472_v28  ;;  %v22366_v39 = vld.sshfl [vmem:[%s24048_s11 + $0x26] sm:$0x1 pattern:$0x75316420]  ;;  %v18130_v16 = vrot.slane %v22365_v15, %v24054_v42  ;;  %v19579_v32 = vunpack.c.l.b16 %v18102_v34  ;;  %v19688_v6 = vsel %vm3370_vm2, %v19687_v59, %v19686_v0  ;;  %v19691_v31 = vrot.slane %v19577_v26, 4 }
 0x3bc   : > { %v22367_v19 = vld.sshfl [vmem:[%s24048_s11 + $0x27] sm:$0x1 pattern:$0x75316420]  ;;  %v18144_v54 = vrot.slane %v22366_v39, %v24054_v42  ;;  %v19580_v25 = vunpack.c.l.b16 %v18116_v44  ;;  %v19690_v35 = vsel %vm3373_vm3, %v19689_v18, %v19688_v6  ;;  %v19693_v53 = vrot.slane %v19578_v49, 3  ;;  %22784 = vmatprep.mubr.msk.bf16.mxu1 %vm23377_vm0, %v27921_v13 }
 0x3bd   : > { %v22368_v30 = vld.sshfl [vmem:[%s24048_s11 + $0x28] sm:$0x1 pattern:$0x75316420]  ;;  %v18158_v55 = vrot.slane %v22367_v19, %v24054_v42  ;;  %v19581_v58 = vunpack.c.l.b16 %v18130_v16  ;;  %v19692_v27 = vsel %vm3376_vm4, %v19691_v31, %v19690_v35  ;;  %v19695_v5 = vrot.slane %v19579_v32, 2 }
 0x3be   : > { %v22369_v63 = vld.sshfl [vmem:[%s24048_s11 + $0x29] sm:$0x1 pattern:$0x75316420]  ;;  %v18172_v41 = vrot.slane %v22368_v30, %v24054_v42  ;;  %v19582_v51 = vunpack.c.l.b16 %v18144_v54  ;;  %v19694_v21 = vsel %vm3379_vm5, %v19693_v53, %v19692_v27  ;;  %v19697_v29 = vrot.slane %v19580_v25, 1 }
 0x3bf   : > { %v22370_v3 = vld.sshfl [vmem:[%s24048_s11 + $0x2a] sm:$0x1 pattern:$0x75316420]  ;;  %v18186_v9 = vrot.slane %v22369_v63, %v24054_v42  ;;  %v19583_v7 = vunpack.c.l.b16 %v18158_v55  ;;  %v19696_v37 = vsel %vm3382_vm6, %v19695_v5, %v19694_v21  ;;  %v10669_v50 = vsel %vm3370_vm2, %v10668_v36, %v27058_v2 }
 0x3c0   : > { %v22371_v46 = vld.sshfl [vmem:[%s24048_s11 + $0x2b] sm:$0x1 pattern:$0x75316420]  ;;  %v18200_v48 = vrot.slane %v22370_v3, %v24054_v42  ;;  %v19584_v1 = vunpack.c.l.b16 %v18172_v41  ;;  %v19698_v40 = vsel %vm3385_vm7, %v19697_v29, %v19696_v37  ;;  %v19699_v62 = vrot.slane %v19582_v51, 7 }
 0x3c1   : > { %v22372_v8 = vld.sshfl [vmem:[%s24048_s11 + $0x2c] sm:$0x1 pattern:$0x75316420]  ;;  %v18214_v12 = vrot.slane %v22371_v46, %v24054_v42  ;;  %v19585_v24 = vunpack.c.l.b16 %v18186_v9  ;;  %v19701_v61 = vrot.slane %v19583_v7, 6  ;;  %v10670_v52 = vrot.slane %v27013_v22, 6 }
 0x3c2   : > { %v18228_v14 = vrot.slane %v22372_v8, %v24054_v42  ;;  %v19586_v56 = vunpack.c.l.b16 %v18200_v48  ;;  %v19700_v2 = vsel %vm3367_vm1, %v19699_v62, %v19581_v58  ;;  %v19703_v36 = vrot.slane %v19584_v1, 5  ;;  %v21197_v28 = vld.sshfl [vmem:[%s24048_s11 + $0xcf] sm:$0x1 pattern:$0x75316420] }
 0x3c3   : > { %v19587_v47 = vunpack.c.l.b16 %v18214_v12  ;;  %v19702_v34 = vsel %vm3370_vm2, %v19701_v61, %v19700_v2  ;;  %v19705_v26 = vrot.slane %v19585_v24, 4  ;;  %v21198_v59 = vld.sshfl [vmem:[%s24048_s11 + $0xd0] sm:$0x1 pattern:$0x75316420]  ;;  %v7725_v15 = vrot.slane %v21197_v28, %v24054_v42 }
 0x3c4   : > { %v19588_v44 = vunpack.c.l.b16 %v18228_v14  ;;  %v19704_v22 = vsel %vm3373_vm3, %v19703_v36, %v19702_v34  ;;  %v19707_v49 = vrot.slane %v19586_v56, 3  ;;  %v21199_v0 = vld.sshfl [vmem:[%s24048_s11 + $0xd1] sm:$0x1 pattern:$0x75316420]  ;;  %v7739_v18 = vrot.slane %v21198_v59, %v24054_v42 }
 0x3c5   : > { %v19706_v39 = vsel %vm3376_vm4, %v19705_v26, %v19704_v22  ;;  %v19709_v16 = vrot.slane %v19587_v47, 2  ;;  %v21200_v32 = vld.sshfl [vmem:[%s24048_s11 + $0xd2] sm:$0x1 pattern:$0x75316420]  ;;  %v7753_v6 = vrot.slane %v21199_v0, %v24054_v42  ;;  %v27148_v31 = vunpack.c.l.b16 %v7725_v15 }
 0x3c6   : > { %v19708_v19 = vsel %vm3379_vm5, %v19707_v49, %v19706_v39  ;;  %v19711_v54 = vrot.slane %v19588_v44, 1  ;;  %v21201_v25 = vld.sshfl [vmem:[%s24048_s11 + $0xd3] sm:$0x1 pattern:$0x75316420]  ;;  %v7767_v35 = vrot.slane %v21200_v32, %v24054_v42  ;;  %v27153_v53 = vunpack.c.l.b16 %v7739_v18 }
 0x3c7   : > { %v19710_v30 = vsel %vm3382_vm6, %v19709_v16, %v19708_v19  ;;  %v21202_v55 = vld.sshfl [vmem:[%s24048_s11 + $0xd4] sm:$0x1 pattern:$0x75316420]  ;;  %v7781_v58 = vrot.slane %v21201_v25, %v24054_v42  ;;  %v27158_v27 = vunpack.c.l.b16 %v7753_v6  ;;  %v10671_v5 = vsel %vm3373_vm3, %v10670_v52, %v10669_v50 }
 0x3c8   : > { %v19712_v63 = vsel %vm3385_vm7, %v19711_v54, %v19710_v30  ;;  %v21203_v41 = vld.sshfl [vmem:[%s24048_s11 + $0xd5] sm:$0x1 pattern:$0x75316420]  ;;  %v7795_v51 = vrot.slane %v21202_v55, %v24054_v42  ;;  %v27164_v21 = vunpack.c.l.b16 %v7767_v35  ;;  %v8412_v29 = vrot.slane %v27153_v53, 7 }
 0x3c9   : > { %v19881_v3 = vpack.c.b16 %v19712_v63, %v19698_v40  ;;  %v21204_v9 = vld.sshfl [vmem:[%s24048_s11 + $0xd6] sm:$0x1 pattern:$0x75316420]  ;;  %v7809_v7 = vrot.slane %v21203_v41, %v24054_v42  ;;  %v27169_v37 = vunpack.c.l.b16 %v7781_v58  ;;  %v8414_v46 = vrot.slane %v27158_v27, 6 }
 0x3ca   : > { %v21205_v50 = vld.sshfl [vmem:[%s24048_s11 + $0xe1] sm:$0x1 pattern:$0x75316420]  ;;  %v7823_v48 = vrot.slane %v21204_v9, %v24054_v42  ;;  %v27174_v1 = vunpack.c.l.b16 %v7795_v51  ;;  %v8413_v62 = vsel %vm3367_vm1, %v8412_v29, %v27148_v31  ;;  %v8416_v8 = vrot.slane %v27164_v21, 5 }
 0x3cb   : > { %22985 = vmatmul.mubr.bf16.vlgmr.msra.gmra.mrb[0].mxu0 %v19881_v3  ;;  %v21206_v40 = vld.sshfl [vmem:[%s24048_s11 + $0xe2] sm:$0x1 pattern:$0x75316420]  ;;  %v7837_v12 = vrot.slane %v21205_v50, %v24054_v42  ;;  %v27181_v24 = vunpack.c.l.b16 %v7809_v7  ;;  %v8415_v61 = vsel %vm3370_vm2, %v8414_v46, %v8413_v62  ;;  %v8418_v52 = vrot.slane %v27169_v37, 4 }
 0x3cc   : > { %22988 = vmatprep.mubr.msk.bf16.mxu0 %vm23377_vm0, %v27921_v13  ;;  %v21207_v14 = vld.sshfl [vmem:[%s24048_s11 + $0xe3] sm:$0x1 pattern:$0x75316420]  ;;  %v7851_v56 = vrot.slane %v21206_v40, %v24054_v42  ;;  %v27189_v2 = vunpack.c.l.b16 %v7823_v48  ;;  %v8417_v36 = vsel %vm3373_vm3, %v8416_v8, %v8415_v61  ;;  %v8420_v28 = vrot.slane %v27174_v1, 3 }
 0x3cd   : > { %v21208_v47 = vld.sshfl [vmem:[%s24048_s11 + $0xe4] sm:$0x1 pattern:$0x75316420]  ;;  %v7865_v34 = vrot.slane %v21207_v14, %v24054_v42  ;;  %v27195_v26 = vunpack.c.l.b16 %v7837_v12  ;;  %v8419_v59 = vsel %vm3376_vm4, %v8418_v52, %v8417_v36  ;;  %v8422_v15 = vrot.slane %v27181_v24, 2 }
 0x3ce   : > { %v21209_v44 = vld.sshfl [vmem:[%s24048_s11 + $0xe5] sm:$0x1 pattern:$0x75316420]  ;;  %v7879_v22 = vrot.slane %v21208_v47, %v24054_v42  ;;  %v27201_v49 = vunpack.c.l.b16 %v7851_v56  ;;  %v8421_v0 = vsel %vm3379_vm5, %v8420_v28, %v8419_v59  ;;  %v8424_v18 = vrot.slane %v27189_v2, 1 }
 0x3cf   : > { %v21210_v39 = vld.sshfl [vmem:[%s24048_s11 + $0xe6] sm:$0x1 pattern:$0x75316420]  ;;  %v7893_v16 = vrot.slane %v21209_v44, %v24054_v42  ;;  %v27207_v32 = vunpack.c.l.b16 %v7865_v34  ;;  %v8423_v6 = vsel %vm3382_vm6, %v8422_v15, %v8421_v0  ;;  %v10672_v19 = vrot.slane %v27018_v43, 5 }
 0x3d0   : > { %v21211_v54 = vld.sshfl [vmem:[%s24048_s11 + $0xe7] sm:$0x1 pattern:$0x75316420]  ;;  %v7907_v25 = vrot.slane %v21210_v39, %v24054_v42  ;;  %v27213_v35 = vunpack.c.l.b16 %v7879_v22  ;;  %v8425_v30 = vsel %vm3385_vm7, %v8424_v18, %v8423_v6  ;;  %v8426_v55 = vrot.slane %v27201_v49, 7 }
 0x3d1   : > { %v21212_v58 = vld.sshfl [vmem:[%s24048_s11 + $0xe8] sm:$0x1 pattern:$0x75316420]  ;;  %v7921_v63 = vrot.slane %v21211_v54, %v24054_v42  ;;  %v27219_v41 = vunpack.c.l.b16 %v7893_v16  ;;  %v8428_v51 = vrot.slane %v27207_v32, 6  ;;  %v27223_v43 = vsel %vm3376_vm4, %v10672_v19, %v10671_v5 }
 0x3d2   : > { %v7935_v29 = vrot.slane %v21212_v58, %v24054_v42  ;;  %v27226_v3 = vunpack.c.l.b16 %v7907_v25  ;;  %v8427_v9 = vsel %vm3367_vm1, %v8426_v55, %v27195_v26  ;;  %v8430_v7 = vrot.slane %v27213_v35, 5  ;;  %v22373_v46 = vld.sshfl [vmem:[%s24048_s11 + $0x37] sm:$0x1 pattern:$0x75316420] }
 0x3d3   : > { %v27232_v50 = vunpack.c.l.b16 %v7921_v63  ;;  %v8429_v48 = vsel %vm3370_vm2, %v8428_v51, %v8427_v9  ;;  %v8432_v62 = vrot.slane %v27219_v41, 4  ;;  %v22374_v5 = vld.sshfl [vmem:[%s24048_s11 + $0x38] sm:$0x1 pattern:$0x75316420]  ;;  %v18242_v8 = vrot.slane %v22373_v46, %v24054_v42 }
 0x3d4   : > { %v27238_v40 = vunpack.c.l.b16 %v7935_v29  ;;  %v8431_v12 = vsel %vm3373_vm3, %v8430_v7, %v8429_v48  ;;  %v8434_v61 = vrot.slane %v27226_v3, 3  ;;  %v22375_v52 = vld.sshfl [vmem:[%s24048_s11 + $0x39] sm:$0x1 pattern:$0x75316420]  ;;  %v18256_v14 = vrot.slane %v22374_v5, %v24054_v42 }
 0x3d5   : > { %v8433_v56 = vsel %vm3376_vm4, %v8432_v62, %v8431_v12  ;;  %v8436_v36 = vrot.slane %v27232_v50, 2  ;;  %v22376_v28 = vld.sshfl [vmem:[%s24048_s11 + $0x3a] sm:$0x1 pattern:$0x75316420]  ;;  %v18270_v47 = vrot.slane %v22375_v52, %v24054_v42  ;;  %v19589_v34 = vunpack.c.l.b16 %v18242_v8 }
 0x3d6   : > { %v8435_v59 = vsel %vm3379_vm5, %v8434_v61, %v8433_v56  ;;  %v8438_v15 = vrot.slane %v27238_v40, 1  ;;  %v22377_v44 = vld.sshfl [vmem:[%s24048_s11 + $0x3b] sm:$0x1 pattern:$0x75316420]  ;;  %v18284_v22 = vrot.slane %v22376_v28, %v24054_v42  ;;  %v19590_v0 = vunpack.c.l.b16 %v18256_v14 }
 0x3d7   : > { %v8437_v18 = vsel %vm3382_vm6, %v8436_v36, %v8435_v59  ;;  %v22378_v39 = vld.sshfl [vmem:[%s24048_s11 + $0x3c] sm:$0x1 pattern:$0x75316420]  ;;  %v18298_v16 = vrot.slane %v22377_v44, %v24054_v42  ;;  %v19591_v6 = vunpack.c.l.b16 %v18270_v47  ;;  %v10674_v19 = vrot.slane %v27023_v17, 4 }
 0x3d8   : > { %v8439_v54 = vsel %vm3385_vm7, %v8438_v15, %v8437_v18  ;;  %v22379_v25 = vld.sshfl [vmem:[%s24048_s11 + $0x3d] sm:$0x1 pattern:$0x75316420]  ;;  %v18312_v55 = vrot.slane %v22378_v39, %v24054_v42  ;;  %v19592_v58 = vunpack.c.l.b16 %v18284_v22  ;;  %v19713_v63 = vrot.slane %v19590_v0, 7 }
 0x3d9   : > { %v8473_v51 = vpack.c.b16 %v8439_v54, %v8425_v30  ;;  %v22380_v29 = vld.sshfl [vmem:[%s24048_s11 + $0x3e] sm:$0x1 pattern:$0x75316420]  ;;  %v18326_v9 = vrot.slane %v22379_v25, %v24054_v42  ;;  %v19593_v7 = vunpack.c.l.b16 %v18298_v16  ;;  %v19715_v46 = vrot.slane %v19591_v6, 6 }
 0x3da   : > { %v22381_v48 = vld.sshfl [vmem:[%s24048_s11 + $0x49] sm:$0x1 pattern:$0x75316420]  ;;  %v18340_v62 = vrot.slane %v22380_v29, %v24054_v42  ;;  %v19594_v17 = vunpack.c.l.b16 %v18312_v55  ;;  %v19714_v5 = vsel %vm3367_vm1, %v19713_v63, %v19589_v34  ;;  %v19717_v8 = vrot.slane %v19592_v58, 5 }
 0x3db   : > { %22785 = vmatmul.mubr.bf16.gmra.mrb[20].mxu1 %v8473_v51  ;;  %v22382_v12 = vld.sshfl [vmem:[%s24048_s11 + $0x4a] sm:$0x1 pattern:$0x75316420]  ;;  %v18354_v61 = vrot.slane %v22381_v48, %v24054_v42  ;;  %v19595_v30 = vunpack.c.l.b16 %v18326_v9  ;;  %v19716_v52 = vsel %vm3370_vm2, %v19715_v46, %v19714_v5  ;;  %v19719_v14 = vrot.slane %v19593_v7, 4 }
 0x3dc   : > { %v22383_v56 = vld.sshfl [vmem:[%s24048_s11 + $0x4b] sm:$0x1 pattern:$0x75316420]  ;;  %v18368_v36 = vrot.slane %v22382_v12, %v24054_v42  ;;  %v19596_v28 = vunpack.c.l.b16 %v18340_v62  ;;  %v19718_v47 = vsel %vm3373_vm3, %v19717_v8, %v19716_v52  ;;  %v19721_v59 = vrot.slane %v19594_v17, 3  ;;  %22788 = vmatprep.mubr.msk.bf16.mxu1 %vm23377_vm0, %v27921_v13 }
 0x3dd   : > { %v22384_v34 = vld.sshfl [vmem:[%s24048_s11 + $0x4c] sm:$0x1 pattern:$0x75316420]  ;;  %v18382_v15 = vrot.slane %v22383_v56, %v24054_v42  ;;  %v19597_v44 = vunpack.c.l.b16 %v18354_v61  ;;  %v19720_v22 = vsel %vm3376_vm4, %v19719_v14, %v19718_v47  ;;  %v19723_v0 = vrot.slane %v19595_v30, 2 }
 0x3de   : > { %v22385_v18 = vld.sshfl [vmem:[%s24048_s11 + $0x4d] sm:$0x1 pattern:$0x75316420]  ;;  %v18396_v39 = vrot.slane %v22384_v34, %v24054_v42  ;;  %v19598_v16 = vunpack.c.l.b16 %v18368_v36  ;;  %v19722_v6 = vsel %vm3379_vm5, %v19721_v59, %v19720_v22  ;;  %v19725_v54 = vrot.slane %v19596_v28, 1 }
 0x3df   : > { %v22386_v25 = vld.sshfl [vmem:[%s24048_s11 + $0x4e] sm:$0x1 pattern:$0x75316420]  ;;  %v18410_v55 = vrot.slane %v22385_v18, %v24054_v42  ;;  %v19599_v58 = vunpack.c.l.b16 %v18382_v15  ;;  %v19724_v63 = vsel %vm3382_vm6, %v19723_v0, %v19722_v6  ;;  %v10675_v51 = vsel %vm3379_vm5, %v10674_v19, %v27223_v43 }
 0x3e0   : > { %v22387_v29 = vld.sshfl [vmem:[%s24048_s11 + $0x4f] sm:$0x1 pattern:$0x75316420]  ;;  %v18424_v9 = vrot.slane %v22386_v25, %v24054_v42  ;;  %v19600_v7 = vunpack.c.l.b16 %v18396_v39  ;;  %v19726_v46 = vsel %vm3385_vm7, %v19725_v54, %v19724_v63  ;;  %v19727_v48 = vrot.slane %v19598_v16, 7 }
 0x3e1   : > { %v22388_v62 = vld.sshfl [vmem:[%s24048_s11 + $0x50] sm:$0x1 pattern:$0x75316420]  ;;  %v18438_v17 = vrot.slane %v22387_v29, %v24054_v42  ;;  %v19601_v5 = vunpack.c.l.b16 %v18410_v55  ;;  %v19729_v8 = vrot.slane %v19599_v58, 6  ;;  %v10676_v12 = vrot.slane %v27028_v57, 3 }
 0x3e2   : > { %v18452_v61 = vrot.slane %v22388_v62, %v24054_v42  ;;  %v19602_v30 = vunpack.c.l.b16 %v18424_v9  ;;  %v19728_v43 = vsel %vm3367_vm1, %v19727_v48, %v19597_v44  ;;  %v19731_v19 = vrot.slane %v19600_v7, 5  ;;  %v21213_v52 = vld.sshfl [vmem:[%s24048_s11 + $0xf3] sm:$0x1 pattern:$0x75316420] }
 0x3e3   : > { %v19603_v14 = vunpack.c.l.b16 %v18438_v17  ;;  %v19730_v56 = vsel %vm3370_vm2, %v19729_v8, %v19728_v43  ;;  %v19733_v36 = vrot.slane %v19601_v5, 4  ;;  %v21214_v28 = vld.sshfl [vmem:[%s24048_s11 + $0xf4] sm:$0x1 pattern:$0x75316420]  ;;  %v7949_v47 = vrot.slane %v21213_v52, %v24054_v42 }
 0x3e4   : > { %v19604_v59 = vunpack.c.l.b16 %v18452_v61  ;;  %v19732_v57 = vsel %vm3373_vm3, %v19731_v19, %v19730_v56  ;;  %v19735_v34 = vrot.slane %v19602_v30, 3  ;;  %v21215_v15 = vld.sshfl [vmem:[%s24048_s11 + $0xf5] sm:$0x1 pattern:$0x75316420]  ;;  %v7963_v22 = vrot.slane %v21214_v28, %v24054_v42 }
 0x3e5   : > { %v19734_v44 = vsel %vm3376_vm4, %v19733_v36, %v19732_v57  ;;  %v19737_v0 = vrot.slane %v19603_v14, 2  ;;  %v21216_v18 = vld.sshfl [vmem:[%s24048_s11 + $0xf6] sm:$0x1 pattern:$0x75316420]  ;;  %v7977_v39 = vrot.slane %v21215_v15, %v24054_v42  ;;  %v27301_v16 = vunpack.c.l.b16 %v7949_v47 }
 0x3e6   : > { %v19736_v6 = vsel %vm3379_vm5, %v19735_v34, %v19734_v44  ;;  %v19739_v54 = vrot.slane %v19604_v59, 1  ;;  %v21217_v25 = vld.sshfl [vmem:[%s24048_s11 + $0xf7] sm:$0x1 pattern:$0x75316420]  ;;  %v7991_v55 = vrot.slane %v21216_v18, %v24054_v42  ;;  %v27306_v58 = vunpack.c.l.b16 %v7963_v22 }
 0x3e7   : > { %v19738_v63 = vsel %vm3382_vm6, %v19737_v0, %v19736_v6  ;;  %v21218_v29 = vld.sshfl [vmem:[%s24048_s11 + $0xf8] sm:$0x1 pattern:$0x75316420]  ;;  %v8005_v9 = vrot.slane %v21217_v25, %v24054_v42  ;;  %v27311_v7 = vunpack.c.l.b16 %v7977_v39  ;;  %v10677_v48 = vsel %vm3382_vm6, %v10676_v12, %v10675_v51 }
 0x3e8   : > { %v19740_v62 = vsel %vm3385_vm7, %v19739_v54, %v19738_v63  ;;  %v21219_v17 = vld.sshfl [vmem:[%s24048_s11 + $0xf9] sm:$0x1 pattern:$0x75316420]  ;;  %v8019_v5 = vrot.slane %v21218_v29, %v24054_v42  ;;  %v27317_v8 = vunpack.c.l.b16 %v7991_v55  ;;  %v8440_v61 = vrot.slane %v27306_v58, 7 }
 0x3e9   : > { %v19882_v30 = vpack.c.b16 %v19740_v62, %v19726_v46  ;;  %v21220_v43 = vld.sshfl [vmem:[%s24048_s11 + $0xfa] sm:$0x1 pattern:$0x75316420]  ;;  %v8033_v19 = vrot.slane %v21219_v17, %v24054_v42  ;;  %v27322_v52 = vunpack.c.l.b16 %v8005_v9  ;;  %v8442_v14 = vrot.slane %v27311_v7, 6 }
 0x3ea   : > { %v21221_v51 = vld.sshfl [vmem:[%s24048_s11 + $0x105] sm:$0x1 pattern:$0x75316420]  ;;  %v8047_v12 = vrot.slane %v21220_v43, %v24054_v42  ;;  %v27327_v56 = vunpack.c.l.b16 %v8019_v5  ;;  %v8441_v36 = vsel %vm3367_vm1, %v8440_v61, %v27301_v16  ;;  %v8444_v28 = vrot.slane %v27317_v8, 5 }
 0x3eb   : > { %22989 = vmatmul.mubr.bf16.gmra.mrb[4].mxu0 %v19882_v30  ;;  %v21222_v46 = vld.sshfl [vmem:[%s24048_s11 + $0x106] sm:$0x1 pattern:$0x75316420]  ;;  %v8061_v47 = vrot.slane %v21221_v51, %v24054_v42  ;;  %v27334_v59 = vunpack.c.l.b16 %v8033_v19  ;;  %v8443_v57 = vsel %vm3370_vm2, %v8442_v14, %v8441_v36  ;;  %v8446_v34 = vrot.slane %v27322_v52, 4 }
 0x3ec   : > { %22992 = vmatprep.mubr.msk.bf16.mxu0 %vm23377_vm0, %v27921_v13  ;;  %v21223_v15 = vld.sshfl [vmem:[%s24048_s11 + $0x107] sm:$0x1 pattern:$0x75316420]  ;;  %v8075_v22 = vrot.slane %v21222_v46, %v24054_v42  ;;  %v27342_v44 = vunpack.c.l.b16 %v8047_v12  ;;  %v8445_v0 = vsel %vm3373_vm3, %v8444_v28, %v8443_v57  ;;  %v8448_v18 = vrot.slane %v27327_v56, 3 }
 0x3ed   : > { %v21224_v39 = vld.sshfl [vmem:[%s24048_s11 + $0x108] sm:$0x1 pattern:$0x75316420]  ;;  %v8089_v6 = vrot.slane %v21223_v15, %v24054_v42  ;;  %v27348_v54 = vunpack.c.l.b16 %v8061_v47  ;;  %v8447_v25 = vsel %vm3376_vm4, %v8446_v34, %v8445_v0  ;;  %v8450_v55 = vrot.slane %v27334_v59, 2 }
 0x3ee   : > { %v21225_v63 = vld.sshfl [vmem:[%s24048_s11 + $0x109] sm:$0x1 pattern:$0x75316420]  ;;  %v8103_v29 = vrot.slane %v21224_v39, %v24054_v42  ;;  %v27354_v9 = vunpack.c.l.b16 %v8075_v22  ;;  %v8449_v62 = vsel %vm3379_vm5, %v8448_v18, %v8447_v25  ;;  %v8452_v17 = vrot.slane %v27342_v44, 1 }
 0x3ef   : > { %v21226_v5 = vld.sshfl [vmem:[%s24048_s11 + $0x10a] sm:$0x1 pattern:$0x75316420]  ;;  %v8117_v61 = vrot.slane %v21225_v63, %v24054_v42  ;;  %v27360_v30 = vunpack.c.l.b16 %v8089_v6  ;;  %v8451_v43 = vsel %vm3382_vm6, %v8450_v55, %v8449_v62  ;;  %v10678_v19 = vrot.slane %v27034_v23, 2 }
 0x3f0   : > { %v21227_v14 = vld.sshfl [vmem:[%s24048_s11 + $0x10b] sm:$0x1 pattern:$0x75316420]  ;;  %v8131_v51 = vrot.slane %v21226_v5, %v24054_v42  ;;  %v27366_v12 = vunpack.c.l.b16 %v8103_v29  ;;  %v8453_v36 = vsel %vm3385_vm7, %v8452_v17, %v8451_v43  ;;  %v8454_v28 = vrot.slane %v27354_v9, 7 }
 0x3f1   : > { %v21228_v46 = vld.sshfl [vmem:[%s24048_s11 + $0x10c] sm:$0x1 pattern:$0x75316420]  ;;  %v8145_v47 = vrot.slane %v21227_v14, %v24054_v42  ;;  %v27372_v57 = vunpack.c.l.b16 %v8117_v61  ;;  %v8456_v34 = vrot.slane %v27360_v30, 6  ;;  %v27376_v23 = vsel %vm3385_vm7, %v10678_v19, %v10677_v48 }
 0x3f2   : > { %v8159_v15 = vrot.slane %v21228_v46, %v24054_v42  ;;  %v27379_v22 = vunpack.c.l.b16 %v8131_v51  ;;  %v8455_v0 = vsel %vm3367_vm1, %v8454_v28, %v27348_v54  ;;  %v8458_v18 = vrot.slane %v27366_v12, 5  ;;  %v22389_v39 = vld.sshfl [vmem:[%s24048_s11 + $0x5b] sm:$0x1 pattern:$0x75316420] }
 0x3f3   : > { %v27385_v6 = vunpack.c.l.b16 %v8145_v47  ;;  %v8457_v25 = vsel %vm3370_vm2, %v8456_v34, %v8455_v0  ;;  %v8460_v55 = vrot.slane %v27372_v57, 4  ;;  %v22390_v48 = vld.sshfl [vmem:[%s24048_s11 + $0x5c] sm:$0x1 pattern:$0x75316420]  ;;  %v18466_v63 = vrot.slane %v22389_v39, %v24054_v42 }
 0x3f4   : > { %v27391_v29 = vunpack.c.l.b16 %v8159_v15  ;;  %v8459_v62 = vsel %vm3373_vm3, %v8458_v18, %v8457_v25  ;;  %v8462_v17 = vrot.slane %v27379_v22, 3  ;;  %v22391_v5 = vld.sshfl [vmem:[%s24048_s11 + $0x5d] sm:$0x1 pattern:$0x75316420]  ;;  %v18480_v61 = vrot.slane %v22390_v48, %v24054_v42 }
 0x3f5   : > { %28042 = vst [vmem:[#allocation5_spill] sm:$0xff] %v27385_v6  ;;  %v8461_v43 = vsel %vm3376_vm4, %v8460_v55, %v8459_v62  ;;  %v8464_v19 = vrot.slane %v27385_v6, 2  ;;  %v22392_v14 = vld.sshfl [vmem:[%s24048_s11 + $0x5e] sm:$0x1 pattern:$0x75316420]  ;;  %v18494_v51 = vrot.slane %v22391_v5, %v24054_v42  ;;  %v19605_v28 = vunpack.c.l.b16 %v18466_v63 }
 0x3f6   : > { %28043 = vst [vmem:[#allocation7_spill] sm:$0xff] %v27391_v29  ;;  %v8463_v46 = vsel %vm3379_vm5, %v8462_v17, %v8461_v43  ;;  %v8466_v47 = vrot.slane %v27391_v29, 1  ;;  %v22393_v34 = vld.sshfl [vmem:[%s24048_s11 + $0x5f] sm:$0x1 pattern:$0x75316420]  ;;  %v18508_v15 = vrot.slane %v22392_v14, %v24054_v42  ;;  %v19606_v0 = vunpack.c.l.b16 %v18480_v61 }
 0x3f7   : > { %v8465_v18 = vsel %vm3382_vm6, %v8464_v19, %v8463_v46  ;;  %v22394_v39 = vld.sshfl [vmem:[%s24048_s11 + $0x60] sm:$0x1 pattern:$0x75316420]  ;;  %v18522_v25 = vrot.slane %v22393_v34, %v24054_v42  ;;  %v19607_v55 = vunpack.c.l.b16 %v18494_v51  ;;  %v10680_v48 = vrot.slane %v27042_v10, 1 }
 0x3f8   : > { %v8467_v63 = vsel %vm3385_vm7, %v8466_v47, %v8465_v18  ;;  %v22395_v62 = vld.sshfl [vmem:[%s24048_s11 + $0x61] sm:$0x1 pattern:$0x75316420]  ;;  %v18536_v17 = vrot.slane %v22394_v39, %v24054_v42  ;;  %v19608_v5 = vunpack.c.l.b16 %v18508_v15  ;;  %v19741_v43 = vrot.slane %v19606_v0, 7 }
 0x3f9   : > { %v8474_v29 = vpack.c.b16 %v8467_v63, %v8453_v36  ;;  %v22396_v61 = vld.sshfl [vmem:[%s24048_s11 + $0x62] sm:$0x1 pattern:$0x75316420]  ;;  %v18550_v14 = vrot.slane %v22395_v62, %v24054_v42  ;;  %v19609_v19 = vunpack.c.l.b16 %v18522_v25  ;;  %v19743_v46 = vrot.slane %v19607_v55, 6 }
 0x3fa   : > { %v22397_v6 = vld.sshfl [vmem:[%s24048_s11 + $0x6d] sm:$0x1 pattern:$0x75316420]  ;;  %v18564_v51 = vrot.slane %v22396_v61, %v24054_v42  ;;  %v19610_v10 = vunpack.c.l.b16 %v18536_v17  ;;  %v19742_v47 = vsel %vm3367_vm1, %v19741_v43, %v19605_v28  ;;  %v19745_v34 = vrot.slane %v19608_v5, 5 }
 0x3fb   : > { %22789 = vmatmul.mubr.bf16.gmra.mrb[24].mxu1 %v8474_v29  ;;  %v22398_v18 = vld.sshfl [vmem:[%s24048_s11 + $0x6e] sm:$0x1 pattern:$0x75316420]  ;;  %v18578_v15 = vrot.slane %v22397_v6, %v24054_v42  ;;  %v19611_v36 = vunpack.c.l.b16 %v18550_v14  ;;  %v19744_v0 = vsel %vm3370_vm2, %v19743_v46, %v19742_v47  ;;  %v19747_v39 = vrot.slane %v19609_v19, 4 }
 0x3fc   : > { %v22399_v63 = vld.sshfl [vmem:[%s24048_s11 + $0x6f] sm:$0x1 pattern:$0x75316420]  ;;  %v18592_v25 = vrot.slane %v22398_v18, %v24054_v42  ;;  %v19612_v55 = vunpack.c.l.b16 %v18564_v51  ;;  %v19746_v62 = vsel %vm3373_vm3, %v19745_v34, %v19744_v0  ;;  %v19749_v17 = vrot.slane %v19610_v10, 3  ;;  %22824 = vmatprep.mubr.msk.bf16.mxu1 %vm23377_vm0, %v27921_v13 }
 0x3fd   : > { %v22400_v29 = vld.sshfl [vmem:[%s24048_s11 + $0x70] sm:$0x1 pattern:$0x75316420]  ;;  %v18606_v28 = vrot.slane %v22399_v63, %v24054_v42  ;;  %v19613_v6 = vunpack.c.l.b16 %v18578_v15  ;;  %v19748_v5 = vsel %vm3376_vm4, %v19747_v39, %v19746_v62  ;;  %v19751_v43 = vrot.slane %v19611_v36, 2 }
 0x3fe   : > { %v22401_v61 = vld.sshfl [vmem:[%s24048_s11 + $0x71] sm:$0x1 pattern:$0x75316420]  ;;  %v18620_v14 = vrot.slane %v22400_v29, %v24054_v42  ;;  %v19614_v19 = vunpack.c.l.b16 %v18592_v25  ;;  %v19750_v46 = vsel %vm3379_vm5, %v19749_v17, %v19748_v5  ;;  %v19753_v51 = vrot.slane %v19612_v55, 1 }
 0x3ff   : > { %v22402_v10 = vld.sshfl [vmem:[%s24048_s11 + $0x72] sm:$0x1 pattern:$0x75316420]  ;;  %v18634_v47 = vrot.slane %v22401_v61, %v24054_v42  ;;  %v19615_v34 = vunpack.c.l.b16 %v18606_v28  ;;  %v19752_v18 = vsel %vm3382_vm6, %v19751_v43, %v19750_v46  ;;  %v10681_v15 = vsel %vm3367_vm1, %v27048_v60, %v10680_v48 }
 0x400   : > { %v22403_v0 = vld.sshfl [vmem:[%s24048_s11 + $0x73] sm:$0x1 pattern:$0x75316420]  ;;  %v18648_v36 = vrot.slane %v22402_v10, %v24054_v42  ;;  %v19616_v39 = vunpack.c.l.b16 %v18620_v14  ;;  %v19754_v63 = vsel %vm3385_vm7, %v19753_v51, %v19752_v18  ;;  %v19755_v25 = vrot.slane %v19614_v19, 7 }
 0x401   : > { %v22404_v62 = vld.sshfl [vmem:[%s24048_s11 + $0x74] sm:$0x1 pattern:$0x75316420]  ;;  %v18662_v55 = vrot.slane %v22403_v0, %v24054_v42  ;;  %v19617_v17 = vunpack.c.l.b16 %v18634_v47  ;;  %v19757_v29 = vrot.slane %v19615_v34, 6  ;;  %v10682_v28 = vrot.slane %v27054_v20, 7 }
 0x402   : > { %v18676_v5 = vrot.slane %v22404_v62, %v24054_v42  ;;  %v19618_v43 = vunpack.c.l.b16 %v18648_v36  ;;  %v19756_v60 = vsel %vm3367_vm1, %v19755_v25, %v19613_v6  ;;  %v19759_v48 = vrot.slane %v19616_v39, 5  ;;  %v22405_v61 = vld.sshfl [vmem:[%s24048_s11 + $0x7f] sm:$0x1 pattern:$0x75316420] }
 0x403   : > { %v19619_v14 = vunpack.c.l.b16 %v18662_v55  ;;  %v19758_v46 = vsel %vm3370_vm2, %v19757_v29, %v19756_v60  ;;  %v19761_v51 = vrot.slane %v19617_v17, 4  ;;  %v10683_v19 = vsel %vm3370_vm2, %v10682_v28, %v10681_v15  ;;  %v22406_v10 = vld.sshfl [vmem:[%s24048_s11 + $0x80] sm:$0x1 pattern:$0x75316420] }
 0x404   : > { %v19620_v47 = vunpack.c.l.b16 %v18676_v5  ;;  %v19760_v34 = vsel %vm3373_vm3, %v19759_v48, %v19758_v46  ;;  %v19763_v20 = vrot.slane %v19618_v43, 3  ;;  %v10684_v18 = vrot.slane %v27062_v11, 6  ;;  %v22407_v0 = vld.sshfl [vmem:[%s24048_s11 + $0x81] sm:$0x1 pattern:$0x75316420] }
 0x405   : > { %v19762_v6 = vsel %vm3376_vm4, %v19761_v51, %v19760_v34  ;;  %v19765_v36 = vrot.slane %v19619_v14, 2  ;;  %v10686_v39 = vrot.slane %v27068_v38, 5  ;;  %v10688_v25 = vrot.slane %v27073_v45, 4 }
 0x406   : > { %v19764_v62 = vsel %vm3379_vm5, %v19763_v20, %v19762_v6  ;;  %v19767_v15 = vrot.slane %v19620_v47, 1  ;;  %v10685_v55 = vsel %vm3373_vm3, %v10684_v18, %v10683_v19  ;;  %v10690_v17 = vrot.slane %v27079_v33, 3  ;;  %v22408_v29 = vld.sshfl [vmem:[%s24048_s11 + $0x82] sm:$0x1 pattern:$0x75316420] }
 0x407   : > { %v19766_v11 = vsel %vm3382_vm6, %v19765_v36, %v19764_v62  ;;  %v10687_v28 = vsel %vm3376_vm4, %v10686_v39, %v10685_v55  ;;  %v10692_v5 = vrot.slane %v27085_v4, 2  ;;  %v22409_v43 = vld.sshfl [vmem:[%s24048_s11 + $0x83] sm:$0x1 pattern:$0x75316420]  ;;  %v18690_v38 = vrot.slane %v22405_v61, %v24054_v42 }
 0x408   : > { %v19768_v45 = vsel %vm3385_vm7, %v19767_v15, %v19766_v11  ;;  %v10689_v60 = vsel %vm3379_vm5, %v10688_v25, %v10687_v28  ;;  %v22410_v48 = vld.sshfl [vmem:[%s24048_s11 + $0x84] sm:$0x1 pattern:$0x75316420]  ;;  %v18704_v14 = vrot.slane %v22406_v10, %v24054_v42  ;;  %v18718_v33 = vrot.slane %v22407_v0, %v24054_v42 }
 0x409   : > { %v19883_v46 = vpack.c.b16 %v19768_v45, %v19754_v63  ;;  %v10691_v51 = vsel %vm3382_vm6, %v10690_v17, %v10689_v60  ;;  %v22411_v19 = vld.sshfl [vmem:[%s24048_s11 + $0x85] sm:$0x1 pattern:$0x75316420]  ;;  %v18732_v4 = vrot.slane %v22408_v29, %v24054_v42  ;;  %v18746_v47 = vrot.slane %v22409_v43, %v24054_v42 }
 0x40a   : > { %v10693_v61 = vsel %vm3385_vm7, %v10692_v5, %v10691_v51  ;;  %v22412_v34 = vld.sshfl [vmem:[%s24048_s11 + $0x86] sm:$0x1 pattern:$0x75316420]  ;;  %v18760_v20 = vrot.slane %v22410_v48, %v24054_v42  ;;  %v18774_v18 = vrot.slane %v22411_v19, %v24054_v42  ;;  %v19621_v10 = vunpack.c.l.b16 %v18690_v38 }
 0x40b   : > { %22993 = vmatmul.mubr.bf16.gmra.mrb[8].mxu0 %v19883_v46  ;;  %v10754_v63 = vpack.c.b16 %v10693_v61, %v27376_v23  ;;  %v22413_v0 = vld.sshfl [vmem:[%s24048_s11 + $0xa3] sm:$0x1 pattern:$0x75316420]  ;;  %v18788_v6 = vrot.slane %v22412_v34, %v24054_v42  ;;  %v19622_v36 = vunpack.c.l.b16 %v18704_v14  ;;  %v19623_v39 = vunpack.c.l.b16 %v18718_v33 }
 0x40c   : > { %22996 = vmatprep.mubr.msk.bf16.mxu0 %vm23377_vm0, %v27921_v13  ;;  %v22414_v25 = vld.sshfl [vmem:[%s24048_s11 + $0xa4] sm:$0x1 pattern:$0x75316420]  ;;  %v18802_v62 = vrot.slane %v22413_v0, %v24054_v42  ;;  %v19624_v15 = vunpack.c.l.b16 %v18732_v4  ;;  %v19625_v55 = vunpack.c.l.b16 %v18746_v47  ;;  %v19626_v17 = vunpack.c.l.b16 %v18760_v20 }
 0x40d   : > { %22825 = vmatmul.mubr.bf16.vlgmr.msra.gmra.mrb[16].mxu1 %v10754_v63  ;;  %v22415_v29 = vld.sshfl [vmem:[%s24048_s11 + $0xa5] sm:$0x1 pattern:$0x75316420]  ;;  %v18816_v23 = vrot.slane %v22414_v25, %v24054_v42  ;;  %v19627_v11 = vunpack.c.l.b16 %v18774_v18  ;;  %v19628_v28 = vunpack.c.l.b16 %v18788_v6  ;;  %v19769_v5 = vrot.slane %v19622_v36, 7 }
 0x40e   : > { %v22416_v43 = vld.sshfl [vmem:[%s24048_s11 + $0xa6] sm:$0x1 pattern:$0x75316420]  ;;  %v18830_v38 = vrot.slane %v22415_v29, %v24054_v42  ;;  %v19629_v45 = vunpack.c.l.b16 %v18802_v62  ;;  %v19771_v60 = vrot.slane %v19623_v39, 6  ;;  %v19773_v48 = vrot.slane %v19624_v15, 5  ;;  %22828 = vmatprep.mubr.msk.bf16.mxu1 %vm23377_vm0, %v27921_v13 }
 0x40f   : > { %v22417_v14 = vld.sshfl [vmem:[%s24048_s11 + $0xa7] sm:$0x1 pattern:$0x75316420]  ;;  %v18844_v33 = vrot.slane %v22416_v43, %v24054_v42  ;;  %v19630_v46 = vunpack.c.l.b16 %v18816_v23  ;;  %v19770_v51 = vsel %vm3367_vm1, %v19769_v5, %v19621_v10  ;;  %v19775_v19 = vrot.slane %v19625_v55, 4  ;;  %v27492_v4 = vpop.f32.mrb[0].mxu1 }
 0x410   : > { %v22418_v47 = vld.sshfl [vmem:[%s24048_s11 + $0xa8] sm:$0x1 pattern:$0x75316420]  ;;  %v18858_v61 = vrot.slane %v22417_v14, %v24054_v42  ;;  %v19631_v34 = vunpack.c.l.b16 %v18830_v38  ;;  %v19772_v20 = vsel %vm3370_vm2, %v19771_v60, %v19770_v51  ;;  %v19777_v18 = vrot.slane %v19626_v17, 3  ;;  %v22766_v63 = vpop.f32.mrb[1].mxu1 }
 0x411   : > { %v22419_v0 = vld.sshfl [vmem:[%s24048_s11 + $0xa9] sm:$0x1 pattern:$0x75316420]  ;;  %v18872_v6 = vrot.slane %v22418_v47, %v24054_v42  ;;  %v19632_v36 = vunpack.c.l.b16 %v18844_v33  ;;  %v19774_v39 = vsel %vm3373_vm3, %v19773_v48, %v19772_v20  ;;  %v19779_v25 = vrot.slane %v19627_v11, 2  ;;  %v27500_v62 = vpop.f32.mrb[2].mxu1 }
 0x412   : > { %v22420_v10 = vld.sshfl [vmem:[%s24048_s11 + $0xaa] sm:$0x1 pattern:$0x75316420]  ;;  %v18886_v15 = vrot.slane %v22419_v0, %v24054_v42  ;;  %v19633_v55 = vunpack.c.l.b16 %v18858_v61  ;;  %v19776_v29 = vsel %vm3376_vm4, %v19775_v19, %v19774_v39  ;;  %v19781_v23 = vrot.slane %v19628_v28, 1  ;;  %v22767_v5 = vpop.f32.mrb[3].mxu1 }
 0x413   : > { %v18900_v17 = vrot.slane %v22420_v10, %v24054_v42  ;;  %v19634_v43 = vunpack.c.l.b16 %v18872_v6  ;;  %v19778_v38 = vsel %vm3379_vm5, %v19777_v18, %v19776_v29  ;;  %v19783_v60 = vrot.slane %v19630_v46, 7  ;;  %v22424_v5 = vld.sshfl [vmem:[%s24048_s11 + $0xb8] sm:$0x1 pattern:$0x75316420] }
 0x414   : > { %v19635_v14 = vunpack.c.l.b16 %v18886_v15  ;;  %v19780_v48 = vsel %vm3382_vm6, %v19779_v25, %v19778_v38  ;;  %v19785_v11 = vrot.slane %v19631_v34, 6  ;;  %v19787_v33 = vrot.slane %v19632_v36, 5  ;;  %v22421_v15 = vld.sshfl [vmem:[%s24048_s11 + $0xb5] sm:$0x1 pattern:$0x75316420] }
 0x415   : > { %v19636_v51 = vunpack.c.l.b16 %v18900_v17  ;;  %v19782_v47 = vsel %vm3385_vm7, %v19781_v23, %v19780_v48  ;;  %v19784_v61 = vsel %vm3367_vm1, %v19783_v60, %v19629_v45  ;;  %v19789_v20 = vrot.slane %v19633_v55, 4  ;;  %v22422_v55 = vld.sshfl [vmem:[%s24048_s11 + $0xb6] sm:$0x1 pattern:$0x75316420] }
 0x416   : > { %v19786_v28 = vsel %vm3370_vm2, %v19785_v11, %v19784_v61  ;;  %v19791_v19 = vrot.slane %v19634_v43, 3  ;;  %v19793_v63 = vrot.slane %v19635_v14, 2  ;;  %v10694_v18 = vrot.slane %v27148_v31, 1 }
 0x417   : > { %v19788_v46 = vsel %vm3373_vm3, %v19787_v33, %v19786_v28  ;;  %v19795_v0 = vrot.slane %v19636_v51, 1  ;;  %v10696_v34 = vrot.slane %v27158_v27, 7  ;;  %v10698_v6 = vrot.slane %v27164_v21, 6 }
 0x418   : > { %v19790_v45 = vsel %vm3376_vm4, %v19789_v20, %v19788_v46  ;;  %v10695_v36 = vsel %vm3367_vm1, %v27153_v53, %v10694_v18  ;;  %v10700_v39 = vrot.slane %v27169_v37, 5  ;;  %v10702_v25 = vrot.slane %v27174_v1, 4  ;;  %v22423_v23 = vld.sshfl [vmem:[%s24048_s11 + $0xb7] sm:$0x1 pattern:$0x75316420] }
 0x419   : > { %v19792_v31 = vsel %vm3379_vm5, %v19791_v19, %v19790_v45  ;;  %v10697_v10 = vsel %vm3370_vm2, %v10696_v34, %v10695_v36  ;;  %v10704_v27 = vrot.slane %v27181_v24, 3  ;;  %v10706_v21 = vrot.slane %v27189_v2, 2  ;;  %v22425_v17 = vld.sshfl [vmem:[%s24048_s11 + $0xb9] sm:$0x1 pattern:$0x75316420] }
 0x41a   : > { %v19794_v29 = vsel %vm3382_vm6, %v19793_v63, %v19792_v31  ;;  %v10699_v53 = vsel %vm3373_vm3, %v10698_v6, %v10697_v10  ;;  %v10708_v37 = vrot.slane %v27195_v26, 1  ;;  %v10710_v1 = vrot.slane %v27207_v32, 7  ;;  %v22426_v60 = vld.sshfl [vmem:[%s24048_s11 + $0xba] sm:$0x1 pattern:$0x75316420] }
 0x41b   : > { %v19796_v24 = vsel %vm3385_vm7, %v19795_v0, %v19794_v29  ;;  %v10701_v43 = vsel %vm3376_vm4, %v10700_v39, %v10699_v53  ;;  %v10712_v2 = vrot.slane %v27213_v35, 6  ;;  %v10714_v38 = vrot.slane %v27219_v41, 5  ;;  %v22427_v14 = vld.sshfl [vmem:[%s24048_s11 + $0xbb] sm:$0x1 pattern:$0x75316420] }
 0x41c   : > { %v19884_v48 = vpack.c.b16 %v19796_v24, %v19782_v47  ;;  %v10703_v26 = vsel %vm3379_vm5, %v10702_v25, %v10701_v43  ;;  %v10709_v32 = vsel %vm3367_vm1, %v27201_v49, %v10708_v37  ;;  %v10716_v11 = vrot.slane %v27226_v3, 4  ;;  %v22428_v33 = vld.sshfl [vmem:[%s24048_s11 + $0xbc] sm:$0x1 pattern:$0x75316420] }
 0x41d   : > { %v10705_v51 = vsel %vm3382_vm6, %v10704_v27, %v10703_v26  ;;  %v10711_v61 = vsel %vm3370_vm2, %v10710_v1, %v10709_v32  ;;  %v10718_v35 = vrot.slane %v27232_v50, 3  ;;  %v10720_v41 = vrot.slane %v27238_v40, 2  ;;  %v22429_v20 = vld.sshfl [vmem:[%s24048_s11 + $0xc7] sm:$0x1 pattern:$0x75316420] }
 0x41e   : > { %22997 = vmatmul.mubr.bf16.gmra.mrb[12].mxu0 %v19884_v48  ;;  %v10707_v47 = vsel %vm3385_vm7, %v10706_v21, %v10705_v51  ;;  %v10713_v28 = vsel %vm3373_vm3, %v10712_v2, %v10711_v61  ;;  %v22430_v49 = vld.sshfl [vmem:[%s24048_s11 + $0xc8] sm:$0x1 pattern:$0x75316420]  ;;  %v18914_v3 = vrot.slane %v22421_v15, %v24054_v42  ;;  %v18928_v19 = vrot.slane %v22422_v55, %v24054_v42 }
 0x41f   : > { %23000 = vmatprep.mubr.msk.bf16.mxu0 %vm23377_vm0, %v27921_v13  ;;  %v10715_v50 = vsel %vm3376_vm4, %v10714_v38, %v10713_v28  ;;  %v22431_v63 = vld.sshfl [vmem:[%s24048_s11 + $0xc9] sm:$0x1 pattern:$0x75316420]  ;;  %v18942_v40 = vrot.slane %v22423_v23, %v24054_v42  ;;  %v18956_v18 = vrot.slane %v22424_v5, %v24054_v42  ;;  %v18970_v46 = vrot.slane %v22425_v17, %v24054_v42 }
 0x420   : > { %v10717_v0 = vsel %vm3379_vm5, %v10716_v11, %v10715_v50  ;;  %v22432_v34 = vld.sshfl [vmem:[%s24048_s11 + $0xca] sm:$0x1 pattern:$0x75316420]  ;;  %v18984_v6 = vrot.slane %v22426_v60, %v24054_v42  ;;  %v18998_v45 = vrot.slane %v22427_v14, %v24054_v42  ;;  %v19012_v36 = vrot.slane %v22428_v33, %v24054_v42 }
 0x421   : > { %v10719_v39 = vsel %vm3382_vm6, %v10718_v35, %v10717_v0  ;;  %v22433_v25 = vld.sshfl [vmem:[%s24048_s11 + $0xcb] sm:$0x1 pattern:$0x75316420]  ;;  %v19026_v31 = vrot.slane %v22429_v20, %v24054_v42  ;;  %v19040_v10 = vrot.slane %v22430_v49, %v24054_v42  ;;  %v19054_v27 = vrot.slane %v22431_v63, %v24054_v42 }
 0x422   : > { %v10721_v21 = vsel %vm3385_vm7, %v10720_v41, %v10719_v39  ;;  %v22434_v15 = vld.sshfl [vmem:[%s24048_s11 + $0xcc] sm:$0x1 pattern:$0x75316420]  ;;  %v19068_v55 = vrot.slane %v22432_v34, %v24054_v42  ;;  %v19082_v29 = vrot.slane %v22433_v25, %v24054_v42  ;;  %v19637_v53 = vunpack.c.l.b16 %v18914_v3 }
 0x423   : > { %v10755_v37 = vpack.c.b16 %v10721_v21, %v10707_v47  ;;  %v22435_v1 = vld.sshfl [vmem:[%s24048_s11 + $0xcd] sm:$0x1 pattern:$0x75316420]  ;;  %v19096_v23 = vrot.slane %v22434_v15, %v24054_v42  ;;  %v19638_v5 = vunpack.c.l.b16 %v18928_v19  ;;  %v19639_v17 = vunpack.c.l.b16 %v18942_v40 }
 0x424   : > { %v22436_v24 = vld.sshfl [vmem:[%s24048_s11 + $0xce] sm:$0x1 pattern:$0x75316420]  ;;  %v19110_v43 = vrot.slane %v22435_v1, %v24054_v42  ;;  %v19640_v2 = vunpack.c.l.b16 %v18956_v18  ;;  %v19641_v38 = vunpack.c.l.b16 %v18970_v46  ;;  %v19642_v60 = vunpack.c.l.b16 %v18984_v6 }
 0x425   : > { %22829 = vmatmul.mubr.bf16.gmra.mrb[20].mxu1 %v10755_v37  ;;  %v19124_v14 = vrot.slane %v22436_v24, %v24054_v42  ;;  %v19643_v48 = vunpack.c.l.b16 %v18998_v45  ;;  %v19644_v26 = vunpack.c.l.b16 %v19012_v36  ;;  %v19645_v32 = vunpack.c.l.b16 %v19026_v31 }
 0x426   : > { %v19646_v11 = vunpack.c.l.b16 %v19040_v10  ;;  %v19647_v33 = vunpack.c.l.b16 %v19054_v27  ;;  %v19648_v51 = vunpack.c.l.b16 %v19068_v55  ;;  %v19649_v61 = vunpack.c.l.b16 %v19082_v29  ;;  %22832 = vmatprep.mubr.msk.bf16.mxu1 %vm23377_vm0, %v27921_v13 }
 0x427   : > { %v19650_v35 = vunpack.c.l.b16 %v19096_v23  ;;  %v19651_v41 = vunpack.c.l.b16 %v19110_v43  ;;  %v19652_v20 = vunpack.c.l.b16 %v19124_v14  ;;  %v19797_v47 = vrot.slane %v19638_v5, 7  ;;  %v22437_v43 = vld.sshfl [vmem:[%s24048_s11 + $0xd9] sm:$0x1 pattern:$0x75316420] }
 0x428   : > { %v19799_v28 = vrot.slane %v19639_v17, 6  ;;  %v19801_v49 = vrot.slane %v19640_v2, 5  ;;  %v19803_v3 = vrot.slane %v19641_v38, 4  ;;  %v19805_v19 = vrot.slane %v19642_v60, 3 }
 0x429   : > { %v19798_v50 = vsel %vm3367_vm1, %v19797_v47, %v19637_v53  ;;  %v19807_v63 = vrot.slane %v19643_v48, 2  ;;  %v19809_v40 = vrot.slane %v19644_v26, 1  ;;  %v19811_v18 = vrot.slane %v19646_v11, 7 }
 0x42a   : > { %v19800_v46 = vsel %vm3370_vm2, %v19799_v28, %v19798_v50  ;;  %v19813_v0 = vrot.slane %v19647_v33, 6  ;;  %v19815_v34 = vrot.slane %v19648_v51, 5  ;;  %v19817_v6 = vrot.slane %v19649_v61, 4 }
 0x42b   : > { %v19802_v45 = vsel %vm3373_vm3, %v19801_v49, %v19800_v46  ;;  %v19812_v36 = vsel %vm3367_vm1, %v19811_v18, %v19645_v32  ;;  %v19819_v39 = vrot.slane %v19650_v35, 3  ;;  %v19821_v25 = vrot.slane %v19651_v41, 2  ;;  %v22438_v14 = vld.sshfl [vmem:[%s24048_s11 + $0xda] sm:$0x1 pattern:$0x75316420] }
 0x42c   : > { %v19804_v31 = vsel %vm3376_vm4, %v19803_v3, %v19802_v45  ;;  %v19814_v10 = vsel %vm3370_vm2, %v19813_v0, %v19812_v36  ;;  %v19823_v27 = vrot.slane %v19652_v20, 1  ;;  %v10722_v21 = vrot.slane %v27301_v16, 1  ;;  %v22439_v48 = vld.sshfl [vmem:[%s24048_s11 + $0xdb] sm:$0x1 pattern:$0x75316420] }
 0x42d   : > { %v19806_v15 = vsel %vm3379_vm5, %v19805_v19, %v19804_v31  ;;  %v19816_v55 = vsel %vm3373_vm3, %v19815_v34, %v19814_v10  ;;  %v10724_v29 = vrot.slane %v27311_v7, 7  ;;  %v10726_v53 = vrot.slane %v27317_v8, 6  ;;  %v22440_v26 = vld.sshfl [vmem:[%s24048_s11 + $0xdc] sm:$0x1 pattern:$0x75316420] }
 0x42e   : > { %v19808_v37 = vsel %vm3382_vm6, %v19807_v63, %v19806_v15  ;;  %v19818_v1 = vsel %vm3376_vm4, %v19817_v6, %v19816_v55  ;;  %v10723_v23 = vsel %vm3367_vm1, %v27306_v58, %v10722_v21  ;;  %v10728_v16 = vrot.slane %v27322_v52, 5  ;;  %v27598_v5 = vpop.f32.mrb[4].mxu1  ;;  %v22441_v51 = vld.sshfl [vmem:[%s24048_s11 + $0xdd] sm:$0x1 pattern:$0x75316420] }
 0x42f   : > { %v19810_v17 = vsel %vm3385_vm7, %v19809_v40, %v19808_v37  ;;  %v19820_v7 = vsel %vm3379_vm5, %v19819_v39, %v19818_v1  ;;  %v10725_v8 = vsel %vm3370_vm2, %v10724_v29, %v10723_v23  ;;  %v10730_v24 = vrot.slane %v27327_v56, 4  ;;  %v22770_v2 = vpop.f32.mrb[5].mxu1  ;;  %v22443_v61 = vld.sshfl [vmem:[%s24048_s11 + $0xdf] sm:$0x1 pattern:$0x75316420] }
 0x430   : > { %v19822_v38 = vsel %vm3382_vm6, %v19821_v25, %v19820_v7  ;;  %v10727_v58 = vsel %vm3373_vm3, %v10726_v53, %v10725_v8  ;;  %v10732_v52 = vrot.slane %v27334_v59, 3  ;;  %v10734_v60 = vrot.slane %v27342_v44, 2  ;;  %v22442_v59 = vld.sshfl [vmem:[%s24048_s11 + $0xde] sm:$0x1 pattern:$0x75316420] }
 0x431   : > { %v19824_v32 = vsel %vm3385_vm7, %v19823_v27, %v19822_v38  ;;  %v10729_v56 = vsel %vm3376_vm4, %v10728_v16, %v10727_v58  ;;  %v10736_v11 = vrot.slane %v27348_v54, 1  ;;  %v10738_v33 = vrot.slane %v27360_v30, 7  ;;  %v22444_v47 = vld.sshfl [vmem:[%s24048_s11 + $0xe0] sm:$0x1 pattern:$0x75316420] }
 0x432   : > { %v19885_v35 = vpack.c.b16 %v19824_v32, %v19810_v17  ;;  %v10731_v44 = vsel %vm3379_vm5, %v10730_v24, %v10729_v56  ;;  %v10740_v41 = vrot.slane %v27366_v12, 6  ;;  %v10742_v20 = vrot.slane %v27372_v57, 5  ;;  %v22445_v28 = vld.sshfl [vmem:[%s24048_s11 + $0xeb] sm:$0x1 pattern:$0x75316420] }
 0x433   : > { %v22446_v49 = vld.sshfl [vmem:[%s24048_s11 + $0xec] sm:$0x1 pattern:$0x75316420]  ;;  %v10733_v54 = vsel %vm3382_vm6, %v10732_v52, %v10731_v44  ;;  %v10737_v30 = vsel %vm3367_vm1, %v27354_v9, %v10736_v11  ;;  %v10744_v3 = vrot.slane %v27379_v22, 4  ;;  %v28045_v18 = vld [vmem:[#allocation7_spill] sm:$0xff]  ;;  %v19138_v34 = vrot.slane %v22437_v43, %v24054_v42 }
 0x434   : > { %v28044_v19 = vld [vmem:[#allocation5_spill] sm:$0xff]  ;;  %23001 = vmatmul.mubr.bf16.gmra.mrb[16].mxu0 %v19885_v35  ;;  %v10735_v12 = vsel %vm3385_vm7, %v10734_v60, %v10733_v54  ;;  %v10739_v57 = vsel %vm3370_vm2, %v10738_v33, %v10737_v30  ;;  %v10748_v46 = vrot.slane %v28045_v18, 2  ;;  %v27637_v6 = vpop.f32.mrb[6].mxu1  ;;  %v19152_v45 = vrot.slane %v22438_v14, %v24054_v42 }
 0x435   : > { %v10746_v50 = vrot.slane %v28044_v19, 3  ;;  %v22447_v63 = vld.sshfl [vmem:[%s24048_s11 + $0xed] sm:$0x1 pattern:$0x75316420]  ;;  %23004 = vmatprep.mubr.msk.bf16.mxu0 %vm23377_vm0, %v27921_v13  ;;  %v10741_v9 = vsel %vm3373_vm3, %v10740_v41, %v10739_v57  ;;  %v19166_v36 = vrot.slane %v22439_v48, %v24054_v42  ;;  %v19180_v39 = vrot.slane %v22440_v26, %v24054_v42  ;;  %v22771_v25 = vpop.f32.mrb[7].mxu1 }
 0x436   : > { %v22448_v40 = vld.sshfl [vmem:[%s24048_s11 + $0xee] sm:$0x1 pattern:$0x75316420]  ;;  %v10743_v31 = vsel %vm3376_vm4, %v10742_v20, %v10741_v9  ;;  %v19194_v27 = vrot.slane %v22441_v51, %v24054_v42  ;;  %v19208_v21 = vrot.slane %v22442_v59, %v24054_v42  ;;  %v19222_v15 = vrot.slane %v22443_v61, %v24054_v42 }
 0x437   : > { %v22449_v0 = vld.sshfl [vmem:[%s24048_s11 + $0xef] sm:$0x1 pattern:$0x75316420]  ;;  %v10745_v55 = vsel %vm3379_vm5, %v10744_v3, %v10743_v31  ;;  %v19236_v53 = vrot.slane %v22444_v47, %v24054_v42  ;;  %v19250_v37 = vrot.slane %v22445_v28, %v24054_v42  ;;  %v19264_v1 = vrot.slane %v22446_v49, %v24054_v42 }
 0x438   : > { %v22450_v22 = vld.sshfl [vmem:[%s24048_s11 + $0xf0] sm:$0x1 pattern:$0x75316420]  ;;  %v10747_v23 = vsel %vm3382_vm6, %v10746_v50, %v10745_v55  ;;  %v19278_v16 = vrot.slane %v22447_v63, %v24054_v42  ;;  %v19292_v17 = vrot.slane %v22448_v40, %v24054_v42  ;;  %v19306_v7 = vrot.slane %v22449_v0, %v24054_v42 }
 0x439   : > { %v22451_v10 = vld.sshfl [vmem:[%s24048_s11 + $0xf1] sm:$0x1 pattern:$0x75316420]  ;;  %v10749_v8 = vsel %vm3385_vm7, %v10748_v46, %v10747_v23  ;;  %v19320_v24 = vrot.slane %v22450_v22, %v24054_v42  ;;  %v19653_v58 = vunpack.c.l.b16 %v19138_v34  ;;  %v19654_v52 = vunpack.c.l.b16 %v19152_v45 }
 0x43a   : > { %v22452_v29 = vld.sshfl [vmem:[%s24048_s11 + $0xf2] sm:$0x1 pattern:$0x75316420]  ;;  %v19334_v43 = vrot.slane %v22451_v10, %v24054_v42  ;;  %v10756_v38 = vpack.c.b16 %v10749_v8, %v10735_v12  ;;  %v19655_v60 = vunpack.c.l.b16 %v19166_v36  ;;  %v19656_v14 = vunpack.c.l.b16 %v19180_v39 }
 0x43b   : > { %v19348_v2 = vrot.slane %v22452_v29, %v24054_v42  ;;  %v19657_v48 = vunpack.c.l.b16 %v19194_v27  ;;  %v19658_v26 = vunpack.c.l.b16 %v19208_v21  ;;  %v19659_v32 = vunpack.c.l.b16 %v19222_v15  ;;  %v22453_v49 = vld.sshfl [vmem:[%s24048_s11 + $0xfd] sm:$0x1 pattern:$0x75316420] }
 0x43c   : > { %22833 = vmatmul.mubr.bf16.gmra.mrb[24].mxu1 %v10756_v38  ;;  %v19660_v56 = vunpack.c.l.b16 %v19236_v53  ;;  %v19661_v11 = vunpack.c.l.b16 %v19250_v37  ;;  %v19662_v33 = vunpack.c.l.b16 %v19264_v1  ;;  %v19663_v51 = vunpack.c.l.b16 %v19278_v16  ;;  %v22454_v54 = vld.sshfl [vmem:[%s24048_s11 + $0xfe] sm:$0x1 pattern:$0x75316420] }
 0x43d   : > { %v19664_v59 = vunpack.c.l.b16 %v19292_v17  ;;  %v19665_v61 = vunpack.c.l.b16 %v19306_v7  ;;  %v19666_v35 = vunpack.c.l.b16 %v19320_v24  ;;  %v19667_v44 = vunpack.c.l.b16 %v19334_v43  ;;  %v22455_v50 = vld.sshfl [vmem:[%s24048_s11 + $0xff] sm:$0x1 pattern:$0x75316420] }
 0x43e   : > { %v19668_v41 = vunpack.c.l.b16 %v19348_v2  ;;  %v19825_v20 = vrot.slane %v19654_v52, 7  ;;  %v19827_v47 = vrot.slane %v19655_v60, 6  ;;  %v19829_v28 = vrot.slane %v19656_v14, 5 }
 0x43f   : > { %v19831_v30 = vrot.slane %v19657_v48, 4  ;;  %v19833_v3 = vrot.slane %v19658_v26, 3  ;;  %v19835_v19 = vrot.slane %v19659_v32, 2  ;;  %v19839_v12 = vrot.slane %v19662_v33, 7 }
 0x440   : > { %v22456_v63 = vld.sshfl [vmem:[%s24048_s11 + $0x100] sm:$0x1 pattern:$0x75316420]  ;;  %v19826_v40 = vsel %vm3367_vm1, %v19825_v20, %v19653_v58  ;;  %v19841_v57 = vrot.slane %v19663_v51, 6  ;;  %v19843_v18 = vrot.slane %v19664_v59, 5  ;;  %v19362_v55 = vrot.slane %v22453_v49, %v24054_v42 }
 0x441   : > { %v22457_v46 = vld.sshfl [vmem:[%s24048_s11 + $0x101] sm:$0x1 pattern:$0x75316420]  ;;  %v19828_v34 = vsel %vm3370_vm2, %v19827_v47, %v19826_v40  ;;  %v19837_v9 = vrot.slane %v19660_v56, 1  ;;  %v19845_v22 = vrot.slane %v19665_v61, 4  ;;  %v19840_v39 = vsel %vm3367_vm1, %v19839_v12, %v19661_v11 }
 0x442   : > { %v22458_v0 = vld.sshfl [vmem:[%s24048_s11 + $0x102] sm:$0x1 pattern:$0x75316420]  ;;  %v19847_v45 = vrot.slane %v19666_v35, 3  ;;  %v19830_v36 = vsel %vm3373_vm3, %v19829_v28, %v19828_v34  ;;  %v19849_v25 = vrot.slane %v19667_v44, 2  ;;  %v19842_v21 = vsel %vm3370_vm2, %v19841_v57, %v19840_v39 }
 0x443   : > { %v19851_v31 = vrot.slane %v19668_v41, 1  ;;  %v22459_v10 = vld.sshfl [vmem:[%s24048_s11 + $0x103] sm:$0x1 pattern:$0x75316420]  ;;  %v19832_v27 = vsel %vm3376_vm4, %v19831_v30, %v19830_v36  ;;  %v19376_v29 = vrot.slane %v22454_v54, %v24054_v42  ;;  %v19844_v37 = vsel %vm3373_vm3, %v19843_v18, %v19842_v21 }
 0x444   : > { %v22460_v15 = vld.sshfl [vmem:[%s24048_s11 + $0x104] sm:$0x1 pattern:$0x75316420]  ;;  %v19834_v53 = vsel %vm3379_vm5, %v19833_v3, %v19832_v27  ;;  %v19390_v23 = vrot.slane %v22455_v50, %v24054_v42  ;;  %v19404_v16 = vrot.slane %v22456_v63, %v24054_v42  ;;  %v19846_v7 = vsel %vm3376_vm4, %v19845_v22, %v19844_v37 }
 0x445   : > { %v22461_v1 = vld.sshfl [vmem:[%s24048_s11 + $0x10f] sm:$0x1 pattern:$0x75316420]  ;;  %v19836_v17 = vsel %vm3382_vm6, %v19835_v19, %v19834_v53  ;;  %v19418_v24 = vrot.slane %v22457_v46, %v24054_v42  ;;  %v19432_v43 = vrot.slane %v22458_v0, %v24054_v42  ;;  %v19848_v38 = vsel %vm3379_vm5, %v19847_v45, %v19846_v7 }
 0x446   : > { %v22462_v8 = vld.sshfl [vmem:[%s24048_s11 + $0x110] sm:$0x1 pattern:$0x75316420]  ;;  %v19838_v2 = vsel %vm3385_vm7, %v19837_v9, %v19836_v17  ;;  %v19446_v52 = vrot.slane %v22459_v10, %v24054_v42  ;;  %v19460_v60 = vrot.slane %v22460_v15, %v24054_v42  ;;  %v19850_v14 = vsel %vm3382_vm6, %v19849_v25, %v19848_v38 }
 0x447   : > { %v22463_v58 = vld.sshfl [vmem:[%s24048_s11 + $0x111] sm:$0x1 pattern:$0x75316420]  ;;  %v19474_v26 = vrot.slane %v22461_v1, %v24054_v42  ;;  %v19488_v32 = vrot.slane %v22462_v8, %v24054_v42  ;;  %v19852_v11 = vsel %vm3385_vm7, %v19851_v31, %v19850_v14  ;;  %v19669_v59 = vunpack.c.l.b16 %v19362_v55 }
 0x448   : > { %v22464_v48 = vld.sshfl [vmem:[%s24048_s11 + $0x112] sm:$0x1 pattern:$0x75316420]  ;;  %v19502_v56 = vrot.slane %v22463_v58, %v24054_v42  ;;  %v19670_v61 = vunpack.c.l.b16 %v19376_v29  ;;  %v19886_v35 = vpack.c.b16 %v19852_v11, %v19838_v2  ;;  %v19671_v20 = vunpack.c.l.b16 %v19390_v23 }
 0x449   : > { %v22465_v33 = vld.sshfl [vmem:[%s24048_s11 + $0x113] sm:$0x1 pattern:$0x75316420]  ;;  %v19516_v51 = vrot.slane %v22464_v48, %v24054_v42  ;;  %v19672_v47 = vunpack.c.l.b16 %v19404_v16  ;;  %v19673_v54 = vunpack.c.l.b16 %v19418_v24  ;;  %v19674_v30 = vunpack.c.l.b16 %v19432_v43 }
 0x44a   : > { %v22466_v44 = vld.sshfl [vmem:[%s24048_s11 + $0x114] sm:$0x1 pattern:$0x75316420]  ;;  %v19530_v41 = vrot.slane %v22465_v33, %v24054_v42  ;;  %v19675_v3 = vunpack.c.l.b16 %v19446_v52  ;;  %23005 = vmatmul.mubr.bf16.gmra.mrb[20].mxu0 %v19886_v35  ;;  %v19676_v63 = vunpack.c.l.b16 %v19460_v60  ;;  %v19678_v40 = vunpack.c.l.b16 %v19488_v32 }
 0x44b   : > { %v22467_v28 = vld.sshfl [vmem:[%s24048_s11 + $0x115] sm:$0x1 pattern:$0x75316420]  ;;  %v19544_v49 = vrot.slane %v22466_v44, %v24054_v42  ;;  %v19679_v12 = vunpack.c.l.b16 %v19502_v56  ;;  %23008 = vmatprep.mubr.msk.bf16.mxu0 %vm23377_vm0, %v27921_v13  ;;  %v19677_v18 = vunpack.c.l.b16 %v19474_v26  ;;  %v19680_v46 = vunpack.c.l.b16 %v19516_v51 }
 0x44c   : > { %v22468_v19 = vld.sshfl [vmem:[%s24048_s11 + $0x116] sm:$0x1 pattern:$0x75316420]  ;;  %v19558_v50 = vrot.slane %v22467_v28, %v24054_v42  ;;  %v19681_v0 = vunpack.c.l.b16 %v19530_v41  ;;  %v19853_v9 = vrot.slane %v19670_v61, 7  ;;  %v19855_v22 = vrot.slane %v19671_v20, 6 }
 0x44d   : > { %v19572_v57 = vrot.slane %v22468_v19, %v24054_v42  ;;  %v19682_v34 = vunpack.c.l.b16 %v19544_v49  ;;  %v19857_v45 = vrot.slane %v19672_v47, 5  ;;  %v19859_v25 = vrot.slane %v19673_v54, 4  ;;  %v28046_v61 = vld [vmem:[#allocation4_spill] sm:$0xff] }
 0x44e   : > { %v19683_v36 = vunpack.c.l.b16 %v19558_v50  ;;  %v27712_v31 = vpop.f32.mrb[8].mxu1  ;;  %v19854_v10 = vsel %vm3367_vm1, %v19853_v9, %v19669_v59  ;;  %v19861_v27 = vrot.slane %v19674_v30, 3  ;;  %v19867_v21 = vrot.slane %v19678_v40, 7 }
 0x44f   : > { %v19684_v39 = vunpack.c.l.b16 %v19572_v57  ;;  %v19869_v15 = vrot.slane %v19679_v12, 6  ;;  %v22774_v13 = vpop.f32.mrb[9].mxu1  ;;  %v19856_v42 = vsel %vm3370_vm2, %v19855_v22, %v19854_v10  ;;  %v19863_v55 = vrot.slane %v19675_v3, 2 }
 0x450   : > { %v19871_v29 = vrot.slane %v19680_v46, 5  ;;  %v19873_v53 = vrot.slane %v19681_v0, 4  ;;  %v27716_v37 = vpop.f32.mrb[10].mxu1  ;;  %v19858_v1 = vsel %vm3373_vm3, %v19857_v45, %v19856_v42  ;;  %v19865_v23 = vrot.slane %v19676_v63, 1 }
 0x451   : > { %v19868_v16 = vsel %vm3367_vm1, %v19867_v21, %v19677_v18  ;;  %v19875_v17 = vrot.slane %v19682_v34, 3  ;;  %v22775_v7 = vpop.f32.mrb[11].mxu1  ;;  %v19860_v8 = vsel %vm3376_vm4, %v19859_v25, %v19858_v1  ;;  %v19877_v43 = vrot.slane %v19683_v36, 2 }
 0x452   : > { %v19870_v24 = vsel %vm3370_vm2, %v19869_v15, %v19868_v16  ;;  %v19862_v2 = vsel %vm3379_vm5, %v19861_v27, %v19860_v8  ;;  %v19879_v58 = vrot.slane %v19684_v39, 1  ;;  %v20048_v35 = vadd.s32 8, %v28046_v61 }
 0x453   : > { %v19872_v38 = vsel %vm3373_vm3, %v19871_v29, %v19870_v24  ;;  %v19864_v52 = vsel %vm3382_vm6, %v19863_v55, %v19862_v2  ;;  %v20065_v44 = vand.u32 7, %v28046_v61  ;;  %v20049_v63 = vadd.s32 16, %v28046_v61 }
 0x454   : > { %v19874_v60 = vsel %vm3376_vm4, %v19873_v53, %v19872_v38  ;;  %v19866_v14 = vsel %vm3385_vm7, %v19865_v23, %v19864_v52  ;;  %v20072_v41 = vand.u32 7, %v20048_v35  ;;  %v20050_v40 = vadd.s32 24, %v28046_v61 }
 0x455   : > { %v19876_v48 = vsel %vm3379_vm5, %v19875_v17, %v19874_v60  ;;  %vm20229_vm8 = vcmp.lt.s32.totalorder %v20065_v44, 7  ;;  %v20079_v12 = vand.u32 7, %v20049_v63  ;;  %v20051_v39 = vadd.s32 32, %v28046_v61 }
 0x456   : > { %v19878_v26 = vsel %vm3382_vm6, %v19877_v43, %v19876_v48  ;;  %vm20230_vm9 = vcmp.lt.s32.totalorder %v20072_v41, 7  ;;  %v20052_v25 = vadd.s32 40, %v28046_v61  ;;  %v20054_v8 = vadd.s32 56, %v28046_v61 }
 0x457   : > { %v19880_v32 = vsel %vm3385_vm7, %v19879_v58, %v19878_v26  ;;  %vm20231_vm10 = vcmp.lt.s32.totalorder %v20079_v12, 7  ;;  %v20093_v10 = vand.u32 7, %v20051_v39  ;;  %v20056_v44 = vadd.s32 72, %v28046_v61 }
 0x458   : > { %v19887_v56 = vpack.c.b16 %v19880_v32, %v19866_v14  ;;  %v20114_v43 = vand.u32 7, %v20054_v8 }
 0x459   : > { %vm20233_vm12 = vcmp.lt.s32.totalorder %v20093_v10, 7 }
 0x45a   : > { %23009 = vmatmul.mubr.bf16.gmra.mrb[24].mxu0 %v19887_v56  ;;  %vm20236_vm15 = vcmp.lt.s32.totalorder %v20114_v43, 7 }
 0x46e   : > { %v8588_v11 = vpop.f32.mrb[12].mxu1 }
 0x46f   : > { %v22778_v33 = vpop.f32.mrb[13].mxu1 }
 0x470   : > { %v27730_v51 = vpop.f32.mrb[14].mxu1 }
 0x471   : > { %v22779_v59 = vpop.f32.mrb[15].mxu1 }
 0x49e   : > { %v19977_v20 = vpop.f32.mrb[0].mxu0 }
 0x49f   : > { %v23028_v47 = vadd.f32 %v19977_v20, %v27492_v4  ;;  %v22986_v28 = vpop.f32.mrb[1].mxu0  ;;  %v20086_v4 = vand.u32 7, %v20050_v40  ;;  %v20128_v20 = vand.u32 7, %v20056_v44 }
 0x4a0   : > { %v19980_v49 = vpop.f32.mrb[2].mxu0 }
 0x4a1   : > { %v23029_v54 = vadd.f32 %v19980_v49, %v27500_v62  ;;  %v22987_v30 = vpop.f32.mrb[3].mxu0  ;;  %v27736_v3 = vsel %vm20229_vm8, %v23028_v47, 0.0  ;;  %vm20232_vm11 = vcmp.lt.s32.totalorder %v20086_v4, 7  ;;  %vm20238_vm1 = vcmp.lt.s32.totalorder %v20128_v20, 7 }
 0x4a3   : > { %v27738_v19 = vsel %vm20230_vm9, %v23029_v54, 0.0 }
 0x4a4   : > { %v20285_v50 = vadd.f32 %v27738_v19, %v27736_v3 }
 0x4be   : > { %v19985_v57 = vpop.f32.mrb[4].mxu0 }
 0x4bf   : > { %v23030_v18 = vadd.f32 %v19985_v57, %v27598_v5  ;;  %v22990_v46 = vpop.f32.mrb[5].mxu0  ;;  %v20100_v5 = vand.u32 7, %v20052_v25 }
 0x4c0   : > { %v19988_v62 = vpop.f32.mrb[6].mxu0 }
 0x4c1   : > { %v27745_v0 = vsel %vm20231_vm10, %v23030_v18, 0.0  ;;  %v23031_v34 = vadd.f32 %v19988_v62, %v27637_v6  ;;  %v22991_v9 = vpop.f32.mrb[7].mxu0  ;;  %vm20234_vm13 = vcmp.lt.s32.totalorder %v20100_v5, 7  ;;  %v20057_v62 = vadd.s32 80, %v28046_v61 }
 0x4c2   : > { %v20286_v22 = vadd.f32 %v20285_v50, %v27745_v0 }
 0x4c3   : > { %v27749_v45 = vsel %vm20232_vm11, %v23031_v34, 0.0  ;;  %v20058_v34 = vadd.s32 88, %v28046_v61  ;;  %v20135_v9 = vand.u32 7, %v20057_v62 }
 0x4c4   : > { %v20287_v36 = vadd.f32 %v20286_v22, %v27749_v45 }
 0x4c5   : > { %v20142_v22 = vand.u32 7, %v20058_v34  ;;  %vm20239_vm2 = vcmp.lt.s32.totalorder %v20135_v9, 7 }
 0x4c7   : > { %vm20240_vm3 = vcmp.lt.s32.totalorder %v20142_v22, 7 }
 0x4de   : > { %v19993_v27 = vpop.f32.mrb[8].mxu0 }
 0x4df   : > { %v23032_v21 = vadd.f32 %v19993_v27, %v27712_v31  ;;  %v22994_v15 = vpop.f32.mrb[9].mxu0  ;;  %v20053_v31 = vadd.s32 48, %v28046_v61 }
 0x4e0   : > { %v19996_v13 = vpop.f32.mrb[10].mxu0  ;;  %v10878_v6 = vpop.f32.mrb[16].mxu1 }
 0x4e1   : > { %v27755_v42 = vsel %vm20233_vm12, %v23032_v21, 0.0  ;;  %v23033_v55 = vadd.f32 %v19996_v13, %v27716_v37  ;;  %v22995_v29 = vpop.f32.mrb[11].mxu0  ;;  %v22826_v53 = vpop.f32.mrb[17].mxu1  ;;  %v20107_v24 = vand.u32 7, %v20053_v31 }
 0x4e2   : > { %v20288_v1 = vadd.f32 %v20287_v36, %v27755_v42  ;;  %v10881_v23 = vpop.f32.mrb[18].mxu1  ;;  %v20060_v29 = vadd.s32 104, %v28046_v61 }
 0x4e3   : > { %v27759_v16 = vsel %vm20234_vm13, %v23033_v55, 0.0  ;;  %v22827_v17 = vpop.f32.mrb[19].mxu1  ;;  %vm20235_vm14 = vcmp.lt.s32.totalorder %v20107_v24, 7  ;;  %v20059_v55 = vadd.s32 96, %v28046_v61 }
 0x4e4   : > { %v20289_v7 = vadd.f32 %v20288_v1, %v27759_v16  ;;  %v20156_v1 = vand.u32 7, %v20060_v29 }
 0x4e5   : > { %v20149_v53 = vand.u32 7, %v20059_v55 }
 0x4e6   : > { %vm20242_vm5 = vcmp.lt.s32.totalorder %v20156_v1, 7 }
 0x4e7   : > { %vm20241_vm4 = vcmp.lt.s32.totalorder %v20149_v53, 7 }
 0x4f1   : > { %v20001_v2 = vpop.f32.mrb[12].mxu0 }
 0x4f2   : > { %v23034_v38 = vadd.f32 %v20001_v2, %v8588_v11  ;;  %v22998_v37 = vpop.f32.mrb[13].mxu0  ;;  %v20055_v11 = vadd.s32 64, %v28046_v61 }
 0x4f3   : > { %v20004_v58 = vpop.f32.mrb[14].mxu0 }
 0x4f4   : > { %v27764_v52 = vsel %vm20235_vm14, %v23034_v38, 0.0  ;;  %v23035_v60 = vadd.f32 %v20004_v58, %v27730_v51  ;;  %v22999_v14 = vpop.f32.mrb[15].mxu0  ;;  %v20121_v41 = vand.u32 7, %v20055_v11 }
 0x4f5   : > { %v20290_v48 = vadd.f32 %v20289_v7, %v27764_v52 }
 0x4f6   : > { %v27768_v26 = vsel %vm20236_vm15, %v23035_v60, 0.0  ;;  %vm20237_vm0 = vcmp.lt.s32.totalorder %v20121_v41, 7 }
 0x4f7   : > { %v20291_v32 = vadd.f32 %v20290_v48, %v27768_v26 }
 0x4f8   : > { %v10886_v56 = vpop.f32.mrb[20].mxu1 }
 0x4f9   : > { %v22830_v33 = vpop.f32.mrb[21].mxu1 }
 0x4fa   : > { %v10889_v59 = vpop.f32.mrb[22].mxu1 }
 0x4fb   : > { %v22831_v35 = vpop.f32.mrb[23].mxu1 }
 0x507   : > { %v20009_v47 = vpop.f32.mrb[16].mxu0 }
 0x508   : > { %v23036_v51 = vadd.f32 %v20009_v47, %v10878_v6  ;;  %v23002_v28 = vpop.f32.mrb[17].mxu0 }
 0x509   : > { %v20012_v49 = vpop.f32.mrb[18].mxu0 }
 0x50a   : > { %v20279_v54 = vsel %vm20237_vm0, %v23036_v51, 0.0  ;;  %v23037_v30 = vadd.f32 %v20012_v49, %v10881_v23  ;;  %v23003_v50 = vpop.f32.mrb[19].mxu0 }
 0x50b   : > { %v20292_v63 = vadd.f32 %v20291_v32, %v20279_v54 }
 0x50c   : > { %v20280_v40 = vsel %vm20238_vm1, %v23037_v30, 0.0 }
 0x50d   : > { %v20293_v12 = vadd.f32 %v20292_v63, %v20280_v40 }
 0x50f   : > { %v10894_v4 = vpop.f32.mrb[24].mxu1 }
 0x510   : > { %v22834_v57 = vpop.f32.mrb[25].mxu1 }
 0x511   : > { %v10897_v18 = vpop.f32.mrb[26].mxu1 }
 0x512   : > { %v22835_v46 = vpop.f32.mrb[27].mxu1 }
 0x51d   : > { %v20017_v36 = vpop.f32.mrb[20].mxu0 }
 0x51e   : > { %v23038_v39 = vadd.f32 %v20017_v36, %v10886_v56  ;;  %v23006_v25 = vpop.f32.mrb[21].mxu0 }
 0x51f   : > { %v20020_v10 = vpop.f32.mrb[22].mxu0 }
 0x520   : > { %v20281_v5 = vsel %vm20239_vm2, %v23038_v39, 0.0  ;;  %v23039_v27 = vadd.f32 %v20020_v10, %v10889_v59  ;;  %v23007_v21 = vpop.f32.mrb[23].mxu0 }
 0x521   : > { %v20294_v15 = vadd.f32 %v20293_v12, %v20281_v5 }
 0x522   : > { %v20282_v13 = vsel %vm20240_vm3, %v23039_v27, 0.0 }
 0x523   : > { %v20295_v6 = vadd.f32 %v20294_v15, %v20282_v13 }
 0x52d   : > { %v20025_v23 = vpop.f32.mrb[24].mxu0 }
 0x52e   : > { %v23040_v17 = vadd.f32 %v20025_v23, %v10894_v4  ;;  %v23010_v7 = vpop.f32.mrb[25].mxu0 }
 0x52f   : > { %v20028_v31 = vpop.f32.mrb[26].mxu0 }
 0x530   : > { %v20283_v8 = vsel %vm20241_vm4, %v23040_v17, 0.0  ;;  %v23041_v24 = vadd.f32 %v20028_v31, %v10897_v18  ;;  %v23011_v43 = vpop.f32.mrb[27].mxu0 }
 0x531   : > { %v20296_v2 = vadd.f32 %v20295_v6, %v20283_v8  ;;  %v20358_v43 = vld [vmem:[%s1424_s14] sm:$0x1] }
 0x532   : > { %v20284_v38 = vsel %vm20242_vm5, %v23041_v24, 0.0 }
 0x533   : > { %v20297_v37 = vadd.f32 %v20296_v2, %v20284_v38  ;;  %v20362_v2 = vsub.s32 0, %v28046_v61 }
 0x535   : > { %v20298_v58 = vrot.slane %v20297_v37, 4 }
 0x537   : > { %v20299_v60 = vadd.f32 %v20298_v58, %v20297_v37 }
 0x539   : > { %v20300_v14 = vrot.slane %v20299_v60, 2 }
 0x53b   : > { %v20301_v48 = vadd.f32 %v20300_v14, %v20299_v60 }
 0x53d   : > { %v20302_v32 = vrot.slane %v20301_v48, 1 }
 0x53f   : > { %v20303_v56 = vadd.f32 %v20302_v32, %v20301_v48 }
 0x541   : > { %v20304_v33 = vmul.f32 0.010204081, %v20303_v56  ;;  %v22477_v56 = vld [vmem:[%s1427_s21] ss:$0 sm:$0xff] }
 0x543   : > { %v20305_v59 = vsub.f32 %v27736_v3, %v20304_v33  ;;  %v20306_v35 = vsub.f32 %v27738_v19, %v20304_v33  ;;  %v20307_v11 = vsub.f32 %v27745_v0, %v20304_v33  ;;  %v20308_v44 = vsub.f32 %v27749_v45, %v20304_v33 }
 0x544   : > { %v20309_v41 = vsub.f32 %v27755_v42, %v20304_v33  ;;  %v20310_v20 = vsub.f32 %v27759_v16, %v20304_v33  ;;  %v20311_v47 = vsub.f32 %v27764_v52, %v20304_v33  ;;  %v20312_v51 = vsub.f32 %v27768_v26, %v20304_v33 }
 0x545   : > { %v20313_v28 = vsub.f32 %v20279_v54, %v20304_v33  ;;  %v20314_v49 = vsub.f32 %v20280_v40, %v20304_v33  ;;  %v20315_v30 = vsub.f32 %v20281_v5, %v20304_v33  ;;  %v20316_v50 = vsub.f32 %v20282_v13, %v20304_v33 }
 0x546   : > { %v20317_v63 = vsub.f32 %v20283_v8, %v20304_v33  ;;  %v20318_v3 = vsub.f32 %v20284_v38, %v20304_v33  ;;  %v20319_v12 = vmul.f32 %v20305_v59, %v20305_v59  ;;  %v20320_v19 = vmul.f32 %v20306_v35, %v20306_v35 }
 0x547   : > { %v20321_v4 = vmul.f32 %v20307_v11, %v20307_v11  ;;  %v20322_v57 = vmul.f32 %v20308_v44, %v20308_v44  ;;  %v20323_v18 = vmul.f32 %v20309_v41, %v20309_v41  ;;  %v20324_v46 = vmul.f32 %v20310_v20, %v20310_v20 }
 0x548   : > { %v20333_v0 = vadd.f32 %v20320_v19, %v20319_v12  ;;  %v20325_v62 = vmul.f32 %v20311_v47, %v20311_v47  ;;  %v20326_v34 = vmul.f32 %v20312_v51, %v20312_v51  ;;  %v20327_v54 = vmul.f32 %v20313_v28, %v20313_v28 }
 0x549   : > { %v20328_v9 = vmul.f32 %v20314_v49, %v20314_v49  ;;  %v20329_v36 = vmul.f32 %v20315_v30, %v20315_v30  ;;  %v20330_v25 = vmul.f32 %v20316_v50, %v20316_v50  ;;  %v20331_v5 = vmul.f32 %v20317_v63, %v20317_v63 }
 0x54a   : > { %v20334_v45 = vadd.f32 %v20333_v0, %v20321_v4  ;;  %v20332_v21 = vmul.f32 %v20318_v3, %v20318_v3  ;;  %v20352_v1 = vmul.f32 14.0, %v20304_v33 }
 0x54c   : > { %v20335_v42 = vadd.f32 %v20334_v45, %v20322_v57  ;;  %v20353_v7 = vmul.f32 %v20352_v1, %v20304_v33 }
 0x54e   : > { %v20336_v16 = vadd.f32 %v20335_v42, %v20323_v18 }
 0x550   : > { %v20337_v52 = vadd.f32 %v20336_v16, %v20324_v46 }
 0x552   : > { %v20338_v26 = vadd.f32 %v20337_v52, %v20325_v62 }
 0x554   : > { %v20339_v40 = vadd.f32 %v20338_v26, %v20326_v34 }
 0x556   : > { %v20340_v22 = vadd.f32 %v20339_v40, %v20327_v54 }
 0x558   : > { %v20341_v39 = vadd.f32 %v20340_v22, %v20328_v9 }
 0x55a   : > { %v20342_v10 = vadd.f32 %v20341_v39, %v20329_v36 }
 0x55c   : > { %v20343_v27 = vadd.f32 %v20342_v10, %v20330_v25 }
 0x55e   : > { %v20344_v15 = vadd.f32 %v20343_v27, %v20331_v5 }
 0x560   : > { %v20345_v13 = vadd.f32 %v20344_v15, %v20332_v21 }
 0x562   : > { %v20346_v6 = vrot.slane %v20345_v13, 4 }
 0x564   : > { %v20347_v55 = vadd.f32 %v20346_v6, %v20345_v13 }
 0x566   : > { %v20348_v29 = vrot.slane %v20347_v55, 2 }
 0x568   : > { %v20349_v53 = vadd.f32 %v20348_v29, %v20347_v55 }
 0x56a   : > { %v20350_v23 = vrot.slane %v20349_v53, 1 }
 0x56c   : > { %v20351_v17 = vadd.f32 %v20350_v23, %v20349_v53 }
 0x56e   : > { %v20354_v31 = vsub.f32 %v20351_v17, %v20353_v7 }
 0x570   : > { %v20355_v8 = vmul.f32 0.010204081, %v20354_v31 }
 0x572   : > { %v20356_v24 = vadd.f32 1e-05, %v20355_v8 }
 0x574   : > { %23341 = vrsqrt.f32 %v20356_v24 }
 0x57e   : > { %v23342_v38 = vpop.eup %23341 }
 0x57f   : > { %v20359_v37 = vmul.f32 %v23342_v38, %v20358_v43 }
 0x581   : > { %v20363_v58 = vrot.slane %v20359_v37, %v20362_v2 }
 0x583   : > { %v20364_v60 = vmul.f32 %v20363_v58, %v20305_v59  ;;  %v20365_v14 = vmul.f32 %v20363_v58, %v20306_v35  ;;  %v20366_v48 = vmul.f32 %v20363_v58, %v20307_v11  ;;  %v20367_v32 = vmul.f32 %v20363_v58, %v20308_v44 }
 0x584   : > { %v20368_v33 = vmul.f32 %v20363_v58, %v20309_v41  ;;  %v20369_v12 = vmul.f32 %v20363_v58, %v20310_v20  ;;  %v20370_v19 = vmul.f32 %v20363_v58, %v20311_v47  ;;  %v20371_v4 = vmul.f32 %v20363_v58, %v20312_v51 }
 0x585   : > { %v20372_v0 = vmul.f32 %v20363_v58, %v20313_v28  ;;  %v20373_v61 = vmul.f32 %v20363_v58, %v20314_v49  ;;  %v20374_v57 = vmul.f32 %v20363_v58, %v20315_v30  ;;  %v20375_v45 = vmul.f32 %v20363_v58, %v20316_v50 }
 0x586   : > { %v20376_v18 = vmul.f32 %v20363_v58, %v20317_v63  ;;  %v20377_v42 = vmul.f32 %v20363_v58, %v20318_v3  ;;  %v20385_v46 = vadd.f32 %v22477_v56, %v20364_v60  ;;  %v20386_v16 = vadd.f32 %v22477_v56, %v20365_v14 }
 0x587   : > { %v20387_v62 = vadd.f32 %v22477_v56, %v20366_v48  ;;  %v20388_v52 = vadd.f32 %v22477_v56, %v20367_v32  ;;  %v20389_v34 = vadd.f32 %v22477_v56, %v20368_v33  ;;  %v20390_v59 = vadd.f32 %v22477_v56, %v20369_v12 }
 0x588   : > { %v20391_v35 = vadd.f32 %v22477_v56, %v20370_v19  ;;  %v20392_v11 = vadd.f32 %v22477_v56, %v20371_v4  ;;  %v20393_v44 = vadd.f32 %v22477_v56, %v20372_v0  ;;  %v20394_v26 = vadd.f32 %v22477_v56, %v20373_v61  ;;  %20399 = vst [vmem:[%s27796_s15] sm:$0xff] %v20385_v46 }
 0x589   : > { %20400 = vst [vmem:[%s27796_s15 + $0x8] sm:$0xff] %v20386_v16  ;;  %v20395_v41 = vadd.f32 %v22477_v56, %v20374_v57  ;;  %v20396_v20 = vadd.f32 %v22477_v56, %v20375_v45  ;;  %v20397_v47 = vadd.f32 %v22477_v56, %v20376_v18  ;;  %v20398_v51 = vadd.f32 %v22477_v56, %v20377_v42  ;;  %20419 = sbr.rel (!%p23434_p5) target bundleno = 1432 (0x598), region = 81 }
 0x58a   : > { %20401 = vst [vmem:[%s27796_s15 + $0x10] sm:$0xff] %v20387_v62  ;;  %20402 = vst [vmem:[%s27796_s15 + $0x18] sm:$0xff] %v20388_v52 }
 0x58b   : > { %20403 = vst [vmem:[%s27796_s15 + $0x20] sm:$0xff] %v20389_v34  ;;  %20404 = vst [vmem:[%s27796_s15 + $0x28] sm:$0xff] %v20390_v59 }
 0x58c   : > { %20405 = vst [vmem:[%s27796_s15 + $0x30] sm:$0xff] %v20391_v35  ;;  %20406 = vst [vmem:[%s27796_s15 + $0x38] sm:$0xff] %v20392_v11 }
 0x58d   : > { %20407 = vst [vmem:[%s27796_s15 + $0x40] sm:$0xff] %v20393_v44  ;;  %20408 = vst [vmem:[%s27796_s15 + $0x48] sm:$0xff] %v20394_v26 }
 0x58e   : > { %20409 = vst [vmem:[%s27796_s15 + $0x50] sm:$0xff] %v20395_v41  ;;  %20410 = vst [vmem:[%s27796_s15 + $0x58] sm:$0xff] %v20396_v20 }
 0x58f   : > { %20411 = vst [vmem:[%s27796_s15 + $0x60] sm:$0xff] %v20397_v47  ;;  %20412 = vst [vmem:[%s27796_s15 + $0x68] sm:$0xff] %v20398_v51  ;;  %v20475_v28 = vld [vmem:[%s27796_s15] sm:$0xff] (%p23434_p5) }
 0x590   : > { %v20477_v49 = vld [vmem:[%s27796_s15 + $0x8] sm:$0xff]  ;;  %20476 = vst [vmem:[%s20421_s28] sm:$0xff] %v20475_v28 }
 0x591   : > { %v20479_v30 = vld [vmem:[%s27796_s15 + $0x10] sm:$0xff]  ;;  %v20481_v50 = vld [vmem:[%s27796_s15 + $0x18] sm:$0xff]  ;;  %20478 = vst [vmem:[%s20421_s28 + $0x10] sm:$0xff] %v20477_v49 }
 0x592   : > { %v20483_v63 = vld [vmem:[%s27796_s15 + $0x20] sm:$0xff]  ;;  %v20485_v3 = vld [vmem:[%s27796_s15 + $0x28] sm:$0xff]  ;;  %20480 = vst [vmem:[%s20421_s28 + $0x20] sm:$0xff] %v20479_v30  ;;  %20482 = vst [vmem:[%s20421_s28 + $0x30] sm:$0xff] %v20481_v50 }
 0x593   : > { %20484 = vst [vmem:[%s20421_s28 + $0x40] sm:$0xff] %v20483_v63  ;;  %20486 = vst [vmem:[%s20421_s28 + $0x50] sm:$0xff] %v20485_v3  ;;  %v20487_v54 = vld [vmem:[%s27796_s15 + $0x30] sm:$0xff]  ;;  %v20489_v40 = vld [vmem:[%s27796_s15 + $0x38] sm:$0xff] }
 0x594   : > { %v20491_v9 = vld [vmem:[%s27796_s15 + $0x40] sm:$0xff]  ;;  %20488 = vst [vmem:[%s20421_s28 + $0x60] sm:$0xff] %v20487_v54  ;;  %20490 = vst [vmem:[%s20421_s28 + $0x70] sm:$0xff] %v20489_v40  ;;  %v20493_v22 = vld [vmem:[%s27796_s15 + $0x48] sm:$0xff] }
 0x595   : > { %20492 = vst [vmem:[%s20421_s28 + $0x80] sm:$0xff] %v20491_v9  ;;  %v20495_v36 = vld [vmem:[%s27796_s15 + $0x50] sm:$0xff]  ;;  %v20497_v39 = vld [vmem:[%s27796_s15 + $0x58] sm:$0xff]  ;;  %20494 = vst [vmem:[%s20421_s28 + $0x90] sm:$0xff] %v20493_v22 }
 0x596   : > { %20496 = vst [vmem:[%s20421_s28 + $0xa0] sm:$0xff] %v20495_v36  ;;  %20498 = vst [vmem:[%s20421_s28 + $0xb0] sm:$0xff] %v20497_v39  ;;  %v20499_v25 = vld [vmem:[%s27796_s15 + $0x60] sm:$0xff]  ;;  %v20501_v10 = vld [vmem:[%s27796_s15 + $0x68] sm:$0xff] }
 0x597   : > { %20500 = vst [vmem:[%s20421_s28 + $0xc0] sm:$0xff] %v20499_v25  ;;  %20502 = vst [vmem:[%s20421_s28 + $0xd0] sm:$0xff] %v20501_v10 }
 0x598 PF: > { %p11_p11 = scmp.ge.s32.totalorder %s23422_s19, 4   ;;  %s28047_s15 = smov %s23369_s16 }
 0x599   : > { %s28048_s16 = smov %s23432_s22  ;;  %s28049_s17 = smov %s23422_s19 }
 0x59a   :  { %13 = sbr.rel (!%p11_p11) target bundleno = 2 (0x2), region = 172 }

</bundles_post_ra>
